<compile_context>
chip_gen: v5e
topology: v5e:2x2
jax: 0.10.0
libtpu: 0.0.40
codegen_flags: <defaults>
</compile_context>

<pallas_src>
import functools

import jax
import jax.numpy as jnp
from jax.experimental import pallas as pl
from jax.experimental.pallas import tpu as pltpu

N_ASSETS = 8                      # rows per portfolio (rows of `state` in the torch module)
NUM_FEATS = 15                    # numerical feature columns
STATE_W = NUM_FEATS + 3           # + sector / month / weekday index columns  (= 18)
HIDDEN = 32                       # hidden_size
AUG_W = NUM_FEATS + 9 + 5 + 12    # numerical + one-hot(sector, weekday, month) = 41
OUT_W = 128                       # lane-dense packed output width

_SELU_ALPHA = 1.6732632423543772
_SELU_SCALE = 1.0507009873554805


def trader_kernel(state_ref, liq_ref, wf_ref, sp_ref, out_ref):
    """One grid step == `pb` portfolios == pb*8 asset rows.

    state_ref : [pb*8, 18] f32  cols 0..14 numerical, 15 sector, 16 month, 17 weekday
    liq_ref   : [pb, 8]    f32
    wf_ref    : [41, H]    f32  fused first-layer weight (embedding tables folded in)
    sp_ref    : [8, H]     f32  small-parameter slab (see pack_params)
    out_ref   : [pb, 128]  f32  lanes 0..7 actor, lanes 8..15 critic (replicated), rest 0
    """
    r = state_ref.shape[0]                     # pb * 8 rows
    pb = liq_ref.shape[0]

    s = state_ref[...]                         # [r, 18]
    sp = sp_ref[...]                           # [8, H]

    # ---- build augmented input A = [numerical | 1hot(sector,9) | 1hot(weekday,5) | 1hot(month,12)]
    num = s[:, :NUM_FEATS]                                              # [r, 15]
    sec = s[:, NUM_FEATS:NUM_FEATS + 1].astype(jnp.int32)               # .int() truncation, as torch
    mon = s[:, NUM_FEATS + 1:NUM_FEATS + 2].astype(jnp.int32)
    wdy = s[:, NUM_FEATS + 2:NUM_FEATS + 3].astype(jnp.int32)

    def onehot(col, k):
        iota = jax.lax.broadcasted_iota(jnp.int32, (r, k), 1)
        return (col == iota).astype(jnp.float32)

    a_in = jnp.concatenate(
        [num, onehot(sec, 9), onehot(wdy, 5), onehot(mon, 12)], axis=1)  # [r, 41]

    # ---- actor_l1 (embeddings folded into wf) -> LayerNorm(H) -> SELU
    h = jnp.dot(a_in, wf_ref[...], preferred_element_type=jnp.float32) + sp[0:1, :]   # [r, H]
    mu = jnp.mean(h, axis=-1, keepdims=True)
    var = jnp.mean((h - mu) * (h - mu), axis=-1, keepdims=True)
    hn = (h - mu) * jax.lax.rsqrt(var + 1e-5)
    hn = hn * sp[1:2, :] + sp[2:3, :]                                    # LayerNorm affine
    act = _SELU_SCALE * jnp.where(hn > 0, hn, _SELU_ALPHA * (jnp.exp(hn) - 1.0))
    # TODO(synk): nn.AlphaDropout(p=0.3) is identity in eval mode; training-mode noise not implemented.

    # ---- actor_l3: per-asset scalar, laid out [pb, 8] (portfolio on sublanes, assets on lanes)
    act3 = act.reshape(pb, N_ASSETS, HIDDEN)                             # tile-aligned split, cheap
    a3 = jnp.sum(act3 * sp[3:4, :], axis=-1) + sp[7:8, 0:1]              # [pb, 8]

    # ---- a4 = exp(log_softmax(a3, dim=assets)) == per-portfolio softmax (before masking, as torch)
    m = jnp.max(a3, axis=-1, keepdims=True)
    e = jnp.exp(a3 - m)
    a4 = e / jnp.sum(e, axis=-1, keepdims=True)

    # ---- liquidity masking + renormalization
    liq = liq_ref[...]                                                   # [pb, 8]
    masked = jnp.where(liq == 0.0, 0.0, a4)
    tot = jnp.sum(masked, axis=-1, keepdims=True)
    # TODO(synk): torch early-returns (1, 1) when max prob == 0 / non-finite; that host-side
    # branch is not representable in-kernel -- we only guard the division to avoid NaN/Inf.
    pure = masked / jnp.where(tot > 0.0, tot, 1.0)
    actor = jnp.where(liq == 0.0, -1.0, pure)                            # [pb, 8]

    # ---- critic on mean(a3): Linear(1,4) -> ReLU -> Linear(4,1) -> Tanh
    a3_avg = jnp.mean(a3, axis=-1, keepdims=True)                        # [pb, 1]
    c1 = jnp.maximum(a3_avg * sp[4:5, :4] + sp[5:6, :4], 0.0)            # [pb, 4]
    c3 = jnp.sum(c1 * sp[6:7, :4], axis=-1, keepdims=True) + sp[7:8, 1:2]
    critic = jnp.tanh(c3)                                                # [pb, 1]

    # ---- single lane-dense packed store: lanes 0..7 actor, lanes 8..15 critic, rest zero
    critic8 = jnp.broadcast_to(critic, (pb, N_ASSETS))
    pad = jnp.zeros((pb, OUT_W - 2 * N_ASSETS), jnp.float32)
    out_ref[...] = jnp.concatenate([actor, critic8, pad], axis=1)


def pack_params(params):
    """Fold the embedding tables into the first-layer weight and pack the remaining tiny
    parameters into one [8, H] slab -> 2 constant kernel inputs instead of 12.

    Expected layouts in `params` (relative to PyTorch):
      w1  [32, H] = actor_l1.weight.T                     emb_* tables as in torch
      w3  [H]     = actor_l3.weight.reshape(-1)
      wc1 [4]     = critic_l1.weight.reshape(-1)          (in_features == 1)
      wc3 [4]     = critic_l3.weight.reshape(-1)
    """
    w1 = params["w1"].astype(jnp.float32)                      # [32, H]
    # x columns: 0..14 numerical, 15..21 sector emb, 22..24 weekday emb, 25..31 month emb
    wf = jnp.concatenate(
        [
            w1[:NUM_FEATS, :],                                              # 15 rows
            params["emb_sector"].astype(jnp.float32) @ w1[15:22, :],        # 9 rows
            params["emb_weekday"].astype(jnp.float32) @ w1[22:25, :],       # 5 rows
            params["emb_month"].astype(jnp.float32) @ w1[25:32, :],         # 12 rows
        ],
        axis=0,
    )                                                                        # [41, H]

    slab = jnp.zeros((8, HIDDEN), jnp.float32)
    slab = slab.at[0, :].set(params["b1"].reshape(-1))
    slab = slab.at[1, :].set(params["ln_g"].reshape(-1))
    slab = slab.at[2, :].set(params["ln_b"].reshape(-1))
    slab = slab.at[3, :].set(params["w3"].reshape(-1))
    slab = slab.at[4, :4].set(params["wc1"].reshape(-1))
    slab = slab.at[5, :4].set(params["bc1"].reshape(-1))
    slab = slab.at[6, :4].set(params["wc3"].reshape(-1))
    slab = slab.at[7, 0].set(jnp.reshape(params["b3"], ()))
    slab = slab.at[7, 1].set(jnp.reshape(params["bc3"], ()))
    return wf, slab


@functools.partial(jax.jit, static_argnames=("block_portfolios",))
def trader_forward(state, liq, wf, slab, *, block_portfolios=64):
    """Batched Trader forward.

    state : [B, 8, 18] f32 (last 3 cols = sector/month/weekday indices stored as floats)
    liq   : [B, 8]     f32
    returns (actor [B, 8], critic [B])
    """
    b = state.shape[0]
    pb = block_portfolios
    if b % pb != 0 or pb % 8 != 0:
        pb = b                       # single block; block dims then equal the full array dims
    grid = (b // pb,)

    state2 = state.reshape(b * N_ASSETS, STATE_W).astype(jnp.float32)
    liq2 = liq.astype(jnp.float32)

    out = pl.pallas_call(
        trader_kernel,
        out_shape=jax.ShapeDtypeStruct((b, OUT_W), jnp.float32),
        grid=grid,
        in_specs=[
            pl.BlockSpec((pb * N_ASSETS, STATE_W), lambda i: (i, 0)),
            pl.BlockSpec((pb, N_ASSETS), lambda i: (i, 0)),
            pl.BlockSpec((AUG_W, HIDDEN), lambda i: (0, 0)),   # constant index -> fetched once
            pl.BlockSpec((8, HIDDEN), lambda i: (0, 0)),       # constant index -> fetched once
        ],
        out_specs=pl.BlockSpec((pb, OUT_W), lambda i: (i, 0)),
        compiler_params=pltpu.CompilerParams(
            dimension_semantics=("parallel",)),                # v7x: blocks sharded over both TCs
    )(state2, liq2, wf, slab)

    return out[:, :N_ASSETS], out[:, N_ASSETS]


# ----------------------------------------------------------------------------- init / reference


def _xavier_uniform(key, fan_in, fan_out, shape):
    bound = (6.0 / (fan_in + fan_out)) ** 0.5
    return jax.random.uniform(key, shape, jnp.float32, -bound, bound)


def init_params(key, hidden_size=HIDDEN):
    ks = jax.random.split(key, 7)
    return dict(
        # nn.Embedding default init: N(0, 1)
        emb_sector=jax.random.normal(ks[0], (9, 7), jnp.float32),
        emb_month=jax.random.normal(ks[1], (12, 7), jnp.float32),
        emb_weekday=jax.random.normal(ks[2], (5, 3), jnp.float32),
        # Linear weights: xavier_uniform (gain=1), biases 0 -- as in Trader.__init__
        w1=_xavier_uniform(ks[3], 32, hidden_size, (32, hidden_size)),   # actor_l1.weight.T
        b1=jnp.zeros((hidden_size,), jnp.float32),
        ln_g=jnp.ones((hidden_size,), jnp.float32),                      # LayerNorm weight
        ln_b=jnp.zeros((hidden_size,), jnp.float32),                     # LayerNorm bias
        w3=_xavier_uniform(ks[4], hidden_size, 1, (hidden_size,)),       # actor_l3.weight
        b3=jnp.zeros((), jnp.float32),
        wc1=_xavier_uniform(ks[5], 1, 4, (4,)),                          # critic_l1.weight
        bc1=jnp.zeros((4,), jnp.float32),
        wc3=_xavier_uniform(ks[6], 4, 1, (4,)),                          # critic_l3.weight
        bc3=jnp.zeros((), jnp.float32),
    )


def reference_forward(state, liq, params):
    """Plain-JAX replica of Trader.forward (vmapped over the portfolio batch)."""

    def one(st, lq):
        sec = params["emb_sector"][st[:, -3].astype(jnp.int32)]
        mon = params["emb_month"][st[:, -2].astype(jnp.int32)]
        wdy = params["emb_weekday"][st[:, -1].astype(jnp.int32)]
        x = jnp.concatenate([st[:, :-3], sec, wdy, mon], axis=1)
        h = x @ params["w1"] + params["b1"]
        mu = jnp.mean(h, axis=-1, keepdims=True)
        var = jnp.mean((h - mu) ** 2, axis=-1, keepdims=True)
        hn = (h - mu) / jnp.sqrt(var + 1e-5) * params["ln_g"] + params["ln_b"]
        act = _SELU_SCALE * jnp.where(hn > 0, hn, _SELU_ALPHA * (jnp.exp(hn) - 1.0))
        a3 = act @ params["w3"] + params["b3"]                           # [8]
        a4 = jax.nn.softmax(a3)
        masked = jnp.where(lq == 0.0, 0.0, a4)
        pure = masked / jnp.sum(masked)
        actor = jnp.where(lq == 0.0, -1.0, pure)
        c1 = jnp.maximum(jnp.mean(a3) * params["wc1"] + params["bc1"], 0.0)
        critic = jnp.tanh(jnp.sum(c1 * params["wc3"]) + params["bc3"])
        return actor, critic

    return jax.vmap(one)(state, liq)


if __name__ == "__main__":
    B = 256                       # independent portfolios batched into ONE pallas_call
    key = jax.random.PRNGKey(0)
    kp, kn, k1, k2, k3, kl = jax.random.split(key, 6)

    params = init_params(kp, HIDDEN)
    wf, slab = pack_params(params)

    numerical = jax.random.normal(kn, (B, N_ASSETS, NUM_FEATS), jnp.float32)
    sector_idx = jax.random.randint(k1, (B, N_ASSETS, 1), 0, 9).astype(jnp.float32)
    month_idx = jax.random.randint(k2, (B, N_ASSETS, 1), 0, 12).astype(jnp.float32)
    weekday_idx = jax.random.randint(k3, (B, N_ASSETS, 1), 0, 5).astype(jnp.float32)
    state = jnp.concatenate([numerical, sector_idx, month_idx, weekday_idx], axis=-1)  # [B, 8, 18]

    liq = (jax.random.uniform(kl, (B, N_ASSETS)) > 0.25).astype(jnp.float32)
    liq = liq.at[:, 0].set(1.0)   # keep >=1 liquid asset per portfolio (torch early-returns otherwise)

    actor, critic = trader_forward(state, liq, wf, slab, block_portfolios=64)
    jax.block_until_ready((actor, critic))

    assert actor.shape == (B, N_ASSETS) and critic.shape == (B,)
    assert bool(jnp.all(jnp.isfinite(actor))) and bool(jnp.all(jnp.isfinite(critic)))

    ref_actor, ref_critic = reference_forward(state, liq, params)
    # Loose tolerance: the MXU f32 matmul path may round slightly differently than the XLA reference.
    assert bool(jnp.allclose(actor, ref_actor, rtol=2e-2, atol=2e-2)), "actor mismatch vs reference"
    assert bool(jnp.allclose(critic, ref_critic, rtol=2e-2, atol=2e-2)), "critic mismatch vs reference"

    print("KERNEL_OK")
</pallas_src>

<mosaic_0001>
module attributes {stable_mosaic.version = 11 : i64} {
  func.func @trader_kernel(%arg0: i32, %arg1: memref<512x18xf32, #tpu.memory_space<vmem>>, %arg2: memref<64x8xf32, #tpu.memory_space<vmem>>, %arg3: memref<41x32xf32, #tpu.memory_space<vmem>>, %arg4: memref<8x32xf32, #tpu.memory_space<vmem>>, %arg5: memref<64x128xf32, #tpu.memory_space<vmem>>) attributes {dimension_semantics = [#tpu.dimension_semantics<parallel>], iteration_bounds = array<i64: 4>, scalar_prefetch = 0 : i64, scratch_operands = 0 : i64, tpu.core_type = #tpu.core_type<tc>, window_params = [{transform_indices = @transform_0, window_bounds = array<i64: 512, 18>}, {transform_indices = @transform_1, window_bounds = array<i64: 64, 8>}, {pipeline_mode = #tpu.pipeline_mode<synchronous>, transform_indices = @transform_2, window_bounds = array<i64: 41, 32>}, {pipeline_mode = #tpu.pipeline_mode<synchronous>, transform_indices = @transform_3, window_bounds = array<i64: 8, 32>}, {transform_indices = @transform_4, window_bounds = array<i64: 64, 128>}]} {
    %c0 = arith.constant 0 : index
    %c0_0 = arith.constant 0 : index
    %0 = vector.load %arg1[%c0, %c0_0] : memref<512x18xf32, #tpu.memory_space<vmem>>, vector<512x18xf32>
    %c0_1 = arith.constant 0 : index
    %c0_2 = arith.constant 0 : index
    %1 = vector.load %arg4[%c0_1, %c0_2] : memref<8x32xf32, #tpu.memory_space<vmem>>, vector<8x32xf32>
    %2 = vector.extract_strided_slice %0 {offsets = [0, 0], sizes = [512, 15], strides = [1, 1]} : vector<512x18xf32> to vector<512x15xf32>
    %3 = vector.extract_strided_slice %0 {offsets = [0, 15], sizes = [512, 1], strides = [1, 1]} : vector<512x18xf32> to vector<512x1xf32>
    %4 = arith.fptosi %3 : vector<512x1xf32> to vector<512x1xi32>
    %5 = vector.extract_strided_slice %0 {offsets = [0, 16], sizes = [512, 1], strides = [1, 1]} : vector<512x18xf32> to vector<512x1xf32>
    %6 = arith.fptosi %5 : vector<512x1xf32> to vector<512x1xi32>
    %7 = vector.extract_strided_slice %0 {offsets = [0, 17], sizes = [512, 1], strides = [1, 1]} : vector<512x18xf32> to vector<512x1xf32>
    %8 = arith.fptosi %7 : vector<512x1xf32> to vector<512x1xi32>
    %9 = tpu.iota {dimensions = array<i32: 1>} : vector<512x9xi32>
    %10 = vector.broadcast %4 : vector<512x1xi32> to vector<512x9xi32>
    %11 = arith.cmpi eq, %10, %9 : vector<512x9xi32>
    %12 = arith.extui %11 : vector<512x9xi1> to vector<512x9xi32>
    %13 = arith.sitofp %12 : vector<512x9xi32> to vector<512x9xf32>
    %14 = tpu.iota {dimensions = array<i32: 1>} : vector<512x5xi32>
    %15 = vector.broadcast %8 : vector<512x1xi32> to vector<512x5xi32>
    %16 = arith.cmpi eq, %15, %14 : vector<512x5xi32>
    %17 = arith.extui %16 : vector<512x5xi1> to vector<512x5xi32>
    %18 = arith.sitofp %17 : vector<512x5xi32> to vector<512x5xf32>
    %19 = tpu.iota {dimensions = array<i32: 1>} : vector<512x12xi32>
    %20 = vector.broadcast %6 : vector<512x1xi32> to vector<512x12xi32>
    %21 = arith.cmpi eq, %20, %19 : vector<512x12xi32>
    %22 = arith.extui %21 : vector<512x12xi1> to vector<512x12xi32>
    %23 = arith.sitofp %22 : vector<512x12xi32> to vector<512x12xf32>
    %24 = tpu.concatenate %2, %13, %18, %23 in 1 : vector<512x15xf32>, vector<512x9xf32>, vector<512x5xf32>, vector<512x12xf32> -> vector<512x41xf32>
    %c0_3 = arith.constant 0 : index
    %c0_4 = arith.constant 0 : index
    %25 = vector.load %arg3[%c0_3, %c0_4] : memref<41x32xf32, #tpu.memory_space<vmem>>, vector<41x32xf32>
    %cst = arith.constant dense<0.000000e+00> : vector<512x32xf32>
    %26 = tpu.matmul %24, %25, %cst {dimension_numbers = #tpu.dot_dimension_numbers<[1], [0], [0], [1], [0, 0, 1, 1], [], []>} : vector<512x41xf32>, vector<41x32xf32>, vector<512x32xf32> -> vector<512x32xf32>
    %27 = vector.extract_strided_slice %1 {offsets = [0, 0], sizes = [1, 32], strides = [1, 1]} : vector<8x32xf32> to vector<1x32xf32>
    %28 = vector.broadcast %27 : vector<1x32xf32> to vector<512x32xf32>
    %29 = arith.addf %26, %28 : vector<512x32xf32>
    %cst_5 = arith.constant dense<0.000000e+00> : vector<512xf32>
    %30 = vector.multi_reduction <add>, %29, %cst_5 [1] : vector<512x32xf32> to vector<512xf32>
    %31 = vector.shape_cast %30 : vector<512xf32> to vector<512x1xf32>
    %cst_6 = arith.constant 3.200000e+01 : f32
    %32 = vector.broadcast %cst_6 : f32 to vector<512x1xf32>
    %33 = arith.divf %31, %32 : vector<512x1xf32>
    %34 = vector.broadcast %33 : vector<512x1xf32> to vector<512x32xf32>
    %35 = arith.subf %29, %34 : vector<512x32xf32>
    %36 = vector.broadcast %33 : vector<512x1xf32> to vector<512x32xf32>
    %37 = arith.subf %29, %36 : vector<512x32xf32>
    %38 = arith.mulf %35, %37 : vector<512x32xf32>
    %cst_7 = arith.constant dense<0.000000e+00> : vector<512xf32>
    %39 = vector.multi_reduction <add>, %38, %cst_7 [1] : vector<512x32xf32> to vector<512xf32>
    %40 = vector.shape_cast %39 : vector<512xf32> to vector<512x1xf32>
    %cst_8 = arith.constant 3.200000e+01 : f32
    %41 = vector.broadcast %cst_8 : f32 to vector<512x1xf32>
    %42 = arith.divf %40, %41 : vector<512x1xf32>
    %43 = vector.broadcast %33 : vector<512x1xf32> to vector<512x32xf32>
    %44 = arith.subf %29, %43 : vector<512x32xf32>
    %cst_9 = arith.constant 9.99999974E-6 : f32
    %45 = vector.broadcast %cst_9 : f32 to vector<512x1xf32>
    %46 = arith.addf %42, %45 : vector<512x1xf32>
    %47 = math.rsqrt %46 : vector<512x1xf32>
    %48 = vector.broadcast %47 : vector<512x1xf32> to vector<512x32xf32>
    %49 = arith.mulf %44, %48 : vector<512x32xf32>
    %50 = vector.extract_strided_slice %1 {offsets = [1, 0], sizes = [1, 32], strides = [1, 1]} : vector<8x32xf32> to vector<1x32xf32>
    %51 = vector.broadcast %50 : vector<1x32xf32> to vector<512x32xf32>
    %52 = arith.mulf %49, %51 : vector<512x32xf32>
    %53 = vector.extract_strided_slice %1 {offsets = [2, 0], sizes = [1, 32], strides = [1, 1]} : vector<8x32xf32> to vector<1x32xf32>
    %54 = vector.broadcast %53 : vector<1x32xf32> to vector<512x32xf32>
    %55 = arith.addf %52, %54 : vector<512x32xf32>
    %cst_10 = arith.constant 0.000000e+00 : f32
    %56 = vector.broadcast %cst_10 : f32 to vector<512x32xf32>
    %57 = arith.cmpf ogt, %55, %56 : vector<512x32xf32>
    %58 = math.exp %55 : vector<512x32xf32>
    %cst_11 = arith.constant 1.000000e+00 : f32
    %59 = vector.broadcast %cst_11 : f32 to vector<512x32xf32>
    %60 = arith.subf %58, %59 : vector<512x32xf32>
    %cst_12 = arith.constant 1.67326319 : f32
    %61 = vector.broadcast %cst_12 : f32 to vector<512x32xf32>
    %62 = arith.mulf %61, %60 : vector<512x32xf32>
    %63 = arith.select %57, %55, %62 : vector<512x32xi1>, vector<512x32xf32>
    %cst_13 = arith.constant 1.05070102 : f32
    %64 = vector.broadcast %cst_13 : f32 to vector<512x32xf32>
    %65 = arith.mulf %64, %63 : vector<512x32xf32>
    %66 = vector.shape_cast %65 : vector<512x32xf32> to vector<64x8x32xf32>
    %67 = vector.extract_strided_slice %1 {offsets = [3, 0], sizes = [1, 32], strides = [1, 1]} : vector<8x32xf32> to vector<1x32xf32>
    %68 = vector.shape_cast %67 : vector<1x32xf32> to vector<1x1x32xf32>
    %69 = vector.broadcast %68 : vector<1x1x32xf32> to vector<64x8x32xf32>
    %70 = arith.mulf %66, %69 : vector<64x8x32xf32>
    %cst_14 = arith.constant dense<0.000000e+00> : vector<64x8xf32>
    %71 = vector.multi_reduction <add>, %70, %cst_14 [2] : vector<64x8x32xf32> to vector<64x8xf32>
    %72 = vector.extract_strided_slice %1 {offsets = [7, 0], sizes = [1, 1], strides = [1, 1]} : vector<8x32xf32> to vector<1x1xf32>
    %73 = vector.broadcast %72 : vector<1x1xf32> to vector<64x8xf32>
    %74 = arith.addf %71, %73 : vector<64x8xf32>
    %cst_15 = arith.constant dense<0xFF800000> : vector<64xf32>
    %75 = vector.multi_reduction <maximumf>, %74, %cst_15 [1] : vector<64x8xf32> to vector<64xf32>
    %76 = vector.shape_cast %75 : vector<64xf32> to vector<64x1xf32>
    %77 = vector.broadcast %76 : vector<64x1xf32> to vector<64x8xf32>
    %78 = arith.subf %74, %77 : vector<64x8xf32>
    %79 = math.exp %78 : vector<64x8xf32>
    %cst_16 = arith.constant dense<0.000000e+00> : vector<64xf32>
    %80 = vector.multi_reduction <add>, %79, %cst_16 [1] : vector<64x8xf32> to vector<64xf32>
    %81 = vector.shape_cast %80 : vector<64xf32> to vector<64x1xf32>
    %82 = vector.broadcast %81 : vector<64x1xf32> to vector<64x8xf32>
    %83 = arith.divf %79, %82 : vector<64x8xf32>
    %c0_17 = arith.constant 0 : index
    %c0_18 = arith.constant 0 : index
    %84 = vector.load %arg2[%c0_17, %c0_18] : memref<64x8xf32, #tpu.memory_space<vmem>>, vector<64x8xf32>
    %cst_19 = arith.constant 0.000000e+00 : f32
    %85 = vector.broadcast %cst_19 : f32 to vector<64x8xf32>
    %86 = arith.cmpf oeq, %84, %85 : vector<64x8xf32>
    %cst_20 = arith.constant 0.000000e+00 : f32
    %87 = vector.broadcast %cst_20 : f32 to vector<64x8xf32>
    %88 = arith.select %86, %87, %83 : vector<64x8xi1>, vector<64x8xf32>
    %cst_21 = arith.constant dense<0.000000e+00> : vector<64xf32>
    %89 = vector.multi_reduction <add>, %88, %cst_21 [1] : vector<64x8xf32> to vector<64xf32>
    %90 = vector.shape_cast %89 : vector<64xf32> to vector<64x1xf32>
    %cst_22 = arith.constant 0.000000e+00 : f32
    %91 = vector.broadcast %cst_22 : f32 to vector<64x1xf32>
    %92 = arith.cmpf ogt, %90, %91 : vector<64x1xf32>
    %cst_23 = arith.constant 1.000000e+00 : f32
    %93 = vector.broadcast %cst_23 : f32 to vector<64x1xf32>
    %94 = arith.select %92, %90, %93 : vector<64x1xi1>, vector<64x1xf32>
    %95 = vector.broadcast %94 : vector<64x1xf32> to vector<64x8xf32>
    %96 = arith.divf %88, %95 : vector<64x8xf32>
    %cst_24 = arith.constant 0.000000e+00 : f32
    %97 = vector.broadcast %cst_24 : f32 to vector<64x8xf32>
    %98 = arith.cmpf oeq, %84, %97 : vector<64x8xf32>
    %cst_25 = arith.constant -1.000000e+00 : f32
    %99 = vector.broadcast %cst_25 : f32 to vector<64x8xf32>
    %100 = arith.select %98, %99, %96 : vector<64x8xi1>, vector<64x8xf32>
    %cst_26 = arith.constant dense<0.000000e+00> : vector<64xf32>
    %101 = vector.multi_reduction <add>, %74, %cst_26 [1] : vector<64x8xf32> to vector<64xf32>
    %102 = vector.shape_cast %101 : vector<64xf32> to vector<64x1xf32>
    %cst_27 = arith.constant 8.000000e+00 : f32
    %103 = vector.broadcast %cst_27 : f32 to vector<64x1xf32>
    %104 = arith.divf %102, %103 : vector<64x1xf32>
    %105 = vector.extract_strided_slice %1 {offsets = [4, 0], sizes = [1, 4], strides = [1, 1]} : vector<8x32xf32> to vector<1x4xf32>
    %106 = vector.broadcast %104 : vector<64x1xf32> to vector<64x4xf32>
    %107 = vector.broadcast %105 : vector<1x4xf32> to vector<64x4xf32>
    %108 = arith.mulf %106, %107 : vector<64x4xf32>
    %109 = vector.extract_strided_slice %1 {offsets = [5, 0], sizes = [1, 4], strides = [1, 1]} : vector<8x32xf32> to vector<1x4xf32>
    %110 = vector.broadcast %109 : vector<1x4xf32> to vector<64x4xf32>
    %111 = arith.addf %108, %110 : vector<64x4xf32>
    %cst_28 = arith.constant 0.000000e+00 : f32
    %112 = vector.broadcast %cst_28 : f32 to vector<64x4xf32>
    %113 = arith.maximumf %111, %112 : vector<64x4xf32>
    %114 = vector.extract_strided_slice %1 {offsets = [6, 0], sizes = [1, 4], strides = [1, 1]} : vector<8x32xf32> to vector<1x4xf32>
    %115 = vector.broadcast %114 : vector<1x4xf32> to vector<64x4xf32>
    %116 = arith.mulf %113, %115 : vector<64x4xf32>
    %cst_29 = arith.constant dense<0.000000e+00> : vector<64xf32>
    %117 = vector.multi_reduction <add>, %116, %cst_29 [1] : vector<64x4xf32> to vector<64xf32>
    %118 = vector.shape_cast %117 : vector<64xf32> to vector<64x1xf32>
    %119 = vector.extract_strided_slice %1 {offsets = [7, 1], sizes = [1, 1], strides = [1, 1]} : vector<8x32xf32> to vector<1x1xf32>
    %120 = vector.broadcast %119 : vector<1x1xf32> to vector<64x1xf32>
    %121 = arith.addf %118, %120 : vector<64x1xf32>
    %122 = math.tanh %121 : vector<64x1xf32>
    %123 = vector.shape_cast %122 : vector<64x1xf32> to vector<64x1xf32>
    %124 = vector.broadcast %123 : vector<64x1xf32> to vector<64x8xf32>
    %cst_30 = arith.constant 0.000000e+00 : f32
    %125 = vector.broadcast %cst_30 : f32 to vector<64x112xf32>
    %126 = tpu.concatenate %100, %124, %125 in 1 : vector<64x8xf32>, vector<64x8xf32>, vector<64x112xf32> -> vector<64x128xf32>
    %c0_31 = arith.constant 0 : index
    %c0_32 = arith.constant 0 : index
    %127 = vector.load %arg5[%c0_31, %c0_32] : memref<64x128xf32, #tpu.memory_space<vmem>>, vector<64x128xf32>
    tpu.vector_store %arg5[%c0_31, %c0_32], %126 {strides = array<i32>} : memref<64x128xf32, #tpu.memory_space<vmem>>, vector<64x128xf32>,
    return
  }
  func.func @transform_0(%arg0: i32) -> (i32, i32) {
    %c0_i32 = arith.constant 0 : i32
    %c0_i32_0 = arith.constant 0 : i32
    return %arg0, %c0_i32 : i32, i32
  }
  func.func @transform_1(%arg0: i32) -> (i32, i32) {
    %c0_i32 = arith.constant 0 : i32
    %c0_i32_0 = arith.constant 0 : i32
    return %arg0, %c0_i32 : i32, i32
  }
  func.func @transform_2(%arg0: i32) -> (i32, i32) {
    %c0_i32 = arith.constant 0 : i32
    %c0_i32_0 = arith.constant 0 : i32
    %c0_i32_1 = arith.constant 0 : i32
    return %c0_i32, %c0_i32_0 : i32, i32
  }
  func.func @transform_3(%arg0: i32) -> (i32, i32) {
    %c0_i32 = arith.constant 0 : i32
    %c0_i32_0 = arith.constant 0 : i32
    %c0_i32_1 = arith.constant 0 : i32
    return %c0_i32, %c0_i32_0 : i32, i32
  }
  func.func @transform_4(%arg0: i32) -> (i32, i32) {
    %c0_i32 = arith.constant 0 : i32
    %c0_i32_0 = arith.constant 0 : i32
    return %arg0, %c0_i32 : i32, i32
  }
}

</mosaic_0001>

<bundles_post_ra>
// kernel: trader_forward.1
= control target key start
LH: loop header
LB: loop body
LE: loop exit
PB: predicated region body
PF: predicated region fallthrough
CT: control target
= control target key end

     0   :  { %s9930_s15 = smov 0   ;;  %s18028_s0 = inlined_call_operand.vmem [shape: f32[2048,18], index: 0, kind: input, shape index: {}]   ;;  %s18029_s1 = inlined_call_operand.vmem [shape: f32[256,8], index: 1, kind: input, shape index: {}]   ;;  %s18030_s2 = inlined_call_operand.vmem [shape: f32[41,32], index: 2, kind: input, shape index: {}]   ;;  %s18031_s3 = inlined_call_operand.vmem [shape: f32[8,32], index: 3, kind: input, shape index: {}]   ;;  %s18032_s4 = inlined_call_operand.vmem [shape: f32[256,128], index: 4, kind: output, shape index: {}]  }
   0x1 LB: > { %s8083_s16 = sadd.s32 4294967295, %s9892_s15   ;;  %p8087_p0 = scmp.ge.s32.totalorder %s9892_s15, 1  ;;  %s9892_s15 = sphi %s9930_s15, %s14_s15  }
   0x2   : > { %p174_p1 = scmp.lt.s32.totalorder %s9892_s15, 5 }
   0x4   : > { %p175_p2 = pnand %p8087_p0, %p174_p1 }
   0x6   : > { %178 = sbr.rel (%p175_p2) target bundleno = 3003 (0xbbb), region = 36 }
   0xb   : > { %s8088_s17 = sshll.u32 %s8083_s16, 6  ;;  %v9894_v0 = vmov 15   ;;  %s9898_s22 = smov 15  }
   0xc   : > { %8778 = vset.pattern.permute.xlu2 %v9894_v0  ;;  %8777 = vset.pattern.permute.xlu1 %v9894_v0  ;;  %p206_p3 = scmp.lt.s32.totalorder %s8088_s17, 255  ;;  %s9899_s23 = smov 24  }
   0xd   : > { %8776 = vset.pattern.permute.xlu0 %v9894_v0  ;;  %s9900_s24 = smov 29   ;;  %s8090_s20 = sshll.u32 %s8083_s16, 3 }
   0xe   : > { %s19068_s17 = smov (!%p206_p3, %s8088_s17), 255  ;;  %p212_p4 = scmp.lt.s32.totalorder %s8090_s20, 31 }
   0xf   : > { %s8089_s18 = sshll.u32 %s19068_s17, 3 }
  0x10   : > { %s9943_s21 = scalar_lea.vmem %s18028_s0, %s8089_s18  ;;  %s19070_s20 = smov (!%p212_p4, %s8090_s20), 31 }
  0x11   : > { %v227_v1 = vld [vmem:[%s9943_s21 + $0x20] sm:$0xff]  ;;  %v225_v2 = vld [vmem:[%s9943_s21 + $0x10] sm:$0xff]  ;;  %v228_v6 = vld [vmem:[%s9943_s21 + $0x28] sm:$0xff]  ;;  %s8091_s16 = sshll.u32 %s19070_s20, 3 }
  0x12   : > { %v223_v3 = vld [vmem:[%s9943_s21] sm:$0xff]  ;;  %vm8455_vm0 = vcmp.lt.s32.totalorder %v227_v1, 0  ;;  %v8456_v4 = vceil.f32 %v227_v1  ;;  %v8457_v5 = vfloor.f32 %v227_v1  ;;  %vm8445_vm1 = vcmp.lt.s32.totalorder %v225_v2, 0  ;;  %v226_v7 = vld [vmem:[%s9943_s21 + $0x18] sm:$0xff]  ;;  %v224_v14 = vld [vmem:[%s9943_s21 + $0x8] sm:$0xff]  ;;  %s17972_s28 = scalar_lea.vmem %s18032_s4, %s8091_s16 }
  0x13   : > { %v8446_v8 = vceil.f32 %v225_v2  ;;  %v8447_v9 = vfloor.f32 %v225_v2  ;;  %vm8435_vm2 = vcmp.lt.s32.totalorder %v223_v3, 0  ;;  %v8436_v10 = vceil.f32 %v223_v3  ;;  %v231_v27 = vld [vmem:[%s9943_s21 + $0x40] sm:$0xff]  ;;  %v230_v29 = vld [vmem:[%s9943_s21 + $0x38] sm:$0xff]  ;;  %v229_v31 = vld [vmem:[%s9943_s21 + $0x30] sm:$0xff] }
  0x14   : > { %v8458_v11 = vsel %vm8455_vm0, %v8456_v4, %v8457_v5  ;;  %v8437_v12 = vfloor.f32 %v223_v3  ;;  %vm8460_vm3 = vcmp.lt.s32.totalorder %v228_v6, 0  ;;  %v8461_v13 = vceil.f32 %v228_v6  ;;  %v234_v42 = vld [vmem:[%s9943_s21 + $0x58] sm:$0xff]  ;;  %v233_v44 = vld [vmem:[%s9943_s21 + $0x50] sm:$0xff]  ;;  %v232_v46 = vld [vmem:[%s9943_s21 + $0x48] sm:$0xff] }
  0x15   : > { %v9951_v15 = vcvt.f32.s32 %v8458_v11  ;;  %v8448_v16 = vsel %vm8445_vm1, %v8446_v8, %v8447_v9  ;;  %v8462_v17 = vfloor.f32 %v228_v6  ;;  %vm8450_vm4 = vcmp.lt.s32.totalorder %v226_v7, 0  ;;  %v237_v57 = vld [vmem:[%s9943_s21 + $0x70] sm:$0xff]  ;;  %v236_v59 = vld [vmem:[%s9943_s21 + $0x68] sm:$0xff]  ;;  %v235_v61 = vld [vmem:[%s9943_s21 + $0x60] sm:$0xff] }
  0x16   : > { %v9953_v18 = vcvt.f32.s32 %v8448_v16  ;;  %v8438_v19 = vsel %vm8435_vm2, %v8436_v10, %v8437_v12  ;;  %v8451_v20 = vceil.f32 %v226_v7  ;;  %v8452_v21 = vfloor.f32 %v226_v7  ;;  %v240_v8 = vld [vmem:[%s9943_s21 + $0x88] sm:$0xff]  ;;  %v239_v10 = vld [vmem:[%s9943_s21 + $0x80] sm:$0xff]  ;;  %v238_v12 = vld [vmem:[%s9943_s21 + $0x78] sm:$0xff] }
  0x17   : > { %367 = vperm.xlu2 %8778, %v9951_v15   ;;  %v9956_v22 = vcvt.f32.s32 %v8438_v19  ;;  %vm8440_vm5 = vcmp.lt.s32.totalorder %v224_v14, 0  ;;  %v8441_v23 = vceil.f32 %v224_v14  ;;  %v8463_v24 = vsel %vm8460_vm3, %v8461_v13, %v8462_v17 }
  0x18   : > { %361 = vperm.xlu1 %8777, %v9953_v18   ;;  %v8442_v25 = vfloor.f32 %v224_v14  ;;  %v8453_v26 = vsel %vm8450_vm4, %v8451_v20, %v8452_v21  ;;  %v9963_v30 = vcvt.f32.s32 %v8463_v24  ;;  %v8476_v33 = vceil.f32 %v231_v27 }
  0x19   : > { %355 = vperm.xlu0 %8776, %v9956_v22   ;;  %v9966_v32 = vcvt.f32.s32 %v8453_v26  ;;  %v8477_v34 = vfloor.f32 %v231_v27  ;;  %vm8475_vm6 = vcmp.lt.s32.totalorder %v231_v27, 0  ;;  %v8471_v36 = vceil.f32 %v230_v29  ;;  %v243_v26 = vld [vmem:[%s9943_s21 + $0xa0] sm:$0xff] }
  0x1a   : > { %v8443_v28 = vsel %vm8440_vm5, %v8441_v23, %v8442_v25  ;;  %v8472_v37 = vfloor.f32 %v230_v29  ;;  %vm8470_vm7 = vcmp.lt.s32.totalorder %v230_v29, 0  ;;  %v8466_v38 = vceil.f32 %v229_v31 }
  0x1b   : > { %v9968_v35 = vcvt.f32.s32 %v8443_v28  ;;  %v8467_v39 = vfloor.f32 %v229_v31  ;;  %vm8465_vm8 = vcmp.lt.s32.totalorder %v229_v31, 0  ;;  %v8478_v40 = vsel %vm8475_vm6, %v8476_v33, %v8477_v34  ;;  %v242_v28 = vld [vmem:[%s9943_s21 + $0x98] sm:$0xff]  ;;  %v241_v31 = vld [vmem:[%s9943_s21 + $0x90] sm:$0xff] }
  0x1c   : > { %v8473_v41 = vsel %vm8470_vm7, %v8471_v36, %v8472_v37  ;;  %v9975_v45 = vcvt.f32.s32 %v8478_v40  ;;  %v8491_v48 = vceil.f32 %v234_v42  ;;  %v8492_v49 = vfloor.f32 %v234_v42 }
  0x1d   : > { %v8468_v43 = vsel %vm8465_vm8, %v8466_v38, %v8467_v39  ;;  %v9978_v47 = vcvt.f32.s32 %v8473_v41  ;;  %vm8490_vm9 = vcmp.lt.s32.totalorder %v234_v42, 0  ;;  %v8486_v51 = vceil.f32 %v233_v44 }
  0x1e   : > { %v9980_v50 = vcvt.f32.s32 %v8468_v43  ;;  %v8487_v52 = vfloor.f32 %v233_v44  ;;  %vm8485_vm10 = vcmp.lt.s32.totalorder %v233_v44, 0  ;;  %v8481_v53 = vceil.f32 %v232_v46  ;;  %v246_v44 = vld [vmem:[%s9943_s21 + $0xb8] sm:$0xff] }
  0x1f   : > { %370 = vperm.xlu2 %8778, %v9963_v30   ;;  %v8482_v54 = vfloor.f32 %v232_v46  ;;  %vm8480_vm11 = vcmp.lt.s32.totalorder %v232_v46, 0  ;;  %v8493_v55 = vsel %vm8490_vm9, %v8491_v48, %v8492_v49  ;;  %v8506_v63 = vceil.f32 %v237_v57  ;;  %v245_v48 = vld [vmem:[%s9943_s21 + $0xb0] sm:$0xff] }
  0x20   : > { %364 = vperm.xlu1 %8777, %v9966_v32   ;;  %v8488_v56 = vsel %vm8485_vm10, %v8486_v51, %v8487_v52  ;;  %v9987_v60 = vcvt.f32.s32 %v8493_v55  ;;  %v8507_v0 = vfloor.f32 %v237_v57  ;;  %vm8505_vm12 = vcmp.lt.s32.totalorder %v237_v57, 0  ;;  %v244_v51 = vld [vmem:[%s9943_s21 + $0xa8] sm:$0xff] }
  0x21   : > { %358 = vperm.xlu0 %8776, %v9968_v35   ;;  %v8483_v58 = vsel %vm8480_vm11, %v8481_v53, %v8482_v54  ;;  %v9990_v62 = vcvt.f32.s32 %v8488_v56  ;;  %v8501_v2 = vceil.f32 %v236_v59  ;;  %v8502_v3 = vfloor.f32 %v236_v59 }
  0x22   : > { %v9992_v1 = vcvt.f32.s32 %v8483_v58  ;;  %vm8500_vm13 = vcmp.lt.s32.totalorder %v236_v59, 0  ;;  %v8496_v4 = vceil.f32 %v235_v61  ;;  %v8497_v5 = vfloor.f32 %v235_v61 }
  0x23   : > { %vm8495_vm14 = vcmp.lt.s32.totalorder %v235_v61, 0  ;;  %v8508_v6 = vsel %vm8505_vm12, %v8506_v63, %v8507_v0  ;;  %v8503_v7 = vsel %vm8500_vm13, %v8501_v2, %v8502_v3  ;;  %v8521_v14 = vceil.f32 %v240_v8  ;;  %v249_v0 = vld [vmem:[%s9943_s21 + $0xd0] sm:$0xff]  ;;  %v248_v3 = vld [vmem:[%s9943_s21 + $0xc8] sm:$0xff] }
  0x24   : > { %v8498_v9 = vsel %vm8495_vm14, %v8496_v4, %v8497_v5  ;;  %v9999_v11 = vcvt.f32.s32 %v8508_v6  ;;  %v10002_v13 = vcvt.f32.s32 %v8503_v7  ;;  %v8522_v16 = vfloor.f32 %v240_v8  ;;  %v247_v5 = vld [vmem:[%s9943_s21 + $0xc0] sm:$0xff] }
  0x25   : > { %v10004_v17 = vcvt.f32.s32 %v8498_v9  ;;  %vm8520_vm15 = vcmp.lt.s32.totalorder %v240_v8, 0  ;;  %v8516_v19 = vceil.f32 %v239_v10  ;;  %v8517_v20 = vfloor.f32 %v239_v10 }
  0x26   : > { %vm8515_vm0 = vcmp.lt.s32.totalorder %v239_v10, 0  ;;  %v8511_v21 = vceil.f32 %v238_v12  ;;  %v8512_v23 = vfloor.f32 %v238_v12  ;;  %vm8510_vm1 = vcmp.lt.s32.totalorder %v238_v12, 0 }
  0x27   : > { %379 = vperm.xlu2 %8778, %v9975_v45   ;;  %v8523_v24 = vsel %vm8520_vm15, %v8521_v14, %v8522_v16  ;;  %v8518_v25 = vsel %vm8515_vm0, %v8516_v19, %v8517_v20  ;;  %v8536_v34 = vceil.f32 %v243_v26  ;;  %v8537_v36 = vfloor.f32 %v243_v26 }
  0x28   : > { %376 = vperm.xlu1 %8777, %v9978_v47   ;;  %v8513_v27 = vsel %vm8510_vm1, %v8511_v21, %v8512_v23  ;;  %v10011_v29 = vcvt.f32.s32 %v8523_v24  ;;  %v10014_v33 = vcvt.f32.s32 %v8518_v25  ;;  %vm8535_vm2 = vcmp.lt.s32.totalorder %v243_v26, 0  ;;  %v252_v21 = vld [vmem:[%s9943_s21 + $0xe8] sm:$0xff]  ;;  %v251_v24 = vld [vmem:[%s9943_s21 + $0xe0] sm:$0xff]  ;;  %v250_v26 = vld [vmem:[%s9943_s21 + $0xd8] sm:$0xff] }
  0x29   : > { %373 = vperm.xlu0 %8776, %v9980_v50   ;;  %v10016_v37 = vcvt.f32.s32 %v8513_v27  ;;  %v8531_v38 = vceil.f32 %v242_v28  ;;  %v8532_v39 = vfloor.f32 %v242_v28  ;;  %vm8530_vm3 = vcmp.lt.s32.totalorder %v242_v28, 0 }
  0x2a   : > { %v8526_v40 = vceil.f32 %v241_v31  ;;  %v8527_v41 = vfloor.f32 %v241_v31  ;;  %vm8525_vm4 = vcmp.lt.s32.totalorder %v241_v31, 0  ;;  %v8538_v42 = vsel %vm8535_vm2, %v8536_v34, %v8537_v36 }
  0x2b   : > { %v8533_v43 = vsel %vm8530_vm3, %v8531_v38, %v8532_v39  ;;  %v10023_v49 = vcvt.f32.s32 %v8538_v42  ;;  %v8551_v53 = vceil.f32 %v246_v44  ;;  %v8552_v54 = vfloor.f32 %v246_v44 }
  0x2c   : > { %v8528_v46 = vsel %vm8525_vm4, %v8526_v40, %v8527_v41  ;;  %v10026_v52 = vcvt.f32.s32 %v8533_v43  ;;  %vm8550_vm5 = vcmp.lt.s32.totalorder %v246_v44, 0  ;;  %v8546_v56 = vceil.f32 %v245_v48  ;;  %v255_v43 = vld [vmem:[%s9943_s21 + $0x100] sm:$0xff] }
  0x2d   : > { %v10028_v55 = vcvt.f32.s32 %v8528_v46  ;;  %v8547_v57 = vfloor.f32 %v245_v48  ;;  %vm8545_vm6 = vcmp.lt.s32.totalorder %v245_v48, 0  ;;  %v8541_v58 = vceil.f32 %v244_v51  ;;  %v254_v46 = vld [vmem:[%s9943_s21 + $0xf8] sm:$0xff] }
  0x2e   : > { %v8542_v59 = vfloor.f32 %v244_v51  ;;  %vm8540_vm7 = vcmp.lt.s32.totalorder %v244_v51, 0  ;;  %v8553_v61 = vsel %vm8550_vm5, %v8551_v53, %v8552_v54  ;;  %v8566_v7 = vceil.f32 %v249_v0  ;;  %v253_v51 = vld [vmem:[%s9943_s21 + $0xf0] sm:$0xff] }
  0x2f   : > { %388 = vperm.xlu2 %8778, %v9987_v60   ;;  %v8548_v63 = vsel %vm8545_vm6, %v8546_v56, %v8547_v57  ;;  %v10035_v4 = vcvt.f32.s32 %v8553_v61  ;;  %v8567_v8 = vfloor.f32 %v249_v0  ;;  %vm8565_vm8 = vcmp.lt.s32.totalorder %v249_v0, 0 }
  0x30   : > { %385 = vperm.xlu1 %8777, %v9990_v62   ;;  %v8543_v2 = vsel %vm8540_vm7, %v8541_v58, %v8542_v59  ;;  %v10038_v6 = vcvt.f32.s32 %v8548_v63  ;;  %v8561_v10 = vceil.f32 %v248_v3  ;;  %v8562_v12 = vfloor.f32 %v248_v3 }
  0x31   : > { %382 = vperm.xlu0 %8776, %v9992_v1   ;;  %v10040_v9 = vcvt.f32.s32 %v8543_v2  ;;  %vm8560_vm9 = vcmp.lt.s32.totalorder %v248_v3, 0  ;;  %v8556_v14 = vceil.f32 %v247_v5  ;;  %v8557_v16 = vfloor.f32 %v247_v5  ;;  %v258_v3 = vld [vmem:[%s9943_s21 + $0x118] sm:$0xff] }
  0x32   : > { %vm8555_vm10 = vcmp.lt.s32.totalorder %v247_v5, 0  ;;  %v8568_v19 = vsel %vm8565_vm8, %v8566_v7, %v8567_v8  ;;  %v8563_v20 = vsel %vm8560_vm9, %v8561_v10, %v8562_v12  ;;  %v8581_v28 = vceil.f32 %v252_v21  ;;  %v257_v7 = vld [vmem:[%s9943_s21 + $0x110] sm:$0xff]  ;;  %v256_v10 = vld [vmem:[%s9943_s21 + $0x108] sm:$0xff] }
  0x33   : > { %v8558_v23 = vsel %vm8555_vm10, %v8556_v14, %v8557_v16  ;;  %v10047_v25 = vcvt.f32.s32 %v8568_v19  ;;  %v10050_v27 = vcvt.f32.s32 %v8563_v20  ;;  %v8582_v31 = vfloor.f32 %v252_v21 }
  0x34   : > { %v10052_v34 = vcvt.f32.s32 %v8558_v23  ;;  %vm8580_vm11 = vcmp.lt.s32.totalorder %v252_v21, 0  ;;  %v8576_v36 = vceil.f32 %v251_v24  ;;  %v8577_v38 = vfloor.f32 %v251_v24 }
  0x35   : > { %vm8575_vm12 = vcmp.lt.s32.totalorder %v251_v24, 0  ;;  %v8571_v39 = vceil.f32 %v250_v26  ;;  %v8572_v40 = vfloor.f32 %v250_v26  ;;  %vm8570_vm13 = vcmp.lt.s32.totalorder %v250_v26, 0 }
  0x36   : > { %v8583_v41 = vsel %vm8580_vm11, %v8581_v28, %v8582_v31  ;;  %v8578_v42 = vsel %vm8575_vm12, %v8576_v36, %v8577_v38  ;;  %v8596_v54 = vceil.f32 %v255_v43  ;;  %v8597_v56 = vfloor.f32 %v255_v43  ;;  %v261_v31 = vld [vmem:[%s9943_s21 + $0x130] sm:$0xff]  ;;  %v260_v38 = vld [vmem:[%s9943_s21 + $0x128] sm:$0xff] }
  0x37   : > { %397 = vperm.xlu2 %8778, %v9999_v11   ;;  %v8573_v44 = vsel %vm8570_vm13, %v8571_v39, %v8572_v40  ;;  %v10059_v48 = vcvt.f32.s32 %v8583_v41  ;;  %v10062_v53 = vcvt.f32.s32 %v8578_v42  ;;  %vm8595_vm14 = vcmp.lt.s32.totalorder %v255_v43, 0  ;;  %v259_v40 = vld [vmem:[%s9943_s21 + $0x120] sm:$0xff] }
  0x38   : > { %394 = vperm.xlu1 %8777, %v10002_v13   ;;  %v10064_v57 = vcvt.f32.s32 %v8573_v44  ;;  %v8591_v58 = vceil.f32 %v254_v46  ;;  %v8592_v59 = vfloor.f32 %v254_v46  ;;  %vm8590_vm15 = vcmp.lt.s32.totalorder %v254_v46, 0 }
  0x39   : > { %391 = vperm.xlu0 %8776, %v10004_v17   ;;  %v8586_v61 = vceil.f32 %v253_v51  ;;  %v8587_v63 = vfloor.f32 %v253_v51  ;;  %vm8585_vm0 = vcmp.lt.s32.totalorder %v253_v51, 0  ;;  %v8598_v0 = vsel %vm8595_vm14, %v8596_v54, %v8597_v56 }
  0x3a   : > { %v8593_v2 = vsel %vm8590_vm15, %v8591_v58, %v8592_v59  ;;  %v10071_v8 = vcvt.f32.s32 %v8598_v0  ;;  %v8611_v14 = vceil.f32 %v258_v3  ;;  %v8612_v16 = vfloor.f32 %v258_v3 }
  0x3b   : > { %v8588_v5 = vsel %vm8585_vm0, %v8586_v61, %v8587_v63  ;;  %v10074_v12 = vcvt.f32.s32 %v8593_v2  ;;  %vm8610_vm1 = vcmp.lt.s32.totalorder %v258_v3, 0  ;;  %v8606_v20 = vceil.f32 %v257_v7  ;;  %v264_v63 = vld [vmem:[%s9943_s21 + $0x148] sm:$0xff]  ;;  %v263_v2 = vld [vmem:[%s9943_s21 + $0x140] sm:$0xff] }
  0x3c   : > { %v10076_v19 = vcvt.f32.s32 %v8588_v5  ;;  %v8607_v21 = vfloor.f32 %v257_v7  ;;  %vm8605_vm2 = vcmp.lt.s32.totalorder %v257_v7, 0  ;;  %v8601_v23 = vceil.f32 %v256_v10  ;;  %v262_v5 = vld [vmem:[%s9943_s21 + $0x138] sm:$0xff] }
  0x3d   : > { %v8602_v24 = vfloor.f32 %v256_v10  ;;  %vm8600_vm3 = vcmp.lt.s32.totalorder %v256_v10, 0  ;;  %v8613_v26 = vsel %vm8610_vm1, %v8611_v14, %v8612_v16  ;;  %v8626_v42 = vceil.f32 %v261_v31 }
  0x3e   : > { %v8608_v28 = vsel %vm8605_vm2, %v8606_v20, %v8607_v21  ;;  %v10083_v39 = vcvt.f32.s32 %v8613_v26  ;;  %v8627_v43 = vfloor.f32 %v261_v31  ;;  %vm8625_vm4 = vcmp.lt.s32.totalorder %v261_v31, 0 }
  0x3f   : > { %406 = vperm.xlu2 %8778, %v10011_v29   ;;  %v8603_v36 = vsel %vm8600_vm3, %v8601_v23, %v8602_v24  ;;  %v10086_v41 = vcvt.f32.s32 %v8608_v28  ;;  %v8621_v46 = vceil.f32 %v260_v38  ;;  %v8622_v51 = vfloor.f32 %v260_v38 }
  0x40   : > { %403 = vperm.xlu1 %8777, %v10014_v33   ;;  %v10088_v44 = vcvt.f32.s32 %v8603_v36  ;;  %vm8620_vm5 = vcmp.lt.s32.totalorder %v260_v38, 0  ;;  %v8616_v54 = vceil.f32 %v259_v40  ;;  %v8617_v56 = vfloor.f32 %v259_v40  ;;  %v267_v36 = vld [vmem:[%s9943_s21 + $0x160] sm:$0xff] }
  0x41   : > { %400 = vperm.xlu0 %8776, %v10016_v37   ;;  %vm8615_vm6 = vcmp.lt.s32.totalorder %v259_v40, 0  ;;  %v8628_v58 = vsel %vm8625_vm4, %v8626_v42, %v8627_v43  ;;  %v8623_v61 = vsel %vm8620_vm5, %v8621_v46, %v8622_v51  ;;  %v8641_v10 = vceil.f32 %v264_v63  ;;  %v266_v40 = vld [vmem:[%s9943_s21 + $0x158] sm:$0xff]  ;;  %v265_v43 = vld [vmem:[%s9943_s21 + $0x150] sm:$0xff] }
  0x42   : > { %v8618_v0 = vsel %vm8615_vm6, %v8616_v54, %v8617_v56  ;;  %v10097_v3 = vcvt.f32.s32 %v8628_v58  ;;  %v10100_v7 = vcvt.f32.s32 %v8623_v61  ;;  %v8642_v14 = vfloor.f32 %v264_v63 }
  0x43   : > { %v10102_v16 = vcvt.f32.s32 %v8618_v0  ;;  %vm8640_vm7 = vcmp.lt.s32.totalorder %v264_v63, 0  ;;  %v8636_v20 = vceil.f32 %v263_v2  ;;  %v8637_v21 = vfloor.f32 %v263_v2 }
  0x44   : > { %vm8635_vm8 = vcmp.lt.s32.totalorder %v263_v2, 0  ;;  %v8631_v23 = vceil.f32 %v262_v5  ;;  %v8632_v24 = vfloor.f32 %v262_v5  ;;  %vm8630_vm9 = vcmp.lt.s32.totalorder %v262_v5, 0 }
  0x45   : > { %v8643_v26 = vsel %vm8640_vm7, %v8641_v10, %v8642_v14  ;;  %v8638_v31 = vsel %vm8635_vm8, %v8636_v20, %v8637_v21  ;;  %v8656_v51 = vceil.f32 %v267_v36  ;;  %v8657_v54 = vfloor.f32 %v267_v36  ;;  %v270_v14 = vld [vmem:[%s9943_s21 + $0x178] sm:$0xff]  ;;  %v269_v21 = vld [vmem:[%s9943_s21 + $0x170] sm:$0xff] }
  0x46   : > { %v8633_v38 = vsel %vm8630_vm9, %v8631_v23, %v8632_v24  ;;  %v10111_v42 = vcvt.f32.s32 %v8643_v26  ;;  %v10114_v46 = vcvt.f32.s32 %v8638_v31  ;;  %vm8655_vm10 = vcmp.lt.s32.totalorder %v267_v36, 0  ;;  %v268_v24 = vld [vmem:[%s9943_s21 + $0x168] sm:$0xff] }
  0x47   : > { %415 = vperm.xlu2 %8778, %v10023_v49   ;;  %v10116_v56 = vcvt.f32.s32 %v8633_v38  ;;  %v8651_v58 = vceil.f32 %v266_v40  ;;  %v8652_v61 = vfloor.f32 %v266_v40  ;;  %vm8650_vm11 = vcmp.lt.s32.totalorder %v266_v40, 0 }
  0x48   : > { %412 = vperm.xlu1 %8777, %v10026_v52   ;;  %v8646_v63 = vceil.f32 %v265_v43  ;;  %v8647_v0 = vfloor.f32 %v265_v43  ;;  %vm8645_vm12 = vcmp.lt.s32.totalorder %v265_v43, 0  ;;  %v8658_v2 = vsel %vm8655_vm10, %v8656_v51, %v8657_v54 }
  0x49   : > { %409 = vperm.xlu0 %8776, %v10028_v55   ;;  %v8653_v10 = vsel %vm8650_vm11, %v8651_v58, %v8652_v61  ;;  %v10125_v23 = vcvt.f32.s32 %v8658_v2  ;;  %v8671_v31 = vceil.f32 %v270_v14  ;;  %v8672_v36 = vfloor.f32 %v270_v14 }
  0x4a   : > { %v8648_v20 = vsel %vm8645_vm12, %v8646_v63, %v8647_v0  ;;  %v10128_v26 = vcvt.f32.s32 %v8653_v10  ;;  %vm8670_vm13 = vcmp.lt.s32.totalorder %v270_v14, 0  ;;  %v8666_v40 = vceil.f32 %v269_v21  ;;  %v273_v0 = vld [vmem:[%s9943_s21 + $0x190] sm:$0xff]  ;;  %v272_v14 = vld [vmem:[%s9943_s21 + $0x188] sm:$0xff] }
  0x4b   : > { %18225 = vst [vmem:[#allocation5_spill] sm:$0xff] %v10125_v23  ;;  %v10130_v38 = vcvt.f32.s32 %v8648_v20  ;;  %v8667_v43 = vfloor.f32 %v269_v21  ;;  %vm8665_vm14 = vcmp.lt.s32.totalorder %v269_v21, 0  ;;  %v8661_v51 = vceil.f32 %v268_v24 }
  0x4c   : > { %v8662_v54 = vfloor.f32 %v268_v24  ;;  %vm8660_vm15 = vcmp.lt.s32.totalorder %v268_v24, 0  ;;  %v8673_v58 = vsel %vm8670_vm13, %v8671_v31, %v8672_v36  ;;  %v8686_v24 = vceil.f32 %v273_v0 }
  0x4d   : > { %v8668_v63 = vsel %vm8665_vm14, %v8666_v40, %v8667_v43  ;;  %v10143_v21 = vcvt.f32.s32 %v8673_v58  ;;  %v8687_v31 = vfloor.f32 %v273_v0  ;;  %vm8685_vm0 = vcmp.lt.s32.totalorder %v273_v0, 0 }
  0x4e   : > { %v8663_v10 = vsel %vm8660_vm15, %v8661_v51, %v8662_v54  ;;  %v8681_v40 = vceil.f32 %v272_v14  ;;  %v8682_v43 = vfloor.f32 %v272_v14  ;;  %vm8680_vm1 = vcmp.lt.s32.totalorder %v272_v14, 0 }
  0x4f   : > { %424 = vperm.xlu2 %8778, %v10035_v4   ;;  %18229 = vst [vmem:[#allocation9_spill] sm:$0xff] %v10143_v21  ;;  %v10148_v36 = vcvt.f32.s32 %v8663_v10  ;;  %v8688_v58 = vsel %vm8685_vm0, %v8686_v24, %v8687_v31 }
  0x50   : > { %421 = vperm.xlu1 %8777, %v10038_v6   ;;  %v8683_v10 = vsel %vm8680_vm1, %v8681_v40, %v8682_v43 }
  0x51   : > { %418 = vperm.xlu0 %8776, %v10040_v9   ;;  %18231 = vst [vmem:[#allocation11_spill] sm:$0xff] %v10148_v36 }
  0x57   : > { %433 = vperm.xlu2 %8778, %v10047_v25  }
  0x58   : > { %430 = vperm.xlu1 %8777, %v10050_v27  }
  0x59   : > { %427 = vperm.xlu0 %8776, %v10052_v34  }
  0x5f   : > { %442 = vperm.xlu2 %8778, %v10059_v48  }
  0x60   : > { %439 = vperm.xlu1 %8777, %v10062_v53  }
  0x61   : > { %436 = vperm.xlu0 %8776, %v10064_v57  }
  0x67   : > { %451 = vperm.xlu2 %8778, %v10071_v8  }
  0x68   : > { %448 = vperm.xlu1 %8777, %v10074_v12  }
  0x69   : > { %445 = vperm.xlu0 %8776, %v10076_v19  }
  0x6f   : > { %460 = vperm.xlu2 %8778, %v10083_v39  }
  0x70   : > { %457 = vperm.xlu1 %8777, %v10086_v41  }
  0x71   : > { %454 = vperm.xlu0 %8776, %v10088_v44   ;;  %v10093_v59 = vpop.permute.xlu2 %367 }
  0x72   : > { %18222 = vst [vmem:[#allocation2_spill] sm:$0xff] %v10093_v59  ;;  %v10146_v59 = vcvt.f32.s32 %v8668_v63 }
  0x74   : > { %18230 = vst [vmem:[#allocation10_spill] sm:$0xff] %v10146_v59 }
  0x77   : > { %469 = vperm.xlu2 %8778, %v10097_v3  }
  0x78   : > { %466 = vperm.xlu1 %8777, %v10100_v7  }
  0x79   : > { %463 = vperm.xlu0 %8776, %v10102_v16   ;;  %v10107_v28 = vpop.permute.xlu2 %370 }
  0x7a   : > { %18223 = vst [vmem:[#allocation3_spill] sm:$0xff] %v10107_v28  ;;  %v271_v28 = vld [vmem:[%s9943_s21 + $0x180] sm:$0xff] }
  0x7b   : > { %v8676_v51 = vceil.f32 %v271_v28  ;;  %v8677_v54 = vfloor.f32 %v271_v28  ;;  %vm8675_vm2 = vcmp.lt.s32.totalorder %v271_v28, 0 }
  0x7f   : > { %478 = vperm.xlu2 %8778, %v10111_v42  }
  0x80   : > { %475 = vperm.xlu1 %8777, %v10114_v46  }
  0x81   : > { %472 = vperm.xlu0 %8776, %v10116_v56   ;;  %v10121_v5 = vpop.permute.xlu2 %379 }
  0x82   : > { %18224 = vst [vmem:[#allocation4_spill] sm:$0xff] %v10121_v5  ;;  %v8678_v5 = vsel %vm8675_vm2, %v8676_v51, %v8677_v54 }
  0x83   : > { %v10166_v31 = vcvt.f32.s32 %v8678_v5 }
  0x85   : > { %18237 = vst [vmem:[#allocation17_spill] sm:$0xff] %v10166_v31 }
  0x87   : > { %487 = vperm.xlu2 %8778, %v10125_v23   ;;  %v274_v23 = vld [vmem:[%s9943_s21 + $0x198] sm:$0xff] }
  0x88   : > { %484 = vperm.xlu1 %8777, %v10128_v26   ;;  %v8691_v51 = vceil.f32 %v274_v23  ;;  %v8692_v54 = vfloor.f32 %v274_v23  ;;  %vm8690_vm5 = vcmp.lt.s32.totalorder %v274_v23, 0 }
  0x89   : > { %481 = vperm.xlu0 %8776, %v10130_v38   ;;  %v10135_v61 = vpop.permute.xlu2 %388 }
  0x8a   : > { %18226 = vst [vmem:[#allocation6_spill] sm:$0xff] %v10135_v61  ;;  %v10138_v2 = vpop.permute.xlu1 %361  ;;  %v276_v61 = vld [vmem:[%s9943_s21 + $0x1a8] sm:$0xff] }
  0x8b   : > { %18227 = vst [vmem:[#allocation7_spill] sm:$0xff] %v10138_v2  ;;  %v10141_v20 = vpop.permute.xlu0 %355  ;;  %v10161_v2 = vcvt.f32.s32 %v8688_v58  ;;  %v8701_v28 = vceil.f32 %v276_v61  ;;  %v8702_v24 = vfloor.f32 %v276_v61  ;;  %vm8700_vm3 = vcmp.lt.s32.totalorder %v276_v61, 0 }
  0x8c   : > { %18228 = vst [vmem:[#allocation8_spill] sm:$0xff] %v10141_v20  ;;  %v275_v20 = vld [vmem:[%s9943_s21 + $0x1a0] sm:$0xff] }
  0x8d   : > { %18235 = vst [vmem:[#allocation15_spill] sm:$0xff] %v10161_v2  ;;  %v8696_v40 = vceil.f32 %v275_v20  ;;  %v8697_v43 = vfloor.f32 %v275_v20  ;;  %vm8695_vm4 = vcmp.lt.s32.totalorder %v275_v20, 0  ;;  %v8703_v58 = vsel %vm8700_vm3, %v8701_v28, %v8702_v24 }
  0x8f   : > { %496 = vperm.xlu2 %8778, %v10143_v21   ;;  %v10164_v21 = vcvt.f32.s32 %v8683_v10  ;;  %v8698_v5 = vsel %vm8695_vm4, %v8696_v40, %v8697_v43 }
  0x90   : > { %493 = vperm.xlu1 %8777, %v10146_v59   ;;  %v10179_v59 = vcvt.f32.s32 %v8703_v58 }
  0x91   : > { %490 = vperm.xlu0 %8776, %v10148_v36   ;;  %v10153_v63 = vpop.permute.xlu2 %397  ;;  %18236 = vst [vmem:[#allocation16_spill] sm:$0xff] %v10164_v21  ;;  %v277_v36 = vld [vmem:[%s9943_s21 + $0x1b0] sm:$0xff] }
  0x92   : > { %18232 = vst [vmem:[#allocation12_spill] sm:$0xff] %v10153_v63  ;;  %v10156_v0 = vpop.permute.xlu1 %364  ;;  %v279_v63 = vld [vmem:[%s9943_s21 + $0x1c0] sm:$0xff]  ;;  %vm8705_vm8 = vcmp.lt.s32.totalorder %v277_v36, 0 }
  0x93   : > { %18233 = vst [vmem:[#allocation13_spill] sm:$0xff] %v10156_v0  ;;  %v10159_v14 = vpop.permute.xlu0 %358  ;;  %v278_v0 = vld [vmem:[%s9943_s21 + $0x1b8] sm:$0xff]  ;;  %v8716_v23 = vceil.f32 %v279_v63  ;;  %v8717_v28 = vfloor.f32 %v279_v63  ;;  %vm8715_vm6 = vcmp.lt.s32.totalorder %v279_v63, 0 }
  0x94   : > { %18234 = vst [vmem:[#allocation14_spill] sm:$0xff] %v10159_v14  ;;  %v8693_v14 = vsel %vm8690_vm5, %v8691_v51, %v8692_v54  ;;  %v8711_v40 = vceil.f32 %v278_v0  ;;  %v8712_v43 = vfloor.f32 %v278_v0  ;;  %vm8710_vm7 = vcmp.lt.s32.totalorder %v278_v0, 0 }
  0x95   : > { %18241 = vst [vmem:[#allocation21_spill] sm:$0xff] %v10179_v59  ;;  %v10184_v24 = vcvt.f32.s32 %v8693_v14  ;;  %v8706_v51 = vceil.f32 %v277_v36  ;;  %v8707_v54 = vfloor.f32 %v277_v36  ;;  %v8718_v58 = vsel %vm8715_vm6, %v8716_v23, %v8717_v28 }
  0x96   : > { %v8713_v14 = vsel %vm8710_vm7, %v8711_v40, %v8712_v43 }
  0x97   : > { %505 = vperm.xlu2 %8778, %v10161_v2   ;;  %v10182_v2 = vcvt.f32.s32 %v8698_v5  ;;  %18243 = vst [vmem:[#allocation23_spill] sm:$0xff] %v10184_v24 }
  0x98   : > { %502 = vperm.xlu1 %8777, %v10164_v21   ;;  %v10197_v21 = vcvt.f32.s32 %v8718_v58 }
  0x99   : > { %499 = vperm.xlu0 %8776, %v10166_v31   ;;  %v10171_v10 = vpop.permute.xlu2 %406  ;;  %18242 = vst [vmem:[#allocation22_spill] sm:$0xff] %v10182_v2  ;;  %v280_v31 = vld [vmem:[%s9943_s21 + $0x1c8] sm:$0xff] }
  0x9a   : > { %18238 = vst [vmem:[#allocation18_spill] sm:$0xff] %v10171_v10  ;;  %v10174_v61 = vpop.permute.xlu1 %376  ;;  %v282_v10 = vld [vmem:[%s9943_s21 + $0x1d8] sm:$0xff]  ;;  %vm8720_vm11 = vcmp.lt.s32.totalorder %v280_v31, 0 }
  0x9b   : > { %18239 = vst [vmem:[#allocation19_spill] sm:$0xff] %v10174_v61  ;;  %v10177_v20 = vpop.permute.xlu0 %373  ;;  %v281_v61 = vld [vmem:[%s9943_s21 + $0x1d0] sm:$0xff]  ;;  %v8731_v36 = vceil.f32 %v282_v10  ;;  %v8732_v23 = vfloor.f32 %v282_v10  ;;  %vm8730_vm9 = vcmp.lt.s32.totalorder %v282_v10, 0 }
  0x9c   : > { %18240 = vst [vmem:[#allocation20_spill] sm:$0xff] %v10177_v20  ;;  %v8708_v20 = vsel %vm8705_vm8, %v8706_v51, %v8707_v54  ;;  %v8726_v40 = vceil.f32 %v281_v61  ;;  %v8727_v43 = vfloor.f32 %v281_v61  ;;  %vm8725_vm10 = vcmp.lt.s32.totalorder %v281_v61, 0 }
  0x9d   : > { %18247 = vst [vmem:[#allocation27_spill] sm:$0xff] %v10197_v21  ;;  %v10202_v28 = vcvt.f32.s32 %v8708_v20  ;;  %v8721_v51 = vceil.f32 %v280_v31  ;;  %v8722_v54 = vfloor.f32 %v280_v31  ;;  %v8733_v58 = vsel %vm8730_vm9, %v8731_v36, %v8732_v23 }
  0x9e   : > { %v8728_v20 = vsel %vm8725_vm10, %v8726_v40, %v8727_v43 }
  0x9f   : > { %514 = vperm.xlu2 %8778, %v10179_v59   ;;  %v10200_v59 = vcvt.f32.s32 %v8713_v14  ;;  %18249 = vst [vmem:[#allocation29_spill] sm:$0xff] %v10202_v28 }
  0xa0   : > { %511 = vperm.xlu1 %8777, %v10182_v2   ;;  %v10215_v2 = vcvt.f32.s32 %v8733_v58 }
  0xa1   : > { %508 = vperm.xlu0 %8776, %v10184_v24   ;;  %v10189_v5 = vpop.permute.xlu2 %415  ;;  %18248 = vst [vmem:[#allocation28_spill] sm:$0xff] %v10200_v59  ;;  %v283_v24 = vld [vmem:[%s9943_s21 + $0x1e0] sm:$0xff] }
  0xa2   : > { %18244 = vst [vmem:[#allocation24_spill] sm:$0xff] %v10189_v5  ;;  %v10192_v63 = vpop.permute.xlu1 %385  ;;  %v285_v5 = vld [vmem:[%s9943_s21 + $0x1f0] sm:$0xff]  ;;  %v8736_v43 = vceil.f32 %v283_v24  ;;  %vm8735_vm14 = vcmp.lt.s32.totalorder %v283_v24, 0 }
  0xa3   : > { %18245 = vst [vmem:[#allocation25_spill] sm:$0xff] %v10192_v63  ;;  %v10195_v0 = vpop.permute.xlu0 %382  ;;  %v8723_v63 = vsel %vm8720_vm11, %v8721_v51, %v8722_v54  ;;  %v8746_v31 = vceil.f32 %v285_v5  ;;  %vm8745_vm12 = vcmp.lt.s32.totalorder %v285_v5, 0 }
  0xa4   : > { %18246 = vst [vmem:[#allocation26_spill] sm:$0xff] %v10195_v0  ;;  %v284_v0 = vld [vmem:[%s9943_s21 + $0x1e8] sm:$0xff]  ;;  %v10220_v36 = vcvt.f32.s32 %v8723_v63 }
  0xa5   : > { %18253 = vst [vmem:[#allocation33_spill] sm:$0xff] %v10215_v2  ;;  %v8741_v23 = vceil.f32 %v284_v0  ;;  %v8742_v40 = vfloor.f32 %v284_v0  ;;  %vm8740_vm13 = vcmp.lt.s32.totalorder %v284_v0, 0  ;;  %v286_v0 = vld [vmem:[%s9943_s21 + $0x1f8] sm:$0xff] }
  0xa6   : > { %vm8750_vm15 = vcmp.lt.s32.totalorder %v286_v0, 0 }
  0xa7   : > { %523 = vperm.xlu2 %8778, %v10197_v21   ;;  %v10218_v21 = vcvt.f32.s32 %v8728_v20  ;;  %v8743_v58 = vsel %vm8740_vm13, %v8741_v23, %v8742_v40 }
  0xa8   : > { %520 = vperm.xlu1 %8777, %v10200_v59   ;;  %v8747_v59 = vfloor.f32 %v285_v5 }
  0xa9   : > { %517 = vperm.xlu0 %8776, %v10202_v28   ;;  %v10207_v14 = vpop.permute.xlu2 %424  ;;  %18254 = vst [vmem:[#allocation34_spill] sm:$0xff] %v10218_v21 }
  0xaa   : > { %18250 = vst [vmem:[#allocation30_spill] sm:$0xff] %v10207_v14  ;;  %v10210_v10 = vpop.permute.xlu1 %394  ;;  %v8737_v14 = vfloor.f32 %v283_v24  ;;  %v8748_v51 = vsel %vm8745_vm12, %v8746_v31, %v8747_v59  ;;  %v8751_v24 = vceil.f32 %v286_v0 }
  0xab   : > { %18251 = vst [vmem:[#allocation31_spill] sm:$0xff] %v10210_v10  ;;  %v10213_v61 = vpop.permute.xlu0 %391  ;;  %v10234_v10 = vcvt.f32.s32 %v8743_v58 }
  0xac   : > { %18252 = vst [vmem:[#allocation32_spill] sm:$0xff] %v10213_v61  ;;  %v8738_v5 = vsel %vm8735_vm14, %v8736_v43, %v8737_v14  ;;  %v10231_v61 = vcvt.f32.s32 %v8748_v51  ;;  %v9895_v43 = vmov 17  }
  0xaf   : > { %532 = vperm.xlu2 %8778, %v10215_v2   ;;  %v10236_v2 = vcvt.f32.s32 %v8738_v5 }
  0xb0   : > { %529 = vperm.xlu1 %8777, %v10218_v21   ;;  %v8752_v21 = vfloor.f32 %v286_v0 }
  0xb1   : > { %526 = vperm.xlu0 %8776, %v10220_v36   ;;  %v10225_v54 = vpop.permute.xlu2 %433  ;;  %18258 = vst [vmem:[#allocation38_spill] sm:$0xff] %v10236_v2 }
  0xb2   : > { %18255 = vst [vmem:[#allocation35_spill] sm:$0xff] %v10225_v54  ;;  %v10227_v63 = vpop.permute.xlu1 %403  ;;  %v8753_v31 = vsel %vm8750_vm15, %v8751_v24, %v8752_v21  ;;  %v18308_v54 = vld [vmem:[#allocation5_spill] sm:$0xff] }
  0xb3   : > { %18256 = vst [vmem:[#allocation36_spill] sm:$0xff] %v10227_v63  ;;  %v10229_v20 = vpop.permute.xlu0 %400  ;;  %v10247_v40 = vcvt.f32.s32 %v8753_v31  ;;  %v18313_v63 = vld [vmem:[#allocation17_spill] sm:$0xff] }
  0xb4   : > { %18257 = vst [vmem:[#allocation37_spill] sm:$0xff] %v10229_v20  ;;  %v18320_v20 = vld [vmem:[#allocation15_spill] sm:$0xff] }
  0xb7   : > { %541 = vperm.xlu2 %8778, %v10231_v61  }
  0xb8   : > { %538 = vperm.xlu1 %8777, %v10234_v10  }
  0xb9   : > { %535 = vperm.xlu0 %8776, %v10236_v2   ;;  %v10241_v59 = vpop.permute.xlu2 %442 }
  0xba   : > { %18259 = vst [vmem:[#allocation39_spill] sm:$0xff] %v10241_v59  ;;  %v10243_v14 = vpop.permute.xlu1 %412 }
  0xbb   : > { %18260 = vst [vmem:[#allocation40_spill] sm:$0xff] %v10243_v14  ;;  %v10245_v23 = vpop.permute.xlu0 %409 }
  0xbc   : > { %18261 = vst [vmem:[#allocation41_spill] sm:$0xff] %v10245_v23  ;;  %v18314_v23 = vld [vmem:[#allocation9_spill] sm:$0xff] }
  0xbf   : > { %8780 = vset.pattern.permute.xlu2 %v9895_v43 }
  0xc0   : > { %8779 = vset.pattern.permute.xlu1 %v9895_v43  ;;  %742 = vperm.xlu2 %8780, %v9968_v35  }
  0xc1   : > { %544 = vperm.xlu0 %8776, %v10247_v40   ;;  %739 = vperm.xlu1 %8779, %v9956_v22   ;;  %v10252_v51 = vpop.permute.xlu2 %451 }
  0xc2   : > { %18262 = vst [vmem:[#allocation42_spill] sm:$0xff] %v10252_v51  ;;  %v10254_v58 = vpop.permute.xlu1 %421 }
  0xc3   : > { %18263 = vst [vmem:[#allocation43_spill] sm:$0xff] %v10254_v58  ;;  %v10256_v5 = vpop.permute.xlu0 %418 }
  0xc4   : > { %18264 = vst [vmem:[#allocation44_spill] sm:$0xff] %v10256_v5  ;;  %v18319_v5 = vld [vmem:[#allocation23_spill] sm:$0xff] }
  0xc8   : > { %751 = vperm.xlu2 %8780, %v9951_v15  }
  0xc9   : > { %8781 = vset.pattern.permute.xlu0 %v9895_v43  ;;  %748 = vperm.xlu1 %8779, %v9966_v32   ;;  %v10260_v21 = vpop.permute.xlu2 %460 }
  0xca   : > { %18265 = vst [vmem:[#allocation45_spill] sm:$0xff] %v10260_v21  ;;  %745 = vperm.xlu0 %8781, %v9953_v18   ;;  %v10263_v0 = vpop.permute.xlu1 %430 }
  0xcb   : > { %18266 = vst [vmem:[#allocation46_spill] sm:$0xff] %v10263_v0  ;;  %v10265_v24 = vpop.permute.xlu0 %427  ;;  %v18307_v0 = vld [vmem:[#allocation11_spill] sm:$0xff] }
  0xcc   : > { %18267 = vst [vmem:[#allocation47_spill] sm:$0xff] %v10265_v24 }
  0xd0   : > { %757 = vperm.xlu2 %8780, %v9980_v50  }
  0xd1   : > { %754 = vperm.xlu1 %8779, %v9963_v30   ;;  %v10269_v31 = vpop.permute.xlu2 %469 }
  0xd2   : > { %18268 = vst [vmem:[#allocation48_spill] sm:$0xff] %v10269_v31  ;;  %760 = vperm.xlu0 %8781, %v9978_v47   ;;  %v10272_v59 = vpop.permute.xlu1 %439 }
  0xd3   : > { %18269 = vst [vmem:[#allocation49_spill] sm:$0xff] %v10272_v59  ;;  %v10274_v43 = vpop.permute.xlu0 %436 }
  0xd4   : > { %18270 = vst [vmem:[#allocation50_spill] sm:$0xff] %v10274_v43 }
  0xd8   : > { %766 = vperm.xlu2 %8780, %v9992_v1  }
  0xd9   : > { %763 = vperm.xlu1 %8779, %v9975_v45   ;;  %v10278_v21 = vpop.permute.xlu2 %478 }
  0xda   : > { %18271 = vst [vmem:[#allocation51_spill] sm:$0xff] %v10278_v21  ;;  %769 = vperm.xlu0 %8781, %v9990_v62   ;;  %v10281_v51 = vpop.permute.xlu1 %448 }
  0xdb   : > { %18272 = vst [vmem:[#allocation52_spill] sm:$0xff] %v10281_v51  ;;  %v10283_v58 = vpop.permute.xlu0 %445 }
  0xdc   : > { %18273 = vst [vmem:[#allocation53_spill] sm:$0xff] %v10283_v58 }
  0xe0   : > { %775 = vperm.xlu2 %8780, %v10004_v17  }
  0xe1   : > { %772 = vperm.xlu1 %8779, %v9987_v60   ;;  %v10287_v31 = vpop.permute.xlu2 %487 }
  0xe2   : > { %18274 = vst [vmem:[#allocation54_spill] sm:$0xff] %v10287_v31  ;;  %778 = vperm.xlu0 %8781, %v10002_v13   ;;  %v10290_v59 = vpop.permute.xlu1 %457 }
  0xe3   : > { %18275 = vst [vmem:[#allocation55_spill] sm:$0xff] %v10290_v59  ;;  %v10292_v24 = vpop.permute.xlu0 %454 }
  0xe4   : > { %18276 = vst [vmem:[#allocation56_spill] sm:$0xff] %v10292_v24 }
  0xe8   : > { %784 = vperm.xlu2 %8780, %v10016_v37  }
  0xe9   : > { %781 = vperm.xlu1 %8779, %v9999_v11   ;;  %v10296_v21 = vpop.permute.xlu2 %496 }
  0xea   : > { %18277 = vst [vmem:[#allocation57_spill] sm:$0xff] %v10296_v21  ;;  %787 = vperm.xlu0 %8781, %v10014_v33   ;;  %v10299_v58 = vpop.permute.xlu1 %466 }
  0xeb   : > { %18278 = vst [vmem:[#allocation58_spill] sm:$0xff] %v10299_v58  ;;  %v10301_v51 = vpop.permute.xlu0 %463 }
  0xec   : > { %18279 = vst [vmem:[#allocation59_spill] sm:$0xff] %v10301_v51 }
  0xf0   : > { %793 = vperm.xlu2 %8780, %v10028_v55  }
  0xf1   : > { %790 = vperm.xlu1 %8779, %v10011_v29   ;;  %v10305_v31 = vpop.permute.xlu2 %505 }
  0xf2   : > { %18280 = vst [vmem:[#allocation60_spill] sm:$0xff] %v10305_v31  ;;  %796 = vperm.xlu0 %8781, %v10026_v52   ;;  %v10308_v59 = vpop.permute.xlu1 %475 }
  0xf3   : > { %18281 = vst [vmem:[#allocation61_spill] sm:$0xff] %v10308_v59  ;;  %v10310_v24 = vpop.permute.xlu0 %472 }
  0xf4   : > { %18282 = vst [vmem:[#allocation62_spill] sm:$0xff] %v10310_v24 }
  0xf8   : > { %802 = vperm.xlu2 %8780, %v10040_v9  }
  0xf9   : > { %799 = vperm.xlu1 %8779, %v10023_v49   ;;  %v10314_v21 = vpop.permute.xlu2 %514 }
  0xfa   : > { %18283 = vst [vmem:[#allocation63_spill] sm:$0xff] %v10314_v21  ;;  %805 = vperm.xlu0 %8781, %v10038_v6   ;;  %v10317_v51 = vpop.permute.xlu1 %484 }
  0xfb   : > { %18284 = vst [vmem:[#allocation64_spill] sm:$0xff] %v10317_v51  ;;  %v10319_v58 = vpop.permute.xlu0 %481 }
  0xfc   : > { %18285 = vst [vmem:[#allocation65_spill] sm:$0xff] %v10319_v58 }
 0x100   : > { %811 = vperm.xlu2 %8780, %v10052_v34  }
 0x101   : > { %808 = vperm.xlu1 %8779, %v10035_v4   ;;  %v10323_v31 = vpop.permute.xlu2 %523 }
 0x102   : > { %18286 = vst [vmem:[#allocation66_spill] sm:$0xff] %v10323_v31  ;;  %814 = vperm.xlu0 %8781, %v10050_v27   ;;  %v10326_v59 = vpop.permute.xlu1 %493 }
 0x103   : > { %18287 = vst [vmem:[#allocation67_spill] sm:$0xff] %v10326_v59  ;;  %v10328_v24 = vpop.permute.xlu0 %490 }
 0x104   : > { %18288 = vst [vmem:[#allocation68_spill] sm:$0xff] %v10328_v24 }
 0x108   : > { %820 = vperm.xlu2 %8780, %v10064_v57  }
 0x109   : > { %817 = vperm.xlu1 %8779, %v10047_v25   ;;  %v10332_v21 = vpop.permute.xlu2 %532 }
 0x10a   : > { %18289 = vst [vmem:[#allocation69_spill] sm:$0xff] %v10332_v21  ;;  %823 = vperm.xlu0 %8781, %v10062_v53   ;;  %v10335_v58 = vpop.permute.xlu1 %502 }
 0x10b   : > { %18290 = vst [vmem:[#allocation70_spill] sm:$0xff] %v10335_v58  ;;  %v10337_v51 = vpop.permute.xlu0 %499 }
 0x10c   : > { %18291 = vst [vmem:[#allocation71_spill] sm:$0xff] %v10337_v51 }
 0x110   : > { %829 = vperm.xlu2 %8780, %v10076_v19  }
 0x111   : > { %826 = vperm.xlu1 %8779, %v10059_v48   ;;  %v10341_v31 = vpop.permute.xlu2 %541 }
 0x112   : > { %18292 = vst [vmem:[#allocation72_spill] sm:$0xff] %v10341_v31  ;;  %832 = vperm.xlu0 %8781, %v10074_v12   ;;  %v10344_v59 = vpop.permute.xlu1 %511 }
 0x113   : > { %18293 = vst [vmem:[#allocation73_spill] sm:$0xff] %v10344_v59  ;;  %v10346_v24 = vpop.permute.xlu0 %508 }
 0x114   : > { %18294 = vst [vmem:[#allocation74_spill] sm:$0xff] %v10346_v24 }
 0x118   : > { %838 = vperm.xlu2 %8780, %v10088_v44  }
 0x119   : > { %835 = vperm.xlu1 %8779, %v10071_v8  }
 0x11a   : > { %841 = vperm.xlu0 %8781, %v10086_v41   ;;  %v10351_v21 = vpop.permute.xlu1 %520  ;;  %v10353_v51 = vpop.permute.xlu2 %742 }
 0x11b   : > { %18295 = vst [vmem:[#allocation75_spill] sm:$0xff] %v10351_v21  ;;  %v10355_v58 = vpop.permute.xlu0 %517 }
 0x11c   : > { %18296 = vst [vmem:[#allocation76_spill] sm:$0xff] %v10353_v51 }
 0x11d   : > { %18297 = vst [vmem:[#allocation77_spill] sm:$0xff] %v10355_v58 }
 0x120   : > { %847 = vperm.xlu2 %8780, %v10102_v16  }
 0x121   : > { %844 = vperm.xlu1 %8779, %v10083_v39  }
 0x122   : > { %850 = vperm.xlu0 %8781, %v10100_v7   ;;  %v10360_v31 = vpop.permute.xlu1 %529  ;;  %v10362_v59 = vpop.permute.xlu2 %751 }
 0x123   : > { %18298 = vst [vmem:[#allocation78_spill] sm:$0xff] %v10360_v31  ;;  %v10364_v24 = vpop.permute.xlu0 %526 }
 0x124   : > { %18299 = vst [vmem:[#allocation79_spill] sm:$0xff] %v10362_v59 }
 0x125   : > { %18300 = vst [vmem:[#allocation80_spill] sm:$0xff] %v10364_v24 }
 0x128   : > { %856 = vperm.xlu2 %8780, %v10116_v56  }
 0x129   : > { %853 = vperm.xlu1 %8779, %v10097_v3  }
 0x12a   : > { %859 = vperm.xlu0 %8781, %v10114_v46   ;;  %v10369_v51 = vpop.permute.xlu1 %538  ;;  %v10371_v58 = vpop.permute.xlu2 %757 }
 0x12b   : > { %18301 = vst [vmem:[#allocation81_spill] sm:$0xff] %v10369_v51  ;;  %v10373_v21 = vpop.permute.xlu0 %535  ;;  %v18309_v51 = vld [vmem:[#allocation10_spill] sm:$0xff] }
 0x12c   : > { %18302 = vst [vmem:[#allocation82_spill] sm:$0xff] %v10371_v58 }
 0x12d   : > { %18303 = vst [vmem:[#allocation83_spill] sm:$0xff] %v10373_v21 }
 0x130   : > { %865 = vperm.xlu2 %8780, %v10130_v38  }
 0x131   : > { %862 = vperm.xlu1 %8779, %v10111_v42  }
 0x132   : > { %868 = vperm.xlu0 %8781, %v10128_v26   ;;  %v10378_v59 = vpop.permute.xlu2 %766 }
 0x133   : > { %18304 = vst [vmem:[#allocation84_spill] sm:$0xff] %v10378_v59  ;;  %v10380_v31 = vpop.permute.xlu0 %544  ;;  %v10382_v24 = vpop.permute.xlu1 %739  ;;  %v18315_v59 = vld [vmem:[#allocation16_spill] sm:$0xff] }
 0x134   : > { %18305 = vst [vmem:[#allocation85_spill] sm:$0xff] %v10380_v31 }
 0x135   : > { %18306 = vst [vmem:[#allocation86_spill] sm:$0xff] %v10382_v24 }
 0x138   : > { %874 = vperm.xlu2 %8780, %v18307_v0  }
 0x139   : > { %871 = vperm.xlu1 %8779, %v18308_v54  }
 0x13a   : > { %877 = vperm.xlu0 %8781, %v18309_v51   ;;  %v10387_v58 = vpop.permute.xlu2 %775 }
 0x13b   : > { %18310 = vst [vmem:[#allocation11_spill] sm:$0xff] %v10387_v58  ;;  %v10389_v21 = vpop.permute.xlu1 %748  ;;  %v18321_v58 = vld [vmem:[#allocation22_spill] sm:$0xff] }
 0x13c   : > { %18311 = vst [vmem:[#allocation5_spill] sm:$0xff] %v10389_v21  ;;  %v10391_v43 = vpop.permute.xlu0 %745 }
 0x13d   : > { %18312 = vst [vmem:[#allocation10_spill] sm:$0xff] %v10391_v43 }
 0x140   : > { %883 = vperm.xlu2 %8780, %v18313_v63  }
 0x141   : > { %880 = vperm.xlu1 %8779, %v18314_v23  }
 0x142   : > { %886 = vperm.xlu0 %8781, %v18315_v59   ;;  %v10396_v31 = vpop.permute.xlu2 %784  ;;  %v18325_v59 = vld [vmem:[#allocation21_spill] sm:$0xff] }
 0x143   : > { %18316 = vst [vmem:[#allocation9_spill] sm:$0xff] %v10396_v31  ;;  %v10398_v24 = vpop.permute.xlu1 %754  ;;  %v18326_v31 = vld [vmem:[#allocation28_spill] sm:$0xff] }
 0x144   : > { %18317 = vst [vmem:[#allocation87_spill] sm:$0xff] %v10398_v24  ;;  %v10400_v14 = vpop.permute.xlu0 %760 }
 0x145   : > { %18318 = vst [vmem:[#allocation88_spill] sm:$0xff] %v10400_v14 }
 0x148   : > { %892 = vperm.xlu2 %8780, %v18319_v5  }
 0x149   : > { %889 = vperm.xlu1 %8779, %v18320_v20  }
 0x14a   : > { %895 = vperm.xlu0 %8781, %v18321_v58   ;;  %v10405_v21 = vpop.permute.xlu2 %793  ;;  %v18330_v58 = vld [vmem:[#allocation27_spill] sm:$0xff] }
 0x14b   : > { %18322 = vst [vmem:[#allocation15_spill] sm:$0xff] %v10405_v21  ;;  %v10407_v43 = vpop.permute.xlu1 %763  ;;  %v18331_v21 = vld [vmem:[#allocation34_spill] sm:$0xff] }
 0x14c   : > { %18323 = vst [vmem:[#allocation89_spill] sm:$0xff] %v10407_v43  ;;  %v10409_v63 = vpop.permute.xlu0 %769 }
 0x14d   : > { %18324 = vst [vmem:[#allocation90_spill] sm:$0xff] %v10409_v63 }
 0x150   : > { %901 = vperm.xlu2 %8780, %v10202_v28  }
 0x151   : > { %898 = vperm.xlu1 %8779, %v18325_v59  }
 0x152   : > { %904 = vperm.xlu0 %8781, %v18326_v31   ;;  %v10414_v24 = vpop.permute.xlu2 %802  ;;  %v18335_v31 = vld [vmem:[#allocation33_spill] sm:$0xff] }
 0x153   : > { %18327 = vst [vmem:[#allocation21_spill] sm:$0xff] %v10414_v24  ;;  %v10416_v14 = vpop.permute.xlu1 %772 }
 0x154   : > { %18328 = vst [vmem:[#allocation91_spill] sm:$0xff] %v10416_v14  ;;  %v10418_v5 = vpop.permute.xlu0 %778 }
 0x155   : > { %18329 = vst [vmem:[#allocation92_spill] sm:$0xff] %v10418_v5 }
 0x158   : > { %910 = vperm.xlu2 %8780, %v10220_v36  }
 0x159   : > { %907 = vperm.xlu1 %8779, %v18330_v58  }
 0x15a   : > { %913 = vperm.xlu0 %8781, %v18331_v21   ;;  %v10423_v43 = vpop.permute.xlu2 %811 }
 0x15b   : > { %18332 = vst [vmem:[#allocation27_spill] sm:$0xff] %v10423_v43  ;;  %v10425_v63 = vpop.permute.xlu1 %781  ;;  %v9896_v43 = vmov 16  }
 0x15c   : > { %18333 = vst [vmem:[#allocation34_spill] sm:$0xff] %v10425_v63  ;;  %v10427_v28 = vpop.permute.xlu0 %787 }
 0x15d   : > { %18334 = vst [vmem:[#allocation93_spill] sm:$0xff] %v10427_v28 }
 0x160   : > { %919 = vperm.xlu2 %8780, %v10236_v2  }
 0x161   : > { %916 = vperm.xlu1 %8779, %v18335_v31  }
 0x162   : > { %922 = vperm.xlu0 %8781, %v10234_v10   ;;  %v10432_v24 = vpop.permute.xlu2 %820 }
 0x163   : > { %18336 = vst [vmem:[#allocation33_spill] sm:$0xff] %v10432_v24  ;;  %v10434_v5 = vpop.permute.xlu1 %790 }
 0x164   : > { %18337 = vst [vmem:[#allocation94_spill] sm:$0xff] %v10434_v5  ;;  %v10436_v14 = vpop.permute.xlu0 %796 }
 0x165   : > { %18338 = vst [vmem:[#allocation95_spill] sm:$0xff] %v10436_v14 }
 0x168   : > { %928 = vperm.xlu2 %8780, %v10247_v40  }
 0x169   : > { %925 = vperm.xlu1 %8779, %v10231_v61  }
 0x16a   : > { %8782 = vset.pattern.permute.xlu0 %v9896_v43  ;;  %v10440_v63 = vpop.permute.xlu2 %829 }
 0x16b   : > { %1123 = vperm.xlu0 %8782, %v9956_v22   ;;  %v10443_v28 = vpop.permute.xlu1 %799 }
 0x16c   : > { %v10445_v2 = vpop.permute.xlu0 %805 }
 0x170   : > { %8784 = vset.pattern.permute.xlu2 %v9896_v43 }
 0x171   : > { %8783 = vset.pattern.permute.xlu1 %v9896_v43  ;;  %1129 = vperm.xlu2 %8784, %v9953_v18  }
 0x172   : > { %1126 = vperm.xlu1 %8783, %v9968_v35   ;;  %v10449_v24 = vpop.permute.xlu2 %838 }
 0x173   : > { %1138 = vperm.xlu0 %8782, %v9963_v30   ;;  %v10452_v14 = vpop.permute.xlu1 %808 }
 0x174   : > { %v10454_v5 = vpop.permute.xlu0 %814 }
 0x179   : > { %1135 = vperm.xlu2 %8784, %v9951_v15  }
 0x17a   : > { %1132 = vperm.xlu1 %8783, %v9966_v32   ;;  %v10458_v22 = vpop.permute.xlu2 %847 }
 0x17b   : > { %1147 = vperm.xlu0 %8782, %v9975_v45   ;;  %v10461_v43 = vpop.permute.xlu1 %817 }
 0x17c   : > { %v10463_v18 = vpop.permute.xlu0 %823 }
 0x181   : > { %1144 = vperm.xlu2 %8784, %v9978_v47  }
 0x182   : > { %1141 = vperm.xlu1 %8783, %v9980_v50   ;;  %v10467_v30 = vpop.permute.xlu2 %856 }
 0x183   : > { %1156 = vperm.xlu0 %8782, %v9987_v60   ;;  %v10470_v35 = vpop.permute.xlu1 %826 }
 0x184   : > { %v10472_v15 = vpop.permute.xlu0 %832 }
 0x189   : > { %1153 = vperm.xlu2 %8784, %v9990_v62  }
 0x18a   : > { %1150 = vperm.xlu1 %8783, %v9992_v1   ;;  %v10476_v32 = vpop.permute.xlu2 %865 }
 0x18b   : > { %1165 = vperm.xlu0 %8782, %v9999_v11   ;;  %v10479_v45 = vpop.permute.xlu1 %835 }
 0x18c   : > { %v10481_v47 = vpop.permute.xlu0 %841 }
 0x191   : > { %1162 = vperm.xlu2 %8784, %v10002_v13  }
 0x192   : > { %1159 = vperm.xlu1 %8783, %v10004_v17   ;;  %v10485_v50 = vpop.permute.xlu2 %874 }
 0x193   : > { %1174 = vperm.xlu0 %8782, %v10011_v29   ;;  %v10488_v60 = vpop.permute.xlu1 %844 }
 0x194   : > { %v10490_v62 = vpop.permute.xlu0 %850 }
 0x199   : > { %1171 = vperm.xlu2 %8784, %v10014_v33  }
 0x19a   : > { %1168 = vperm.xlu1 %8783, %v10016_v37   ;;  %v10494_v1 = vpop.permute.xlu2 %883 }
 0x19b   : > { %1183 = vperm.xlu0 %8782, %v10023_v49   ;;  %v10497_v11 = vpop.permute.xlu1 %853 }
 0x19c   : > { %v10499_v13 = vpop.permute.xlu0 %859 }
 0x1a1   : > { %1180 = vperm.xlu2 %8784, %v10026_v52  }
 0x1a2   : > { %1177 = vperm.xlu1 %8783, %v10028_v55   ;;  %v10503_v17 = vpop.permute.xlu2 %892 }
 0x1a3   : > { %1192 = vperm.xlu0 %8782, %v10035_v4   ;;  %v10506_v29 = vpop.permute.xlu1 %862 }
 0x1a4   : > { %v10508_v33 = vpop.permute.xlu0 %868 }
 0x1a9   : > { %1189 = vperm.xlu2 %8784, %v10038_v6  }
 0x1aa   : > { %1186 = vperm.xlu1 %8783, %v10040_v9   ;;  %v10512_v37 = vpop.permute.xlu2 %901 }
 0x1ab   : > { %1201 = vperm.xlu0 %8782, %v10047_v25   ;;  %v10515_v49 = vpop.permute.xlu1 %871 }
 0x1ac   : > { %v10517_v52 = vpop.permute.xlu0 %877 }
 0x1b1   : > { %1198 = vperm.xlu2 %8784, %v10050_v27  }
 0x1b2   : > { %1195 = vperm.xlu1 %8783, %v10052_v34   ;;  %v10521_v55 = vpop.permute.xlu2 %910 }
 0x1b3   : > { %1210 = vperm.xlu0 %8782, %v10059_v48   ;;  %v10524_v4 = vpop.permute.xlu1 %880 }
 0x1b4   : > { %v10526_v6 = vpop.permute.xlu0 %886 }
 0x1b9   : > { %1207 = vperm.xlu2 %8784, %v10062_v53  }
 0x1ba   : > { %1204 = vperm.xlu1 %8783, %v10064_v57   ;;  %v10530_v9 = vpop.permute.xlu2 %919 }
 0x1bb   : > { %1219 = vperm.xlu0 %8782, %v10071_v8   ;;  %v10533_v25 = vpop.permute.xlu1 %889 }
 0x1bc   : > { %v10535_v27 = vpop.permute.xlu0 %895 }
 0x1c1   : > { %1216 = vperm.xlu2 %8784, %v10074_v12  }
 0x1c2   : > { %1213 = vperm.xlu1 %8783, %v10076_v19   ;;  %v10539_v34 = vpop.permute.xlu2 %928 }
 0x1c3   : > { %1228 = vperm.xlu0 %8782, %v10083_v39   ;;  %v10542_v48 = vpop.permute.xlu1 %898 }
 0x1c4   : > { %v10544_v53 = vpop.permute.xlu0 %904 }
 0x1c9   : > { %1225 = vperm.xlu2 %8784, %v10086_v41  }
 0x1ca   : > { %1222 = vperm.xlu1 %8783, %v10088_v44  }
 0x1cb   : > { %1237 = vperm.xlu0 %8782, %v10097_v3   ;;  %v10549_v57 = vpop.permute.xlu1 %907  ;;  %v10551_v8 = vpop.permute.xlu2 %1129 }
 0x1cc   : > { %18339 = vst [vmem:[#allocation96_spill] sm:$0xff] %v10551_v8  ;;  %v10553_v12 = vpop.permute.xlu0 %913 }
 0x1d1   : > { %1234 = vperm.xlu2 %8784, %v10100_v7  }
 0x1d2   : > { %1231 = vperm.xlu1 %8783, %v10102_v16  }
 0x1d3   : > { %1246 = vperm.xlu0 %8782, %v10111_v42   ;;  %v10558_v19 = vpop.permute.xlu1 %916  ;;  %v10560_v39 = vpop.permute.xlu2 %1135 }
 0x1d4   : > { %v10562_v41 = vpop.permute.xlu0 %922 }
 0x1d9   : > { %1243 = vperm.xlu2 %8784, %v10114_v46  }
 0x1da   : > { %1240 = vperm.xlu1 %8783, %v10116_v56  }
 0x1db   : > { %1255 = vperm.xlu0 %8782, %v18308_v54   ;;  %v10567_v44 = vpop.permute.xlu1 %925  ;;  %v10569_v3 = vpop.permute.xlu2 %1144 }
 0x1dd   : > { %v10571_v7 = vpop.permute.xlu0 %1123 }
 0x1e1   : > { %1252 = vperm.xlu2 %8784, %v10128_v26  }
 0x1e2   : > { %1249 = vperm.xlu1 %8783, %v10130_v38   ;;  %v18343_v38 = vld [vmem:[#allocation16_spill] sm:$0xff] }
 0x1e3   : > { %1264 = vperm.xlu0 %8782, %v18314_v23   ;;  %v10576_v16 = vpop.permute.xlu2 %1153  ;;  %v18344_v23 = vld [vmem:[#allocation17_spill] sm:$0xff] }
 0x1e4   : > { %18340 = vst [vmem:[#allocation97_spill] sm:$0xff] %v10576_v16  ;;  %v10578_v42 = vpop.permute.xlu1 %1126 }
 0x1e5   : > { %v10580_v46 = vpop.permute.xlu0 %1138 }
 0x1e9   : > { %1261 = vperm.xlu2 %8784, %v18309_v51  }
 0x1ea   : > { %1258 = vperm.xlu1 %8783, %v18307_v0   ;;  %v18347_v0 = vld [vmem:[#allocation22_spill] sm:$0xff] }
 0x1eb   : > { %1273 = vperm.xlu0 %8782, %v18320_v20   ;;  %v10585_v56 = vpop.permute.xlu2 %1162  ;;  %v18348_v20 = vld [vmem:[#allocation23_spill] sm:$0xff] }
 0x1ec   : > { %18341 = vst [vmem:[#allocation98_spill] sm:$0xff] %v10585_v56  ;;  %v10587_v54 = vpop.permute.xlu1 %1132 }
 0x1ed   : > { %v10589_v26 = vpop.permute.xlu0 %1147 }
 0x1ee   : > { %18342 = vst [vmem:[#allocation99_spill] sm:$0xff] %v10589_v26 }
 0x1f1   : > { %1270 = vperm.xlu2 %8784, %v18343_v38  }
 0x1f2   : > { %1267 = vperm.xlu1 %8783, %v18344_v23   ;;  %v18352_v23 = vld [vmem:[#allocation28_spill] sm:$0xff] }
 0x1f3   : > { %1282 = vperm.xlu0 %8782, %v18325_v59   ;;  %v10594_v16 = vpop.permute.xlu2 %1171  ;;  %v18353_v59 = vld [vmem:[#allocation29_spill] sm:$0xff] }
 0x1f4   : > { %18345 = vst [vmem:[#allocation16_spill] sm:$0xff] %v10594_v16  ;;  %v10596_v8 = vpop.permute.xlu1 %1141 }
 0x1f5   : > { %v10598_v51 = vpop.permute.xlu0 %1156 }
 0x1f6   : > { %18346 = vst [vmem:[#allocation17_spill] sm:$0xff] %v10598_v51 }
 0x1f9   : > { %1279 = vperm.xlu2 %8784, %v18347_v0   ;;  %v352_v0 = vlaneseq }
 0x1fa   : > { %1276 = vperm.xlu1 %8783, %v18348_v20  }
 0x1fb   : > { %1291 = vperm.xlu0 %8782, %v18330_v58   ;;  %v10603_v56 = vpop.permute.xlu2 %1180  ;;  %v10618_v58 = vand.u32 127, %v352_v0  ;;  %v9897_v0 = vmov 0.0  }
 0x1fc   : > { %18349 = vst [vmem:[#allocation22_spill] sm:$0xff] %v10603_v56  ;;  %v10605_v26 = vpop.permute.xlu1 %1150  ;;  %v18363_v56 = vld [vmem:[#allocation14_spill] sm:$0xff] }
 0x1fd   : > { %18350 = vst [vmem:[#allocation23_spill] sm:$0xff] %v10605_v26  ;;  %v10607_v38 = vpop.permute.xlu0 %1165  ;;  %vm547_vm2 = vcmp.eq.s32.totalorder %v18363_v56, %v10618_v58  ;;  %v18369_v56 = vld [vmem:[#allocation4_spill] sm:$0xff] }
 0x1fe   : > { %18351 = vst [vmem:[#allocation100_spill] sm:$0xff] %v10607_v38  ;;  %v18358_v38 = vld [vmem:[#allocation13_spill] sm:$0xff]  ;;  %vm554_vm5 = vcmp.eq.s32.totalorder %v18369_v56, %v10618_v58  ;;  %v18373_v56 = vld [vmem:[#allocation2_spill] sm:$0xff] }
 0x1ff   : > { %18357 = vst [vmem:[#allocation102_spill] sm:$0xff] %v10618_v58  ;;  %vm549_vm0 = vcmp.eq.s32.totalorder %v18358_v38, %v10618_v58  ;;  %v18365_v38 = vld [vmem:[#allocation8_spill] sm:$0xff]  ;;  %vm550_vm8 = vcmp.eq.s32.totalorder %v18373_v56, %v10618_v58 }
 0x200   : > { %vm546_vm3 = vcmp.eq.s32.totalorder %v18365_v38, %v10618_v58 }
 0x201   : > { %1288 = vperm.xlu2 %8784, %v18352_v23  }
 0x202   : > { %1285 = vperm.xlu1 %8783, %v18353_v59   ;;  %v18361_v59 = vld [vmem:[#allocation7_spill] sm:$0xff] }
 0x203   : > { %1300 = vperm.xlu0 %8782, %v18335_v31   ;;  %v10612_v16 = vpop.permute.xlu2 %1189  ;;  %vm548_vm1 = vcmp.eq.s32.totalorder %v18361_v59, %v10618_v58  ;;  %v18366_v59 = vld [vmem:[#allocation26_spill] sm:$0xff] }
 0x204   : > { %18354 = vst [vmem:[#allocation28_spill] sm:$0xff] %v10612_v16  ;;  %v10614_v51 = vpop.permute.xlu1 %1159  ;;  %vm555_vm4 = vcmp.eq.s32.totalorder %v18366_v59, %v10618_v58  ;;  %v8102_v59 = vsel %vm554_vm5, 1.0, %v9897_v0 }
 0x205   : > { %18355 = vst [vmem:[#allocation29_spill] sm:$0xff] %v10614_v51  ;;  %v10616_v20 = vpop.permute.xlu0 %1174  ;;  %v8103_v38 = vsel %vm555_vm4, 1.0, %v9897_v0  ;;  %v18382_v51 = vld [vmem:[#allocation25_spill] sm:$0xff] }
 0x206   : > { %18356 = vst [vmem:[#allocation101_spill] sm:$0xff] %v10616_v20  ;;  %v8097_v20 = vsel %vm549_vm0, 1.0, %v9897_v0  ;;  %vm556_vm14 = vcmp.eq.s32.totalorder %v18382_v51, %v10618_v58  ;;  %v18387_v51 = vld [vmem:[#allocation24_spill] sm:$0xff] }
 0x209   : > { %1297 = vperm.xlu2 %8784, %v18331_v21   ;;  %v8096_v21 = vsel %vm548_vm1, 1.0, %v9897_v0  ;;  %vm566_vm1 = vcmp.eq.s32.totalorder %v18387_v51, %v10618_v58  ;;  %v18391_v51 = vld [vmem:[#allocation36_spill] sm:$0xff] }
 0x20a   : > { %1294 = vperm.xlu1 %8783, %v10220_v36   ;;  %v8790_v36 = vpack.i.bf16 %v8097_v20, %v8096_v21  ;;  %v8095_v20 = vsel %vm547_vm2, 1.0, %v9897_v0  ;;  %vm562_vm4 = vcmp.eq.s32.totalorder %v18391_v51, %v10618_v58 }
 0x20b   : > { %1309 = vperm.xlu0 %8782, %v10231_v61   ;;  %v10625_v23 = vpop.permute.xlu2 %1198  ;;  %v18364_v61 = vld [vmem:[#allocation38_spill] sm:$0xff] }
 0x20c   : > { %18359 = vst [vmem:[#allocation13_spill] sm:$0xff] %v10625_v23  ;;  %v10627_v31 = vpop.permute.xlu1 %1168 }
 0x20d   : > { %18360 = vst [vmem:[#allocation103_spill] sm:$0xff] %v10627_v31  ;;  %v10631_v16 = vpop.permute.xlu0 %1183  ;;  %v8805_v31 = vpack.i.bf16 %v8103_v38, %v8102_v59  ;;  %v8098_v59 = vsel %vm550_vm8, 1.0, %v9897_v0 }
 0x20e   : > { %18362 = vst [vmem:[#allocation7_spill] sm:$0xff] %v10631_v16 }
 0x211   : > { %1306 = vperm.xlu2 %8784, %v10234_v10  }
 0x212   : > { %1303 = vperm.xlu1 %8783, %v18364_v61   ;;  %v8094_v61 = vsel %vm546_vm3, 1.0, %v9897_v0 }
 0x213   : > { %8791 = vrot.lane.b32.xlu0 %v8790_v36, %s9898_s22  ;;  %v10644_v16 = vpop.permute.xlu2 %1207  ;;  %v8785_v23 = vpack.i.bf16 %v8095_v20, %v8094_v61  ;;  %v18371_v36 = vld [vmem:[#allocation19_spill] sm:$0xff]  ;;  %v18375_v20 = vld [vmem:[#allocation37_spill] sm:$0xff] }
 0x214   : > { %18367 = vst [vmem:[#allocation14_spill] sm:$0xff] %v10644_v16  ;;  %v10647_v21 = vpop.permute.xlu1 %1177  ;;  %vm553_vm6 = vcmp.eq.s32.totalorder %v18371_v36, %v10618_v58  ;;  %v18372_v16 = vld [vmem:[#allocation20_spill] sm:$0xff]  ;;  %vm561_vm10 = vcmp.eq.s32.totalorder %v18375_v20, %v10618_v58 }
 0x215   : > { %18368 = vst [vmem:[#allocation38_spill] sm:$0xff] %v10647_v21  ;;  %v10651_v10 = vpop.permute.xlu0 %1192  ;;  %vm552_vm7 = vcmp.eq.s32.totalorder %v18372_v16, %v10618_v58  ;;  %v8101_v16 = vsel %vm553_vm6, 1.0, %v9897_v0  ;;  %v8109_v56 = vsel %vm561_vm10, 1.0, %v9897_v0  ;;  %v18380_v21 = vld [vmem:[#allocation31_spill] sm:$0xff] }
 0x216   : > { %18370 = vst [vmem:[#allocation8_spill] sm:$0xff] %v10651_v10  ;;  %v18374_v10 = vld [vmem:[#allocation3_spill] sm:$0xff]  ;;  %v8100_v38 = vsel %vm552_vm7, 1.0, %v9897_v0  ;;  %vm559_vm12 = vcmp.eq.s32.totalorder %v18380_v21, %v10618_v58  ;;  %v18385_v21 = vld [vmem:[#allocation6_spill] sm:$0xff] }
 0x217   : > { %vm551_vm9 = vcmp.eq.s32.totalorder %v18374_v10, %v10618_v58  ;;  %v18378_v10 = vld [vmem:[#allocation12_spill] sm:$0xff]  ;;  %vm557_vm0 = vcmp.eq.s32.totalorder %v18385_v21, %v10618_v58 }
 0x218   : > { %v8099_v36 = vsel %vm551_vm9, 1.0, %v9897_v0  ;;  %vm560_vm11 = vcmp.eq.s32.totalorder %v18378_v10, %v10618_v58  ;;  %v18383_v10 = vld [vmem:[#allocation44_spill] sm:$0xff] }
 0x219   : > { %8786 = vrot.lane.b32.xlu2 %v8785_v23, %s9898_s22  ;;  %v8795_v20 = vpack.i.bf16 %v8099_v36, %v8098_v59  ;;  %vm567_vm15 = vcmp.eq.s32.totalorder %v18383_v10, %v10618_v58  ;;  %v8104_v59 = vsel %vm556_vm14, 1.0, %v9897_v0  ;;  %v18389_v21 = vld [vmem:[#allocation40_spill] sm:$0xff] }
 0x21a   : > { %1312 = vperm.xlu1 %8783, %v10247_v40   ;;  %vm565_vm2 = vcmp.eq.s32.totalorder %v18389_v21, %v10618_v58 }
 0x21b   : > { %8806 = vrot.lane.b32.xlu0 %v8805_v31, %s9898_s22  ;;  %v10669_v61 = vpop.permute.xlu2 %1216  ;;  %v8800_v31 = vpack.i.bf16 %v8101_v16, %v8100_v38  ;;  %v8107_v38 = vsel %vm559_vm12, 1.0, %v9897_v0 }
 0x21c   : > { %18376 = vst [vmem:[#allocation26_spill] sm:$0xff] %v10669_v61  ;;  %v10673_v23 = vpop.permute.xlu1 %1186  ;;  %v8108_v61 = vsel %vm560_vm11, 1.0, %v9897_v0 }
 0x21d   : > { %18377 = vst [vmem:[#allocation4_spill] sm:$0xff] %v10673_v23  ;;  %v10679_v40 = vpop.permute.xlu0 %1201  ;;  %v18381_v23 = vld [vmem:[#allocation32_spill] sm:$0xff]  ;;  %v8820_v26 = vpack.i.bf16 %v8109_v56, %v8108_v61  ;;  %v8105_v56 = vsel %vm557_vm0, 1.0, %v9897_v0 }
 0x21e   : > { %18379 = vst [vmem:[#allocation19_spill] sm:$0xff] %v10679_v40  ;;  %vm558_vm13 = vcmp.eq.s32.totalorder %v18381_v23, %v10618_v58  ;;  %v8810_v10 = vpack.i.bf16 %v8105_v56, %v8104_v59  ;;  %v18396_v56 = vld [vmem:[#allocation35_spill] sm:$0xff] }
 0x21f   : > { %v8106_v61 = vsel %vm558_vm13, 1.0, %v9897_v0  ;;  %vm572_vm7 = vcmp.eq.s32.totalorder %v18396_v56, %v10618_v58  ;;  %v18400_v56 = vld [vmem:[#allocation43_spill] sm:$0xff] }
 0x220   : > { %v8120_v21 = vsel %vm572_vm7, 1.0, %v9897_v0  ;;  %vm568_vm10 = vcmp.eq.s32.totalorder %v18400_v56, %v10618_v58 }
 0x221   : > { %8801 = vrot.lane.b32.xlu2 %v8800_v31, %s9898_s22  ;;  %v8815_v31 = vpack.i.bf16 %v8107_v38, %v8106_v61  ;;  %v18394_v61 = vld [vmem:[#allocation18_spill] sm:$0xff] }
 0x222   : > { %8796 = vrot.lane.b32.xlu1 %v8795_v20, %s9898_s22  ;;  %v8114_v20 = vsel %vm566_vm1, 1.0, %v9897_v0  ;;  %vm563_vm6 = vcmp.eq.s32.totalorder %v18394_v61, %v10618_v58  ;;  %v18398_v61 = vld [vmem:[#allocation46_spill] sm:$0xff] }
 0x223   : > { %8821 = vrot.lane.b32.xlu0 %v8820_v26, %s9898_s22  ;;  %v10694_v16 = vpop.permute.xlu2 %1225  ;;  %v8115_v26 = vsel %vm567_vm15, 1.0, %v9897_v0  ;;  %vm571_vm8 = vcmp.eq.s32.totalorder %v18398_v61, %v10618_v58 }
 0x224   : > { %18384 = vst [vmem:[#allocation20_spill] sm:$0xff] %v10694_v16  ;;  %v10700_v23 = vpop.permute.xlu1 %1195  ;;  %v18390_v16 = vld [vmem:[#allocation41_spill] sm:$0xff]  ;;  %v8835_v40 = vpack.i.bf16 %v8115_v26, %v8114_v20 }
 0x225   : > { %18386 = vst [vmem:[#allocation2_spill] sm:$0xff] %v10700_v23  ;;  %v10705_v36 = vpop.permute.xlu0 %1210  ;;  %vm564_vm3 = vcmp.eq.s32.totalorder %v18390_v16, %v10618_v58  ;;  %v8113_v16 = vsel %vm565_vm2, 1.0, %v9897_v0  ;;  %v18472_v23 = vld [vmem:[#allocation88_spill] sm:$0xff] }
 0x226   : > { %18388 = vst [vmem:[#allocation3_spill] sm:$0xff] %v10705_v36  ;;  %v18392_v36 = vld [vmem:[#allocation50_spill] sm:$0xff]  ;;  %v8112_v59 = vsel %vm564_vm3, 1.0, %v9897_v0 }
 0x227   : > { %vm573_vm5 = vcmp.eq.s32.totalorder %v18392_v36, %v10618_v58  ;;  %v8111_v36 = vsel %vm563_vm6, 1.0, %v9897_v0 }
 0x229   : > { %8816 = vrot.lane.b32.xlu2 %v8815_v31, %s9898_s22  ;;  %v8110_v31 = vsel %vm562_vm4, 1.0, %v9897_v0 }
 0x22a   : > { %8811 = vrot.lane.b32.xlu1 %v8810_v10, %s9898_s22  ;;  %v8830_v10 = vpack.i.bf16 %v8113_v16, %v8112_v59  ;;  %v8825_v51 = vpack.i.bf16 %v8111_v36, %v8110_v31  ;;  %v18403_v59 = vld [vmem:[#allocation30_spill] sm:$0xff] }
 0x22b   : > { %8836 = vrot.lane.b32.xlu0 %v8835_v40, %s9898_s22  ;;  %v10721_v38 = vpop.permute.xlu2 %1234  ;;  %v8121_v40 = vsel %vm573_vm5, 1.0, %v9897_v0  ;;  %vm569_vm12 = vcmp.eq.s32.totalorder %v18403_v59, %v10618_v58  ;;  %v18405_v36 = vld [vmem:[#allocation42_spill] sm:$0xff]  ;;  %v18407_v59 = vld [vmem:[#allocation52_spill] sm:$0xff] }
 0x22c   : > { %18393 = vst [vmem:[#allocation37_spill] sm:$0xff] %v10721_v38  ;;  %v10727_v26 = vpop.permute.xlu1 %1204  ;;  %v18399_v38 = vld [vmem:[#allocation47_spill] sm:$0xff]  ;;  %vm578_vm13 = vcmp.eq.s32.totalorder %v18405_v36, %v10618_v58  ;;  %vm577_vm14 = vcmp.eq.s32.totalorder %v18407_v59, %v10618_v58  ;;  %v18409_v36 = vld [vmem:[#allocation49_spill] sm:$0xff] }
 0x22d   : > { %18395 = vst [vmem:[#allocation12_spill] sm:$0xff] %v10727_v26  ;;  %v10732_v20 = vpop.permute.xlu0 %1219  ;;  %vm570_vm9 = vcmp.eq.s32.totalorder %v18399_v38, %v10618_v58  ;;  %v8850_v26 = vpack.i.bf16 %v8121_v40, %v8120_v21  ;;  %v8119_v38 = vsel %vm571_vm8, 1.0, %v9897_v0  ;;  %v8126_v61 = vsel %vm578_vm13, 1.0, %v9897_v0 }
 0x22e   : > { %18397 = vst [vmem:[#allocation31_spill] sm:$0xff] %v10732_v20  ;;  %v18401_v20 = vld [vmem:[#allocation56_spill] sm:$0xff]  ;;  %v8118_v31 = vsel %vm570_vm9, 1.0, %v9897_v0  ;;  %vm574_vm0 = vcmp.eq.s32.totalorder %v18409_v36, %v10618_v58 }
 0x22f   : > { %vm579_vm11 = vcmp.eq.s32.totalorder %v18401_v20, %v10618_v58  ;;  %v8117_v20 = vsel %vm569_vm12, 1.0, %v9897_v0 }
 0x231   : > { %8831 = vrot.lane.b32.xlu2 %v8830_v10, %s9898_s22  ;;  %v8116_v10 = vsel %vm568_vm10, 1.0, %v9897_v0 }
 0x232   : > { %8826 = vrot.lane.b32.xlu1 %v8825_v51, %s9898_s22  ;;  %v8845_v51 = vpack.i.bf16 %v8119_v38, %v8118_v31  ;;  %v8840_v56 = vpack.i.bf16 %v8117_v20, %v8116_v10  ;;  %v18412_v31 = vld [vmem:[#allocation39_spill] sm:$0xff]  ;;  %v18414_v20 = vld [vmem:[#allocation48_spill] sm:$0xff] }
 0x233   : > { %8851 = vrot.lane.b32.xlu0 %v8850_v26, %s9898_s22  ;;  %v10748_v16 = vpop.permute.xlu2 %1243  ;;  %v8127_v26 = vsel %vm579_vm11, 1.0, %v9897_v0  ;;  %vm575_vm2 = vcmp.eq.s32.totalorder %v18412_v31, %v10618_v58  ;;  %vm584_vm3 = vcmp.eq.s32.totalorder %v18414_v20, %v10618_v58  ;;  %v18416_v31 = vld [vmem:[#allocation58_spill] sm:$0xff]  ;;  %v18418_v20 = vld [vmem:[#allocation55_spill] sm:$0xff] }
 0x234   : > { %18402 = vst [vmem:[#allocation32_spill] sm:$0xff] %v10748_v16  ;;  %v10754_v40 = vpop.permute.xlu1 %1213  ;;  %v18408_v16 = vld [vmem:[#allocation53_spill] sm:$0xff]  ;;  %v8132_v59 = vsel %vm584_vm3, 1.0, %v9897_v0  ;;  %vm583_vm4 = vcmp.eq.s32.totalorder %v18416_v31, %v10618_v58  ;;  %vm580_vm6 = vcmp.eq.s32.totalorder %v18418_v20, %v10618_v58 }
 0x235   : > { %18404 = vst [vmem:[#allocation25_spill] sm:$0xff] %v10754_v40  ;;  %v10759_v21 = vpop.permute.xlu0 %1228  ;;  %vm576_vm15 = vcmp.eq.s32.totalorder %v18408_v16, %v10618_v58  ;;  %v8865_v40 = vpack.i.bf16 %v8127_v26, %v8126_v61  ;;  %v8125_v16 = vsel %vm577_vm14, 1.0, %v9897_v0 }
 0x236   : > { %18406 = vst [vmem:[#allocation44_spill] sm:$0xff] %v10759_v21  ;;  %v18410_v21 = vld [vmem:[#allocation62_spill] sm:$0xff]  ;;  %v8124_v10 = vsel %vm576_vm15, 1.0, %v9897_v0 }
 0x237   : > { %vm585_vm1 = vcmp.eq.s32.totalorder %v18410_v21, %v10618_v58  ;;  %v8123_v21 = vsel %vm575_vm2, 1.0, %v9897_v0 }
 0x239   : > { %8846 = vrot.lane.b32.xlu2 %v8845_v51, %s9898_s22  ;;  %v8122_v51 = vsel %vm574_vm0, 1.0, %v9897_v0 }
 0x23a   : > { %8841 = vrot.lane.b32.xlu1 %v8840_v56, %s9898_s22  ;;  %v8860_v56 = vpack.i.bf16 %v8125_v16, %v8124_v10  ;;  %v8855_v36 = vpack.i.bf16 %v8123_v21, %v8122_v51  ;;  %v18421_v10 = vld [vmem:[#allocation45_spill] sm:$0xff]  ;;  %v18423_v21 = vld [vmem:[#allocation54_spill] sm:$0xff] }
 0x23b   : > { %8866 = vrot.lane.b32.xlu0 %v8865_v40, %s9898_s22  ;;  %v10775_v38 = vpop.permute.xlu2 %1252  ;;  %v8133_v40 = vsel %vm585_vm1, 1.0, %v9897_v0  ;;  %vm581_vm8 = vcmp.eq.s32.totalorder %v18421_v10, %v10618_v58  ;;  %vm590_vm9 = vcmp.eq.s32.totalorder %v18423_v21, %v10618_v58  ;;  %v18425_v10 = vld [vmem:[#allocation64_spill] sm:$0xff]  ;;  %v18427_v21 = vld [vmem:[#allocation61_spill] sm:$0xff] }
 0x23c   : > { %18411 = vst [vmem:[#allocation6_spill] sm:$0xff] %v10775_v38  ;;  %v10781_v26 = vpop.permute.xlu1 %1222  ;;  %v18417_v38 = vld [vmem:[#allocation59_spill] sm:$0xff]  ;;  %v8138_v31 = vsel %vm590_vm9, 1.0, %v9897_v0  ;;  %vm589_vm10 = vcmp.eq.s32.totalorder %v18425_v10, %v10618_v58  ;;  %vm586_vm12 = vcmp.eq.s32.totalorder %v18427_v21, %v10618_v58 }
 0x23d   : > { %18413 = vst [vmem:[#allocation24_spill] sm:$0xff] %v10781_v26  ;;  %v10786_v61 = vpop.permute.xlu0 %1237  ;;  %vm582_vm5 = vcmp.eq.s32.totalorder %v18417_v38, %v10618_v58  ;;  %v8880_v26 = vpack.i.bf16 %v8133_v40, %v8132_v59  ;;  %v8131_v38 = vsel %vm583_vm4, 1.0, %v9897_v0 }
 0x23e   : > { %18415 = vst [vmem:[#allocation40_spill] sm:$0xff] %v10786_v61  ;;  %v18419_v61 = vld [vmem:[#allocation68_spill] sm:$0xff]  ;;  %v8130_v51 = vsel %vm582_vm5, 1.0, %v9897_v0 }
 0x23f   : > { %vm591_vm7 = vcmp.eq.s32.totalorder %v18419_v61, %v10618_v58  ;;  %v8129_v61 = vsel %vm581_vm8, 1.0, %v9897_v0 }
 0x241   : > { %8861 = vrot.lane.b32.xlu2 %v8860_v56, %s9898_s22  ;;  %v8128_v56 = vsel %vm580_vm6, 1.0, %v9897_v0 }
 0x242   : > { %8856 = vrot.lane.b32.xlu1 %v8855_v36, %s9898_s22  ;;  %v8875_v36 = vpack.i.bf16 %v8131_v38, %v8130_v51  ;;  %v8870_v20 = vpack.i.bf16 %v8129_v61, %v8128_v56  ;;  %v18430_v51 = vld [vmem:[#allocation51_spill] sm:$0xff]  ;;  %v18432_v61 = vld [vmem:[#allocation60_spill] sm:$0xff] }
 0x243   : > { %8881 = vrot.lane.b32.xlu0 %v8880_v26, %s9898_s22  ;;  %v10802_v16 = vpop.permute.xlu2 %1261  ;;  %v8139_v26 = vsel %vm591_vm7, 1.0, %v9897_v0  ;;  %vm587_vm14 = vcmp.eq.s32.totalorder %v18430_v51, %v10618_v58  ;;  %vm596_vm15 = vcmp.eq.s32.totalorder %v18432_v61, %v10618_v58  ;;  %v18434_v51 = vld [vmem:[#allocation70_spill] sm:$0xff]  ;;  %v18436_v61 = vld [vmem:[#allocation67_spill] sm:$0xff] }
 0x244   : > { %18420 = vst [vmem:[#allocation41_spill] sm:$0xff] %v10802_v16  ;;  %v10808_v40 = vpop.permute.xlu1 %1231  ;;  %v18426_v16 = vld [vmem:[#allocation65_spill] sm:$0xff]  ;;  %v8144_v10 = vsel %vm596_vm15, 1.0, %v9897_v0  ;;  %vm595_vm0 = vcmp.eq.s32.totalorder %v18434_v51, %v10618_v58  ;;  %vm592_vm2 = vcmp.eq.s32.totalorder %v18436_v61, %v10618_v58 }
 0x245   : > { %18422 = vst [vmem:[#allocation36_spill] sm:$0xff] %v10808_v40  ;;  %v10813_v59 = vpop.permute.xlu0 %1246  ;;  %vm588_vm11 = vcmp.eq.s32.totalorder %v18426_v16, %v10618_v58  ;;  %v8895_v40 = vpack.i.bf16 %v8139_v26, %v8138_v31  ;;  %v8137_v16 = vsel %vm589_vm10, 1.0, %v9897_v0 }
 0x246   : > { %18424 = vst [vmem:[#allocation50_spill] sm:$0xff] %v10813_v59  ;;  %v18428_v59 = vld [vmem:[#allocation74_spill] sm:$0xff]  ;;  %v8136_v56 = vsel %vm588_vm11, 1.0, %v9897_v0 }
 0x247   : > { %vm597_vm13 = vcmp.eq.s32.totalorder %v18428_v59, %v10618_v58  ;;  %v8135_v59 = vsel %vm587_vm14, 1.0, %v9897_v0 }
 0x249   : > { %8876 = vrot.lane.b32.xlu2 %v8875_v36, %s9898_s22  ;;  %v8134_v36 = vsel %vm586_vm12, 1.0, %v9897_v0 }
 0x24a   : > { %8871 = vrot.lane.b32.xlu1 %v8870_v20, %s9898_s22  ;;  %v8890_v20 = vpack.i.bf16 %v8137_v16, %v8136_v56  ;;  %v8885_v21 = vpack.i.bf16 %v8135_v59, %v8134_v36  ;;  %v18439_v56 = vld [vmem:[#allocation57_spill] sm:$0xff]  ;;  %v18441_v59 = vld [vmem:[#allocation66_spill] sm:$0xff] }
 0x24b   : > { %8896 = vrot.lane.b32.xlu0 %v8895_v40, %s9898_s22  ;;  %v10829_v38 = vpop.permute.xlu2 %1270  ;;  %v8145_v40 = vsel %vm597_vm13, 1.0, %v9897_v0  ;;  %vm593_vm4 = vcmp.eq.s32.totalorder %v18439_v56, %v10618_v58  ;;  %vm602_vm5 = vcmp.eq.s32.totalorder %v18441_v59, %v10618_v58  ;;  %v18443_v56 = vld [vmem:[#allocation75_spill] sm:$0xff]  ;;  %v18445_v59 = vld [vmem:[#allocation73_spill] sm:$0xff] }
 0x24c   : > { %18429 = vst [vmem:[#allocation18_spill] sm:$0xff] %v10829_v38  ;;  %v10835_v26 = vpop.permute.xlu1 %1240  ;;  %v18435_v38 = vld [vmem:[#allocation71_spill] sm:$0xff]  ;;  %v8150_v51 = vsel %vm602_vm5, 1.0, %v9897_v0  ;;  %vm601_vm6 = vcmp.eq.s32.totalorder %v18443_v56, %v10618_v58  ;;  %vm598_vm8 = vcmp.eq.s32.totalorder %v18445_v59, %v10618_v58 }
 0x24d   : > { %18431 = vst [vmem:[#allocation35_spill] sm:$0xff] %v10835_v26  ;;  %v10840_v31 = vpop.permute.xlu0 %1255  ;;  %vm594_vm1 = vcmp.eq.s32.totalorder %v18435_v38, %v10618_v58  ;;  %v8910_v26 = vpack.i.bf16 %v8145_v40, %v8144_v10  ;;  %v8143_v38 = vsel %vm595_vm0, 1.0, %v9897_v0 }
 0x24e   : > { %18433 = vst [vmem:[#allocation46_spill] sm:$0xff] %v10840_v31  ;;  %v18437_v31 = vld [vmem:[#allocation80_spill] sm:$0xff]  ;;  %v8142_v36 = vsel %vm594_vm1, 1.0, %v9897_v0 }
 0x24f   : > { %vm603_vm3 = vcmp.eq.s32.totalorder %v18437_v31, %v10618_v58  ;;  %v8141_v31 = vsel %vm593_vm4, 1.0, %v9897_v0 }
 0x251   : > { %8891 = vrot.lane.b32.xlu2 %v8890_v20, %s9898_s22  ;;  %v8140_v20 = vsel %vm592_vm2, 1.0, %v9897_v0 }
 0x252   : > { %8886 = vrot.lane.b32.xlu1 %v8885_v21, %s9898_s22  ;;  %v8905_v21 = vpack.i.bf16 %v8143_v38, %v8142_v36  ;;  %v8900_v61 = vpack.i.bf16 %v8141_v31, %v8140_v20  ;;  %v18448_v36 = vld [vmem:[#allocation63_spill] sm:$0xff]  ;;  %v18450_v31 = vld [vmem:[#allocation72_spill] sm:$0xff] }
 0x253   : > { %8911 = vrot.lane.b32.xlu0 %v8910_v26, %s9898_s22  ;;  %v10856_v16 = vpop.permute.xlu2 %1279  ;;  %v8151_v26 = vsel %vm603_vm3, 1.0, %v9897_v0  ;;  %vm599_vm10 = vcmp.eq.s32.totalorder %v18448_v36, %v10618_v58  ;;  %vm608_vm11 = vcmp.eq.s32.totalorder %v18450_v31, %v10618_v58  ;;  %v18452_v36 = vld [vmem:[#allocation81_spill] sm:$0xff]  ;;  %v18454_v31 = vld [vmem:[#allocation78_spill] sm:$0xff] }
 0x254   : > { %18438 = vst [vmem:[#allocation47_spill] sm:$0xff] %v10856_v16  ;;  %v10862_v40 = vpop.permute.xlu1 %1249  ;;  %v18444_v16 = vld [vmem:[#allocation77_spill] sm:$0xff]  ;;  %v8156_v56 = vsel %vm608_vm11, 1.0, %v9897_v0  ;;  %vm607_vm12 = vcmp.eq.s32.totalorder %v18452_v36, %v10618_v58  ;;  %vm604_vm14 = vcmp.eq.s32.totalorder %v18454_v31, %v10618_v58 }
 0x255   : > { %18440 = vst [vmem:[#allocation43_spill] sm:$0xff] %v10862_v40  ;;  %v10867_v10 = vpop.permute.xlu0 %1264  ;;  %vm600_vm7 = vcmp.eq.s32.totalorder %v18444_v16, %v10618_v58  ;;  %v8925_v40 = vpack.i.bf16 %v8151_v26, %v8150_v51  ;;  %v8149_v16 = vsel %vm601_vm6, 1.0, %v9897_v0 }
 0x256   : > { %18442 = vst [vmem:[#allocation56_spill] sm:$0xff] %v10867_v10  ;;  %v18446_v10 = vld [vmem:[#allocation85_spill] sm:$0xff]  ;;  %v8148_v20 = vsel %vm600_vm7, 1.0, %v9897_v0 }
 0x257   : > { %vm609_vm9 = vcmp.eq.s32.totalorder %v18446_v10, %v10618_v58  ;;  %v8147_v10 = vsel %vm599_vm10, 1.0, %v9897_v0  ;;  %vm937_vm10 = vcmp.eq.s32.totalorder %v18472_v23, %v10618_v58 }
 0x258   : > { %v8165_v23 = vsel %vm937_vm10, 1.0, %v9897_v0  ;;  %vm956_vm10 = vcmp.eq.s32.totalorder %v10461_v43, %v10618_v58  ;;  %v18485_v43 = vld [vmem:[#allocation27_spill] sm:$0xff] }
 0x259   : > { %8906 = vrot.lane.b32.xlu2 %v8905_v21, %s9898_s22  ;;  %v8146_v21 = vsel %vm598_vm8, 1.0, %v9897_v0 }
 0x25a   : > { %8901 = vrot.lane.b32.xlu1 %v8900_v61, %s9898_s22  ;;  %v8920_v61 = vpack.i.bf16 %v8149_v16, %v8148_v20  ;;  %v8915_v59 = vpack.i.bf16 %v8147_v10, %v8146_v21  ;;  %v18456_v16 = vld [vmem:[#allocation87_spill] sm:$0xff]  ;;  %v8155_v21 = vsel %vm607_vm12, 1.0, %v9897_v0 }
 0x25b   : > { %8926 = vrot.lane.b32.xlu0 %v8925_v40, %s9898_s22  ;;  %v10883_v38 = vpop.permute.xlu2 %1288  ;;  %v8157_v40 = vsel %vm609_vm9, 1.0, %v9897_v0  ;;  %vm935_vm0 = vcmp.eq.s32.totalorder %v18456_v16, %v10618_v58  ;;  %v18461_v16 = vld [vmem:[#allocation5_spill] sm:$0xff] }
 0x25c   : > { %18447 = vst [vmem:[#allocation30_spill] sm:$0xff] %v10883_v38  ;;  %v10889_v26 = vpop.permute.xlu1 %1258  ;;  %v18453_v38 = vld [vmem:[#allocation83_spill] sm:$0xff]  ;;  %vm933_vm2 = vcmp.eq.s32.totalorder %v18461_v16, %v10618_v58 }
 0x25d   : > { %18449 = vst [vmem:[#allocation42_spill] sm:$0xff] %v10889_v26  ;;  %v10894_v51 = vpop.permute.xlu0 %1273  ;;  %vm606_vm13 = vcmp.eq.s32.totalorder %v18453_v38, %v10618_v58  ;;  %v8940_v26 = vpack.i.bf16 %v8157_v40, %v8156_v56  ;;  %v18458_v38 = vld [vmem:[#allocation69_spill] sm:$0xff] }
 0x25e   : > { %18451 = vst [vmem:[#allocation52_spill] sm:$0xff] %v10894_v51  ;;  %v18455_v51 = vld [vmem:[#allocation79_spill] sm:$0xff]  ;;  %vm605_vm1 = vcmp.eq.s32.totalorder %v18458_v38, %v10618_v58  ;;  %v8154_v40 = vsel %vm606_vm13, 1.0, %v9897_v0  ;;  %v18462_v38 = vld [vmem:[#allocation10_spill] sm:$0xff] }
 0x25f   : > { %vm934_vm15 = vcmp.eq.s32.totalorder %v18455_v51, %v10618_v58  ;;  %v8935_v36 = vpack.i.bf16 %v8155_v21, %v8154_v40  ;;  %vm932_vm3 = vcmp.eq.s32.totalorder %v18462_v38, %v10618_v58  ;;  %v18465_v21 = vld [vmem:[#allocation91_spill] sm:$0xff] }
 0x260   : > { %v8162_v51 = vsel %vm934_vm15, 1.0, %v9897_v0  ;;  %vm941_vm6 = vcmp.eq.s32.totalorder %v18465_v21, %v10618_v58  ;;  %v18470_v21 = vld [vmem:[#allocation89_spill] sm:$0xff] }
 0x261   : > { %8921 = vrot.lane.b32.xlu2 %v8920_v61, %s9898_s22  ;;  %v8152_v61 = vsel %vm604_vm14, 1.0, %v9897_v0  ;;  %vm938_vm8 = vcmp.eq.s32.totalorder %v18470_v21, %v10618_v58 }
 0x262   : > { %8916 = vrot.lane.b32.xlu1 %v8915_v59, %s9898_s22  ;;  %v8163_v59 = vsel %vm935_vm0, 1.0, %v9897_v0 }
 0x263   : > { %8941 = vrot.lane.b32.xlu0 %v8940_v26, %s9898_s22  ;;  %v10912_v20 = vpop.permute.xlu2 %1297  ;;  %v8153_v26 = vsel %vm605_vm1, 1.0, %v9897_v0  ;;  %vm953_vm1 = vcmp.eq.s32.totalorder %v10452_v14, %v10618_v58 }
 0x264   : > { %18457 = vst [vmem:[#allocation53_spill] sm:$0xff] %v10912_v20  ;;  %v10918_v10 = vpop.permute.xlu1 %1267  ;;  %v8930_v31 = vpack.i.bf16 %v8153_v26, %v8152_v61  ;;  %v8955_v20 = vpack.i.bf16 %v8163_v59, %v8162_v51  ;;  %v8161_v61 = vsel %vm933_vm2, 1.0, %v9897_v0  ;;  %v8160_v51 = vsel %vm932_vm3, 1.0, %v9897_v0  ;;  %v18468_v26 = vld [vmem:[#allocation90_spill] sm:$0xff] }
 0x265   : > { %18459 = vst [vmem:[#allocation49_spill] sm:$0xff] %v10918_v10  ;;  %v10921_v56 = vpop.permute.xlu0 %1282  ;;  %v18463_v10 = vld [vmem:[#allocation76_spill] sm:$0xff]  ;;  %vm940_vm7 = vcmp.eq.s32.totalorder %v18468_v26, %v10618_v58  ;;  %vm952_vm3 = vcmp.eq.s32.totalorder %v10445_v2, %v10618_v58  ;;  %v18481_v2 = vld [vmem:[#allocation95_spill] sm:$0xff] }
 0x266   : > { %18460 = vst [vmem:[#allocation62_spill] sm:$0xff] %v10921_v56  ;;  %vm931_vm4 = vcmp.eq.s32.totalorder %v18463_v10, %v10618_v58  ;;  %v18464_v56 = vld [vmem:[#allocation86_spill] sm:$0xff]  ;;  %v8168_v38 = vsel %vm940_vm7, 1.0, %v9897_v0  ;;  %v18473_v26 = vld [vmem:[#allocation84_spill] sm:$0xff]  ;;  %vm959_vm7 = vcmp.eq.s32.totalorder %v10470_v35, %v10618_v58 }
 0x267   : > { %vm930_vm5 = vcmp.eq.s32.totalorder %v18464_v56, %v10618_v58  ;;  %v8159_v10 = vsel %vm931_vm4, 1.0, %v9897_v0  ;;  %vm939_vm11 = vcmp.eq.s32.totalorder %v18473_v26, %v10618_v58  ;;  %vm950_vm4 = vcmp.eq.s32.totalorder %v10443_v28, %v10618_v58  ;;  %v18483_v28 = vld [vmem:[#allocation15_spill] sm:$0xff] }
 0x268   : > { %v8158_v56 = vsel %vm930_vm5, 1.0, %v9897_v0  ;;  %vm949_vm5 = vcmp.eq.s32.totalorder %v18481_v2, %v10618_v58 }
 0x269   : > { %8936 = vrot.lane.b32.xlu2 %v8935_v36, %s9898_s22  ;;  %v8945_v16 = vpack.i.bf16 %v8159_v10, %v8158_v56  ;;  %v8166_v10 = vsel %vm938_vm8, 1.0, %v9897_v0  ;;  %vm948_vm8 = vcmp.eq.s32.totalorder %v18483_v28, %v10618_v58 }
 0x26a   : > { %8931 = vrot.lane.b32.xlu1 %v8930_v31, %s9898_s22  ;;  %v8169_v31 = vsel %vm941_vm6, 1.0, %v9897_v0 }
 0x26b   : > { %8956 = vrot.lane.b32.xlu0 %v8955_v20, %s9899_s23  ;;  %v10939_v40 = vpop.permute.xlu2 %1306  ;;  %v8950_v20 = vpack.i.bf16 %v8161_v61, %v8160_v51  ;;  %v18474_v61 = vld [vmem:[#allocation94_spill] sm:$0xff] }
 0x26c   : > { %18466 = vst [vmem:[#allocation39_spill] sm:$0xff] %v10939_v40  ;;  %v10943_v59 = vpop.permute.xlu1 %1276  ;;  %v8970_v40 = vpack.i.bf16 %v8169_v31, %v8168_v38  ;;  %vm947_vm12 = vcmp.eq.s32.totalorder %v18474_v61, %v10618_v58  ;;  %v18476_v31 = vld [vmem:[#allocation93_spill] sm:$0xff]  ;;  %v18477_v61 = vld [vmem:[#allocation34_spill] sm:$0xff] }
 0x26d   : > { %18467 = vst [vmem:[#allocation48_spill] sm:$0xff] %v10943_v59  ;;  %v10949_v36 = vpop.permute.xlu0 %1291  ;;  %v18471_v59 = vld [vmem:[#allocation82_spill] sm:$0xff]  ;;  %vm946_vm13 = vcmp.eq.s32.totalorder %v18476_v31, %v10618_v58  ;;  %v8175_v38 = vsel %vm947_vm12, 1.0, %v9897_v0  ;;  %vm944_vm14 = vcmp.eq.s32.totalorder %v18477_v61, %v10618_v58  ;;  %v18479_v31 = vld [vmem:[#allocation9_spill] sm:$0xff]  ;;  %v8180_v61 = vsel %vm952_vm3, 1.0, %v9897_v0 }
 0x26e   : > { %18469 = vst [vmem:[#allocation58_spill] sm:$0xff] %v10949_v36  ;;  %vm936_vm9 = vcmp.eq.s32.totalorder %v18471_v59, %v10618_v58  ;;  %v8174_v26 = vsel %vm946_vm13, 1.0, %v9897_v0  ;;  %v18478_v36 = vld [vmem:[#allocation92_spill] sm:$0xff]  ;;  %vm945_vm0 = vcmp.eq.s32.totalorder %v18479_v31, %v10618_v58  ;;  %vm965_vm13 = vcmp.eq.s32.totalorder %v10488_v60, %v10618_v58 }
 0x26f   : > { %v8164_v59 = vsel %vm936_vm9, 1.0, %v9897_v0  ;;  %vm943_vm15 = vcmp.eq.s32.totalorder %v18478_v36, %v10618_v58  ;;  %v8173_v14 = vsel %vm945_vm0, 1.0, %v9897_v0  ;;  %vm958_vm9 = vcmp.eq.s32.totalorder %v10463_v18, %v10618_v58  ;;  %v18484_v18 = vld [vmem:[#allocation33_spill] sm:$0xff] }
 0x270   : > { %v8960_v21 = vpack.i.bf16 %v8165_v23, %v8164_v59  ;;  %v18480_v59 = vld [vmem:[#allocation11_spill] sm:$0xff]  ;;  %v8172_v23 = vsel %vm944_vm14, 1.0, %v9897_v0  ;;  %v8171_v36 = vsel %vm943_vm15, 1.0, %v9897_v0  ;;  %v8186_v2 = vsel %vm958_vm9, 1.0, %v9897_v0 }
 0x271   : > { %8951 = vrot.lane.b32.xlu2 %v8950_v20, %s9899_s23  ;;  %vm942_vm2 = vcmp.eq.s32.totalorder %v18480_v59, %v10618_v58  ;;  %v18482_v59 = vld [vmem:[#allocation21_spill] sm:$0xff]  ;;  %vm957_vm12 = vcmp.eq.s32.totalorder %v18484_v18, %v10618_v58  ;;  %vm954_vm14 = vcmp.eq.s32.totalorder %v18485_v43, %v10618_v58  ;;  %vm964_vm15 = vcmp.eq.s32.totalorder %v10481_v47, %v10618_v58 }
 0x272   : > { %8946 = vrot.lane.b32.xlu1 %v8945_v16, %s9899_s23  ;;  %v8167_v16 = vsel %vm939_vm11, 1.0, %v9897_v0  ;;  %vm951_vm6 = vcmp.eq.s32.totalorder %v18482_v59, %v10618_v58  ;;  %vm955_vm11 = vcmp.eq.s32.totalorder %v10454_v5, %v10618_v58  ;;  %v8185_v60 = vsel %vm957_vm12, 1.0, %v9897_v0 }
 0x273   : > { %8971 = vrot.lane.b32.xlu0 %v8970_v40, %s9899_s23  ;;  %v10966_v51 = vpop.permute.xlu2 %8786  ;;  %v8965_v40 = vpack.i.bf16 %v8167_v16, %v8166_v10  ;;  %v8179_v35 = vsel %vm951_vm6, 1.0, %v9897_v0  ;;  %v8183_v5 = vsel %vm955_vm11, 1.0, %v9897_v0  ;;  %vm962_vm0 = vcmp.eq.s32.totalorder %v10479_v45, %v10618_v58 }
 0x274   : > { %18475 = vst [vmem:[#allocation59_spill] sm:$0xff] %v10966_v51  ;;  %v10969_v56 = vpop.permute.xlu1 %1285  ;;  %v8985_v51 = vpack.i.bf16 %v8175_v38, %v8174_v26  ;;  %vm971_vm3 = vcmp.eq.s32.totalorder %v10506_v29, %v10618_v58  ;;  %v8190_v45 = vsel %vm962_vm0, 1.0, %v9897_v0  ;;  %vm968_vm6 = vcmp.eq.s32.totalorder %v10497_v11, %v10618_v58 }
 0x275   : > { %v10975_v20 = vpop.permute.xlu0 %1300  ;;  %v8199_v43 = vsel %vm971_vm3, 1.0, %v9897_v0  ;;  %vm977_vm9 = vcmp.eq.s32.totalorder %v10524_v4, %v10618_v58  ;;  %v8196_v11 = vsel %vm968_vm6, 1.0, %v9897_v0  ;;  %vm976_vm11 = vcmp.eq.s32.totalorder %v10517_v52, %v10618_v58 }
 0x276   : > { %vm974_vm12 = vcmp.eq.s32.totalorder %v10515_v49, %v10618_v58  ;;  %vm972_vm0 = vcmp.eq.s32.totalorder %v10476_v32, %v10618_v58  ;;  %vm979_vm3 = vcmp.eq.s32.totalorder %v10526_v6, %v10618_v58  ;;  %vm978_vm6 = vcmp.eq.s32.totalorder %v10494_v1, %v10618_v58 }
 0x277   : > { %v8202_v49 = vsel %vm974_vm12, 1.0, %v9897_v0  ;;  %v8207_v6 = vsel %vm979_vm3, 1.0, %v9897_v0  ;;  %vm984_vm12 = vcmp.eq.s32.totalorder %v10512_v37, %v10618_v58  ;;  %vm990_vm3 = vcmp.eq.s32.totalorder %v10530_v9, %v10618_v58 }
 0x279   : > { %8966 = vrot.lane.b32.xlu2 %v8965_v40, %s9899_s23  ;;  %v8170_v40 = vsel %vm942_vm2, 1.0, %v9897_v0  ;;  %vm963_vm2 = vcmp.eq.s32.totalorder %v10449_v24, %v10618_v58 }
 0x27a   : > { %8961 = vrot.lane.b32.xlu1 %v8960_v21, %s9899_s23  ;;  %v8980_v21 = vpack.i.bf16 %v8173_v14, %v8172_v23  ;;  %v8975_v26 = vpack.i.bf16 %v8171_v36, %v8170_v40  ;;  %v8178_v36 = vsel %vm950_vm4, 1.0, %v9897_v0  ;;  %vm960_vm4 = vcmp.eq.s32.totalorder %v10440_v63, %v10618_v58 }
 0x27b   : > { %8986 = vrot.lane.b32.xlu0 %v8985_v51, %s9899_s23  ;;  %v10991_v10 = vpop.permute.xlu2 %8801  ;;  %v8181_v51 = vsel %vm953_vm1, 1.0, %v9897_v0  ;;  %vm961_vm1 = vcmp.eq.s32.totalorder %v10472_v15, %v10618_v58  ;;  %v8191_v29 = vsel %vm963_vm2, 1.0, %v9897_v0  ;;  %vm980_vm2 = vcmp.eq.s32.totalorder %v10533_v25, %v10618_v58 }
 0x27c   : > { %v10996_v16 = vpop.permute.xlu1 %1294  ;;  %v9000_v31 = vpack.i.bf16 %v8181_v51, %v8180_v61  ;;  %v8177_v51 = vsel %vm949_vm5, 1.0, %v9897_v0  ;;  %v8995_v61 = vpack.i.bf16 %v8179_v35, %v8178_v36  ;;  %v8184_v36 = vsel %vm956_vm10, 1.0, %v9897_v0 }
 0x27d   : > { %v11001_v38 = vpop.permute.xlu0 %1309  ;;  %v8189_v15 = vsel %vm961_vm1, 1.0, %v9897_v0  ;;  %vm970_vm5 = vcmp.eq.s32.totalorder %v10499_v13, %v10618_v58  ;;  %vm966_vm10 = vcmp.eq.s32.totalorder %v10458_v22, %v10618_v58  ;;  %v8204_v22 = vsel %vm976_vm11, 1.0, %v9897_v0 }
 0x27e   : > { %v8198_v63 = vsel %vm970_vm5, 1.0, %v9897_v0  ;;  %vm982_vm1 = vcmp.eq.s32.totalorder %v10535_v27, %v10618_v58  ;;  %vm989_vm5 = vcmp.eq.s32.totalorder %v10558_v19, %v10618_v58  ;;  %v8208_v25 = vsel %vm980_vm2, 1.0, %v9897_v0 }
 0x27f   : > { %v8210_v32 = vsel %vm982_vm1, 1.0, %v9897_v0  ;;  %vm1315_vm11 = vcmp.eq.s32.totalorder %v10578_v42, %v10618_v58  ;;  %vm1321_vm1 = vcmp.eq.s32.totalorder %v10569_v3, %v10618_v58  ;;  %vm1320_vm2 = vcmp.eq.s32.totalorder %v10596_v8, %v10618_v58 }
 0x280   : > { %v8229_v8 = vsel %vm1321_vm1, 1.0, %v9897_v0 }
 0x281   : > { %8981 = vrot.lane.b32.xlu2 %v8980_v21, %s9899_s23  ;;  %v8187_v21 = vsel %vm959_vm7, 1.0, %v9897_v0  ;;  %vm967_vm7 = vcmp.eq.s32.totalorder %v10490_v62, %v10618_v58 }
 0x282   : > { %8976 = vrot.lane.b32.xlu1 %v8975_v26, %s9899_s23  ;;  %v8176_v26 = vsel %vm948_vm8, 1.0, %v9897_v0  ;;  %v9015_v59 = vpack.i.bf16 %v8187_v21, %v8186_v2  ;;  %v8193_v21 = vsel %vm965_vm13, 1.0, %v9897_v0  ;;  %v8192_v2 = vsel %vm964_vm15, 1.0, %v9897_v0 }
 0x283   : > { %9001 = vrot.lane.b32.xlu0 %v9000_v31, %s9899_s23  ;;  %v11018_v23 = vpop.permute.xlu2 %8816  ;;  %v8990_v31 = vpack.i.bf16 %v8177_v51, %v8176_v26  ;;  %v8182_v26 = vsel %vm954_vm14, 1.0, %v9897_v0  ;;  %vm969_vm8 = vcmp.eq.s32.totalorder %v10467_v30, %v10618_v58  ;;  %v8195_v62 = vsel %vm967_vm7, 1.0, %v9897_v0 }
 0x284   : > { %v11023_v14 = vpop.permute.xlu1 %1303  ;;  %v8197_v4 = vsel %vm969_vm8, 1.0, %v9897_v0  ;;  %vm973_vm13 = vcmp.eq.s32.totalorder %v10508_v33, %v10618_v58  ;;  %vm975_vm14 = vcmp.eq.s32.totalorder %v10485_v50, %v10618_v58  ;;  %vm983_vm15 = vcmp.eq.s32.totalorder %v10542_v48, %v10618_v58 }
 0x285   : > { %v11028_v40 = vpop.permute.xlu0 %8791  ;;  %v8201_v33 = vsel %vm973_vm13, 1.0, %v9897_v0  ;;  %v8203_v48 = vsel %vm975_vm14, 1.0, %v9897_v0  ;;  %vm988_vm7 = vcmp.eq.s32.totalorder %v10553_v12, %v10618_v58  ;;  %vm986_vm8 = vcmp.eq.s32.totalorder %v10549_v57, %v10618_v58 }
 0x286   : > { %v8216_v1 = vsel %vm988_vm7, 1.0, %v9897_v0  ;;  %v8214_v57 = vsel %vm986_vm8, 1.0, %v9897_v0  ;;  %vm1314_vm13 = vcmp.eq.s32.totalorder %v10571_v7, %v10618_v58  ;;  %vm992_vm14 = vcmp.eq.s32.totalorder %v10567_v44, %v10618_v58 }
 0x287   : > { %v8222_v37 = vsel %vm1314_vm13, 1.0, %v9897_v0  ;;  %vm1317_vm7 = vcmp.eq.s32.totalorder %v10587_v54, %v10618_v58 }
 0x288   : > { %v8225_v54 = vsel %vm1317_vm7, 1.0, %v9897_v0 }
 0x289   : > { %8996 = vrot.lane.b32.xlu2 %v8995_v61, %s9899_s23  ;;  %v9010_v61 = vpack.i.bf16 %v8185_v60, %v8184_v36  ;;  %v8188_v36 = vsel %vm960_vm4, 1.0, %v9897_v0  ;;  %vm981_vm4 = vcmp.eq.s32.totalorder %v10503_v17, %v10618_v58 }
 0x28a   : > { %8991 = vrot.lane.b32.xlu1 %v8990_v31, %s9899_s23  ;;  %v9005_v31 = vpack.i.bf16 %v8183_v5, %v8182_v26  ;;  %v9025_v5 = vpack.i.bf16 %v8191_v29, %v8190_v45  ;;  %v9020_v60 = vpack.i.bf16 %v8189_v15, %v8188_v36  ;;  %v8211_v29 = vsel %vm983_vm15, 1.0, %v9897_v0 }
 0x28b   : > { %9016 = vrot.lane.b32.xlu0 %v9015_v59, %s9899_s23  ;;  %v11045_v28 = vpop.permute.xlu2 %8831  ;;  %v9030_v59 = vpack.i.bf16 %v8193_v21, %v8192_v2  ;;  %v9045_v21 = vpack.i.bf16 %v8199_v43, %v8198_v63  ;;  %v9040_v2 = vpack.i.bf16 %v8197_v4, %v8196_v11  ;;  %v8200_v43 = vsel %vm972_vm0, 1.0, %v9897_v0 }
 0x28c   : > { %v11050_v51 = vpop.permute.xlu1 %1312  ;;  %v9055_v36 = vpack.i.bf16 %v8203_v48, %v8202_v49  ;;  %v8209_v19 = vsel %vm981_vm4, 1.0, %v9897_v0  ;;  %v8206_v11 = vsel %vm978_vm6, 1.0, %v9897_v0  ;;  %vm991_vm15 = vcmp.eq.s32.totalorder %v10562_v41, %v10618_v58 }
 0x28d   : > { %v11055_v35 = vpop.permute.xlu0 %8806  ;;  %v9065_v4 = vpack.i.bf16 %v8207_v6, %v8206_v11  ;;  %vm993_vm0 = vcmp.eq.s32.totalorder %v10539_v34, %v10618_v58  ;;  %v8220_v41 = vsel %vm992_vm14, 1.0, %v9897_v0  ;;  %v8219_v34 = vsel %vm991_vm15, 1.0, %v9897_v0 }
 0x28e   : > { %v8221_v3 = vsel %vm993_vm0, 1.0, %v9897_v0  ;;  %v8228_v48 = vsel %vm1320_vm2, 1.0, %v9897_v0  ;;  %vm1318_vm4 = vcmp.eq.s32.totalorder %v10560_v39, %v10618_v58 }
 0x28f   : > { %v9120_v9 = vpack.i.bf16 %v8229_v8, %v8228_v48 }
 0x291   : > { %9011 = vrot.lane.b32.xlu2 %v9010_v61, %s9899_s23  ;;  %v8205_v61 = vsel %vm977_vm9, 1.0, %v9897_v0  ;;  %vm985_vm9 = vcmp.eq.s32.totalorder %v10544_v53, %v10618_v58 }
 0x292   : > { %9006 = vrot.lane.b32.xlu1 %v9005_v31, %s9899_s23  ;;  %v8194_v31 = vsel %vm966_vm10, 1.0, %v9897_v0  ;;  %v9060_v45 = vpack.i.bf16 %v8205_v61, %v8204_v22  ;;  %vm987_vm10 = vcmp.eq.s32.totalorder %v10521_v55, %v10618_v58  ;;  %v8213_v53 = vsel %vm985_vm9, 1.0, %v9897_v0 }
 0x293   : > { %9031 = vrot.lane.b32.xlu0 %v9030_v59, %s9899_s23  ;;  %v11072_v47 = vpop.permute.xlu2 %8846  ;;  %v9035_v59 = vpack.i.bf16 %v8195_v62, %v8194_v31  ;;  %v9070_v62 = vpack.i.bf16 %v8209_v19, %v8208_v25  ;;  %v8215_v42 = vsel %vm987_vm10, 1.0, %v9897_v0  ;;  %v18492_v19 = vld [vmem:[#allocation98_spill] sm:$0xff] }
 0x294   : > { %v11077_v18 = vpop.permute.xlu1 %8796  ;;  %v9085_v22 = vpack.i.bf16 %v8215_v42, %v8214_v57  ;;  %vm1327_vm9 = vcmp.eq.s32.totalorder %v18492_v19, %v10618_v58  ;;  %v18494_v57 = vld [vmem:[#allocation17_spill] sm:$0xff]  ;;  %v18495_v42 = vld [vmem:[#allocation23_spill] sm:$0xff]  ;;  %v18505_v19 = vld [vmem:[#allocation100_spill] sm:$0xff] }
 0x295   : > { %v11082_v24 = vpop.permute.xlu0 %8821 }
 0x299   : > { %9026 = vrot.lane.b32.xlu2 %v9025_v5, %s9899_s23  ;;  %v9050_v5 = vpack.i.bf16 %v8201_v33, %v8200_v43  ;;  %v9100_v43 = vpack.i.bf16 %v8221_v3, %v8220_v41  ;;  %v18499_v41 = vld [vmem:[#allocation22_spill] sm:$0xff] }
 0x29a   : > { %9021 = vrot.lane.b32.xlu1 %v9020_v60, %s9899_s23  ;;  %v9075_v60 = vpack.i.bf16 %v8211_v29, %v8210_v32  ;;  %v8218_v29 = vsel %vm990_vm3, 1.0, %v9897_v0  ;;  %v18490_v32 = vld [vmem:[#allocation29_spill] sm:$0xff]  ;;  %vm1333_vm15 = vcmp.eq.s32.totalorder %v18499_v41, %v10618_v58  ;;  %v18509_v41 = vld [vmem:[#allocation4_spill] sm:$0xff] }
 0x29b   : > { %9046 = vrot.lane.b32.xlu0 %v9045_v21, %s9899_s23  ;;  %v11099_v13 = vpop.permute.xlu2 %8861  ;;  %v8217_v21 = vsel %vm989_vm5, 1.0, %v9897_v0  ;;  %vm1319_vm5 = vcmp.eq.s32.totalorder %v10580_v46, %v10618_v58  ;;  %vm1326_vm8 = vcmp.eq.s32.totalorder %v18490_v32, %v10618_v58  ;;  %v8226_v46 = vsel %vm1318_vm4, 1.0, %v9897_v0  ;;  %v18502_v32 = vld [vmem:[#allocation103_spill] sm:$0xff] }
 0x29c   : > { %18486 = vst [vmem:[#allocation55_spill] sm:$0xff] %v11099_v13  ;;  %v11104_v26 = vpop.permute.xlu1 %8811  ;;  %v9090_v61 = vpack.i.bf16 %v8217_v21, %v8216_v1  ;;  %v8234_v11 = vsel %vm1326_vm8, 1.0, %v9897_v0  ;;  %vm1329_vm1 = vcmp.eq.s32.totalorder %v18502_v32, %v10618_v58  ;;  %vm1328_vm4 = vcmp.eq.s32.totalorder %v18505_v19, %v10618_v58 }
 0x29d   : > { %v11109_v30 = vpop.permute.xlu0 %8836  ;;  %vm1335_vm7 = vcmp.eq.s32.totalorder %v18509_v41, %v10618_v58 }
 0x2a1   : > { %9041 = vrot.lane.b32.xlu2 %v9040_v2, %s9899_s23  ;;  %v8223_v2 = vsel %vm1315_vm11, 1.0, %v9897_v0  ;;  %vm1325_vm11 = vcmp.eq.s32.totalorder %v18494_v57, %v10618_v58 }
 0x2a2   : > { %9036 = vrot.lane.b32.xlu1 %v9035_v59, %s9899_s23  ;;  %v8212_v59 = vsel %vm984_vm12, 1.0, %v9897_v0  ;;  %v9105_v49 = vpack.i.bf16 %v8223_v2, %v8222_v37  ;;  %vm1323_vm12 = vcmp.eq.s32.totalorder %v18495_v42, %v10618_v58  ;;  %v18496_v2 = vld [vmem:[#allocation38_spill] sm:$0xff]  ;;  %v8233_v37 = vsel %vm1325_vm11, 1.0, %v9897_v0 }
 0x2a3   : > { %9061 = vrot.lane.b32.xlu0 %v9060_v45, %s9899_s23  ;;  %v11126_v52 = vpop.permute.xlu2 %8876  ;;  %v9080_v45 = vpack.i.bf16 %v8213_v53, %v8212_v59  ;;  %vm1332_vm13 = vcmp.eq.s32.totalorder %v18496_v2, %v10618_v58 }
 0x2a4   : > { %v11131_v15 = vpop.permute.xlu1 %8826  ;;  %v8240_v8 = vsel %vm1332_vm13, 1.0, %v9897_v0 }
 0x2a5   : > { %v11136_v50 = vpop.permute.xlu0 %8851 }
 0x2a9   : > { %9056 = vrot.lane.b32.xlu2 %v9055_v36, %s9899_s23  ;;  %v9095_v36 = vpack.i.bf16 %v8219_v34, %v8218_v29  ;;  %v8231_v34 = vsel %vm1323_vm12, 1.0, %v9897_v0 }
 0x2aa   : > { %9051 = vrot.lane.b32.xlu1 %v9050_v5, %s9899_s23  ;;  %v18489_v5 = vld [vmem:[#allocation96_spill] sm:$0xff] }
 0x2ab   : > { %9076 = vrot.lane.b32.xlu0 %v9075_v60, %s9899_s23  ;;  %v11153_v27 = vpop.permute.xlu2 %8891  ;;  %vm1316_vm6 = vcmp.eq.s32.totalorder %v18489_v5, %v10618_v58  ;;  %v8227_v60 = vsel %vm1319_vm5, 1.0, %v9897_v0 }
 0x2ac   : > { %18487 = vst [vmem:[#allocation68_spill] sm:$0xff] %v11153_v27  ;;  %v11158_v63 = vpop.permute.xlu1 %8841  ;;  %v8224_v6 = vsel %vm1316_vm6, 1.0, %v9897_v0 }
 0x2ad   : > { %v11163_v17 = vpop.permute.xlu0 %8866  ;;  %v9110_v1 = vpack.i.bf16 %v8225_v54, %v8224_v6 }
 0x2b1   : > { %9071 = vrot.lane.b32.xlu2 %v9070_v62, %s9899_s23  ;;  %v9115_v62 = vpack.i.bf16 %v8227_v60, %v8226_v46  ;;  %v18503_v46 = vld [vmem:[#allocation16_spill] sm:$0xff]  ;;  %v18504_v60 = vld [vmem:[#allocation2_spill] sm:$0xff] }
 0x2b2   : > { %9066 = vrot.lane.b32.xlu1 %v9065_v4, %s9899_s23  ;;  %v8235_v4 = vsel %vm1327_vm9, 1.0, %v9897_v0  ;;  %vm1330_vm2 = vcmp.eq.s32.totalorder %v18503_v46, %v10618_v58  ;;  %vm1338_vm3 = vcmp.eq.s32.totalorder %v18504_v60, %v10618_v58 }
 0x2b3   : > { %9091 = vrot.lane.b32.xlu0 %v9090_v61, %s9899_s23  ;;  %v11180_v12 = vpop.permute.xlu2 %8906  ;;  %v18493_v61 = vld [vmem:[#allocation97_spill] sm:$0xff]  ;;  %v9135_v53 = vpack.i.bf16 %v8235_v4, %v8234_v11  ;;  %v8237_v4 = vsel %vm1329_vm1, 1.0, %v9897_v0  ;;  %v8246_v57 = vsel %vm1338_vm3, 1.0, %v9897_v0 }
 0x2b4   : > { %v11185_v31 = vpop.permute.xlu1 %8856  ;;  %vm1324_vm10 = vcmp.eq.s32.totalorder %v18493_v61, %v10618_v58  ;;  %v8238_v61 = vsel %vm1330_vm2, 1.0, %v9897_v0 }
 0x2b5   : > { %v11190_v55 = vpop.permute.xlu0 %8881 }
 0x2b9   : > { %9086 = vrot.lane.b32.xlu2 %v9085_v22, %s9899_s23  ;;  %v8232_v22 = vsel %vm1324_vm10, 1.0, %v9897_v0 }
 0x2ba   : > { %9081 = vrot.lane.b32.xlu1 %v9080_v45, %s9899_s23  ;;  %v18497_v45 = vld [vmem:[#allocation99_spill] sm:$0xff]  ;;  %v9130_v29 = vpack.i.bf16 %v8233_v37, %v8232_v22 }
 0x2bb   : > { %9106 = vrot.lane.b32.xlu0 %v9105_v49, %s9900_s24  ;;  %v11209_v44 = vpop.permute.xlu2 %8921  ;;  %vm1322_vm14 = vcmp.eq.s32.totalorder %v18497_v45, %v10618_v58  ;;  %v18508_v45 = vld [vmem:[#allocation8_spill] sm:$0xff] }
 0x2bc   : > { %v11214_v7 = vpop.permute.xlu1 %8871  ;;  %v8230_v48 = vsel %vm1322_vm14, 1.0, %v9897_v0  ;;  %vm1337_vm6 = vcmp.eq.s32.totalorder %v18508_v45, %v10618_v58  ;;  %v18519_v45 = vld [vmem:[#allocation19_spill] sm:$0xff] }
 0x2bd   : > { %v11217_v33 = vpop.permute.xlu0 %8896 }
 0x2be   : > { %18488 = vst [vmem:[#allocation45_spill] sm:$0xff] %v11217_v33 }
 0x2c1   : > { %9101 = vrot.lane.b32.xlu2 %v9100_v43, %s9899_s23  ;;  %v8241_v43 = vsel %vm1333_vm15, 1.0, %v9897_v0 }
 0x2c2   : > { %9096 = vrot.lane.b32.xlu1 %v9095_v36, %s9899_s23  ;;  %v9125_v36 = vpack.i.bf16 %v8231_v34, %v8230_v48  ;;  %v9150_v5 = vpack.i.bf16 %v8241_v43, %v8240_v8  ;;  %v18510_v34 = vld [vmem:[#allocation28_spill] sm:$0xff]  ;;  %v18511_v8 = vld [vmem:[#allocation25_spill] sm:$0xff]  ;;  %v8245_v43 = vsel %vm1337_vm6, 1.0, %v9897_v0  ;;  %s17656_s23 = scalar_lea.vmem %s18029_s1, %s8091_s16 }
 0x2c3   : > { %9121 = vrot.lane.b32.xlu0 %v9120_v9, %s9900_s24  ;;  %v11236_v39 = vpop.permute.xlu2 %8936  ;;  %v18501_v9 = vld [vmem:[#allocation101_spill] sm:$0xff]  ;;  %vm1336_vm8 = vcmp.eq.s32.totalorder %v18510_v34, %v10618_v58  ;;  %vm1344_vm9 = vcmp.eq.s32.totalorder %v18511_v8, %v10618_v58 }
 0x2c4   : > { %18491 = vst [vmem:[#allocation54_spill] sm:$0xff] %v11236_v39  ;;  %v11240_v25 = vpop.permute.xlu1 %8886  ;;  %vm1331_vm0 = vcmp.eq.s32.totalorder %v18501_v9, %v10618_v58  ;;  %v18514_v9 = vld [vmem:[#allocation26_spill] sm:$0xff]  ;;  %v8244_v46 = vsel %vm1336_vm8, 1.0, %v9897_v0  ;;  %v8252_v60 = vsel %vm1344_vm9, 1.0, %v9897_v0  ;;  %v18520_v34 = vld [vmem:[#allocation37_spill] sm:$0xff] }
 0x2c5   : > { %v11246_v21 = vpop.permute.xlu0 %8911  ;;  %v8239_v54 = vsel %vm1331_vm0, 1.0, %v9897_v0  ;;  %vm1345_vm11 = vcmp.eq.s32.totalorder %v18514_v9, %v10618_v58  ;;  %vm1340_vm0 = vcmp.eq.s32.totalorder %v18519_v45, %v10618_v58  ;;  %vm1351_vm1 = vcmp.eq.s32.totalorder %v18520_v34, %v10618_v58 }
 0x2c6   : > { %v9145_v42 = vpack.i.bf16 %v8239_v54, %v8238_v61  ;;  %v9160_v54 = vpack.i.bf16 %v8245_v43, %v8244_v46  ;;  %v18515_v61 = vld [vmem:[#allocation3_spill] sm:$0xff] }
 0x2c7   : > { %vm1343_vm12 = vcmp.eq.s32.totalorder %v18515_v61, %v10618_v58  ;;  %v18523_v61 = vld [vmem:[#allocation20_spill] sm:$0xff] }
 0x2c9   : > { %9116 = vrot.lane.b32.xlu2 %v9115_v62, %s9900_s24  ;;  %v18506_v62 = vld [vmem:[#allocation13_spill] sm:$0xff] }
 0x2ca   : > { %9111 = vrot.lane.b32.xlu1 %v9110_v1, %s9900_s24  ;;  %vm1339_vm5 = vcmp.eq.s32.totalorder %v18506_v62, %v10618_v58  ;;  %v8253_v62 = vsel %vm1345_vm11, 1.0, %v9897_v0 }
 0x2cb   : > { %9136 = vrot.lane.b32.xlu0 %v9135_v53, %s9900_s24  ;;  %v11261_v59 = vpop.permute.xlu2 %8951  ;;  %v8236_v53 = vsel %vm1328_vm4, 1.0, %v9897_v0  ;;  %v8247_v2 = vsel %vm1339_vm5, 1.0, %v9897_v0  ;;  %vm1348_vm4 = vcmp.eq.s32.totalorder %v18523_v61, %v10618_v58  ;;  %v18529_v61 = vld [vmem:[#allocation32_spill] sm:$0xff] }
 0x2cc   : > { %v11267_v49 = vpop.permute.xlu1 %8901  ;;  %v9140_v22 = vpack.i.bf16 %v8237_v4, %v8236_v53  ;;  %v9165_v37 = vpack.i.bf16 %v8247_v2, %v8246_v57  ;;  %v9180_v57 = vpack.i.bf16 %v8253_v62, %v8252_v60  ;;  %v18516_v53 = vld [vmem:[#allocation12_spill] sm:$0xff]  ;;  %v8259_v60 = vsel %vm1351_vm1, 1.0, %v9897_v0 }
 0x2cd   : > { %18498 = vst [vmem:[#allocation64_spill] sm:$0xff] %v11267_v49  ;;  %v11272_v3 = vpop.permute.xlu0 %8926  ;;  %vm1341_vm13 = vcmp.eq.s32.totalorder %v18516_v53, %v10618_v58  ;;  %v18518_v2 = vld [vmem:[#allocation36_spill] sm:$0xff]  ;;  %vm1368_vm1 = vcmp.eq.s32.totalorder %v10969_v56, %v10618_v58  ;;  %v18540_v49 = vld [vmem:[#allocation47_spill] sm:$0xff] }
 0x2ce   : > { %18500 = vst [vmem:[#allocation65_spill] sm:$0xff] %v11272_v3  ;;  %vm1350_vm15 = vcmp.eq.s32.totalorder %v18518_v2, %v10618_v58  ;;  %v8249_v8 = vsel %vm1341_vm13, 1.0, %v9897_v0 }
 0x2cf   : > { %v8258_v9 = vsel %vm1350_vm15, 1.0, %v9897_v0 }
 0x2d0   : > { %v9195_v62 = vpack.i.bf16 %v8259_v60, %v8258_v9 }
 0x2d1   : > { %9131 = vrot.lane.b32.xlu2 %v9130_v29, %s9900_s24  ;;  %v18512_v29 = vld [vmem:[#allocation7_spill] sm:$0xff] }
 0x2d2   : > { %9126 = vrot.lane.b32.xlu1 %v9125_v36, %s9900_s24  ;;  %vm1334_vm10 = vcmp.eq.s32.totalorder %v18512_v29, %v10618_v58 }
 0x2d3   : > { %9151 = vrot.lane.b32.xlu0 %v9150_v5, %s9900_s24  ;;  %v11288_v6 = vpop.permute.xlu2 %8966  ;;  %v8243_v5 = vsel %vm1335_vm7, 1.0, %v9897_v0  ;;  %v8242_v19 = vsel %vm1334_vm10, 1.0, %v9897_v0  ;;  %vm1354_vm10 = vcmp.eq.s32.totalorder %v18529_v61, %v10618_v58  ;;  %v18533_v61 = vld [vmem:[#allocation56_spill] sm:$0xff] }
 0x2d4   : > { %v11293_v11 = vpop.permute.xlu1 %8916  ;;  %v9155_v4 = vpack.i.bf16 %v8243_v5, %v8242_v19  ;;  %v8248_v5 = vsel %vm1340_vm0, 1.0, %v9897_v0 }
 0x2d5   : > { %v11298_v1 = vpop.permute.xlu0 %8941  ;;  %v9170_v19 = vpack.i.bf16 %v8249_v8, %v8248_v5 }
 0x2d6   : > { %18507 = vst [vmem:[#allocation61_spill] sm:$0xff] %v11298_v1 }
 0x2d9   : > { %9146 = vrot.lane.b32.xlu2 %v9145_v42, %s9900_s24  ;;  %v18517_v42 = vld [vmem:[#allocation14_spill] sm:$0xff] }
 0x2da   : > { %9141 = vrot.lane.b32.xlu1 %v9140_v22, %s9900_s24  ;;  %vm1342_vm14 = vcmp.eq.s32.totalorder %v18517_v42, %v10618_v58  ;;  %v18525_v42 = vld [vmem:[#allocation31_spill] sm:$0xff] }
 0x2db   : > { %9166 = vrot.lane.b32.xlu0 %v9165_v37, %s9900_s24  ;;  %v11315_v48 = vpop.permute.xlu2 %8981  ;;  %v8251_v37 = vsel %vm1343_vm12, 1.0, %v9897_v0  ;;  %v8250_v43 = vsel %vm1342_vm14, 1.0, %v9897_v0  ;;  %vm1346_vm6 = vcmp.eq.s32.totalorder %v18525_v42, %v10618_v58  ;;  %vm1361_vm14 = vcmp.eq.s32.totalorder %v18533_v61, %v10618_v58 }
 0x2dc   : > { %v11320_v36 = vpop.permute.xlu1 %8931  ;;  %v9175_v46 = vpack.i.bf16 %v8251_v37, %v8250_v43  ;;  %v18526_v37 = vld [vmem:[#allocation6_spill] sm:$0xff]  ;;  %v8256_v43 = vsel %vm1348_vm4, 1.0, %v9897_v0  ;;  %v8254_v5 = vsel %vm1346_vm6, 1.0, %v9897_v0  ;;  %vm1366_vm6 = vcmp.eq.s32.totalorder %v18540_v49, %v10618_v58 }
 0x2dd   : > { %18513 = vst [vmem:[#allocation74_spill] sm:$0xff] %v11320_v36  ;;  %v11325_v32 = vpop.permute.xlu0 %8956  ;;  %vm1357_vm7 = vcmp.eq.s32.totalorder %v18526_v37, %v10618_v58 }
 0x2de   : > { %v8265_v60 = vsel %vm1357_vm7, 1.0, %v9897_v0  ;;  %vm1374_vm7 = vcmp.eq.s32.totalorder %v11023_v14, %v10618_v58  ;;  %v2474_v14 = vld [vmem:[%s18030_s2 + $0x28] sm:$0x1] }
 0x2e1   : > { %9161 = vrot.lane.b32.xlu2 %v9160_v54, %s9900_s24  ;;  %v18521_v54 = vld [vmem:[#allocation44_spill] sm:$0xff] }
 0x2e2   : > { %9156 = vrot.lane.b32.xlu1 %v9155_v4, %s9900_s24  ;;  %vm1349_vm2 = vcmp.eq.s32.totalorder %v18521_v54, %v10618_v58  ;;  %v18522_v4 = vld [vmem:[#allocation24_spill] sm:$0xff]  ;;  %v18527_v54 = vld [vmem:[#allocation50_spill] sm:$0xff] }
 0x2e3   : > { %9181 = vrot.lane.b32.xlu0 %v9180_v57, %s9900_s24  ;;  %v11342_v22 = vpop.permute.xlu2 %8996  ;;  %vm1347_vm3 = vcmp.eq.s32.totalorder %v18522_v4, %v10618_v58  ;;  %v18524_v57 = vld [vmem:[#allocation43_spill] sm:$0xff]  ;;  %v8257_v2 = vsel %vm1349_vm2, 1.0, %v9897_v0  ;;  %vm1355_vm8 = vcmp.eq.s32.totalorder %v18527_v54, %v10618_v58 }
 0x2e4   : > { %v11347_v41 = vpop.permute.xlu1 %8946  ;;  %vm1356_vm5 = vcmp.eq.s32.totalorder %v18524_v57, %v10618_v58  ;;  %v8255_v34 = vsel %vm1347_vm3, 1.0, %v9897_v0  ;;  %v18528_v4 = vld [vmem:[#allocation35_spill] sm:$0xff]  ;;  %v18530_v57 = vld [vmem:[#allocation49_spill] sm:$0xff]  ;;  %v8263_v37 = vsel %vm1355_vm8, 1.0, %v9897_v0 }
 0x2e5   : > { %v11352_v29 = vpop.permute.xlu0 %8971  ;;  %v8264_v9 = vsel %vm1356_vm5, 1.0, %v9897_v0  ;;  %vm1353_vm9 = vcmp.eq.s32.totalorder %v18528_v4, %v10618_v58  ;;  %vm1362_vm11 = vcmp.eq.s32.totalorder %v18530_v57, %v10618_v58  ;;  %v8949_v3 = vunpack.i.h.bf16 %v11347_v41 }
 0x2e9   : > { %9176 = vrot.lane.b32.xlu2 %v9175_v46, %s9900_s24  ;;  %v9190_v46 = vpack.i.bf16 %v8257_v2, %v8256_v43  ;;  %v18531_v2 = vld [vmem:[#allocation40_spill] sm:$0xff]  ;;  %v18532_v43 = vld [vmem:[#allocation18_spill] sm:$0xff] }
 0x2ea   : > { %9171 = vrot.lane.b32.xlu1 %v9170_v19, %s9900_s24  ;;  %v9185_v19 = vpack.i.bf16 %v8255_v34, %v8254_v5  ;;  %vm1352_vm12 = vcmp.eq.s32.totalorder %v18531_v2, %v10618_v58  ;;  %vm1363_vm13 = vcmp.eq.s32.totalorder %v18532_v43, %v10618_v58  ;;  %v18534_v2 = vld [vmem:[#allocation42_spill] sm:$0xff]  ;;  %v18535_v43 = vld [vmem:[#allocation41_spill] sm:$0xff] }
 0x2eb   : > { %9196 = vrot.lane.b32.xlu0 %v9195_v62, %s9900_s24  ;;  %v11369_v53 = vpop.permute.xlu2 %9011  ;;  %v9210_v62 = vpack.i.bf16 %v8265_v60, %v8264_v9  ;;  %v8261_v9 = vsel %vm1353_vm9, 1.0, %v9897_v0  ;;  %v8270_v60 = vsel %vm1362_vm11, 1.0, %v9897_v0  ;;  %vm1359_vm15 = vcmp.eq.s32.totalorder %v18534_v2, %v10618_v58 }
 0x2ec   : > { %v11374_v45 = vpop.permute.xlu1 %8961  ;;  %vm1360_vm0 = vcmp.eq.s32.totalorder %v18535_v43, %v10618_v58  ;;  %vm1373_vm11 = vcmp.eq.s32.totalorder %v10975_v20, %v10618_v58 }
 0x2ed   : > { %v11379_v8 = vpop.permute.xlu0 %8986  ;;  %v8268_v56 = vsel %vm1360_vm0, 1.0, %v9897_v0  ;;  %vm1376_vm0 = vcmp.eq.s32.totalorder %v11001_v38, %v10618_v58 }
 0x2ee   : > { %v8988_v27 = vunpack.i.l.bf16 %v11379_v8 }
 0x2f1   : > { %9191 = vrot.lane.b32.xlu2 %v9190_v46, %s9900_s24  ;;  %v8262_v46 = vsel %vm1354_vm10, 1.0, %v9897_v0  ;;  %vm2669_vm10 = vcmask 1040384  }
 0x2f2   : > { %9186 = vrot.lane.b32.xlu1 %v9185_v19, %s9900_s24  ;;  %v8260_v19 = vsel %vm1352_vm12, 1.0, %v9897_v0  ;;  %v9205_v54 = vpack.i.bf16 %v8263_v37, %v8262_v46  ;;  %v8269_v46 = vsel %vm1361_vm14, 1.0, %v9897_v0  ;;  %8286 = vmatpush.msk.msra.mxu0 %vm2669_vm10, %v2474_v14  ;;  %vm1371_vm12 = vcmp.eq.s32.totalorder %v10996_v16, %v10618_v58 }
 0x2f3   : > { %9211 = vrot.lane.b32.xlu0 %v9210_v62, %s9900_s24  ;;  %v11396_v42 = vpop.permute.xlu2 %9026  ;;  %v8271_v62 = vsel %vm1363_vm13, 1.0, %v9897_v0  ;;  %v9200_v4 = vpack.i.bf16 %v8261_v9, %v8260_v19  ;;  %v18536_v9 = vld [vmem:[#allocation46_spill] sm:$0xff]  ;;  %8417 = vmatpush.msk.msra.mxu1 %vm2669_vm10, %v2474_v14  ;;  %v8279_v16 = vsel %vm1371_vm12, 1.0, %v9897_v0 }
 0x2f4   : > { %v11401_v34 = vpop.permute.xlu1 %8976  ;;  %v9225_v57 = vpack.i.bf16 %v8271_v62, %v8270_v60  ;;  %vm1358_vm2 = vcmp.eq.s32.totalorder %v18536_v9, %v10618_v58  ;;  %v18537_v19 = vld [vmem:[#allocation30_spill] sm:$0xff]  ;;  %8418 = vmatpush.msk.msra.mxu2 %vm2669_vm10, %v2474_v14  ;;  %8419 = vmatpush.msk.msra.mxu3 %vm2669_vm10, %v2474_v14 }
 0x2f5   : > { %v11406_v5 = vpop.permute.xlu0 %9001  ;;  %vm1369_vm3 = vcmp.eq.s32.totalorder %v18537_v19, %v10618_v58  ;;  %v8266_v61 = vsel %vm1358_vm2, 1.0, %v9897_v0  ;;  %v18538_v9 = vld [vmem:[#allocation62_spill] sm:$0xff]  ;;  %v18539_v19 = vld [vmem:[#allocation48_spill] sm:$0xff]  ;;  %vm2339_vm2 = vcmask 195584  }
 0x2f6   : > { %v8277_v2 = vsel %vm1369_vm3, 1.0, %v9897_v0  ;;  %vm1367_vm4 = vcmp.eq.s32.totalorder %v18538_v9, %v10618_v58  ;;  %vm1365_vm5 = vcmp.eq.s32.totalorder %v18539_v19, %v10618_v58  ;;  %v18545_v14 = vld [vmem:[#allocation58_spill] sm:$0xff]  ;;  %vm2476_vm3 = vcmask 334848  }
 0x2f7   : > { %vm1370_vm14 = vcmp.eq.s32.totalorder %v18545_v14, %v10618_v58 }
 0x2f9   : > { %9206 = vrot.lane.b32.xlu2 %v9205_v54, %s9900_s24  ;;  %v8267_v54 = vsel %vm1359_vm15, 1.0, %v9897_v0  ;;  %vm1377_vm15 = vcmp.eq.s32.totalorder %v11050_v51, %v10618_v58 }
 0x2fa   : > { %9201 = vrot.lane.b32.xlu1 %v9200_v4, %s9900_s24  ;;  %v8276_v4 = vsel %vm1368_vm1, 1.0, %v9897_v0  ;;  %v9215_v43 = vpack.i.bf16 %v8267_v54, %v8266_v61  ;;  %v18542_v54 = vld [vmem:[#allocation52_spill] sm:$0xff]  ;;  %v18543_v61 = vld [vmem:[#allocation39_spill] sm:$0xff]  ;;  %vm2274_vm1 = vcmask 121856  }
 0x2fb   : > { %9226 = vrot.lane.b32.xlu0 %v9225_v57, %s9900_s24  ;;  %v11423_v37 = vpop.permute.xlu2 %9041  ;;  %v9220_v57 = vpack.i.bf16 %v8269_v46, %v8268_v56  ;;  %v9240_v1 = vpack.i.bf16 %v8277_v2, %v8276_v4  ;;  %vm1364_vm8 = vcmp.eq.s32.totalorder %v18542_v54, %v10618_v58  ;;  %v8275_v56 = vsel %vm1367_vm4, 1.0, %v9897_v0  ;;  %v2472_v54 = vld [vmem:[%s18030_s2 + $0x18] sm:$0xff] }
 0x2fc   : > { %v11428_v60 = vpop.permute.xlu1 %8991  ;;  %vm1375_vm9 = vcmp.eq.s32.totalorder %v18543_v61, %v10618_v58  ;;  %v8282_v2 = vsel %vm1374_vm7, 1.0, %v9897_v0  ;;  %v8272_v9 = vsel %vm1364_vm8, 1.0, %v9897_v0  ;;  %vm2404_vm4 = vcmask 236544  }
 0x2fd   : > { %v11433_v62 = vpop.permute.xlu0 %9016  ;;  %v8283_v61 = vsel %vm1375_vm9, 1.0, %v9897_v0 }
 0x301   : > { %9221 = vrot.lane.b32.xlu2 %v9220_v57, %s9900_s24  ;;  %v8273_v57 = vsel %vm1365_vm5, 1.0, %v9897_v0  ;;  %vm2882_vm5 = vcmask 261120  }
 0x302   : > { %9216 = vrot.lane.b32.xlu1 %v9215_v43, %s9900_s24  ;;  %v2473_v43 = vld [vmem:[%s18030_s2 + $0x20] sm:$0xff]  ;;  %v9230_v39 = vpack.i.bf16 %v8273_v57, %v8272_v9  ;;  %v18544_v57 = vld [vmem:[#allocation53_spill] sm:$0xff] }
 0x303   : > { %9241 = vrot.lane.b32.xlu0 %v9240_v1, %s9900_s24  ;;  %v11450_v46 = vpop.permute.xlu2 %9056  ;;  %v8274_v1 = vsel %vm1366_vm6, 1.0, %v9897_v0  ;;  %2684 = vmatpush.msra.mxu0 %v2473_v43  ;;  %vm1372_vm13 = vcmp.eq.s32.totalorder %v18544_v57, %v10618_v58 }
 0x304   : > { %18541 = vst [vmem:[#allocation51_spill] sm:$0xff] %v11450_v46  ;;  %v11455_v4 = vpop.permute.xlu1 %9006  ;;  %v9235_v19 = vpack.i.bf16 %v8275_v56, %v8274_v1  ;;  %8420 = vmatpush.msra.mxu1 %v2473_v43  ;;  %v9255_v46 = vpack.i.bf16 %v8283_v61, %v8282_v2  ;;  %v2471_v56 = vld [vmem:[%s18030_s2 + $0x10] sm:$0xff]  ;;  %8421 = vmatpush.msra.mxu2 %v2473_v43  ;;  %v8281_v1 = vsel %vm1373_vm11, 1.0, %v9897_v0  ;;  %v8280_v9 = vsel %vm1372_vm13, 1.0, %v9897_v0 }
 0x305   : > { %v11460_v49 = vpop.permute.xlu0 %9031  ;;  %2685 = vmatpush.msra.mxu0 %v2472_v54  ;;  %8422 = vmatpush.msra.mxu3 %v2473_v43  ;;  %v8278_v61 = vsel %vm1370_vm14, 1.0, %v9897_v0  ;;  %v9250_v57 = vpack.i.bf16 %v8281_v1, %v8280_v9  ;;  %v8284_v9 = vsel %vm1376_vm0, 1.0, %v9897_v0 }
 0x306   : > { %8423 = vmatpush.msra.mxu1 %v2472_v54  ;;  %8424 = vmatpush.msra.mxu2 %v2472_v54  ;;  %v9245_v14 = vpack.i.bf16 %v8279_v16, %v8278_v61 }
 0x307   : > { %2686 = vmatpush.msra.mxu0 %v2471_v56  ;;  %8425 = vmatpush.msra.mxu3 %v2472_v54  ;;  %v8285_v54 = vsel %vm1377_vm15, 1.0, %v9897_v0  ;;  %v8948_v0 = vunpack.i.l.bf16 %v11347_v41 }
 0x308   : > { %8426 = vmatpush.msra.mxu1 %v2471_v56  ;;  %8427 = vmatpush.msra.mxu2 %v2471_v56  ;;  %v9260_v51 = vpack.i.bf16 %v8285_v54, %v8284_v9 }
 0x309   : > { %9236 = vrot.lane.b32.xlu2 %v9235_v19, %s9900_s24  ;;  %v2469_v19 = vld [vmem:[%s18030_s2] sm:$0xff]  ;;  %8428 = vmatpush.msra.mxu3 %v2471_v56 }
 0x30a   : > { %9231 = vrot.lane.b32.xlu1 %v9230_v39, %s9900_s24 }
 0x30b   : > { %9256 = vrot.lane.b32.xlu0 %v9255_v46, %s9900_s24  ;;  %v11487_v20 = vpop.permute.xlu2 %9071  ;;  %v2470_v46 = vld [vmem:[%s18030_s2 + $0x8] sm:$0xff] }
 0x30c   : > { %v11492_v2 = vpop.permute.xlu1 %9021  ;;  %2687 = vmatpush.msra.mxu0 %v2470_v46  ;;  %8429 = vmatpush.msra.mxu1 %v2470_v46 }
 0x30d   : > { %18546 = vst [vmem:[#allocation60_spill] sm:$0xff] %v11492_v2  ;;  %v11495_v39 = vpop.permute.xlu0 %9046  ;;  %8430 = vmatpush.msra.mxu2 %v2470_v46  ;;  %8431 = vmatpush.msra.mxu3 %v2470_v46  ;;  %v18553_v46 = vld [vmem:[#allocation59_spill] sm:$0xff] }
 0x30e   : > { %18547 = vst [vmem:[#allocation70_spill] sm:$0xff] %v11495_v39  ;;  %2688 = vmatpush.msra.mxu0 %v2469_v19  ;;  %8432 = vmatpush.msra.mxu1 %v2469_v19 }
 0x30f   : > { %8433 = vmatpush.msra.mxu2 %v2469_v19  ;;  %8434 = vmatpush.msra.mxu3 %v2469_v19 }
 0x311   : > { %9251 = vrot.lane.b32.xlu2 %v9250_v57, %s9900_s24 }
 0x312   : > { %9246 = vrot.lane.b32.xlu1 %v9245_v14, %s9900_s24 }
 0x313   : > { %v11509_v43 = vpop.permute.xlu2 %9086 }
 0x314   : > { %18548 = vst [vmem:[#allocation71_spill] sm:$0xff] %v11509_v43  ;;  %v11513_v1 = vpop.permute.xlu1 %9036  ;;  %v8789_v43 = vunpack.i.h.bf16 %v18553_v46 }
 0x315   : > { %v11516_v16 = vpop.permute.xlu0 %9061 }
 0x316   : > { %18549 = vst [vmem:[#allocation67_spill] sm:$0xff] %v11516_v16  ;;  %v8788_v16 = vunpack.i.l.bf16 %v18553_v46 }
 0x31a   : > { %9261 = vrot.lane.b32.xlu1 %v9260_v51, %s9900_s24 }
 0x31b   : > { %v11520_v61 = vpop.permute.xlu2 %9101 }
 0x31c   : > { %18550 = vst [vmem:[#allocation80_spill] sm:$0xff] %v11520_v61  ;;  %v11522_v56 = vpop.permute.xlu1 %9051  ;;  %v9819_v61 = vld [vmem:[%s9943_s21] sm:$0xff] }
 0x31d   : > { %18551 = vst [vmem:[#allocation57_spill] sm:$0xff] %v11522_v56  ;;  %v11524_v57 = vpop.permute.xlu0 %9076  ;;  %v2275_v33 = vsel %vm2274_vm1, %v9819_v61, %v8788_v16 }
 0x31e   : > { %v2340_v36 = vsel %vm2339_vm2, %v2275_v33, %v8948_v0  ;;  %v9820_v33 = vld [vmem:[%s9943_s21 + $0x80] sm:$0xff] }
 0x323   : > { %v11526_v38 = vpop.permute.xlu2 %9116 }
 0x324   : > { %v11528_v14 = vpop.permute.xlu1 %9066 }
 0x325   : > { %v11530_v58 = vpop.permute.xlu0 %9091 }
 0x326   : > { %18552 = vst [vmem:[#allocation66_spill] sm:$0xff] %v11530_v58  ;;  %v8828_v58 = vunpack.i.l.bf16 %v11131_v15 }
 0x328   : > { %v2291_v0 = vsel %vm2274_vm1, %v9820_v33, %v8828_v58  ;;  %v8793_v58 = vunpack.i.l.bf16 %v11028_v40  ;;  %v8989_v33 = vunpack.i.h.bf16 %v11379_v8 }
 0x32b   : > { %v11534_v19 = vpop.permute.xlu2 %9131 }
 0x32c   : > { %v11536_v54 = vpop.permute.xlu1 %9081 }
 0x32d   : > { %v9107_v9 = vpop.permute.xlu0 %9106 }
 0x32e   : > { %v9108_v51 = vunpack.i.l.bf16 %v9107_v9  ;;  %v9109_v16 = vunpack.i.h.bf16 %v9107_v9  ;;  %v8829_v9 = vunpack.i.h.bf16 %v11131_v15 }
 0x330   : > { %v2405_v56 = vsel %vm2404_vm4, %v2340_v36, %v9108_v51  ;;  %v2356_v36 = vsel %vm2339_vm2, %v2291_v0, %v8988_v27  ;;  %v9821_v51 = vld [vmem:[%s9943_s21 + $0x8] sm:$0xff]  ;;  %v8953_v27 = vunpack.i.l.bf16 %v11261_v59 }
 0x331   : > { %8287 = vmatmul.msk.f32.vlgmr.msra.gmra.mxu0 %vm2476_vm3, %v2405_v56  ;;  %v2276_v56 = vsel %vm2274_vm1, %v9821_v51, %v8789_v43  ;;  %v9822_v51 = vld [vmem:[%s9943_s21 + $0x88] sm:$0xff] }
 0x332   : > { %v2341_v41 = vsel %vm2339_vm2, %v2276_v56, %v8949_v3  ;;  %v9823_v56 = vld [vmem:[%s9943_s21 + $0x10] sm:$0xff] }
 0x333   : > { %v9147_v2 = vpop.permute.xlu2 %9146  ;;  %v2277_v15 = vsel %vm2274_vm1, %v9823_v56, %v8793_v58  ;;  %v8993_v58 = vunpack.i.l.bf16 %v11428_v60  ;;  %v9825_v56 = vld [vmem:[%s9943_s21 + $0x90] sm:$0xff] }
 0x334   : > { %v11547_v61 = vpop.permute.xlu1 %9096  ;;  %v9148_v39 = vunpack.i.l.bf16 %v9147_v2  ;;  %v9149_v43 = vunpack.i.h.bf16 %v9147_v2  ;;  %v2342_v8 = vsel %vm2339_vm2, %v2277_v15, %v8953_v27 }
 0x335   : > { %18554 = vst [vmem:[#allocation75_spill] sm:$0xff] %v11547_v61  ;;  %v11551_v13 = vpop.permute.xlu0 %9121  ;;  %v2406_v61 = vsel %vm2404_vm4, %v2341_v41, %v9109_v16  ;;  %v8833_v41 = vunpack.i.l.bf16 %v11045_v28 }
 0x336   : > { %v2421_v46 = vsel %vm2404_vm4, %v2356_v36, %v9148_v39  ;;  %v2292_v39 = vsel %vm2274_vm1, %v9822_v51, %v8829_v9  ;;  %v8954_v9 = vunpack.i.h.bf16 %v11261_v59 }
 0x337   : > { %8303 = vmatmul.msk.f32.vlgmr.msra.gmra.mxu1 %vm2476_vm3, %v2421_v46  ;;  %v2357_v16 = vsel %vm2339_vm2, %v2292_v39, %v8989_v33  ;;  %v8794_v46 = vunpack.i.h.bf16 %v11028_v40  ;;  %v2293_v15 = vsel %vm2274_vm1, %v9825_v56, %v8833_v41  ;;  %v9118_v41 = vunpack.i.l.bf16 %v11526_v38 }
 0x339   : > { %8288 = vmatmul.msk.f32.gmra.mxu0 %vm2476_vm3, %v2406_v61  ;;  %v2422_v61 = vsel %vm2404_vm4, %v2357_v16, %v9149_v43  ;;  %v9824_v43 = vld [vmem:[%s9943_s21 + $0x18] sm:$0xff]  ;;  %v2358_v16 = vsel %vm2339_vm2, %v2293_v15, %v8993_v58 }
 0x33c   : > { %v9112_v0 = vpop.permute.xlu1 %9111 }
 0x33d   : > { %v9113_v3 = vunpack.i.l.bf16 %v9112_v0  ;;  %v11567_v36 = vpop.permute.xlu0 %9136  ;;  %v9114_v33 = vunpack.i.h.bf16 %v9112_v0 }
 0x33f   : > { %v2407_v2 = vsel %vm2404_vm4, %v2342_v8, %v9113_v3  ;;  %8304 = vmatmul.msk.f32.gmra.mxu1 %vm2476_vm3, %v2422_v61  ;;  %v2278_v3 = vsel %vm2274_vm1, %v9824_v43, %v8794_v46  ;;  %v8834_v8 = vunpack.i.h.bf16 %v11045_v28  ;;  %v8798_v61 = vunpack.i.l.bf16 %v11077_v18 }
 0x340   : > { %v2343_v40 = vsel %vm2339_vm2, %v2278_v3, %v8954_v9  ;;  %v8994_v46 = vunpack.i.h.bf16 %v11428_v60  ;;  %v9827_v3 = vld [vmem:[%s9943_s21 + $0x98] sm:$0xff] }
 0x341   : > { %8289 = vmatmul.msk.f32.gmra.mxu0 %vm2476_vm3, %v2407_v2  ;;  %v2408_v59 = vsel %vm2404_vm4, %v2343_v40, %v9114_v33  ;;  %v8958_v2 = vunpack.i.l.bf16 %v11325_v32  ;;  %v2294_v28 = vsel %vm2274_vm1, %v9827_v3, %v8834_v8  ;;  %v8838_v40 = vunpack.i.l.bf16 %v11109_v30 }
 0x342   : > { %v2359_v15 = vsel %vm2339_vm2, %v2294_v28, %v8994_v46  ;;  %v9119_v8 = vunpack.i.h.bf16 %v11526_v38  ;;  %v11626_v28 = vpop.permute.xlu2 %9161 }
 0x344   : > { %v11581_v51 = vpop.permute.xlu1 %9126 }
 0x345   : > { %v9152_v27 = vpop.permute.xlu0 %9151 }
 0x346   : > { %v9153_v39 = vunpack.i.l.bf16 %v9152_v27  ;;  %v9154_v9 = vunpack.i.h.bf16 %v9152_v27 }
 0x348   : > { %v2423_v0 = vsel %vm2404_vm4, %v2358_v16, %v9153_v39  ;;  %v9826_v39 = vld [vmem:[%s9943_s21 + $0x20] sm:$0xff]  ;;  %v2424_v27 = vsel %vm2404_vm4, %v2359_v15, %v9154_v9  ;;  %v8799_v16 = vunpack.i.h.bf16 %v11077_v18  ;;  %v8839_v15 = vunpack.i.h.bf16 %v11109_v30 }
 0x349   : > { %8290 = vmatmul.msk.f32.gmra.mxu0 %vm2476_vm3, %v2408_v59  ;;  %8305 = vmatmul.msk.f32.gmra.mxu1 %vm2476_vm3, %v2423_v0  ;;  %v2279_v43 = vsel %vm2274_vm1, %v9826_v39, %v8798_v61  ;;  %v8998_v59 = vunpack.i.l.bf16 %v11342_v22  ;;  %v8959_v0 = vunpack.i.h.bf16 %v11325_v32  ;;  %v9829_v39 = vld [vmem:[%s9943_s21 + $0x28] sm:$0xff] }
 0x34a   : > { %v2344_v56 = vsel %vm2339_vm2, %v2279_v43, %v8958_v2  ;;  %v2280_v43 = vsel %vm2274_vm1, %v9829_v39, %v8799_v16 }
 0x34b   : > { %v2409_v60 = vsel %vm2404_vm4, %v2344_v56, %v9118_v41  ;;  %v9828_v41 = vld [vmem:[%s9943_s21 + $0xa0] sm:$0xff]  ;;  %v2345_v18 = vsel %vm2339_vm2, %v2280_v43, %v8959_v0  ;;  %v8803_v56 = vunpack.i.l.bf16 %v10991_v10 }
 0x34c   : > { %v11598_v58 = vpop.permute.xlu1 %9141  ;;  %v2295_v9 = vsel %vm2274_vm1, %v9828_v41, %v8838_v40  ;;  %v2410_v38 = vsel %vm2404_vm4, %v2345_v18, %v9119_v8  ;;  %v9123_v40 = vunpack.i.l.bf16 %v11551_v13  ;;  %v9830_v8 = vld [vmem:[%s9943_s21 + $0x30] sm:$0xff]  ;;  %v9831_v41 = vld [vmem:[%s9943_s21 + $0xa8] sm:$0xff]  ;;  %v8843_v18 = vunpack.i.l.bf16 %v11158_v63 }
 0x34d   : > { %v11600_v33 = vpop.permute.xlu0 %9166  ;;  %v2360_v3 = vsel %vm2339_vm2, %v2295_v9, %v8998_v59  ;;  %v2296_v9 = vsel %vm2274_vm1, %v9831_v41, %v8839_v15  ;;  %v9003_v15 = vunpack.i.l.bf16 %v11406_v5  ;;  %v9833_v41 = vld [vmem:[%s9943_s21 + $0x38] sm:$0xff] }
 0x351   : > { %8291 = vmatmul.msk.f32.gmra.mxu0 %vm2476_vm3, %v2409_v60  ;;  %8306 = vmatmul.msk.f32.gmra.mxu1 %vm2476_vm3, %v2424_v27  ;;  %v8999_v60 = vunpack.i.h.bf16 %v11342_v22  ;;  %v8963_v27 = vunpack.i.l.bf16 %v11374_v45 }
 0x353   : > { %v2361_v30 = vsel %vm2339_vm2, %v2296_v9, %v8999_v60  ;;  %v9124_v60 = vunpack.i.h.bf16 %v11551_v13 }
 0x354   : > { %v9157_v61 = vpop.permute.xlu1 %9156 }
 0x355   : > { %v9158_v2 = vunpack.i.l.bf16 %v9157_v61  ;;  %v11617_v46 = vpop.permute.xlu0 %9181  ;;  %v9159_v16 = vunpack.i.h.bf16 %v9157_v61  ;;  %v8868_v61 = vunpack.i.l.bf16 %v11163_v17 }
 0x356   : > { %18555 = vst [vmem:[#allocation77_spill] sm:$0xff] %v11617_v46 }
 0x357   : > { %v2425_v32 = vsel %vm2404_vm4, %v2360_v3, %v9158_v2  ;;  %v2281_v2 = vsel %vm2274_vm1, %v9830_v8, %v8803_v56  ;;  %v2426_v43 = vsel %vm2404_vm4, %v2361_v30, %v9159_v16  ;;  %v8804_v3 = vunpack.i.h.bf16 %v10991_v10 }
 0x358   : > { %v2346_v39 = vsel %vm2339_vm2, %v2281_v2, %v8963_v27  ;;  %v8964_v56 = vunpack.i.h.bf16 %v11374_v45  ;;  %v9163_v27 = vunpack.i.l.bf16 %v11626_v28  ;;  %v9832_v2 = vld [vmem:[%s9943_s21 + $0x100] sm:$0xff] }
 0x359   : > { %8292 = vmatmul.msk.f32.gmra.mxu0 %vm2476_vm3, %v2410_v38  ;;  %8307 = vmatmul.msk.f32.gmra.mxu1 %vm2476_vm3, %v2425_v32  ;;  %v2411_v22 = vsel %vm2404_vm4, %v2346_v39, %v9123_v40  ;;  %v9028_v32 = vunpack.i.l.bf16 %v11396_v42  ;;  %v11654_v38 = vpop.permute.xlu2 %9176  ;;  %v2307_v10 = vsel %vm2274_vm1, %v9832_v2, %v8868_v61  ;;  %v2282_v9 = vsel %vm2274_vm1, %v9833_v41, %v8804_v3  ;;  %v9834_v39 = vld [vmem:[%s9943_s21 + $0xb0] sm:$0xff]  ;;  %v9836_v41 = vld [vmem:[%s9943_s21 + $0x108] sm:$0xff] }
 0x35a   : > { %v2297_v30 = vsel %vm2274_vm1, %v9834_v39, %v8843_v18  ;;  %v8808_v61 = vunpack.i.l.bf16 %v11055_v35  ;;  %v8869_v3 = vunpack.i.h.bf16 %v11163_v17  ;;  %v8844_v18 = vunpack.i.h.bf16 %v11158_v63  ;;  %v9837_v39 = vld [vmem:[%s9943_s21 + $0xb8] sm:$0xff] }
 0x35b   : > { %v2372_v45 = vsel %vm2339_vm2, %v2307_v10, %v9028_v32  ;;  %v2362_v13 = vsel %vm2339_vm2, %v2297_v30, %v9003_v15  ;;  %v8908_v32 = vunpack.i.l.bf16 %v11180_v12  ;;  %v8968_v15 = vunpack.i.l.bf16 %v11288_v6  ;;  %v9835_v10 = vld [vmem:[%s9943_s21 + $0x40] sm:$0xff] }
 0x35c   : > { %v11636_v59 = vpop.permute.xlu1 %9171  ;;  %v2298_v30 = vsel %vm2274_vm1, %v9837_v39, %v8844_v18  ;;  %v9839_v39 = vld [vmem:[%s9943_s21 + $0x110] sm:$0xff] }
 0x35d   : > { %v11638_v0 = vpop.permute.xlu0 %9196 }
 0x361   : > { %8293 = vmatmul.msk.f32.gmra.mxu0 %vm2476_vm3, %v2411_v22  ;;  %8308 = vmatmul.msk.f32.gmra.mxu1 %vm2476_vm3, %v2426_v43  ;;  %v2347_v22 = vsel %vm2339_vm2, %v2282_v9, %v8964_v56  ;;  %v9029_v56 = vunpack.i.h.bf16 %v11396_v42  ;;  %v2283_v42 = vsel %vm2274_vm1, %v9835_v10, %v8808_v61  ;;  %v2308_v9 = vsel %vm2274_vm1, %v9836_v41, %v8869_v3 }
 0x362   : > { %v2412_v46 = vsel %vm2404_vm4, %v2347_v22, %v9124_v60  ;;  %v9004_v60 = vunpack.i.h.bf16 %v11406_v5  ;;  %v2348_v22 = vsel %vm2339_vm2, %v2283_v42, %v8968_v15  ;;  %v8848_v15 = vunpack.i.l.bf16 %v11072_v47 }
 0x363   : > { %v9069_v42 = vunpack.i.h.bf16 %v11528_v14  ;;  %v9168_v41 = vunpack.i.l.bf16 %v11600_v33 }
 0x364   : > { %v9187_v40 = vpop.permute.xlu1 %9186 }
 0x365   : > { %v9188_v16 = vunpack.i.l.bf16 %v9187_v40  ;;  %v11660_v8 = vpop.permute.xlu0 %9211  ;;  %v9189_v17 = vunpack.i.h.bf16 %v9187_v40  ;;  %v2373_v40 = vsel %vm2339_vm2, %v2308_v9, %v9029_v56  ;;  %v8873_v56 = vunpack.i.l.bf16 %v11214_v7 }
 0x366   : > { %18556 = vst [vmem:[#allocation73_spill] sm:$0xff] %v11660_v8  ;;  %v2427_v8 = vsel %vm2404_vm4, %v2362_v13, %v9163_v27  ;;  %v9068_v27 = vunpack.i.l.bf16 %v11528_v14  ;;  %v2363_v13 = vsel %vm2339_vm2, %v2298_v30, %v9004_v60  ;;  %v9033_v60 = vunpack.i.l.bf16 %v11460_v49 }
 0x367   : > { %v2437_v43 = vsel %vm2404_vm4, %v2372_v45, %v9188_v16  ;;  %v9128_v16 = vunpack.i.l.bf16 %v11581_v51  ;;  %v2309_v30 = vsel %vm2274_vm1, %v9839_v39, %v8873_v56  ;;  %v8913_v56 = vunpack.i.l.bf16 %v11246_v21  ;;  %v9844_v39 = vld [vmem:[%s9943_s21 + $0x190] sm:$0xff] }
 0x368   : > { %8319 = vmatmul.msk.f32.vlgmr.msra.gmra.mxu2 %vm2476_vm3, %v2437_v43  ;;  %v2438_v43 = vsel %vm2404_vm4, %v2373_v40, %v9189_v17  ;;  %v8969_v17 = vunpack.i.h.bf16 %v11288_v6  ;;  %v9840_v6 = vld [vmem:[%s9943_s21 + $0x48] sm:$0xff]  ;;  %v2374_v14 = vsel %vm2339_vm2, %v2309_v30, %v9033_v60  ;;  %v8813_v60 = vunpack.i.l.bf16 %v11104_v26 }
 0x369   : > { %8294 = vmatmul.msk.f32.gmra.mxu0 %vm2476_vm3, %v2412_v46  ;;  %8309 = vmatmul.msk.f32.gmra.mxu1 %vm2476_vm3, %v2427_v8  ;;  %v9164_v46 = vunpack.i.h.bf16 %v11626_v28  ;;  %v11687_v8 = vpop.permute.xlu2 %9191  ;;  %v9838_v28 = vld [vmem:[%s9943_s21 + $0x180] sm:$0xff]  ;;  %v2413_v10 = vsel %vm2404_vm4, %v2348_v22, %v9128_v16  ;;  %v2325_v30 = vsel %vm2274_vm1, %v9844_v39, %v8913_v56  ;;  %v8914_v56 = vunpack.i.h.bf16 %v11246_v21 }
 0x36a   : > { %v2323_v45 = vsel %vm2274_vm1, %v9838_v28, %v8908_v32  ;;  %v8809_v32 = vunpack.i.h.bf16 %v11055_v35  ;;  %v9193_v16 = vunpack.i.l.bf16 %v11687_v8  ;;  %v9129_v35 = vunpack.i.h.bf16 %v11581_v51  ;;  %v9841_v28 = vld [vmem:[%s9943_s21 + $0xc0] sm:$0xff] }
 0x36b   : > { %v2388_v61 = vsel %vm2339_vm2, %v2323_v45, %v9068_v27  ;;  %v2428_v3 = vsel %vm2404_vm4, %v2363_v13, %v9164_v46  ;;  %v8909_v27 = vunpack.i.h.bf16 %v11180_v12  ;;  %v9008_v46 = vunpack.i.l.bf16 %v11455_v4 }
 0x36c   : > { %v11689_v63 = vpop.permute.xlu1 %9201  ;;  %v2284_v40 = vsel %vm2274_vm1, %v9840_v6, %v8809_v32  ;;  %v2299_v45 = vsel %vm2274_vm1, %v9841_v28, %v8848_v15  ;;  %v2439_v13 = vsel %vm2404_vm4, %v2374_v14, %v9193_v16  ;;  %v8849_v15 = vunpack.i.h.bf16 %v11072_v47  ;;  %v9845_v6 = vld [vmem:[%s9943_s21 + $0x50] sm:$0xff]  ;;  %v9846_v28 = vld [vmem:[%s9943_s21 + $0xc8] sm:$0xff] }
 0x36d   : > { %v9227_v2 = vpop.permute.xlu0 %9226  ;;  %v2349_v51 = vsel %vm2339_vm2, %v2284_v40, %v8969_v17  ;;  %v2364_v22 = vsel %vm2339_vm2, %v2299_v45, %v9008_v46  ;;  %v8973_v17 = vunpack.i.l.bf16 %v11352_v29  ;;  %v9009_v46 = vunpack.i.h.bf16 %v11455_v4 }
 0x36e   : > { %v9228_v5 = vunpack.i.l.bf16 %v9227_v2  ;;  %v9194_v16 = vunpack.i.h.bf16 %v11687_v8  ;;  %v9169_v47 = vunpack.i.h.bf16 %v11600_v33  ;;  %v2285_v40 = vsel %vm2274_vm1, %v9845_v6, %v8813_v60 }
 0x36f   : > { %v2300_v4 = vsel %vm2274_vm1, %v9846_v28, %v8849_v15  ;;  %v2350_v33 = vsel %vm2339_vm2, %v2285_v40, %v8973_v17  ;;  %v9013_v15 = vunpack.i.l.bf16 %v11369_v53  ;;  %v9198_v60 = vunpack.i.l.bf16 %v11638_v0 }
 0x370   : > { %8320 = vmatmul.msk.f32.gmra.mxu2 %vm2476_vm3, %v2438_v43  ;;  %v2453_v18 = vsel %vm2404_vm4, %v2388_v61, %v9228_v5  ;;  %v9229_v5 = vunpack.i.h.bf16 %v9227_v2  ;;  %v9842_v2 = vld [vmem:[%s9943_s21 + $0x188] sm:$0xff]  ;;  %v2414_v61 = vsel %vm2404_vm4, %v2349_v51, %v9129_v35  ;;  %v2365_v14 = vsel %vm2339_vm2, %v2300_v4, %v9009_v46  ;;  %v9847_v46 = vld [vmem:[%s9943_s21 + $0x120] sm:$0xff] }
 0x371   : > { %8295 = vmatmul.msk.f32.gmra.mxu0 %vm2476_vm3, %v2413_v10  ;;  %8310 = vmatmul.msk.f32.gmra.mxu1 %vm2476_vm3, %v2428_v3  ;;  %v11726_v12 = vpop.permute.xlu2 %9206  ;;  %v2324_v43 = vsel %vm2274_vm1, %v9842_v2, %v8909_v27  ;;  %v2429_v10 = vsel %vm2404_vm4, %v2364_v22, %v9168_v41  ;;  %v9034_v27 = vunpack.i.h.bf16 %v11460_v49  ;;  %v8879_v40 = vunpack.i.h.bf16 %v11126_v52 }
 0x372   : > { %8335 = vmatmul.msk.f32.vlgmr.msra.gmra.mxu3 %vm2476_vm3, %v2453_v18  ;;  %v2389_v3 = vsel %vm2339_vm2, %v2324_v43, %v9069_v42  ;;  %v8874_v18 = vunpack.i.h.bf16 %v11214_v7  ;;  %v9073_v7 = vunpack.i.l.bf16 %v11487_v20  ;;  %v9133_v42 = vunpack.i.l.bf16 %v11534_v19 }
 0x373   : > { %v2454_v32 = vsel %vm2404_vm4, %v2389_v3, %v9229_v5  ;;  %v9843_v5 = vld [vmem:[%s9943_s21 + $0x118] sm:$0xff]  ;;  %v2430_v43 = vsel %vm2404_vm4, %v2365_v14, %v9169_v47  ;;  %v8853_v3 = vunpack.i.l.bf16 %v11136_v50  ;;  %v9849_v47 = vld [vmem:[%s9943_s21 + $0xd0] sm:$0xff]  ;;  %v8818_v4 = vunpack.i.l.bf16 %v11018_v23 }
 0x374   : > { %v11722_v9 = vpop.permute.xlu1 %9216  ;;  %v2310_v49 = vsel %vm2274_vm1, %v9843_v5, %v8874_v18  ;;  %v2390_v45 = vsel %vm2339_vm2, %v2325_v30, %v9073_v7  ;;  %v2415_v2 = vsel %vm2404_vm4, %v2350_v33, %v9133_v42  ;;  %v9038_v18 = vunpack.i.l.bf16 %v11513_v1  ;;  %v9848_v42 = vld [vmem:[%s9943_s21 + $0x58] sm:$0xff] }
 0x375   : > { %v2375_v8 = vsel %vm2339_vm2, %v2310_v49, %v9034_v27  ;;  %v9074_v27 = vunpack.i.h.bf16 %v11487_v20  ;;  %v9173_v7 = vunpack.i.l.bf16 %v11636_v59  ;;  %v9850_v49 = vld [vmem:[%s9943_s21 + $0x198] sm:$0xff]  ;;  %v9014_v14 = vunpack.i.h.bf16 %v11369_v53 }
 0x376   : > { %v2440_v51 = vsel %vm2404_vm4, %v2375_v8, %v9194_v16  ;;  %v8854_v8 = vunpack.i.h.bf16 %v11136_v50  ;;  %v9138_v50 = vunpack.i.l.bf16 %v11567_v36  ;;  %v9853_v53 = vld [vmem:[%s9943_s21 + $0xd8] sm:$0xff] }
 0x378   : > { %8321 = vmatmul.msk.f32.gmra.mxu2 %vm2476_vm3, %v2439_v13 }
 0x379   : > { %8296 = vmatmul.msk.f32.gmra.mxu0 %vm2476_vm3, %v2414_v61  ;;  %8311 = vmatmul.msk.f32.gmra.mxu1 %vm2476_vm3, %v2429_v10  ;;  %v11771_v13 = vpop.permute.xlu2 %9221  ;;  %v8878_v61 = vunpack.i.l.bf16 %v11126_v52  ;;  %v8814_v10 = vunpack.i.h.bf16 %v11104_v26  ;;  %v9134_v26 = vunpack.i.h.bf16 %v11534_v19  ;;  %v8918_v52 = vunpack.i.l.bf16 %v11293_v11 }
 0x37a   : > { %8336 = vmatmul.msk.f32.gmra.mxu3 %vm2476_vm3, %v2454_v32  ;;  %v8974_v32 = vunpack.i.h.bf16 %v11352_v29  ;;  %v2301_v29 = vsel %vm2274_vm1, %v9849_v47, %v8853_v3  ;;  %v9852_v3 = vld [vmem:[%s9943_s21 + $0x60] sm:$0xff]  ;;  %v9043_v47 = vunpack.i.l.bf16 %v11423_v37 }
 0x37b   : > { %v2311_v16 = vsel %vm2274_vm1, %v9847_v46, %v8878_v61  ;;  %v2286_v21 = vsel %vm2274_vm1, %v9848_v42, %v8814_v10  ;;  %v2366_v20 = vsel %vm2339_vm2, %v2301_v29, %v9013_v15  ;;  %v9851_v61 = vld [vmem:[%s9943_s21 + $0x128] sm:$0xff]  ;;  %v8883_v46 = vunpack.i.l.bf16 %v11190_v55 }
 0x37c   : > { %v9232_v35 = vpop.permute.xlu1 %9231  ;;  %v2351_v5 = vsel %vm2339_vm2, %v2286_v21, %v8974_v32  ;;  %v2431_v30 = vsel %vm2404_vm4, %v2366_v20, %v9173_v7  ;;  %v2312_v10 = vsel %vm2274_vm1, %v9851_v61, %v8879_v40  ;;  %v8819_v42 = vunpack.i.h.bf16 %v11018_v23 }
 0x37d   : > { %v9233_v41 = vunpack.i.l.bf16 %v9232_v35  ;;  %v9234_v17 = vunpack.i.h.bf16 %v9232_v35  ;;  %v2326_v35 = vsel %vm2274_vm1, %v9850_v49, %v8914_v56  ;;  %v2416_v39 = vsel %vm2404_vm4, %v2351_v5, %v9134_v26 }
 0x37e   : > { %v2391_v6 = vsel %vm2339_vm2, %v2326_v35, %v9074_v27  ;;  %v2302_v56 = vsel %vm2274_vm1, %v9853_v53, %v8854_v8  ;;  %v8858_v21 = vunpack.i.l.bf16 %v11185_v31  ;;  %v8919_v29 = vunpack.i.h.bf16 %v11293_v11  ;;  %v9858_v8 = vld [vmem:[%s9943_s21 + $0x1a8] sm:$0xff] }
 0x37f   : > { %v2455_v22 = vsel %vm2404_vm4, %v2390_v45, %v9233_v41  ;;  %v2376_v41 = vsel %vm2339_vm2, %v2311_v16, %v9038_v18  ;;  %v2456_v28 = vsel %vm2404_vm4, %v2391_v6, %v9234_v17  ;;  %v9039_v45 = vunpack.i.h.bf16 %v11513_v1  ;;  %v9856_v6 = vld [vmem:[%s9943_s21 + $0x68] sm:$0xff] }
 0x380   : > { %8322 = vmatmul.msk.f32.gmra.mxu2 %vm2476_vm3, %v2440_v51  ;;  %v2441_v19 = vsel %vm2404_vm4, %v2376_v41, %v9198_v60  ;;  %v8978_v51 = vunpack.i.l.bf16 %v11401_v34  ;;  %v2287_v18 = vsel %vm2274_vm1, %v9852_v3, %v8818_v4  ;;  %v2367_v15 = vsel %vm2339_vm2, %v2302_v56, %v9014_v14  ;;  %v9859_v56 = vld [vmem:[%s9943_s21 + $0x138] sm:$0xff] }
 0x381   : > { %8297 = vmatmul.msk.f32.gmra.mxu0 %vm2476_vm3, %v2415_v2  ;;  %8312 = vmatmul.msk.f32.gmra.mxu1 %vm2476_vm3, %v2430_v43  ;;  %v11813_v33 = vpop.permute.xlu2 %9236  ;;  %v9078_v2 = vunpack.i.l.bf16 %v11524_v57  ;;  %v9174_v43 = vunpack.i.h.bf16 %v11636_v59  ;;  %v2377_v32 = vsel %vm2339_vm2, %v2312_v10, %v9039_v45  ;;  %v9854_v59 = vld [vmem:[%s9943_s21 + $0x1a0] sm:$0xff]  ;;  %v8979_v41 = vunpack.i.h.bf16 %v11401_v34 }
 0x382   : > { %8337 = vmatmul.msk.f32.gmra.mxu3 %vm2476_vm3, %v2455_v22  ;;  %v9199_v22 = vunpack.i.h.bf16 %v11638_v0  ;;  %v9238_v1 = vunpack.i.l.bf16 %v11813_v33  ;;  %v2352_v0 = vsel %vm2339_vm2, %v2287_v18, %v8978_v51  ;;  %v2327_v27 = vsel %vm2274_vm1, %v9854_v59, %v8918_v52  ;;  %v9857_v34 = vld [vmem:[%s9943_s21 + $0xe0] sm:$0xff] }
 0x383   : > { %v2417_v26 = vsel %vm2404_vm4, %v2352_v0, %v9138_v50  ;;  %v2432_v7 = vsel %vm2404_vm4, %v2367_v15, %v9174_v43  ;;  %v2392_v17 = vsel %vm2339_vm2, %v2327_v27, %v9078_v2  ;;  %v9018_v5 = vunpack.i.l.bf16 %v11433_v62  ;;  %v9860_v0 = vld [vmem:[%s9943_s21 + $0x70] sm:$0xff] }
 0x384   : > { %v2442_v60 = vsel %vm2404_vm4, %v2377_v32, %v9199_v22  ;;  %v2457_v16 = vsel %vm2404_vm4, %v2392_v17, %v9238_v1  ;;  %v9203_v20 = vunpack.i.l.bf16 %v11689_v63  ;;  %v9139_v23 = vunpack.i.h.bf16 %v11567_v36  ;;  %v11879_v1 = vpop.permute.xlu0 %9241 }
 0x385   : > { %v9178_v49 = vunpack.i.l.bf16 %v11654_v38  ;;  %v9239_v35 = vunpack.i.h.bf16 %v11813_v33  ;;  %v2288_v11 = vsel %vm2274_vm1, %v9856_v6, %v8819_v42  ;;  %v2303_v40 = vsel %vm2274_vm1, %v9857_v34, %v8858_v21  ;;  %v18560_v6 = vld [vmem:[#allocation77_spill] sm:$0xff] }
 0x386   : > { %v2353_v4 = vsel %vm2339_vm2, %v2288_v11, %v8979_v41  ;;  %v2328_v45 = vsel %vm2274_vm1, %v9858_v8, %v8919_v29  ;;  %v8884_v51 = vunpack.i.h.bf16 %v11190_v55  ;;  %v8823_v2 = vunpack.i.l.bf16 %v11082_v24  ;;  %v18557_v29 = vld [vmem:[#allocation55_spill] sm:$0xff] }
 0x387   : > { %v2418_v33 = vsel %vm2404_vm4, %v2353_v4, %v9139_v23  ;;  %v8859_v50 = vunpack.i.h.bf16 %v11185_v31  ;;  %v9044_v43 = vunpack.i.h.bf16 %v11423_v37  ;;  %v8923_v55 = vunpack.i.l.bf16 %v11209_v44  ;;  %v9864_v4 = vld [vmem:[%s9943_s21 + $0x78] sm:$0xff] }
 0x388   : > { %8323 = vmatmul.msk.f32.gmra.mxu2 %vm2476_vm3, %v2441_v19  ;;  %v9079_v19 = vunpack.i.h.bf16 %v11524_v57  ;;  %v2368_v57 = vsel %vm2339_vm2, %v2303_v40, %v9018_v5  ;;  %v8983_v61 = vunpack.i.l.bf16 %v11315_v48  ;;  %v9019_v10 = vunpack.i.h.bf16 %v11433_v62  ;;  %v18558_v5 = vld [vmem:[#allocation70_spill] sm:$0xff] }
 0x389   : > { %8298 = vmatmul.msk.f32.gmra.mxu0 %vm2476_vm3, %v2416_v39  ;;  %8313 = vmatmul.msk.f32.gmra.mxu1 %vm2476_vm3, %v2431_v30  ;;  %v9855_v39 = vld [vmem:[%s9943_s21 + $0x130] sm:$0xff]  ;;  %v2433_v52 = vsel %vm2404_vm4, %v2368_v57, %v9178_v49  ;;  %v9204_v3 = vunpack.i.h.bf16 %v11689_v63  ;;  %v9083_v18 = vunpack.i.l.bf16 %v11536_v54  ;;  %v9179_v31 = vunpack.i.h.bf16 %v11654_v38  ;;  %v9863_v40 = vld [vmem:[%s9943_s21 + $0x140] sm:$0xff] }
 0x38a   : > { %8338 = vmatmul.msk.f32.gmra.mxu3 %vm2476_vm3, %v2456_v28  ;;  %v2313_v30 = vsel %vm2274_vm1, %v9855_v39, %v8883_v46  ;;  %v2393_v14 = vsel %vm2339_vm2, %v2328_v45, %v9079_v19  ;;  %v9143_v53 = vunpack.i.l.bf16 %v11598_v58  ;;  %v9243_v37 = vunpack.i.l.bf16 %v11879_v1  ;;  %v18559_v49 = vld [vmem:[#allocation60_spill] sm:$0xff]  ;;  %v9866_v45 = vld [vmem:[%s9943_s21 + $0x1b8] sm:$0xff] }
 0x38b   : > { %v2378_v28 = vsel %vm2339_vm2, %v2313_v30, %v9043_v47  ;;  %v2458_v22 = vsel %vm2404_vm4, %v2393_v14, %v9239_v35  ;;  %v2314_v32 = vsel %vm2274_vm1, %v9859_v56, %v8884_v51  ;;  %v2289_v15 = vsel %vm2274_vm1, %v9860_v0, %v8823_v2 }
 0x38c   : > { %v2443_v36 = vsel %vm2404_vm4, %v2378_v28, %v9203_v20  ;;  %v2379_v59 = vsel %vm2339_vm2, %v2314_v32, %v9044_v43  ;;  %v2354_v63 = vsel %vm2339_vm2, %v2289_v15, %v8983_v61  ;;  %v8888_v42 = vunpack.i.l.bf16 %v11240_v25  ;;  %v18561_v61 = vld [vmem:[#allocation65_spill] sm:$0xff]  ;;  %v9867_v32 = vld [vmem:[%s9943_s21 + $0x148] sm:$0xff] }
 0x38d   : > { %v2444_v38 = vsel %vm2404_vm4, %v2379_v59, %v9204_v3  ;;  %v2419_v17 = vsel %vm2404_vm4, %v2354_v63, %v9143_v53  ;;  %v8824_v47 = vunpack.i.h.bf16 %v11082_v24  ;;  %v8863_v41 = vunpack.i.l.bf16 %v18557_v29 }
 0x38e   : > { %v9048_v20 = vunpack.i.l.bf16 %v18558_v5  ;;  %v8924_v19 = vunpack.i.h.bf16 %v11209_v44  ;;  %v8984_v23 = vunpack.i.h.bf16 %v11315_v48  ;;  %v9023_v35 = vunpack.i.l.bf16 %v18559_v49  ;;  %v9865_v48 = vld [vmem:[%s9943_s21 + $0xf0] sm:$0xff] }
 0x38f   : > { %v9208_v39 = vunpack.i.l.bf16 %v11726_v12  ;;  %v9084_v30 = vunpack.i.h.bf16 %v11536_v54  ;;  %v9144_v24 = vunpack.i.h.bf16 %v11598_v58  ;;  %v9183_v11 = vunpack.i.l.bf16 %v18560_v6 }
 0x390   : > { %8324 = vmatmul.msk.f32.gmra.mxu2 %vm2476_vm3, %v2442_v60  ;;  %v9861_v60 = vld [vmem:[%s9943_s21 + $0xe8] sm:$0xff]  ;;  %v9244_v34 = vunpack.i.h.bf16 %v11879_v1  ;;  %v2315_v28 = vsel %vm2274_vm1, %v9863_v40, %v8888_v42  ;;  %v2290_v44 = vsel %vm2274_vm1, %v9864_v4, %v8824_v47  ;;  %v2305_v57 = vsel %vm2274_vm1, %v9865_v48, %v8863_v41  ;;  %v18564_v47 = vld [vmem:[#allocation57_spill] sm:$0xff] }
 0x391   : > { %8299 = vmatmul.msk.f32.gmra.mxu0 %vm2476_vm3, %v2417_v26  ;;  %8314 = vmatmul.msk.f32.gmra.mxu1 %vm2476_vm3, %v2432_v7  ;;  %v2304_v62 = vsel %vm2274_vm1, %v9861_v60, %v8859_v50  ;;  %v9862_v26 = vld [vmem:[%s9943_s21 + $0x1b0] sm:$0xff]  ;;  %v2355_v8 = vsel %vm2339_vm2, %v2290_v44, %v8984_v23  ;;  %v2370_v54 = vsel %vm2339_vm2, %v2305_v57, %v9023_v35  ;;  %v8889_v2 = vunpack.i.h.bf16 %v11240_v25  ;;  %v9868_v60 = vld [vmem:[%s9943_s21 + $0xf8] sm:$0xff] }
 0x392   : > { %8339 = vmatmul.msk.f32.gmra.mxu3 %vm2476_vm3, %v2457_v16  ;;  %v2369_v27 = vsel %vm2339_vm2, %v2304_v62, %v9019_v10  ;;  %v2329_v7 = vsel %vm2274_vm1, %v9862_v26, %v8923_v55  ;;  %v2435_v14 = vsel %vm2404_vm4, %v2370_v54, %v9183_v11  ;;  %v8864_v43 = vunpack.i.h.bf16 %v18557_v29  ;;  %v9247_v55 = vpop.permute.xlu1 %9246  ;;  %v9870_v35 = vld [vmem:[%s9943_s21 + $0x150] sm:$0xff] }
 0x393   : > { %v2434_v46 = vsel %vm2404_vm4, %v2369_v27, %v9179_v31  ;;  %v2394_v16 = vsel %vm2339_vm2, %v2329_v7, %v9083_v18  ;;  %v9049_v1 = vunpack.i.h.bf16 %v18558_v5  ;;  %v8928_v10 = vunpack.i.l.bf16 %v18561_v61  ;;  %v18562_v31 = vld [vmem:[#allocation71_spill] sm:$0xff]  ;;  %v18565_v5 = vld [vmem:[#allocation73_spill] sm:$0xff] }
 0x394   : > { %v2459_v21 = vsel %vm2404_vm4, %v2394_v16, %v9243_v37  ;;  %v9024_v3 = vunpack.i.h.bf16 %v18559_v49  ;;  %v9209_v25 = vunpack.i.h.bf16 %v11726_v12  ;;  %v9088_v53 = vunpack.i.l.bf16 %v18562_v31 }
 0x395   : > { %v9184_v37 = vunpack.i.h.bf16 %v18560_v6  ;;  %v9248_v56 = vunpack.i.l.bf16 %v9247_v55  ;;  %v2316_v0 = vsel %vm2274_vm1, %v9867_v32, %v8889_v2  ;;  %v2306_v62 = vsel %vm2274_vm1, %v9868_v60, %v8864_v43 }
 0x396   : > { %v2381_v59 = vsel %vm2339_vm2, %v2316_v0, %v9049_v1  ;;  %v2371_v12 = vsel %vm2339_vm2, %v2306_v62, %v9024_v3  ;;  %v9053_v29 = vunpack.i.l.bf16 %v18564_v47  ;;  %v8929_v41 = vunpack.i.h.bf16 %v18561_v61  ;;  %v18568_v3 = vld [vmem:[#allocation45_spill] sm:$0xff]  ;;  %v9874_v62 = vld [vmem:[%s9943_s21 + $0x160] sm:$0xff] }
 0x397   : > { %v2446_v27 = vsel %vm2404_vm4, %v2381_v59, %v9209_v25  ;;  %v2436_v7 = vsel %vm2404_vm4, %v2371_v12, %v9184_v37  ;;  %v9249_v49 = vunpack.i.h.bf16 %v9247_v55  ;;  %v9054_v57 = vunpack.i.h.bf16 %v18564_v47  ;;  %v9873_v55 = vld [vmem:[%s9943_s21 + $0x1d0] sm:$0xff]  ;;  %v18569_v37 = vld [vmem:[#allocation51_spill] sm:$0xff] }
 0x398   : > { %8325 = vmatmul.msk.f32.gmra.mxu2 %vm2476_vm3, %v2443_v36  ;;  %v2380_v36 = vsel %vm2339_vm2, %v2315_v28, %v9048_v20  ;;  %v9213_v20 = vunpack.i.l.bf16 %v18565_v5  ;;  %v8898_v25 = vunpack.i.l.bf16 %v18568_v3  ;;  %v9218_v0 = vunpack.i.l.bf16 %v11722_v9 }
 0x399   : > { %8300 = vmatmul.msk.f32.gmra.mxu0 %vm2476_vm3, %v2418_v33  ;;  %8315 = vmatmul.msk.f32.gmra.mxu1 %vm2476_vm3, %v2433_v52  ;;  %v2445_v58 = vsel %vm2404_vm4, %v2380_v36, %v9208_v39  ;;  %v2330_v33 = vsel %vm2274_vm1, %v9866_v45, %v8924_v19  ;;  %v2420_v52 = vsel %vm2404_vm4, %v2355_v8, %v9144_v24  ;;  %v9089_v19 = vunpack.i.h.bf16 %v18562_v31  ;;  %v9252_v36 = vpop.permute.xlu2 %9251  ;;  %v18566_v8 = vld [vmem:[#allocation74_spill] sm:$0xff] }
 0x39a   : > { %8340 = vmatmul.msk.f32.gmra.mxu3 %vm2476_vm3, %v2458_v22  ;;  %v2395_v51 = vsel %vm2339_vm2, %v2330_v33, %v9084_v30  ;;  %v287_v22 = vld [vmem:[%s18031_s3] sm:$0xff]  ;;  %v8933_v54 = vunpack.i.l.bf16 %v18566_v8  ;;  %v8934_v32 = vunpack.i.h.bf16 %v18566_v8  ;;  %v9254_v60 = vunpack.i.h.bf16 %v9252_v36 }
 0x39b   : > { %v2460_v50 = vsel %vm2404_vm4, %v2395_v51, %v9244_v34  ;;  %v11951_v18 = vperm.slane %v287_v22, 0  ;;  %v9871_v34 = vld [vmem:[%s9943_s21 + $0x1c8] sm:$0xff]  ;;  %v18567_v45 = vld [vmem:[#allocation66_spill] sm:$0xff]  ;;  %v9872_v51 = vld [vmem:[%s9943_s21 + $0x158] sm:$0xff]  ;;  %v2319_v59 = vsel %vm2274_vm1, %v9874_v62, %v8898_v25 }
 0x39c   : > { %v2332_v40 = vsel %vm2274_vm1, %v9871_v34, %v8929_v41  ;;  %v9093_v33 = vunpack.i.l.bf16 %v18567_v45  ;;  %v2333_v61 = vsel %vm2274_vm1, %v9873_v55, %v8933_v54  ;;  %v9257_v41 = vpop.permute.xlu0 %9256  ;;  %v9879_v25 = vld [vmem:[%s9943_s21 + $0x1e8] sm:$0xff] }
 0x39d   : > { %v2397_v28 = vsel %vm2339_vm2, %v2332_v40, %v9089_v19  ;;  %v9219_v19 = vunpack.i.h.bf16 %v11722_v9 }
 0x39e   : > { %v2462_v44 = vsel %vm2404_vm4, %v2397_v28, %v9249_v49  ;;  %v18571_v49 = vld [vmem:[#allocation75_spill] sm:$0xff] }
 0x3a0   : > { %8326 = vmatmul.msk.f32.gmra.mxu2 %vm2476_vm3, %v2444_v38  ;;  %v9869_v38 = vld [vmem:[%s9943_s21 + $0x1c0] sm:$0xff] }
 0x3a1   : > { %8301 = vmatmul.msk.f32.gmra.mxu0 %vm2476_vm3, %v2419_v17  ;;  %8316 = vmatmul.msk.f32.gmra.mxu1 %vm2476_vm3, %v2434_v46  ;;  %v2331_v26 = vsel %vm2274_vm1, %v9869_v38, %v8928_v10  ;;  %v18563_v46 = vld [vmem:[#allocation68_spill] sm:$0xff]  ;;  %v2398_v10 = vsel %vm2339_vm2, %v2333_v61, %v9093_v33 }
 0x3a2   : > { %8341 = vmatmul.msk.f32.gmra.mxu3 %vm2476_vm3, %v2459_v21  ;;  %v2396_v17 = vsel %vm2339_vm2, %v2331_v26, %v9088_v53  ;;  %v8893_v16 = vunpack.i.l.bf16 %v18563_v46  ;;  %v8894_v4 = vunpack.i.h.bf16 %v18563_v46 }
 0x3a3   : > { %v2461_v42 = vsel %vm2404_vm4, %v2396_v17, %v9248_v56  ;;  %v9058_v56 = vunpack.i.l.bf16 %v18569_v37  ;;  %v9875_v17 = vld [vmem:[%s9943_s21 + $0x1d8] sm:$0xff] }
 0x3a4   : > { %v2317_v39 = vsel %vm2274_vm1, %v9870_v35, %v8893_v16  ;;  %v2318_v22 = vsel %vm2274_vm1, %v9872_v51, %v8894_v4  ;;  %v2334_v46 = vsel %vm2274_vm1, %v9875_v17, %v8934_v32  ;;  %v9098_v35 = vunpack.i.l.bf16 %v18571_v49  ;;  %v9880_v17 = vld [vmem:[%s9943_s21 + $0x178] sm:$0xff] }
 0x3a5   : > { %v2382_v24 = vsel %vm2339_vm2, %v2317_v39, %v9053_v29  ;;  %v2384_v38 = vsel %vm2339_vm2, %v2319_v59, %v9058_v56  ;;  %v9059_v29 = vunpack.i.h.bf16 %v18569_v37  ;;  %v9258_v39 = vunpack.i.l.bf16 %v9257_v41 }
 0x3a6   : > { %v2447_v11 = vsel %vm2404_vm4, %v2382_v24, %v9213_v20  ;;  %v9099_v51 = vunpack.i.h.bf16 %v18571_v49  ;;  %v9224_v59 = vunpack.i.h.bf16 %v11771_v13 }
 0x3a8   : > { %8327 = vmatmul.msk.f32.gmra.mxu2 %vm2476_vm3, %v2445_v58  ;;  %v9214_v58 = vunpack.i.h.bf16 %v18565_v5  ;;  %v18570_v5 = vld [vmem:[#allocation54_spill] sm:$0xff] }
 0x3a9   : > { %8302 = vmatmul.msk.f32.gmra.mxu0 %vm2476_vm3, %v2420_v52  ;;  %8317 = vmatmul.msk.f32.gmra.mxu1 %vm2476_vm3, %v2435_v14  ;;  %v9253_v14 = vunpack.i.l.bf16 %v9252_v36  ;;  %v8938_v20 = vunpack.i.l.bf16 %v18570_v5  ;;  %v8939_v33 = vunpack.i.h.bf16 %v18570_v5 }
 0x3aa   : > { %8342 = vmatmul.msk.f32.gmra.mxu3 %vm2476_vm3, %v2460_v50  ;;  %v2383_v50 = vsel %vm2339_vm2, %v2318_v22, %v9054_v57  ;;  %v18572_v57 = vld [vmem:[#allocation64_spill] sm:$0xff]  ;;  %v9259_v22 = vunpack.i.h.bf16 %v9257_v41 }
 0x3ab   : > { %v2448_v1 = vsel %vm2404_vm4, %v2383_v50, %v9214_v58  ;;  %v2463_v31 = vsel %vm2404_vm4, %v2398_v10, %v9253_v14  ;;  %v8903_v36 = vunpack.i.l.bf16 %v18572_v57  ;;  %v18573_v58 = vld [vmem:[#allocation67_spill] sm:$0xff]  ;;  %v9223_v14 = vunpack.i.l.bf16 %v11771_v13  ;;  %v9881_v41 = vld [vmem:[%s9943_s21 + $0x1f0] sm:$0xff] }
 0x3ac   : > { %v8904_v37 = vunpack.i.h.bf16 %v18572_v57 }
 0x3ae   : > { %v2690_v15 = vpop.f32.mrf.mxu0 }
 0x3af   : > { %v11961_v63 = vadd.f32 %v2690_v15, %v11951_v18  ;;  %v9094_v15 = vunpack.i.h.bf16 %v18567_v45  ;;  %v9063_v45 = vunpack.i.l.bf16 %v18573_v58 }
 0x3b0   : > { %8328 = vmatmul.msk.f32.gmra.mxu2 %vm2476_vm3, %v2446_v27 }
 0x3b1   : > { %8318 = vmatmul.msk.f32.gmra.mxu1 %vm2476_vm3, %v2436_v7  ;;  %v2883_v21 = vsel %vm2882_vm5, %v11961_v63, 0.0  ;;  %v2449_v7 = vsel %vm2404_vm4, %v2384_v38, %v9218_v0  ;;  %v2399_v16 = vsel %vm2339_vm2, %v2334_v46, %v9094_v15  ;;  %v9064_v0 = vunpack.i.h.bf16 %v18573_v58  ;;  %v9262_v15 = vpop.permute.xlu1 %9261 }
 0x3b2   : > { %8343 = vmatmul.msk.f32.gmra.mxu3 %vm2476_vm3, %v2461_v42  ;;  %2884 = vadd.xlane.f32.xlu2 %v2883_v21  ;;  %v8899_v42 = vunpack.i.h.bf16 %v18568_v3  ;;  %v2464_v21 = vsel %vm2404_vm4, %v2399_v16, %v9254_v60  ;;  %v18574_v60 = vld [vmem:[#allocation61_spill] sm:$0xff]  ;;  %v2322_v46 = vsel %vm2274_vm1, %v9880_v17, %v8904_v37 }
 0x3b3   : > { %v8943_v62 = vunpack.i.l.bf16 %v18574_v60  ;;  %v8944_v49 = vunpack.i.h.bf16 %v18574_v60 }
 0x3b4   : > { %v11980_v23 = vpop.f32.mrf.mxu1 }
 0x3b5   : > { %v2337_v13 = vsel %vm2274_vm1, %v9881_v41, %v8943_v62 }
 0x3b6   : > { %v2693_v30 = vpop.f32.mrf.mxu0 }
 0x3b7   : > { %v11986_v6 = vadd.f32 %v2693_v30, %v11951_v18  ;;  %v9876_v30 = vld [vmem:[%s9943_s21 + $0x168] sm:$0xff] }
 0x3b8   : > { %8329 = vmatmul.msk.f32.gmra.mxu2 %vm2476_vm3, %v2447_v11  ;;  %v2320_v24 = vsel %vm2274_vm1, %v9876_v30, %v8899_v42 }
 0x3b9   : > { %v2886_v48 = vsel %vm2882_vm5, %v11986_v6, 0.0  ;;  %v2385_v40 = vsel %vm2339_vm2, %v2320_v24, %v9059_v29 }
 0x3ba   : > { %8344 = vmatmul.msk.f32.gmra.mxu3 %vm2476_vm3, %v2462_v44  ;;  %2887 = vadd.xlane.f32.xlu0 %v2886_v48  ;;  %v2450_v4 = vsel %vm2404_vm4, %v2385_v40, %v9219_v19  ;;  %v9877_v44 = vld [vmem:[%s9943_s21 + $0x1e0] sm:$0xff] }
 0x3bb   : > { %v2335_v9 = vsel %vm2274_vm1, %v9877_v44, %v8938_v20 }
 0x3bc   : > { %v12002_v52 = vpop.f32.mrf.mxu1  ;;  %v2400_v48 = vsel %vm2339_vm2, %v2335_v9, %v9098_v35 }
 0x3bd   : > { %v2465_v8 = vsel %vm2404_vm4, %v2400_v48, %v9258_v39  ;;  %v9264_v39 = vunpack.i.h.bf16 %v9262_v15 }
 0x3be   : > { %v2696_v2 = vpop.f32.mrf.mxu0 }
 0x3bf   : > { %v12008_v43 = vadd.f32 %v2696_v2, %v11951_v18  ;;  %v9878_v2 = vld [vmem:[%s9943_s21 + $0x170] sm:$0xff] }
 0x3c0   : > { %8330 = vmatmul.msk.f32.gmra.mxu2 %vm2476_vm3, %v2448_v1  ;;  %v2321_v50 = vsel %vm2274_vm1, %v9878_v2, %v8903_v36 }
 0x3c1   : > { %v2889_v53 = vsel %vm2882_vm5, %v12008_v43, 0.0  ;;  %v2386_v61 = vsel %vm2339_vm2, %v2321_v50, %v9063_v45 }
 0x3c2   : > { %8345 = vmatmul.msk.f32.gmra.mxu3 %vm2476_vm3, %v2463_v31  ;;  %2890 = vadd.xlane.f32.xlu1 %v2889_v53  ;;  %v2451_v3 = vsel %vm2404_vm4, %v2386_v61, %v9223_v14  ;;  %v2336_v31 = vsel %vm2274_vm1, %v9879_v25, %v8939_v33 }
 0x3c3   : > { %v2401_v53 = vsel %vm2339_vm2, %v2336_v31, %v9099_v51 }
 0x3c4   : > { %v2466_v56 = vsel %vm2404_vm4, %v2401_v53, %v9259_v22 }
 0x3c6   : > { %v2699_v12 = vpop.f32.mrf.mxu0  ;;  %v12026_v27 = vpop.f32.mrf.mxu1 }
 0x3c7   : > { %v12030_v26 = vadd.f32 %v2699_v12, %v11951_v18  ;;  %v18575_v12 = vld [vmem:[#allocation80_spill] sm:$0xff] }
 0x3c8   : > { %8331 = vmatmul.msk.f32.gmra.mxu2 %vm2476_vm3, %v2449_v7  ;;  %v9103_v38 = vunpack.i.l.bf16 %v18575_v12  ;;  %v9263_v7 = vunpack.i.l.bf16 %v9262_v15  ;;  %v9104_v35 = vunpack.i.h.bf16 %v18575_v12 }
 0x3c9   : > { %v2892_v47 = vsel %vm2882_vm5, %v12030_v26, 0.0 }
 0x3ca   : > { %8346 = vmatmul.msk.f32.gmra.mxu3 %vm2476_vm3, %v2464_v21  ;;  %2893 = vadd.xlane.f32.xlu2 %v2892_v47  ;;  %v2387_v21 = vsel %vm2339_vm2, %v2322_v46, %v9064_v0  ;;  %v2402_v5 = vsel %vm2339_vm2, %v2337_v13, %v9103_v38 }
 0x3cb   : > { %v2452_v29 = vsel %vm2404_vm4, %v2387_v21, %v9224_v59  ;;  %v2467_v20 = vsel %vm2404_vm4, %v2402_v5, %v9263_v7  ;;  %v12175_v21 = vadd.f32 %v11980_v23, %v11951_v18  ;;  %v12190_v23 = vadd.f32 %v12002_v52, %v11951_v18 }
 0x3ce   : > { %v2702_v11 = vpop.f32.mrf.mxu0  ;;  %v12048_v34 = vpop.f32.mrf.mxu1 }
 0x3cf   : > { %v12052_v28 = vadd.f32 %v2702_v11, %v11951_v18  ;;  %v9882_v11 = vld [vmem:[%s9943_s21 + $0x1f8] sm:$0xff] }
 0x3d0   : > { %8332 = vmatmul.msk.f32.gmra.mxu2 %vm2476_vm3, %v2450_v4  ;;  %v2338_v40 = vsel %vm2274_vm1, %v9882_v11, %v8944_v49  ;;  %v2934_v11 = vsel %vm2882_vm5, %v12190_v23, 0.0 }
 0x3d1   : > { %v2895_v54 = vsel %vm2882_vm5, %v12052_v28, 0.0  ;;  %v2403_v44 = vsel %vm2339_vm2, %v2338_v40, %v9104_v35  ;;  %v12194_v35 = vadd.f32 %v12048_v34, %v11951_v18 }
 0x3d2   : > { %8347 = vmatmul.msk.f32.gmra.mxu3 %vm2476_vm3, %v2465_v8  ;;  %2896 = vadd.xlane.f32.xlu2 %v2895_v54  ;;  %v2468_v9 = vsel %vm2404_vm4, %v2403_v44, %v9264_v39 }
 0x3d3   : > { %v2940_v40 = vsel %vm2882_vm5, %v12194_v35, 0.0 }
 0x3d6   : > { %v2705_v1 = vpop.f32.mrf.mxu0  ;;  %v12070_v55 = vpop.f32.mrf.mxu1 }
 0x3d7   : > { %v12074_v10 = vadd.f32 %v2705_v1, %v11951_v18  ;;  %v12211_v34 = vadd.f32 %v12070_v55, %v11951_v18 }
 0x3d8   : > { %8333 = vmatmul.msk.f32.gmra.mxu2 %vm2476_vm3, %v2451_v3 }
 0x3d9   : > { %v2898_v32 = vsel %vm2882_vm5, %v12074_v10, 0.0 }
 0x3da   : > { %8348 = vmatmul.msk.f32.gmra.mxu3 %vm2476_vm3, %v2466_v56  ;;  %2899 = vadd.xlane.f32.xlu0 %v2898_v32 }
 0x3de   : > { %v2708_v16 = vpop.f32.mrf.mxu0  ;;  %v12092_v42 = vpop.f32.mrf.mxu1 }
 0x3df   : > { %v12096_v47 = vadd.f32 %v2708_v16, %v11951_v18 }
 0x3e0   : > { %8334 = vmatmul.msk.f32.gmra.mxu2 %vm2476_vm3, %v2452_v29 }
 0x3e1   : > { %v2901_v19 = vsel %vm2882_vm5, %v12096_v47, 0.0 }
 0x3e2   : > { %8349 = vmatmul.msk.f32.gmra.mxu3 %vm2476_vm3, %v2467_v20  ;;  %2902 = vadd.xlane.f32.xlu1 %v2901_v19  ;;  %v2931_v20 = vsel %vm2882_vm5, %v12175_v21, 0.0 }
 0x3e6   : > { %v2711_v30 = vpop.f32.mrf.mxu0  ;;  %v12114_v4 = vpop.f32.mrf.mxu1 }
 0x3e7   : > { %v12110_v24 = vadd.f32 %v2711_v30, %v11951_v18 }
 0x3e9   : > { %v2904_v48 = vsel %vm2882_vm5, %v12110_v24, 0.0 }
 0x3ea   : > { %8350 = vmatmul.msk.f32.gmra.mxu3 %vm2476_vm3, %v2468_v9  ;;  %2905 = vadd.xlane.f32.xlu2 %v2904_v48  ;;  %v12215_v48 = vadd.f32 %v12114_v4, %v11951_v18 }
 0x3eb   : > { %v12121_v57 = vpop.f32.mrf.mxu2 }
 0x3ee   : > { %v2714_v36 = vpop.f32.mrf.mxu0  ;;  %v12128_v58 = vpop.f32.mrf.mxu1 }
 0x3ef   : > { %v12124_v8 = vadd.f32 %v2714_v36, %v11951_v18  ;;  %v12219_v36 = vadd.f32 %v12026_v27, %v11951_v18  ;;  %v12231_v4 = vadd.f32 %v12128_v58, %v11951_v18 }
 0x3f1   : > { %v2907_v54 = vsel %vm2882_vm5, %v12124_v8, 0.0  ;;  %v2937_v55 = vsel %vm2882_vm5, %v12219_v36, 0.0 }
 0x3f2   : > { %2908 = vadd.xlane.f32.xlu0 %v2907_v54 }
 0x3f3   : > { %v12130_v45 = vpop.f32.mrf.mxu2 }
 0x3f5   : > { %v12155_v32 = vpop.f32.mrf.mxu3 }
 0x3f6   : > { %v2717_v33 = vpop.f32.mrf.mxu0  ;;  %v12139_v2 = vpop.f32.mrf.mxu1 }
 0x3f7   : > { %v12133_v14 = vadd.f32 %v2717_v33, %v11951_v18  ;;  %v2943_v33 = vsel %vm2882_vm5, %v12211_v34, 0.0 }
 0x3f9   : > { %v2910_v51 = vsel %vm2882_vm5, %v12133_v14, 0.0 }
 0x3fa   : > { %2911 = vadd.xlane.f32.xlu1 %v2910_v51  ;;  %v2949_v51 = vsel %vm2882_vm5, %v12215_v48, 0.0 }
 0x3fb   : > { %v12137_v22 = vpop.f32.mrf.mxu2 }
 0x3fd   : > { %v12164_v12 = vpop.f32.mrf.mxu3 }
 0x3fe   : > { %v2720_v50 = vpop.f32.mrf.mxu0  ;;  %v2765_v25 = vpop.f32.mrf.mxu1 }
 0x3ff   : > { %v12142_v1 = vadd.f32 %v2720_v50, %v11951_v18  ;;  %v12234_v27 = vadd.f32 %v2765_v25, %v11951_v18 }
 0x401   : > { %v2913_v61 = vsel %vm2882_vm5, %v12142_v1, 0.0 }
 0x402   : > { %2914 = vadd.xlane.f32.xlu2 %v2913_v61  ;;  %v12238_v61 = vadd.f32 %v12092_v42, %v11951_v18 }
 0x403   : > { %v12146_v3 = vpop.f32.mrf.mxu2 }
 0x404   : > { %v2946_v58 = vsel %vm2882_vm5, %v12238_v61, 0.0 }
 0x405   : > { %v12180_v13 = vpop.f32.mrf.mxu3 }
 0x406   : > { %v2723_v31 = vpop.f32.mrf.mxu0  ;;  %v2768_v60 = vpop.f32.mrf.mxu1 }
 0x407   : > { %v12149_v53 = vadd.f32 %v2723_v31, %v11951_v18  ;;  %v12249_v25 = vadd.f32 %v2768_v60, %v11951_v18 }
 0x409   : > { %v2916_v37 = vsel %vm2882_vm5, %v12149_v53, 0.0 }
 0x40a   : > { %2917 = vadd.xlane.f32.xlu0 %v2916_v37 }
 0x40b   : > { %v12153_v56 = vpop.f32.mrf.mxu2 }
 0x40d   : > { %v12205_v9 = vpop.f32.mrf.mxu3 }
 0x40e   : > { %v2726_v0 = vpop.f32.mrf.mxu0  ;;  %v2771_v46 = vpop.f32.mrf.mxu1 }
 0x40f   : > { %v12158_v15 = vadd.f32 %v2726_v0, %v11951_v18  ;;  %v2952_v0 = vsel %vm2882_vm5, %v12231_v4, 0.0 }
 0x411   : > { %v2919_v62 = vsel %vm2882_vm5, %v12158_v15, 0.0 }
 0x412   : > { %2920 = vadd.xlane.f32.xlu1 %v2919_v62  ;;  %v2958_v62 = vsel %vm2882_vm5, %v12234_v27, 0.0 }
 0x413   : > { %v12162_v59 = vpop.f32.mrf.mxu2 }
 0x415   : > { %v12227_v50 = vpop.f32.mrf.mxu3 }
 0x416   : > { %v2729_v38 = vpop.f32.mrf.mxu0  ;;  %v2774_v49 = vpop.f32.mrf.mxu1 }
 0x417   : > { %v12167_v7 = vadd.f32 %v2729_v38, %v11951_v18  ;;  %v12252_v42 = vadd.f32 %v2774_v49, %v11951_v18  ;;  %v12256_v38 = vadd.f32 %v12139_v2, %v11951_v18 }
 0x419   : > { %v2922_v17 = vsel %vm2882_vm5, %v12167_v7, 0.0  ;;  %v2955_v60 = vsel %vm2882_vm5, %v12256_v38, 0.0 }
 0x41a   : > { %2923 = vadd.xlane.f32.xlu2 %v2922_v17 }
 0x41b   : > { %v12171_v16 = vpop.f32.mrf.mxu2 }
 0x41d   : > { %v12258_v17 = vpop.f32.mrf.mxu3 }
 0x41e   : > { %v2732_v29 = vpop.f32.mrf.mxu0  ;;  %v2777_v54 = vpop.f32.mrf.mxu1 }
 0x41f   : > { %v12178_v41 = vadd.f32 %v2732_v29, %v11951_v18  ;;  %v12269_v2 = vadd.f32 %v2777_v54, %v11951_v18 }
 0x421   : > { %v2925_v5 = vsel %vm2882_vm5, %v12178_v41, 0.0 }
 0x422   : > { %2926 = vadd.xlane.f32.xlu0 %v2925_v5  ;;  %2932 = vadd.xlane.f32.xlu2 %v2931_v20  ;;  %v2961_v5 = vsel %vm2882_vm5, %v12249_v25, 0.0  ;;  %v2967_v20 = vsel %vm2882_vm5, %v12252_v42, 0.0 }
 0x423   : > { %v12186_v19 = vpop.f32.mrf.mxu2 }
 0x426   : > { %v2735_v39 = vpop.f32.mrf.mxu0  ;;  %v2780_v37 = vpop.f32.mrf.mxu1 }
 0x427   : > { %v12197_v30 = vadd.f32 %v2735_v39, %v11951_v18 }
 0x429   : > { %v2928_v44 = vsel %vm2882_vm5, %v12197_v30, 0.0 }
 0x42a   : > { %2935 = vadd.xlane.f32.xlu0 %v2934_v11  ;;  %2941 = vadd.xlane.f32.xlu2 %v2940_v40  ;;  %v12275_v11 = vadd.f32 %v2771_v46, %v11951_v18  ;;  %v12277_v40 = vpop.f32.mrf.mxu3  ;;  %v12291_v46 = vadd.f32 %v12137_v22, %v11951_v18  ;;  %v12306_v22 = vadd.f32 %v12146_v3, %v11951_v18 }
 0x42b   : > { %2929 = vadd.xlane.f32.xlu1 %v2928_v44  ;;  %v12207_v52 = vpop.f32.mrf.mxu2  ;;  %v2970_v44 = vsel %vm2882_vm5, %v12269_v2, 0.0 }
 0x42c   : > { %v2964_v54 = vsel %vm2882_vm5, %v12275_v11, 0.0  ;;  %18577 = vst [vmem:[#allocation63_spill] sm:$0xff] %v12306_v22 }
 0x42e   : > { %v2783_v39 = vpop.f32.mrf.mxu1 }
 0x42f   : > { %v12272_v49 = vadd.f32 %v2783_v39, %v11951_v18  ;;  %v12314_v39 = vadd.f32 %v12130_v45, %v11951_v18  ;;  %v12330_v45 = vadd.f32 %v12207_v52, %v11951_v18 }
 0x431   : > { %v2982_v3 = vsel %vm2882_vm5, %v12314_v39, 0.0  ;;  %18580 = vst [vmem:[#allocation83_spill] sm:$0xff] %v12330_v45 }
 0x432   : > { %2944 = vadd.xlane.f32.xlu0 %v2943_v33  ;;  %2950 = vadd.xlane.f32.xlu2 %v2949_v51  ;;  %v2976_v33 = vsel %vm2882_vm5, %v12272_v49, 0.0 }
 0x433   : > { %2938 = vadd.xlane.f32.xlu1 %v2937_v55  ;;  %v12240_v31 = vpop.f32.mrf.mxu2  ;;  %v12287_v55 = vadd.f32 %v12121_v57, %v11951_v18 }
 0x434   : > { %v12346_v52 = vadd.f32 %v12240_v31, %v11951_v18 }
 0x435   : > { %18576 = vst [vmem:[#allocation85_spill] sm:$0xff] %v12287_v55 }
 0x436   : > { %18582 = vst [vmem:[#allocation79_spill] sm:$0xff] %v12346_v52 }
 0x43a   : > { %2953 = vadd.xlane.f32.xlu0 %v2952_v0  ;;  %2959 = vadd.xlane.f32.xlu2 %v2958_v62  ;;  %v12294_v0 = vadd.f32 %v2780_v37, %v11951_v18  ;;  %v2979_v62 = vsel %vm2882_vm5, %v12287_v55, 0.0  ;;  %v12310_v37 = vadd.f32 %v12162_v59, %v11951_v18  ;;  %v12326_v59 = vadd.f32 %v12171_v16, %v11951_v18 }
 0x43b   : > { %2947 = vadd.xlane.f32.xlu1 %v2946_v58  ;;  %v12260_v29 = vpop.f32.mrf.mxu2  ;;  %v2985_v58 = vsel %vm2882_vm5, %v12291_v46, 0.0 }
 0x43c   : > { %v2973_v57 = vsel %vm2882_vm5, %v12294_v0, 0.0  ;;  %18578 = vst [vmem:[#allocation72_spill] sm:$0xff] %v12310_v37 }
 0x43d   : > { %18579 = vst [vmem:[#allocation81_spill] sm:$0xff] %v12326_v59 }
 0x442   : > { %2962 = vadd.xlane.f32.xlu0 %v2961_v5  ;;  %2968 = vadd.xlane.f32.xlu2 %v2967_v20  ;;  %v12300_v5 = vpop.f32.mrf.mxu3 }
 0x443   : > { %2956 = vadd.xlane.f32.xlu1 %v2955_v60  ;;  %v2819_v51 = vpop.f32.mrf.mxu2  ;;  %v2988_v60 = vsel %vm2882_vm5, %v12306_v22, 0.0 }
 0x44a   : > { %2971 = vadd.xlane.f32.xlu0 %v2970_v44  ;;  %2977 = vadd.xlane.f32.xlu2 %v2976_v33  ;;  %v2994_v44 = vsel %vm2882_vm5, %v12310_v37, 0.0  ;;  %v12322_v33 = vpop.f32.mrf.mxu3 }
 0x44b   : > { %2965 = vadd.xlane.f32.xlu1 %v2964_v54  ;;  %v2822_v20 = vpop.f32.mrf.mxu2  ;;  %v12334_v54 = vadd.f32 %v12153_v56, %v11951_v18  ;;  %v12349_v56 = vadd.f32 %v2819_v51, %v11951_v18  ;;  %v12449_v55 = vadd.f32 %v12322_v33, %v11951_v18 }
 0x44d   : > { %18581 = vst [vmem:[#allocation78_spill] sm:$0xff] %v12334_v54  ;;  %v2991_v16 = vsel %vm2882_vm5, %v12334_v54, 0.0 }
 0x44e   : > { %18583 = vst [vmem:[#allocation87_spill] sm:$0xff] %v12349_v56 }
 0x44f   : > { %18597 = vst [vmem:[#allocation34_spill] sm:$0xff] %v12449_v55 }
 0x452   : > { %2980 = vadd.xlane.f32.xlu0 %v2979_v62  ;;  %2986 = vadd.xlane.f32.xlu2 %v2985_v58  ;;  %v2997_v58 = vsel %vm2882_vm5, %v12326_v59, 0.0 }
 0x453   : > { %2974 = vadd.xlane.f32.xlu1 %v2973_v57  ;;  %v2825_v62 = vpop.f32.mrf.mxu2  ;;  %v3003_v57 = vsel %vm2882_vm5, %v12330_v45, 0.0 }
 0x45a   : > { %2989 = vadd.xlane.f32.xlu0 %v2988_v60  ;;  %2995 = vadd.xlane.f32.xlu2 %v2994_v44  ;;  %v12342_v60 = vpop.xlane.xlu2 %2884  ;;  %v12353_v44 = vadd.f32 %v12186_v19, %v11951_v18  ;;  %v12366_v19 = vadd.f32 %v2822_v20, %v11951_v18 }
 0x45b   : > { %2983 = vadd.xlane.f32.xlu1 %v2982_v3  ;;  %v12355_v3 = vpop.f32.mrf.mxu3 }
 0x45c   : > { %18584 = vst [vmem:[#allocation69_spill] sm:$0xff] %v12353_v44  ;;  %v3000_v31 = vsel %vm2882_vm5, %v12353_v44, 0.0  ;;  %v12431_v44 = vadd.f32 %v12300_v5, %v11951_v18 }
 0x45d   : > { %18585 = vst [vmem:[#allocation5_spill] sm:$0xff] %v12366_v19 }
 0x45e   : > { %18595 = vst [vmem:[#allocation94_spill] sm:$0xff] %v12431_v44 }
 0x462   : > { %2998 = vadd.xlane.f32.xlu0 %v2997_v58  ;;  %3004 = vadd.xlane.f32.xlu2 %v3003_v57  ;;  %v2828_v58 = vpop.f32.mrf.mxu2  ;;  %v3006_v57 = vsel %vm2882_vm5, %v12346_v52, 0.0  ;;  %v12363_v51 = vpop.xlane.xlu2 %2893  ;;  %v12373_v52 = vadd.f32 %v12260_v29, %v11951_v18 }
 0x463   : > { %2992 = vadd.xlane.f32.xlu1 %v2991_v16  ;;  %v3012_v16 = vsel %vm2882_vm5, %v12349_v56, 0.0  ;;  %v12369_v59 = vadd.f32 %v2828_v58, %v11951_v18  ;;  %v2864_v45 = vpop.f32.mrf.mxu3  ;;  %v12383_v58 = vadd.f32 %v12164_v12, %v11951_v18  ;;  %v12385_v29 = vpop.xlane.xlu0 %2887 }
 0x464   : > { %18587 = vst [vmem:[#allocation76_spill] sm:$0xff] %v12373_v52  ;;  %v3009_v20 = vsel %vm2882_vm5, %v12373_v52, 0.0 }
 0x465   : > { %18586 = vst [vmem:[#allocation10_spill] sm:$0xff] %v12369_v59 }
 0x466   : > { %18588 = vst [vmem:[#allocation86_spill] sm:$0xff] %v12383_v58 }
 0x46a   : > { %3007 = vadd.xlane.f32.xlu0 %v3006_v57  ;;  %3013 = vadd.xlane.f32.xlu2 %v3012_v16  ;;  %v3015_v57 = vsel %vm2882_vm5, %v12366_v19, 0.0  ;;  %v3021_v16 = vsel %vm2882_vm5, %v12369_v59, 0.0  ;;  %v2831_v56 = vpop.f32.mrf.mxu2  ;;  %v12393_v59 = vadd.f32 %v2825_v62, %v11951_v18  ;;  %v12407_v62 = vadd.f32 %v12227_v50, %v11951_v18 }
 0x46b   : > { %3001 = vadd.xlane.f32.xlu1 %v3000_v31  ;;  %v12387_v31 = vpop.xlane.xlu2 %2896  ;;  %v12390_v19 = vadd.f32 %v2831_v56, %v11951_v18  ;;  %v2867_v12 = vpop.f32.mrf.mxu3  ;;  %v12403_v56 = vadd.f32 %v12180_v13, %v11951_v18 }
 0x46c   : > { %18590 = vst [vmem:[#allocation90_spill] sm:$0xff] %v12393_v59  ;;  %v3018_v52 = vsel %vm2882_vm5, %v12393_v59, 0.0  ;;  %v3039_v13 = vsel %vm2882_vm5, %v12407_v62, 0.0 }
 0x46d   : > { %18589 = vst [vmem:[#allocation91_spill] sm:$0xff] %v12390_v19 }
 0x46e   : > { %18591 = vst [vmem:[#allocation89_spill] sm:$0xff] %v12403_v56 }
 0x46f   : > { %18592 = vst [vmem:[#allocation82_spill] sm:$0xff] %v12407_v62 }
 0x472   : > { %3016 = vadd.xlane.f32.xlu0 %v3015_v57  ;;  %3022 = vadd.xlane.f32.xlu2 %v3021_v16  ;;  %v9901_v57 = vmov 32.0   ;;  %v3024_v16 = vsel %vm2882_vm5, %v12390_v19, 0.0 }
 0x473   : > { %3010 = vadd.xlane.f32.xlu1 %v3009_v20  ;;  %9271 = vrcp.f32 %v9901_v57  ;;  %v3030_v20 = vsel %vm2882_vm5, %v12383_v58, 0.0  ;;  %v12409_v57 = vpop.xlane.xlu0 %2899  ;;  %v12411_v19 = vpop.xlane.xlu2 %2905 }
 0x474   : > { %v2870_v22 = vpop.f32.mrf.mxu3 }
 0x479   : > { %v9272_v58 = vpop.eup %9271 }
 0x47a   : > { %3025 = vadd.xlane.f32.xlu0 %v3024_v16  ;;  %3031 = vadd.xlane.f32.xlu2 %v3030_v20  ;;  %v12415_v16 = vadd.f32 %v12155_v32, %v11951_v18  ;;  %v12417_v20 = vpop.xlane.xlu1 %2890  ;;  %v3076_v59 = vmul.f32 32.0, %v9272_v58  ;;  %v12427_v32 = vadd.f32 %v12258_v17, %v11951_v18  ;;  %v3048_v17 = vsel %vm2882_vm5, %v12431_v44, 0.0 }
 0x47b   : > { %3019 = vadd.xlane.f32.xlu1 %v3018_v52  ;;  %v3033_v52 = vsel %vm2882_vm5, %v12403_v56, 0.0  ;;  %v12433_v56 = vpop.xlane.xlu0 %2908  ;;  %v12435_v37 = vpop.xlane.xlu2 %2914  ;;  %vm3080_vm6 = vweird.f32 %v9272_v58 }
 0x47c   : > { %18593 = vst [vmem:[#allocation88_spill] sm:$0xff] %v12415_v16  ;;  %v3027_v50 = vsel %vm2882_vm5, %v12415_v16, 0.0  ;;  %v2873_v44 = vpop.f32.mrf.mxu3 }
 0x47d   : > { %18594 = vst [vmem:[#allocation84_spill] sm:$0xff] %v12427_v32  ;;  %v12476_v54 = vadd.f32 %v2873_v44, %v11951_v18 }
 0x47f   : > { %18600 = vst [vmem:[#allocation11_spill] sm:$0xff] %v12476_v54  ;;  %v3066_v44 = vsel %vm2882_vm5, %v12476_v54, 0.0 }
 0x482   : > { %3034 = vadd.xlane.f32.xlu0 %v3033_v52  ;;  %3040 = vadd.xlane.f32.xlu2 %v3039_v13  ;;  %v12439_v52 = vadd.f32 %v12205_v9, %v11951_v18  ;;  %v3077_v13 = vsub.f32 1.0, %v3076_v59  ;;  %v2903_v62 = vpop.xlane.xlu1 %2902  ;;  %v12452_v9 = vadd.f32 %v2864_v45, %v11951_v18 }
 0x483   : > { %3028 = vadd.xlane.f32.xlu1 %v3027_v50  ;;  %v3042_v50 = vsel %vm2882_vm5, %v12427_v32, 0.0  ;;  %v12454_v59 = vpop.xlane.xlu0 %2917 }
 0x484   : > { %18596 = vst [vmem:[#allocation93_spill] sm:$0xff] %v12439_v52  ;;  %v3078_v16 = vmul.f32 %v9272_v58, %v3077_v13  ;;  %v3036_v5 = vsel %vm2882_vm5, %v12439_v52, 0.0  ;;  %v12460_v13 = vadd.f32 %v12277_v40, %v11951_v18  ;;  %v3057_v33 = vsel %vm2882_vm5, %v12452_v9, 0.0 }
 0x485   : > { %18598 = vst [vmem:[#allocation92_spill] sm:$0xff] %v12452_v9 }
 0x486   : > { %v3045_v52 = vsel %vm2882_vm5, %v12460_v13, 0.0 }
 0x48a   : > { %3043 = vadd.xlane.f32.xlu0 %v3042_v50  ;;  %3049 = vadd.xlane.f32.xlu2 %v3048_v17  ;;  %v3079_v50 = vadd.f32 %v9272_v58, %v3078_v16  ;;  %v2912_v17 = vpop.xlane.xlu1 %2911  ;;  %v12473_v16 = vadd.f32 %v2867_v12, %v11951_v18 }
 0x48b   : > { %3037 = vadd.xlane.f32.xlu1 %v3036_v5  ;;  %v3051_v5 = vsel %vm2882_vm5, %v12449_v55, 0.0 }
 0x48c   : > { %v12466_v45 = vsel %vm3080_vm6, %v9272_v58, %v3079_v50  ;;  %18599 = vst [vmem:[#allocation9_spill] sm:$0xff] %v12473_v16  ;;  %v12484_v58 = vadd.f32 %v12355_v3, %v11951_v18  ;;  %v3060_v12 = vsel %vm2882_vm5, %v12473_v16, 0.0 }
 0x48d   : > { %v12456_v32 = vpop.xlane.xlu2 %2923  ;;  %v3082_v40 = vmul.f32 %v12466_v45, %v12342_v60  ;;  %v2876_v60 = vpop.f32.mrf.mxu3  ;;  %v3083_v3 = vmul.f32 %v12466_v45, %v12385_v29 }
 0x48e   : > { %18601 = vst [vmem:[#allocation95_spill] sm:$0xff] %v12484_v58 }
 0x48f   : > { %v12516_v29 = vsub.f32 %v11986_v6, %v3083_v3  ;;  %v3088_v6 = vmul.f32 %v12466_v45, %v2903_v62 }
 0x491   : > { %18604 = vst [vmem:[#allocation33_spill] sm:$0xff] %v12516_v29  ;;  %v12548_v62 = vsub.f32 %v12096_v47, %v3088_v6 }
 0x492   : > { %3052 = vadd.xlane.f32.xlu0 %v3051_v5  ;;  %3058 = vadd.xlane.f32.xlu2 %v3057_v33  ;;  %v12486_v50 = vpop.xlane.xlu1 %2920  ;;  %v3054_v5 = vsel %vm2882_vm5, %v12484_v58, 0.0  ;;  %v12502_v33 = vadd.f32 %v2876_v60, %v11951_v18  ;;  %v3086_v58 = vmul.f32 %v12466_v45, %v12387_v31 }
 0x493   : > { %3046 = vadd.xlane.f32.xlu1 %v3045_v52  ;;  %v12489_v52 = vsub.f32 %v11961_v63, %v3082_v40  ;;  %v3085_v63 = vmul.f32 %v12466_v45, %v12363_v51 }
 0x494   : > { %18603 = vst [vmem:[#allocation15_spill] sm:$0xff] %v12502_v33  ;;  %v3069_v60 = vsel %vm2882_vm5, %v12502_v33, 0.0  ;;  %v12545_v31 = vsub.f32 %v12052_v28, %v3086_v58  ;;  %v3089_v28 = vmul.f32 %v12466_v45, %v12411_v19 }
 0x495   : > { %v12478_v55 = vpop.xlane.xlu0 %2926  ;;  %v12480_v9 = vpop.xlane.xlu2 %2932  ;;  %18602 = vst [vmem:[#allocation21_spill] sm:$0xff] %v12489_v52  ;;  %v12519_v51 = vsub.f32 %v12030_v26, %v3085_v63  ;;  %v3211_v63 = vmul.f32 %v12516_v29, %v12516_v29 }
 0x497   : > { %18605 = vst [vmem:[#allocation27_spill] sm:$0xff] %v12519_v51  ;;  %v3277_v33 = vsel %vm2882_vm5, %v3211_v63, 0.0 }
 0x49a   : > { %3061 = vadd.xlane.f32.xlu0 %v3060_v12  ;;  %3067 = vadd.xlane.f32.xlu2 %v3066_v44  ;;  %v3210_v12 = vmul.f32 %v12489_v52, %v12489_v52  ;;  %v12511_v44 = vadd.f32 %v2870_v22, %v11951_v18  ;;  %v2879_v22 = vpop.f32.mrf.mxu3 }
 0x49b   : > { %3055 = vadd.xlane.f32.xlu1 %v3054_v5 }
 0x49c   : > { %v3274_v54 = vsel %vm2882_vm5, %v3210_v12, 0.0  ;;  %v3063_v52 = vsel %vm2882_vm5, %v12511_v44, 0.0  ;;  %v3084_v12 = vmul.f32 %v12466_v45, %v12417_v20  ;;  %v3091_v20 = vmul.f32 %v12466_v45, %v2912_v17 }
 0x49d   : > { %v12504_v40 = vpop.xlane.xlu0 %2935  ;;  %v12506_v16 = vpop.xlane.xlu2 %2941  ;;  %v12575_v17 = vsub.f32 %v12110_v24, %v3089_v28  ;;  %v3094_v24 = vmul.f32 %v12466_v45, %v12486_v50 }
 0x49e   : > { %v12513_v5 = vpop.xlane.xlu1 %2929  ;;  %v12578_v6 = vsub.f32 %v12133_v14, %v3091_v20 }
 0x49f   : > { %v3217_v20 = vmul.f32 %v12575_v17, %v12575_v17 }
 0x4a2   : > { %3070 = vadd.xlane.f32.xlu0 %v3069_v60  ;;  %3275 = vadd.xlane.f32.xlu2 %v3274_v54  ;;  %v3213_v54 = vmul.f32 %v12519_v51, %v12519_v51  ;;  %v12553_v51 = vsub.f32 %v12008_v43, %v3084_v12  ;;  %v3216_v43 = vmul.f32 %v12548_v62, %v12548_v62 }
 0x4a3   : > { %3064 = vadd.xlane.f32.xlu1 %v3063_v52  ;;  %v12540_v52 = vadd.f32 %v2879_v22, %v11951_v18  ;;  %v3214_v22 = vmul.f32 %v12545_v31, %v12545_v31 }
 0x4a4   : > { %v3283_v29 = vsel %vm2882_vm5, %v3213_v54, 0.0  ;;  %v3212_v19 = vmul.f32 %v12553_v51, %v12553_v51  ;;  %v3292_v54 = vsel %vm2882_vm5, %v3216_v43, 0.0 }
 0x4a5   : > { %v12529_v3 = vpop.xlane.xlu0 %2944  ;;  %v12531_v26 = vpop.xlane.xlu2 %2950  ;;  %v3072_v18 = vsel %vm2882_vm5, %v12540_v52, 0.0  ;;  %v3286_v63 = vsel %vm2882_vm5, %v3214_v22, 0.0  ;;  %v3090_v22 = vmul.f32 %v12466_v45, %v12433_v56 }
 0x4a6   : > { %v12542_v60 = vpop.xlane.xlu1 %2938 }
 0x4aa   : > { %3278 = vadd.xlane.f32.xlu0 %v3277_v33  ;;  %3284 = vadd.xlane.f32.xlu2 %v3283_v29  ;;  %v3087_v33 = vmul.f32 %v12466_v45, %v12409_v57  ;;  %v3280_v57 = vsel %vm2882_vm5, %v3212_v19, 0.0  ;;  %v3295_v19 = vsel %vm2882_vm5, %v3217_v20, 0.0  ;;  %v3093_v20 = vmul.f32 %v12466_v45, %v12454_v59 }
 0x4ab   : > { %3073 = vadd.xlane.f32.xlu1 %v3072_v18  ;;  %v3092_v18 = vmul.f32 %v12466_v45, %v12435_v37 }
 0x4ac   : > { %v12583_v12 = vsub.f32 %v12074_v10, %v3087_v33  ;;  %v3219_v10 = vmul.f32 %v12578_v6, %v12578_v6  ;;  %v12608_v33 = vsub.f32 %v12158_v15, %v3094_v24 }
 0x4ad   : > { %v12560_v47 = vpop.xlane.xlu0 %2953  ;;  %v12562_v58 = vpop.xlane.xlu2 %2959  ;;  %v12605_v50 = vsub.f32 %v12142_v1, %v3092_v18  ;;  %v3097_v1 = vmul.f32 %v12466_v45, %v12513_v5 }
 0x4ae   : > { %v12570_v29 = vpop.xlane.xlu1 %2947  ;;  %v3215_v37 = vmul.f32 %v12583_v12, %v12583_v12 }
 0x4af   : > { %v3220_v24 = vmul.f32 %v12605_v50, %v12605_v50 }
 0x4b0   : > { %v3289_v56 = vsel %vm2882_vm5, %v3215_v37, 0.0 }
 0x4b1   : > { %v3304_v37 = vsel %vm2882_vm5, %v3220_v24, 0.0  ;;  %v3096_v24 = vmul.f32 %v12466_v45, %v12478_v55 }
 0x4b2   : > { %3287 = vadd.xlane.f32.xlu0 %v3286_v63  ;;  %3293 = vadd.xlane.f32.xlu2 %v3292_v54  ;;  %v3301_v63 = vsel %vm2882_vm5, %v3219_v10, 0.0  ;;  %v12613_v54 = vsub.f32 %v12124_v8, %v3090_v22  ;;  %v3222_v8 = vmul.f32 %v12608_v33, %v12608_v33  ;;  %v12638_v22 = vsub.f32 %v12197_v30, %v3097_v1 }
 0x4b3   : > { %3281 = vadd.xlane.f32.xlu1 %v3280_v57  ;;  %v3095_v57 = vmul.f32 %v12466_v45, %v12456_v32 }
 0x4b4   : > { %v3218_v32 = vmul.f32 %v12613_v54, %v12613_v54 }
 0x4b5   : > { %v12590_v14 = vpop.xlane.xlu0 %2962  ;;  %v12592_v28 = vpop.xlane.xlu2 %2968  ;;  %v12635_v5 = vsub.f32 %v12167_v7, %v3095_v57  ;;  %v3100_v7 = vmul.f32 %v12466_v45, %v12542_v60 }
 0x4b6   : > { %v12600_v43 = vpop.xlane.xlu1 %2956  ;;  %v3298_v59 = vsel %vm2882_vm5, %v3218_v32, 0.0 }
 0x4b7   : > { %v3223_v1 = vmul.f32 %v12635_v5, %v12635_v5 }
 0x4b9   : > { %v3313_v32 = vsel %vm2882_vm5, %v3223_v1, 0.0  ;;  %v3099_v1 = vmul.f32 %v12466_v45, %v12504_v40 }
 0x4ba   : > { %3296 = vadd.xlane.f32.xlu0 %v3295_v19  ;;  %3302 = vadd.xlane.f32.xlu2 %v3301_v63  ;;  %v3310_v19 = vsel %vm2882_vm5, %v3222_v8, 0.0  ;;  %v12643_v63 = vsub.f32 %v12149_v53, %v3093_v20  ;;  %v3225_v53 = vmul.f32 %v12638_v22, %v12638_v22  ;;  %v12668_v20 = vsub.f32 %v12219_v36, %v3100_v7 }
 0x4bb   : > { %3290 = vadd.xlane.f32.xlu1 %v3289_v56  ;;  %v3098_v56 = vmul.f32 %v12466_v45, %v12480_v9 }
 0x4bc   : > { %v3221_v9 = vmul.f32 %v12643_v63, %v12643_v63  ;;  %18606 = vst [vmem:[#allocation96_spill] sm:$0xff] %v12668_v20 }
 0x4bd   : > { %v12620_v15 = vpop.xlane.xlu0 %2971  ;;  %v12622_v18 = vpop.xlane.xlu2 %2977  ;;  %v12665_v60 = vsub.f32 %v12175_v21, %v3098_v56  ;;  %v3103_v21 = vmul.f32 %v12466_v45, %v12570_v29 }
 0x4be   : > { %v12630_v10 = vpop.xlane.xlu1 %2965  ;;  %v3307_v55 = vsel %vm2882_vm5, %v3221_v9, 0.0 }
 0x4bf   : > { %v3226_v7 = vmul.f32 %v12665_v60, %v12665_v60 }
 0x4c1   : > { %v3322_v9 = vsel %vm2882_vm5, %v3226_v7, 0.0  ;;  %v3102_v7 = vmul.f32 %v12466_v45, %v12529_v3 }
 0x4c2   : > { %3305 = vadd.xlane.f32.xlu0 %v3304_v37  ;;  %3311 = vadd.xlane.f32.xlu2 %v3310_v19  ;;  %v3319_v37 = vsel %vm2882_vm5, %v3225_v53, 0.0  ;;  %v12673_v19 = vsub.f32 %v12178_v41, %v3096_v24  ;;  %v3228_v41 = vmul.f32 %v12668_v20, %v12668_v20  ;;  %v12698_v24 = vsub.f32 %v12238_v61, %v3103_v21 }
 0x4c3   : > { %3299 = vadd.xlane.f32.xlu1 %v3298_v59  ;;  %v3101_v59 = vmul.f32 %v12466_v45, %v12506_v16 }
 0x4c4   : > { %18607 = vst [vmem:[#allocation29_spill] sm:$0xff] %v12673_v19  ;;  %v3224_v16 = vmul.f32 %v12673_v19, %v12673_v19 }
 0x4c5   : > { %v12650_v30 = vpop.xlane.xlu0 %2980  ;;  %v12652_v57 = vpop.xlane.xlu2 %2986  ;;  %v12695_v29 = vsub.f32 %v12194_v35, %v3101_v59  ;;  %18609 = vst [vmem:[#allocation97_spill] sm:$0xff] %v12698_v24  ;;  %v3106_v35 = vmul.f32 %v12466_v45, %v12600_v43 }
 0x4c6   : > { %v12660_v8 = vpop.xlane.xlu1 %2974  ;;  %v3316_v40 = vsel %vm2882_vm5, %v3224_v16, 0.0 }
 0x4c7   : > { %18608 = vst [vmem:[#allocation98_spill] sm:$0xff] %v12695_v29  ;;  %v3229_v21 = vmul.f32 %v12695_v29, %v12695_v29 }
 0x4c9   : > { %v3331_v16 = vsel %vm2882_vm5, %v3229_v21, 0.0  ;;  %v3105_v21 = vmul.f32 %v12466_v45, %v12560_v47 }
 0x4ca   : > { %3314 = vadd.xlane.f32.xlu0 %v3313_v32  ;;  %3320 = vadd.xlane.f32.xlu2 %v3319_v37  ;;  %v3328_v32 = vsel %vm2882_vm5, %v3228_v41, 0.0  ;;  %v12703_v37 = vsub.f32 %v12190_v23, %v3099_v1  ;;  %v3231_v23 = vmul.f32 %v12698_v24, %v12698_v24  ;;  %v12728_v1 = vsub.f32 %v12256_v38, %v3106_v35 }
 0x4cb   : > { %3308 = vadd.xlane.f32.xlu1 %v3307_v55  ;;  %v3104_v55 = vmul.f32 %v12466_v45, %v12531_v26 }
 0x4cc   : > { %18610 = vst [vmem:[#allocation17_spill] sm:$0xff] %v12703_v37  ;;  %v3227_v26 = vmul.f32 %v12703_v37, %v12703_v37 }
 0x4cd   : > { %v12680_v36 = vpop.xlane.xlu0 %2989  ;;  %v12682_v56 = vpop.xlane.xlu2 %2995  ;;  %v12725_v43 = vsub.f32 %v12215_v48, %v3104_v55  ;;  %18612 = vst [vmem:[#allocation38_spill] sm:$0xff] %v12728_v1  ;;  %v3109_v48 = vmul.f32 %v12466_v45, %v12630_v10 }
 0x4ce   : > { %v12690_v53 = vpop.xlane.xlu1 %2983  ;;  %v3325_v3 = vsel %vm2882_vm5, %v3227_v26, 0.0 }
 0x4cf   : > { %18611 = vst [vmem:[#allocation23_spill] sm:$0xff] %v12725_v43  ;;  %v3232_v35 = vmul.f32 %v12725_v43, %v12725_v43 }
 0x4d1   : > { %v3340_v26 = vsel %vm2882_vm5, %v3232_v35, 0.0  ;;  %v3108_v35 = vmul.f32 %v12466_v45, %v12590_v14 }
 0x4d2   : > { %3323 = vadd.xlane.f32.xlu0 %v3322_v9  ;;  %3329 = vadd.xlane.f32.xlu2 %v3328_v32  ;;  %v3337_v9 = vsel %vm2882_vm5, %v3231_v23, 0.0  ;;  %v12733_v32 = vsub.f32 %v12211_v34, %v3102_v7  ;;  %v3234_v34 = vmul.f32 %v12728_v1, %v12728_v1  ;;  %v12758_v7 = vsub.f32 %v12275_v11, %v3109_v48 }
 0x4d3   : > { %3317 = vadd.xlane.f32.xlu1 %v3316_v40  ;;  %v3107_v40 = vmul.f32 %v12466_v45, %v12562_v58 }
 0x4d4   : > { %18613 = vst [vmem:[#allocation99_spill] sm:$0xff] %v12733_v32  ;;  %v3230_v58 = vmul.f32 %v12733_v32, %v12733_v32 }
 0x4d5   : > { %v12710_v61 = vpop.xlane.xlu0 %2998  ;;  %v12712_v59 = vpop.xlane.xlu2 %3004  ;;  %v12755_v10 = vsub.f32 %v12234_v27, %v3107_v40  ;;  %18615 = vst [vmem:[#allocation101_spill] sm:$0xff] %v12758_v7  ;;  %v3112_v27 = vmul.f32 %v12466_v45, %v12660_v8 }
 0x4d6   : > { %v12720_v41 = vpop.xlane.xlu1 %2992  ;;  %v3334_v47 = vsel %vm2882_vm5, %v3230_v58, 0.0 }
 0x4d7   : > { %18614 = vst [vmem:[#allocation22_spill] sm:$0xff] %v12755_v10  ;;  %v3235_v48 = vmul.f32 %v12755_v10, %v12755_v10 }
 0x4d9   : > { %v3349_v58 = vsel %vm2882_vm5, %v3235_v48, 0.0  ;;  %v3111_v48 = vmul.f32 %v12466_v45, %v12620_v15 }
 0x4da   : > { %3332 = vadd.xlane.f32.xlu0 %v3331_v16  ;;  %3338 = vadd.xlane.f32.xlu2 %v3337_v9  ;;  %v3346_v16 = vsel %vm2882_vm5, %v3234_v34, 0.0  ;;  %v12763_v9 = vsub.f32 %v12231_v4, %v3105_v21  ;;  %v3237_v4 = vmul.f32 %v12758_v7, %v12758_v7  ;;  %v12788_v21 = vsub.f32 %v12294_v0, %v3112_v27 }
 0x4db   : > { %3326 = vadd.xlane.f32.xlu1 %v3325_v3  ;;  %v3110_v3 = vmul.f32 %v12466_v45, %v12592_v28 }
 0x4dc   : > { %18616 = vst [vmem:[#allocation103_spill] sm:$0xff] %v12763_v9  ;;  %v3233_v28 = vmul.f32 %v12763_v9, %v12763_v9 }
 0x4dd   : > { %v12740_v38 = vpop.xlane.xlu0 %3007  ;;  %v12742_v55 = vpop.xlane.xlu2 %3013  ;;  %v12785_v8 = vsub.f32 %v12252_v42, %v3110_v3  ;;  %18618 = vst [vmem:[#allocation2_spill] sm:$0xff] %v12788_v21  ;;  %v3115_v42 = vmul.f32 %v12466_v45, %v12690_v53 }
 0x4de   : > { %v12750_v23 = vpop.xlane.xlu1 %3001  ;;  %v3343_v14 = vsel %vm2882_vm5, %v3233_v28, 0.0 }
 0x4df   : > { %18617 = vst [vmem:[#allocation16_spill] sm:$0xff] %v12785_v8  ;;  %v3238_v27 = vmul.f32 %v12785_v8, %v12785_v8 }
 0x4e1   : > { %v3358_v28 = vsel %vm2882_vm5, %v3238_v27, 0.0  ;;  %v3114_v27 = vmul.f32 %v12466_v45, %v12650_v30 }
 0x4e2   : > { %3341 = vadd.xlane.f32.xlu0 %v3340_v26  ;;  %3347 = vadd.xlane.f32.xlu2 %v3346_v16  ;;  %v3355_v26 = vsel %vm2882_vm5, %v3237_v4, 0.0  ;;  %v12793_v16 = vsub.f32 %v12249_v25, %v3108_v35  ;;  %v3240_v25 = vmul.f32 %v12788_v21, %v12788_v21  ;;  %v12818_v35 = vsub.f32 %v12314_v39, %v3115_v42 }
 0x4e3   : > { %3335 = vadd.xlane.f32.xlu1 %v3334_v47  ;;  %v3113_v47 = vmul.f32 %v12466_v45, %v12622_v18 }
 0x4e4   : > { %18619 = vst [vmem:[#allocation100_spill] sm:$0xff] %v12793_v16  ;;  %v3236_v18 = vmul.f32 %v12793_v16, %v12793_v16 }
 0x4e5   : > { %v12770_v11 = vpop.xlane.xlu0 %3016  ;;  %v12772_v40 = vpop.xlane.xlu2 %3022  ;;  %v12815_v53 = vsub.f32 %v12272_v49, %v3113_v47  ;;  %18621 = vst [vmem:[#allocation8_spill] sm:$0xff] %v12818_v35  ;;  %v3118_v49 = vmul.f32 %v12466_v45, %v12720_v41 }
 0x4e6   : > { %v12780_v34 = vpop.xlane.xlu1 %3010  ;;  %v3352_v15 = vsel %vm2882_vm5, %v3236_v18, 0.0 }
 0x4e7   : > { %18620 = vst [vmem:[#allocation13_spill] sm:$0xff] %v12815_v53  ;;  %v3241_v42 = vmul.f32 %v12815_v53, %v12815_v53 }
 0x4ea   : > { %3350 = vadd.xlane.f32.xlu0 %v3349_v58  ;;  %3356 = vadd.xlane.f32.xlu2 %v3355_v26  ;;  %v3364_v58 = vsel %vm2882_vm5, %v3240_v25, 0.0  ;;  %v12823_v26 = vsub.f32 %v12269_v2, %v3111_v48  ;;  %v3243_v2 = vmul.f32 %v12818_v35, %v12818_v35  ;;  %v18624_v48 = vld [vmem:[#allocation78_spill] sm:$0xff] }
 0x4eb   : > { %3344 = vadd.xlane.f32.xlu1 %v3343_v14  ;;  %v3116_v14 = vmul.f32 %v12466_v45, %v12652_v57  ;;  %v12848_v18 = vsub.f32 %v18624_v48, %v3118_v49  ;;  %v18628_v48 = vld [vmem:[#allocation72_spill] sm:$0xff] }
 0x4ec   : > { %18622 = vst [vmem:[#allocation4_spill] sm:$0xff] %v12823_v26  ;;  %v3239_v57 = vmul.f32 %v12823_v26, %v12823_v26  ;;  %v3119_v26 = vmul.f32 %v12466_v45, %v12682_v56 }
 0x4ed   : > { %v12800_v0 = vpop.xlane.xlu0 %3025  ;;  %v12802_v3 = vpop.xlane.xlu2 %3031  ;;  %v12845_v41 = vsub.f32 %v12291_v46, %v3116_v14  ;;  %18625 = vst [vmem:[#allocation25_spill] sm:$0xff] %v12848_v18  ;;  %v3121_v46 = vmul.f32 %v12466_v45, %v12750_v23 }
 0x4ee   : > { %v12810_v4 = vpop.xlane.xlu1 %3019  ;;  %v3361_v30 = vsel %vm2882_vm5, %v3239_v57, 0.0  ;;  %v12875_v23 = vsub.f32 %v18628_v48, %v3119_v26  ;;  %v3124_v26 = vmul.f32 %v12466_v45, %v12780_v34 }
 0x4ef   : > { %18623 = vst [vmem:[#allocation28_spill] sm:$0xff] %v12845_v41 }
 0x4f0   : > { %18629 = vst [vmem:[#allocation26_spill] sm:$0xff] %v12875_v23 }
 0x4f2   : > { %3359 = vadd.xlane.f32.xlu0 %v3358_v28  ;;  %3365 = vadd.xlane.f32.xlu2 %v3364_v58  ;;  %v3367_v28 = vsel %vm2882_vm5, %v3241_v42, 0.0  ;;  %v3373_v58 = vsel %vm2882_vm5, %v3243_v2, 0.0  ;;  %v3244_v42 = vmul.f32 %v12845_v41, %v12845_v41  ;;  %v3246_v2 = vmul.f32 %v12848_v18, %v12848_v18  ;;  %v18632_v41 = vld [vmem:[#allocation63_spill] sm:$0xff] }
 0x4f3   : > { %3353 = vadd.xlane.f32.xlu1 %v3352_v15  ;;  %v18626_v15 = vld [vmem:[#allocation85_spill] sm:$0xff] }
 0x4f4   : > { %v12853_v35 = vsub.f32 %v18626_v15, %v3114_v27  ;;  %v3117_v27 = vmul.f32 %v12466_v45, %v12680_v36  ;;  %v3376_v15 = vsel %vm2882_vm5, %v3244_v42, 0.0  ;;  %v3247_v42 = vmul.f32 %v12875_v23, %v12875_v23  ;;  %v18638_v23 = vld [vmem:[#allocation81_spill] sm:$0xff] }
 0x4f5   : > { %v12830_v39 = vpop.xlane.xlu0 %3034  ;;  %v12832_v47 = vpop.xlane.xlu2 %3040 }
 0x4f6   : > { %v12840_v25 = vpop.xlane.xlu1 %3028  ;;  %18627 = vst [vmem:[#allocation7_spill] sm:$0xff] %v12853_v35  ;;  %v3242_v56 = vmul.f32 %v12853_v35, %v12853_v35  ;;  %v12883_v18 = vsub.f32 %v18632_v41, %v3117_v27  ;;  %v3122_v35 = vmul.f32 %v12466_v45, %v12712_v59 }
 0x4f8   : > { %18633 = vst [vmem:[#allocation12_spill] sm:$0xff] %v12883_v18  ;;  %v3370_v36 = vsel %vm2882_vm5, %v3242_v56, 0.0  ;;  %v3245_v59 = vmul.f32 %v12883_v18, %v12883_v18  ;;  %v18634_v56 = vld [vmem:[#allocation83_spill] sm:$0xff]  ;;  %v3125_v18 = vmul.f32 %v12466_v45, %v12742_v55 }
 0x4f9   : > { %v12905_v34 = vsub.f32 %v18634_v56, %v3122_v35  ;;  %v3127_v35 = vmul.f32 %v12466_v45, %v12810_v4 }
 0x4fa   : > { %3368 = vadd.xlane.f32.xlu0 %v3367_v28  ;;  %3374 = vadd.xlane.f32.xlu2 %v3373_v58  ;;  %v18630_v28 = vld [vmem:[#allocation69_spill] sm:$0xff] }
 0x4fb   : > { %3362 = vadd.xlane.f32.xlu1 %v3361_v30  ;;  %v12878_v58 = vsub.f32 %v18630_v28, %v3121_v46  ;;  %v3382_v30 = vsel %vm2882_vm5, %v3246_v2, 0.0  ;;  %v3120_v2 = vmul.f32 %v12466_v45, %v12710_v61  ;;  %18635 = vst [vmem:[#allocation14_spill] sm:$0xff] %v12905_v34  ;;  %v18636_v28 = vld [vmem:[#allocation76_spill] sm:$0xff]  ;;  %v3379_v61 = vsel %vm2882_vm5, %v3245_v59, 0.0  ;;  %v18640_v59 = vld [vmem:[#allocation87_spill] sm:$0xff] }
 0x4fc   : > { %v12935_v4 = vsub.f32 %v18640_v59, %v3125_v18  ;;  %v3130_v18 = vmul.f32 %v12466_v45, %v12840_v25  ;;  %v18646_v25 = vld [vmem:[#allocation10_spill] sm:$0xff] }
 0x4fd   : > { %v12860_v14 = vpop.xlane.xlu0 %3043  ;;  %v12862_v49 = vpop.xlane.xlu2 %3049  ;;  %18631 = vst [vmem:[#allocation3_spill] sm:$0xff] %v12878_v58  ;;  %v3249_v41 = vmul.f32 %v12878_v58, %v12878_v58  ;;  %v12913_v58 = vsub.f32 %v18638_v23, %v3120_v2 }
 0x4fe   : > { %v12870_v57 = vpop.xlane.xlu1 %3037  ;;  %18641 = vst [vmem:[#allocation37_spill] sm:$0xff] %v12935_v4 }
 0x4ff   : > { %18639 = vst [vmem:[#allocation19_spill] sm:$0xff] %v12913_v58  ;;  %v3248_v55 = vmul.f32 %v12913_v58, %v12913_v58  ;;  %v3128_v58 = vmul.f32 %v12466_v45, %v12772_v40 }
 0x502   : > { %3377 = vadd.xlane.f32.xlu0 %v3376_v15  ;;  %3383 = vadd.xlane.f32.xlu2 %v3382_v30  ;;  %v12908_v15 = vsub.f32 %v18636_v28, %v3124_v26  ;;  %v3385_v30 = vsel %vm2882_vm5, %v3247_v42, 0.0  ;;  %v3250_v42 = vmul.f32 %v12905_v34, %v12905_v34  ;;  %v18642_v28 = vld [vmem:[#allocation90_spill] sm:$0xff]  ;;  %v18644_v34 = vld [vmem:[#allocation79_spill] sm:$0xff] }
 0x503   : > { %3371 = vadd.xlane.f32.xlu1 %v3370_v36  ;;  %v3391_v36 = vsel %vm2882_vm5, %v3249_v41, 0.0  ;;  %v3123_v41 = vmul.f32 %v12466_v45, %v12740_v38  ;;  %v3388_v38 = vsel %vm2882_vm5, %v3248_v55, 0.0 }
 0x504   : > { %18637 = vst [vmem:[#allocation36_spill] sm:$0xff] %v12908_v15  ;;  %v3252_v23 = vmul.f32 %v12908_v15, %v12908_v15 }
 0x505   : > { %v12890_v46 = vpop.xlane.xlu0 %3052  ;;  %v12892_v48 = vpop.xlane.xlu2 %3058  ;;  %v12943_v15 = vsub.f32 %v18644_v34, %v3123_v41 }
 0x506   : > { %v12900_v27 = vpop.xlane.xlu1 %3046 }
 0x507   : > { %18645 = vst [vmem:[#allocation24_spill] sm:$0xff] %v12943_v15  ;;  %v3251_v40 = vmul.f32 %v12943_v15, %v12943_v15 }
 0x50a   : > { %3386 = vadd.xlane.f32.xlu0 %v3385_v30  ;;  %3392 = vadd.xlane.f32.xlu2 %v3391_v36  ;;  %v12938_v30 = vsub.f32 %v18642_v28, %v3127_v35  ;;  %v3394_v36 = vsel %vm2882_vm5, %v3250_v42, 0.0  ;;  %v3253_v42 = vmul.f32 %v12935_v4, %v12935_v4  ;;  %v12964_v28 = vsub.f32 %v18646_v25, %v3128_v58 }
 0x50b   : > { %3380 = vadd.xlane.f32.xlu1 %v3379_v61  ;;  %v3400_v61 = vsel %vm2882_vm5, %v3252_v23, 0.0  ;;  %v3126_v23 = vmul.f32 %v12466_v45, %v12770_v11  ;;  %v18650_v11 = vld [vmem:[#allocation5_spill] sm:$0xff] }
 0x50c   : > { %18643 = vst [vmem:[#allocation44_spill] sm:$0xff] %v12938_v30  ;;  %v3255_v34 = vmul.f32 %v12938_v30, %v12938_v30  ;;  %v3403_v30 = vsel %vm2882_vm5, %v3253_v42, 0.0  ;;  %v3256_v58 = vmul.f32 %v12964_v28, %v12964_v28  ;;  %v3133_v42 = vmul.f32 %v12466_v45, %v12870_v57  ;;  %v18654_v57 = vld [vmem:[#allocation93_spill] sm:$0xff] }
 0x50d   : > { %v12920_v26 = vpop.xlane.xlu0 %3061  ;;  %v12922_v56 = vpop.xlane.xlu2 %3067  ;;  %18647 = vst [vmem:[#allocation20_spill] sm:$0xff] %v12964_v28  ;;  %v12974_v53 = vsub.f32 %v18650_v11, %v3126_v23  ;;  %v18656_v28 = vld [vmem:[#allocation91_spill] sm:$0xff] }
 0x50e   : > { %v12930_v2 = vpop.xlane.xlu1 %3055  ;;  %v3409_v4 = vsel %vm2882_vm5, %v3255_v34, 0.0 }
 0x50f   : > { %18651 = vst [vmem:[#allocation31_spill] sm:$0xff] %v12974_v53 }
 0x512   : > { %3395 = vadd.xlane.f32.xlu0 %v3394_v36  ;;  %3401 = vadd.xlane.f32.xlu2 %v3400_v61  ;;  %v18648_v61 = vld [vmem:[#allocation88_spill] sm:$0xff] }
 0x513   : > { %3389 = vadd.xlane.f32.xlu1 %v3388_v38  ;;  %v12969_v38 = vsub.f32 %v18648_v61, %v3130_v18  ;;  %v3131_v18 = vmul.f32 %v12466_v45, %v12802_v3  ;;  %v3412_v3 = vsel %vm2882_vm5, %v3256_v58, 0.0  ;;  %v18652_v61 = vld [vmem:[#allocation86_spill] sm:$0xff] }
 0x515   : > { %v12950_v35 = vpop.xlane.xlu0 %3070  ;;  %v3276_v59 = vpop.xlane.xlu2 %3275  ;;  %18649 = vst [vmem:[#allocation43_spill] sm:$0xff] %v12969_v38  ;;  %v3258_v23 = vmul.f32 %v12969_v38, %v12969_v38  ;;  %v12996_v11 = vsub.f32 %v18652_v61, %v3131_v18  ;;  %v3132_v18 = vmul.f32 %v12466_v45, %v12830_v39  ;;  %v3137_v39 = vmul.f32 %v12466_v45, %v12862_v49 }
 0x516   : > { %v3466_v41 = vmul.f32 %v3276_v59, %v12466_v45  ;;  %v12959_v55 = vpop.xlane.xlu1 %3064  ;;  %v3397_v59 = vsel %vm2882_vm5, %v3251_v40, 0.0 }
 0x517   : > { %18653 = vst [vmem:[#allocation6_spill] sm:$0xff] %v12996_v11 }
 0x518   : > { %v12966_v36 = vadd.f32 1e-05, %v3466_v41 }
 0x51a   : > { %9273 = vrsqrt.f32 %v12966_v36  ;;  %3404 = vadd.xlane.f32.xlu0 %v3403_v30  ;;  %3410 = vadd.xlane.f32.xlu2 %v3409_v4  ;;  %v3129_v30 = vmul.f32 %v12466_v45, %v12800_v0  ;;  %v3254_v4 = vmul.f32 %v12974_v53, %v12974_v53  ;;  %v3418_v0 = vsel %vm2882_vm5, %v3258_v23, 0.0 }
 0x51b   : > { %3398 = vadd.xlane.f32.xlu1 %v3397_v59  ;;  %v12999_v59 = vsub.f32 %v18654_v57, %v3133_v42  ;;  %v3134_v53 = vmul.f32 %v12466_v45, %v12832_v47  ;;  %v3136_v23 = vmul.f32 %v12466_v45, %v12900_v27  ;;  %v3259_v47 = vmul.f32 %v12996_v11, %v12996_v11 }
 0x51c   : > { %v13005_v15 = vsub.f32 %v18656_v28, %v3129_v30  ;;  %v3406_v58 = vsel %vm2882_vm5, %v3254_v4, 0.0  ;;  %v18658_v4 = vld [vmem:[#allocation82_spill] sm:$0xff]  ;;  %vm3600_vm8 = vweird.f32 %v12966_v36 }
 0x51d   : > { %v3279_v34 = vpop.xlane.xlu0 %3278  ;;  %v3285_v41 = vpop.xlane.xlu2 %3284  ;;  %18655 = vst [vmem:[#allocation50_spill] sm:$0xff] %v12999_v59  ;;  %v3421_v49 = vsel %vm2882_vm5, %v3259_v47, 0.0  ;;  %v3140_v47 = vmul.f32 %v12466_v45, %v12892_v48 }
 0x51e   : > { %v12988_v40 = vpop.xlane.xlu1 %3073  ;;  %18657 = vst [vmem:[#allocation35_spill] sm:$0xff] %v13005_v15  ;;  %v3467_v16 = vmul.f32 %v3279_v34, %v12466_v45  ;;  %v3469_v42 = vmul.f32 %v3285_v41, %v12466_v45  ;;  %v3261_v34 = vmul.f32 %v12999_v59, %v12999_v59  ;;  %v3257_v27 = vmul.f32 %v13005_v15, %v13005_v15  ;;  %v18663_v59 = vld [vmem:[#allocation94_spill] sm:$0xff] }
 0x51f   : > { %v13043_v21 = vsub.f32 %v18663_v59, %v3137_v39 }
 0x520   : > { %v12992_v25 = vpop.eup %9273  ;;  %v13026_v41 = vadd.f32 1e-05, %v3467_v16  ;;  %v13035_v11 = vadd.f32 1e-05, %v3469_v42  ;;  %v3427_v16 = vsel %vm2882_vm5, %v3261_v34, 0.0  ;;  %v18665_v42 = vld [vmem:[#allocation84_spill] sm:$0xff] }
 0x521   : > { %v3595_v38 = vmul.f32 %v12992_v25, %v12966_v36  ;;  %18664 = vst [vmem:[#allocation18_spill] sm:$0xff] %v13043_v21  ;;  %vm3601_vm7 = vweird.f32 %v12992_v25 }
 0x522   : > { %3413 = vadd.xlane.f32.xlu0 %v3412_v3  ;;  %3419 = vadd.xlane.f32.xlu2 %v3418_v0  ;;  %v13022_v3 = vsub.f32 %v18658_v4, %v3134_v53  ;;  %v13038_v53 = vsub.f32 %v12460_v13, %v3136_v23  ;;  %9275 = vrsqrt.f32 %v13026_v41  ;;  %vm13106_vm9 = vmor %vm3600_vm8, %vm3601_vm7  ;;  %vm3610_vm10 = vweird.f32 %v13026_v41 }
 0x523   : > { %3407 = vadd.xlane.f32.xlu1 %v3406_v58  ;;  %v3596_v28 = vmul.f32 %v12992_v25, %v3595_v38  ;;  %v18660_v38 = vld [vmem:[#allocation89_spill] sm:$0xff]  ;;  %v3135_v58 = vmul.f32 %v12466_v45, %v12860_v14  ;;  %9277 = vrsqrt.f32 %v13035_v11  ;;  %vm3630_vm12 = vweird.f32 %v13035_v11 }
 0x524   : > { %18659 = vst [vmem:[#allocation32_spill] sm:$0xff] %v13022_v3  ;;  %v13031_v0 = vsub.f32 %v18660_v38, %v3132_v18  ;;  %v3415_v18 = vsel %vm2882_vm5, %v3257_v27, 0.0  ;;  %v3262_v14 = vmul.f32 %v13022_v3, %v13022_v3  ;;  %v3264_v39 = vmul.f32 %v13038_v53, %v13038_v53 }
 0x525   : > { %v3288_v30 = vpop.xlane.xlu0 %3287  ;;  %v3294_v61 = vpop.xlane.xlu2 %3293  ;;  %18662 = vst [vmem:[#allocation40_spill] sm:$0xff] %v13038_v53  ;;  %v3597_v4 = vmul.f32 0.5, %v3596_v28  ;;  %v13050_v13 = vsub.f32 %v18665_v42, %v3135_v58  ;;  %v3138_v28 = vmul.f32 %v12466_v45, %v12890_v46  ;;  %v3139_v27 = vmul.f32 %v12466_v45, %v12930_v2  ;;  %v18667_v2 = vld [vmem:[#allocation34_spill] sm:$0xff]  ;;  %v18669_v53 = vld [vmem:[#allocation92_spill] sm:$0xff] }
 0x526   : > { %v3282_v57 = vpop.xlane.xlu1 %3281  ;;  %18661 = vst [vmem:[#allocation49_spill] sm:$0xff] %v13031_v0  ;;  %v3470_v23 = vmul.f32 %v3288_v30, %v12466_v45  ;;  %v3260_v59 = vmul.f32 %v13031_v0, %v13031_v0  ;;  %v3472_v34 = vmul.f32 %v3294_v61, %v12466_v45 }
 0x527   : > { %18666 = vst [vmem:[#allocation56_spill] sm:$0xff] %v13050_v13  ;;  %v3598_v38 = vsub.f32 1.5, %v3597_v4  ;;  %v3468_v48 = vmul.f32 %v3282_v57, %v12466_v45  ;;  %v3263_v42 = vmul.f32 %v13050_v13, %v13050_v13  ;;  %v13077_v4 = vsub.f32 %v18667_v2, %v3138_v28  ;;  %v18671_v57 = vld [vmem:[#allocation95_spill] sm:$0xff]  ;;  %v18675_v2 = vld [vmem:[#allocation9_spill] sm:$0xff] }
 0x528   : > { %v13068_v46 = vadd.f32 1e-05, %v3470_v23  ;;  %v3424_v61 = vsel %vm2882_vm5, %v3260_v59, 0.0  ;;  %v13074_v0 = vpop.eup %9275  ;;  %v13082_v3 = vadd.f32 1e-05, %v3472_v34  ;;  %v3436_v23 = vsel %vm2882_vm5, %v3264_v39, 0.0 }
 0x529   : > { %18668 = vst [vmem:[#allocation42_spill] sm:$0xff] %v13077_v4  ;;  %v13088_v15 = vsub.f32 %v18671_v57, %v3139_v27  ;;  %v3599_v59 = vmul.f32 %v12992_v25, %v3598_v38  ;;  %v3141_v28 = vmul.f32 %v12466_v45, %v12920_v26  ;;  %v3605_v39 = vmul.f32 %v13074_v0, %v13026_v41 }
 0x52a   : > { %3422 = vadd.xlane.f32.xlu0 %v3421_v49  ;;  %3428 = vadd.xlane.f32.xlu2 %v3427_v16  ;;  %v3430_v49 = vsel %vm2882_vm5, %v3262_v14, 0.0  ;;  %v3265_v16 = vmul.f32 %v13043_v21, %v13043_v21  ;;  %v13080_v14 = vsub.f32 %v18669_v53, %v3140_v47  ;;  %v13085_v21 = vpop.eup %9277  ;;  %v3143_v53 = vmul.f32 %v12466_v45, %v12922_v56 }
 0x52b   : > { %3416 = vadd.xlane.f32.xlu1 %v3415_v18  ;;  %18672 = vst [vmem:[#allocation46_spill] sm:$0xff] %v13088_v15  ;;  %v3142_v47 = vmul.f32 %v12466_v45, %v12959_v55  ;;  %9279 = vrsqrt.f32 %v13068_v46  ;;  %v13104_v27 = vadd.f32 1e-05, %v3468_v48  ;;  %v3625_v56 = vmul.f32 %v13085_v21, %v13035_v11 }
 0x52c   : > { %18670 = vst [vmem:[#allocation41_spill] sm:$0xff] %v13080_v14  ;;  %v3439_v34 = vsel %vm2882_vm5, %v3265_v16, 0.0  ;;  %9281 = vrsqrt.f32 %v13082_v3  ;;  %v3268_v36 = vmul.f32 %v13080_v14, %v13080_v14  ;;  %v3603_v38 = vsel %vm13106_vm9, %v12992_v25, %v3599_v59  ;;  %v13142_v59 = vld [vmem:[%s18031_s3] sm:$0xff] }
 0x52d   : > { %v3297_v30 = vpop.xlane.xlu0 %3296  ;;  %v3303_v58 = vpop.xlane.xlu2 %3302  ;;  %v3144_v14 = vmul.f32 %v12466_v45, %v12950_v35  ;;  %v3266_v25 = vmul.f32 %v13077_v4, %v13077_v4  ;;  %9283 = vrsqrt.f32 %v13104_v27  ;;  %v3626_v26 = vmul.f32 %v13085_v21, %v3625_v56 }
 0x52e   : > { %v3291_v18 = vpop.xlane.xlu1 %3290  ;;  %v3473_v13 = vmul.f32 %v3297_v30, %v12466_v45  ;;  %v3475_v55 = vmul.f32 %v3303_v58, %v12466_v45  ;;  %v18677_v58 = vld [vmem:[#allocation11_spill] sm:$0xff]  ;;  %vm3611_vm11 = vweird.f32 %v13074_v0  ;;  %vm3631_vm13 = vweird.f32 %v13085_v21 }
 0x52f   : > { %v13128_v57 = vsub.f32 %v18677_v58, %v3143_v53  ;;  %v18680_v53 = vld [vmem:[#allocation21_spill] sm:$0xff]  ;;  %v3442_v7 = vsel %vm2882_vm5, %v3266_v25, 0.0  ;;  %vm13237_vm14 = vmor %vm3610_vm10, %vm3611_vm11  ;;  %vm3640_vm0 = vweird.f32 %v13068_v46  ;;  %vm3660_vm3 = vweird.f32 %v13082_v3 }
 0x530   : > { %v13119_v30 = vadd.f32 1e-05, %v3473_v13  ;;  %v13135_v13 = vsub.f32 %v12511_v44, %v3142_v47  ;;  %v4234_v35 = vmul.f32 %v3603_v38, %v18680_v53  ;;  %v3145_v44 = vmul.f32 %v12466_v45, %v12988_v40  ;;  %v18681_v38 = vld [vmem:[#allocation15_spill] sm:$0xff]  ;;  %vm13253_vm15 = vmor %vm3630_vm12, %vm3631_vm13 }
 0x531   : > { %18678 = vst [vmem:[#allocation62_spill] sm:$0xff] %v13128_v57  ;;  %v13151_v47 = vadd.f32 1e-05, %v3475_v55  ;;  %v13163_v56 = vsub.f32 %v18681_v38, %v3144_v14  ;;  %v3433_v55 = vsel %vm2882_vm5, %v3263_v42, 0.0  ;;  %v13174_v14 = vperm.slane %v13142_v59, 2 }
 0x532   : > { %3431 = vadd.xlane.f32.xlu0 %v3430_v49  ;;  %3437 = vadd.xlane.f32.xlu2 %v3436_v23  ;;  %v3471_v49 = vmul.f32 %v3291_v18, %v12466_v45  ;;  %v13125_v23 = vsub.f32 %v18675_v2, %v3141_v28  ;;  %18679 = vst [vmem:[#allocation48_spill] sm:$0xff] %v13135_v13  ;;  %v13145_v28 = vperm.slane %v13142_v59, 1  ;;  %9285 = vrsqrt.f32 %v13119_v30 }
 0x533   : > { %3425 = vadd.xlane.f32.xlu1 %v3424_v61  ;;  %v3267_v61 = vmul.f32 %v13088_v15, %v13088_v15  ;;  %v3606_v18 = vmul.f32 %v13074_v0, %v3605_v39  ;;  %v13153_v39 = vpop.eup %9279  ;;  %18682 = vst [vmem:[#allocation47_spill] sm:$0xff] %v13163_v56  ;;  %v3627_v38 = vmul.f32 0.5, %v3626_v26  ;;  %9287 = vrsqrt.f32 %v13151_v47 }
 0x534   : > { %18676 = vst [vmem:[#allocation30_spill] sm:$0xff] %v13125_v23  ;;  %v13156_v2 = vadd.f32 1e-05, %v3471_v49  ;;  %v13160_v8 = vpop.eup %9281  ;;  %v3271_v49 = vmul.f32 %v13128_v57, %v13128_v57  ;;  %vm3641_vm1 = vweird.f32 %v13153_v39  ;;  %vm3620_vm6 = vweird.f32 %v13104_v27 }
 0x535   : > { %v3306_v16 = vpop.xlane.xlu0 %3305  ;;  %v3312_v48 = vpop.xlane.xlu2 %3311  ;;  %v3445_v15 = vsel %vm2882_vm5, %v3267_v61, 0.0  ;;  %v3607_v53 = vmul.f32 0.5, %v3606_v18  ;;  %v3269_v61 = vmul.f32 %v13125_v23, %v13125_v23  ;;  %v3655_v18 = vmul.f32 %v13160_v8, %v13082_v3  ;;  %vm13308_vm9 = vmor %vm3640_vm0, %vm3641_vm1 }
 0x536   : > { %v3476_v58 = vmul.f32 %v3306_v16, %v12466_v45  ;;  %v3300_v4 = vpop.xlane.xlu1 %3299  ;;  %v3478_v40 = vmul.f32 %v3312_v48, %v12466_v45  ;;  %v3270_v16 = vmul.f32 %v13135_v13, %v13135_v13  ;;  %v13181_v42 = vpop.eup %9283  ;;  %v3635_v48 = vmul.f32 %v13153_v39, %v13068_v46 }
 0x537   : > { %9289 = vrsqrt.f32 %v13156_v2  ;;  %v3448_v23 = vsel %vm2882_vm5, %v3268_v36, 0.0  ;;  %v3608_v13 = vsub.f32 1.5, %v3607_v53  ;;  %v3457_v10 = vsel %vm2882_vm5, %v3271_v49, 0.0 }
 0x538   : > { %v13190_v26 = vadd.f32 1e-05, %v3478_v40  ;;  %v13196_v57 = vpop.eup %9285  ;;  %v3628_v40 = vsub.f32 1.5, %v3627_v38  ;;  %v3454_v36 = vsel %vm2882_vm5, %v3270_v16, 0.0  ;;  %v3656_v53 = vmul.f32 %v13160_v8, %v3655_v18 }
 0x539   : > { %v13214_v49 = vpop.eup %9287  ;;  %vm3661_vm2 = vweird.f32 %v13160_v8  ;;  %vm3621_vm4 = vweird.f32 %v13181_v42  ;;  %vm3670_vm7 = vweird.f32 %v13119_v30  ;;  %vm3690_vm8 = vweird.f32 %v13151_v47 }
 0x53a   : > { %3440 = vadd.xlane.f32.xlu0 %v3439_v34  ;;  %3446 = vadd.xlane.f32.xlu2 %v3445_v15  ;;  %v13177_v34 = vsub.f32 %v12540_v52, %v3145_v44  ;;  %v4299_v15 = vmul.f32 %v13145_v28, %v4234_v35  ;;  %v3474_v52 = vmul.f32 %v3300_v4, %v12466_v45  ;;  %vm3671_vm10 = vweird.f32 %v13196_v57  ;;  %vm13326_vm13 = vmor %vm3660_vm3, %vm3661_vm2 }
 0x53b   : > { %3434 = vadd.xlane.f32.xlu1 %v3433_v55  ;;  %v13188_v55 = vadd.f32 1e-05, %v3476_v58  ;;  %v3272_v35 = vmul.f32 %v13163_v56, %v13163_v56  ;;  %v13201_v58 = vsel %vm2882_vm5, %v3269_v61, 0.0  ;;  %v3615_v4 = vmul.f32 %v13181_v42, %v13104_v27 }
 0x53c   : > { %18683 = vst [vmem:[#allocation52_spill] sm:$0xff] %v13177_v34  ;;  %v13207_v32 = vadd.f32 %v13174_v14, %v4299_v15  ;;  %v3636_v56 = vmul.f32 %v13153_v39, %v3635_v48  ;;  %v3273_v25 = vmul.f32 %v13177_v34, %v13177_v34  ;;  %v3665_v61 = vmul.f32 %v13196_v57, %v13119_v30 }
 0x53d   : > { %v3315_v44 = vpop.xlane.xlu0 %3314  ;;  %v3321_v9 = vpop.xlane.xlu2 %3320  ;;  %9291 = vrsqrt.f32 %v13188_v55  ;;  %v13219_v16 = vadd.f32 1e-05, %v3474_v52  ;;  %v13222_v38 = vsel %vm2882_vm5, %v3272_v35, 0.0  ;;  %v3609_v48 = vmul.f32 %v13074_v0, %v3608_v13 }
 0x53e   : > { %9293 = vrsqrt.f32 %v13190_v26  ;;  %v13224_v15 = vpop.eup %9289  ;;  %v3309_v18 = vpop.xlane.xlu1 %3308  ;;  %v3629_v52 = vmul.f32 %v13085_v21, %v3628_v40  ;;  %v4492_v35 = vmul.f32 1.442695, %v13207_v32  ;;  %v3657_v34 = vmul.f32 0.5, %v3656_v53 }
 0x53f   : > { %v3685_v13 = vmul.f32 %v13214_v49, %v13151_v47  ;;  %v3463_v41 = vsel %vm2882_vm5, %v3273_v25, 0.0  ;;  %v3645_v40 = vmul.f32 %v13224_v15, %v13156_v2  ;;  %9295 = vrsqrt.f32 %v13219_v16 }
 0x540   : > { %v3613_v53 = vsel %vm13237_vm14, %v13074_v0, %v3609_v48  ;;  %9297 = vpow2.f32 %v4492_v35  ;;  %v3658_v48 = vsub.f32 1.5, %v3657_v34  ;;  %v3481_v37 = vmul.f32 %v3321_v9, %v12466_v45  ;;  %vm13340_vm14 = vmor %vm3620_vm6, %vm3621_vm4 }
 0x541   : > { %v3686_v43 = vmul.f32 %v13214_v49, %v3685_v13  ;;  %v3646_v25 = vmul.f32 %v13224_v15, %v3645_v40  ;;  %vm3650_vm11 = vweird.f32 %v13156_v2  ;;  %vm4428_vm12 = vcmp.gt.f32.partialorder %v13207_v32, 0.0 }
 0x542   : > { %3449 = vadd.xlane.f32.xlu0 %v3448_v23  ;;  %3455 = vadd.xlane.f32.xlu2 %v3454_v36  ;;  %v3616_v23 = vmul.f32 %v13181_v42, %v3615_v4  ;;  %v3637_v36 = vmul.f32 0.5, %v3636_v56  ;;  %v3479_v4 = vmul.f32 %v3315_v44, %v12466_v45  ;;  %v3633_v44 = vsel %vm13253_vm15, %v13085_v21, %v3629_v52  ;;  %vm13365_vm15 = vmor %vm3670_vm7, %vm3671_vm10 }
 0x543   : > { %3443 = vadd.xlane.f32.xlu1 %v3442_v7  ;;  %v3666_v7 = vmul.f32 %v13196_v57, %v3665_v61  ;;  %v13246_v56 = vpop.eup %9291  ;;  %v3477_v52 = vmul.f32 %v3309_v18, %v12466_v45  ;;  %v3647_v20 = vmul.f32 0.5, %v3646_v25  ;;  %vm3691_vm0 = vweird.f32 %v13214_v49 }
 0x544   : > { %v13260_v61 = vpop.eup %9293  ;;  %v3617_v1 = vmul.f32 0.5, %v3616_v23  ;;  %v3638_v0 = vsub.f32 1.5, %v3637_v36  ;;  %v13271_v21 = vadd.f32 1e-05, %v3479_v4  ;;  %v18688_v23 = vld [vmem:[#allocation33_spill] sm:$0xff]  ;;  %v3695_v34 = vmul.f32 %v13246_v56, %v13188_v55  ;;  %vm13384_vm2 = vmor %vm3690_vm8, %vm3691_vm0 }
 0x545   : > { %v3324_v11 = vpop.xlane.xlu0 %3323  ;;  %v3330_v24 = vpop.xlane.xlu2 %3329  ;;  %v3667_v29 = vmul.f32 0.5, %v3666_v7  ;;  %v13275_v35 = vmul.f32 %v3613_v53, %v18688_v23  ;;  %v3715_v9 = vmul.f32 %v13260_v61, %v13190_v26  ;;  %v18689_v7 = vld [vmem:[#allocation27_spill] sm:$0xff]  ;;  %v3659_v4 = vmul.f32 %v13160_v8, %v3658_v48 }
 0x546   : > { %v3482_v36 = vmul.f32 %v3324_v11, %v12466_v45  ;;  %v13283_v13 = vpop.eup %9295  ;;  %v13286_v40 = vmul.f32 %v3633_v44, %v18689_v7  ;;  %v3484_v18 = vmul.f32 %v3330_v24, %v12466_v45  ;;  %v3687_v53 = vmul.f32 0.5, %v3686_v43  ;;  %v3318_v11 = vpop.xlane.xlu1 %3317 }
 0x547   : > { %v13292_v23 = vadd.f32 1e-05, %v3481_v37  ;;  %v9298_v19 = vpop.eup %9297  ;;  %9299 = vrsqrt.f32 %v13271_v21  ;;  %v13295_v44 = vadd.f32 1e-05, %v3477_v52  ;;  %v3716_v24 = vmul.f32 %v13260_v61, %v3715_v9 }
 0x548   : > { %v13302_v43 = vadd.f32 1e-05, %v3482_v36  ;;  %v13315_v48 = vadd.f32 1e-05, %v3484_v18  ;;  %v3480_v25 = vmul.f32 %v3318_v11, %v12466_v45  ;;  %v8351_v9 = vadd.f32 -1.0, %v9298_v19 }
 0x549   : > { %9301 = vrsqrt.f32 %v13292_v23  ;;  %v3663_v36 = vsel %vm13326_vm13, %v13160_v8, %v3659_v4  ;;  %v3717_v18 = vmul.f32 0.5, %v3716_v24  ;;  %vm3651_vm1 = vweird.f32 %v13224_v15 }
 0x54a   : > { %3458 = vadd.xlane.f32.xlu0 %v3457_v10  ;;  %3464 = vadd.xlane.f32.xlu2 %v3463_v41  ;;  %v3618_v10 = vsub.f32 1.5, %v3617_v1  ;;  %v3639_v41 = vmul.f32 %v13153_v39, %v3638_v0  ;;  %v3696_v1 = vmul.f32 %v13246_v56, %v3695_v34  ;;  %v3675_v0 = vmul.f32 %v13283_v13, %v13219_v16  ;;  %vm13405_vm6 = vmor %vm3650_vm11, %vm3651_vm1 }
 0x54b   : > { %3452 = vadd.xlane.f32.xlu1 %v13201_v58  ;;  %v3668_v58 = vsub.f32 1.5, %v3667_v29  ;;  %v3688_v34 = vsub.f32 1.5, %v3687_v53  ;;  %9303 = vrsqrt.f32 %v13295_v44  ;;  %v13356_v4 = vadd.f32 1e-05, %v3480_v25 }
 0x54c   : > { %v3619_v37 = vmul.f32 %v13181_v42, %v3618_v10  ;;  %v3643_v46 = vsel %vm13308_vm9, %v13153_v39, %v3639_v41  ;;  %v3648_v10 = vsub.f32 1.5, %v3647_v20  ;;  %v3697_v39 = vmul.f32 0.5, %v3696_v1 }
 0x54d   : > { %v3669_v7 = vmul.f32 %v13196_v57, %v3668_v58  ;;  %v3676_v19 = vmul.f32 %v13283_v13, %v3675_v0  ;;  %9305 = vrsqrt.f32 %v13302_v43  ;;  %v3333_v8 = vpop.xlane.xlu0 %3332  ;;  %v13347_v20 = vpop.eup %9299  ;;  %v13350_v41 = vmul.f32 %v3643_v46, %v12545_v31 }
 0x54e   : > { %v3623_v27 = vsel %vm13340_vm14, %v13181_v42, %v3619_v37  ;;  %9307 = vrsqrt.f32 %v13315_v48  ;;  %v13359_v53 = vmul.f32 %v3663_v36, %v12548_v62  ;;  %v3689_v31 = vmul.f32 %v13214_v49, %v3688_v34  ;;  %v3339_v34 = vpop.xlane.xlu2 %3338 }
 0x54f   : > { %v4684_v42 = vmul.f32 1.6732632, %v8351_v9  ;;  %v3673_v11 = vsel %vm13365_vm15, %v13196_v57, %v3669_v7  ;;  %v3649_v62 = vmul.f32 %v13224_v15, %v3648_v10  ;;  %v3485_v58 = vmul.f32 %v3333_v8, %v12466_v45  ;;  %v13377_v30 = vpop.eup %9301  ;;  %v3327_v10 = vpop.xlane.xlu1 %3326 }
 0x550   : > { %v4236_v1 = vmul.f32 %v3623_v27, %v12553_v51  ;;  %v3698_v24 = vsub.f32 1.5, %v3697_v39  ;;  %v3718_v0 = vsub.f32 1.5, %v3717_v18  ;;  %v3677_v29 = vmul.f32 0.5, %v3676_v19 }
 0x551   : > { %v13380_v37 = vpop.eup %9303  ;;  %vm3700_vm3 = vweird.f32 %v13188_v55  ;;  %vm3720_vm4 = vweird.f32 %v13190_v26  ;;  %v3725_v57 = vmul.f32 %v13347_v20, %v13271_v21  ;;  %9309 = vrsqrt.f32 %v13356_v4 }
 0x552   : > { %v13396_v46 = vmul.f32 %v3673_v11, %v12575_v17  ;;  %v3693_v47 = vsel %vm13384_vm2, %v13214_v49, %v3689_v31  ;;  %vm3680_vm7 = vweird.f32 %v13219_v16  ;;  %v4748_v17 = vsel %vm4428_vm12, %v13207_v32, %v4684_v42 }
 0x553   : > { %3461 = vadd.xlane.f32.xlu1 %v13222_v38  ;;  %v13393_v51 = vpop.eup %9305  ;;  %v13414_v9 = vperm.slane %v13142_v59, 3  ;;  %v3653_v2 = vsel %vm13405_vm6, %v13224_v15, %v3649_v62  ;;  %vm3701_vm8 = vweird.f32 %v13246_v56  ;;  %v3745_v49 = vmul.f32 %v13377_v30, %v13292_v23 }
 0x554   : > { %v13416_v36 = vpop.eup %9307  ;;  %v13424_v7 = vadd.f32 1e-05, %v3485_v58  ;;  %v3699_v3 = vmul.f32 %v13246_v56, %v3698_v24  ;;  %v3719_v32 = vmul.f32 %v13260_v61, %v3718_v0  ;;  %vm3721_vm9 = vweird.f32 %v13260_v61  ;;  %vm13440_vm10 = vmor %vm3700_vm3, %vm3701_vm8 }
 0x555   : > { %v3678_v59 = vsub.f32 1.5, %v3677_v29  ;;  %v13430_v39 = vmul.f32 %v3693_v47, %v12578_v6  ;;  %v3726_v15 = vmul.f32 %v13347_v20, %v3725_v57  ;;  %v3705_v18 = vmul.f32 %v13380_v37, %v13295_v44  ;;  %vm13453_vm11 = vmor %vm3720_vm4, %vm3721_vm9  ;;  %v3342_v0 = vpop.xlane.xlu0 %3341 }
 0x556   : > { %v4812_v19 = vmul.f32 1.050701, %v4748_v17  ;;  %v13436_v8 = vmul.f32 %v3653_v2, %v12583_v12  ;;  %v3755_v38 = vmul.f32 %v13393_v51, %v13302_v43  ;;  %v3775_v6 = vmul.f32 %v13416_v36, %v13315_v48 }
 0x557   : > { %v3487_v31 = vmul.f32 %v3339_v34, %v12466_v45  ;;  %v13449_v42 = vpop.eup %9309  ;;  %v3746_v55 = vmul.f32 %v13377_v30, %v3745_v49  ;;  %9311 = vrsqrt.f32 %v13424_v7  ;;  %v4301_v62 = vmul.f32 %v13145_v28, %v4236_v1 }
 0x558   : > { %v4877_v11 = vmul.f32 %v13414_v9, %v4812_v19  ;;  %v3703_v58 = vsel %vm13440_vm10, %v13246_v56, %v3699_v3  ;;  %v3723_v26 = vsel %vm13453_vm11, %v13260_v61, %v3719_v32  ;;  %v3679_v24 = vmul.f32 %v13283_v13, %v3678_v59  ;;  %v3348_v32 = vpop.xlane.xlu2 %3347  ;;  %v3336_v19 = vpop.xlane.xlu1 %3335 }
 0x559   : > { %vm3681_vm12 = vweird.f32 %v13283_v13  ;;  %v3727_v29 = vmul.f32 0.5, %v3726_v15  ;;  %v3706_v25 = vmul.f32 %v13380_v37, %v3705_v18  ;;  %v3483_v57 = vmul.f32 %v3327_v10, %v12466_v45 }
 0x55a   : > { %v4941_v1 = vsel %vm2882_vm5, %v4877_v11, 0.0  ;;  %v3756_v47 = vmul.f32 %v13393_v51, %v3755_v38  ;;  %v3776_v56 = vmul.f32 %v13416_v36, %v3775_v6  ;;  %v3735_v52 = vmul.f32 %v13449_v42, %v13356_v4  ;;  %vm13480_vm13 = vmor %vm3680_vm7, %vm3681_vm12 }
 0x55b   : > { %v13476_v61 = vadd.f32 1e-05, %v3487_v31  ;;  %4942 = vadd.xlane.f32.xlu0 %v4941_v1  ;;  %vm3730_vm14 = vweird.f32 %v13271_v21  ;;  %vm3731_vm15 = vweird.f32 %v13347_v20  ;;  %v3747_v17 = vmul.f32 0.5, %v3746_v55 }
 0x55c   : > { %v3488_v2 = vmul.f32 %v3342_v0, %v12466_v45  ;;  %v13488_v49 = vadd.f32 %v13174_v14, %v4301_v62  ;;  %v13491_v10 = vmul.f32 %v3703_v58, %v12605_v50  ;;  %v13494_v3 = vmul.f32 %v3723_v26, %v12608_v33  ;;  %vm13537_vm7 = vmor %vm3730_vm14, %vm3731_vm15 }
 0x55d   : > { %v3683_v16 = vsel %vm13480_vm13, %v13283_v13, %v3679_v24  ;;  %vm3751_vm0 = vweird.f32 %v13377_v30  ;;  %v13500_v59 = vpop.eup %9311  ;;  %v3728_v15 = vsub.f32 1.5, %v3727_v29  ;;  %vm3750_vm1 = vweird.f32 %v13292_v23 }
 0x55e   : > { %v3707_v18 = vmul.f32 0.5, %v3706_v25  ;;  %vm3711_vm2 = vweird.f32 %v13380_v37  ;;  %v13504_v50 = vadd.f32 1e-05, %v3483_v57  ;;  %vm3710_vm3 = vweird.f32 %v13295_v44  ;;  %vm13560_vm10 = vmor %vm3750_vm1, %vm3751_vm0 }
 0x55f   : > { %v3757_v33 = vmul.f32 0.5, %v3756_v47  ;;  %v3777_v27 = vmul.f32 0.5, %v3776_v56  ;;  %v3736_v13 = vmul.f32 %v13449_v42, %v3735_v52  ;;  %9313 = vrsqrt.f32 %v13476_v61  ;;  %vm13574_vm12 = vmor %vm3710_vm3, %vm3711_vm2 }
 0x560   : > { %v3748_v38 = vsub.f32 1.5, %v3747_v17  ;;  %vm3760_vm4 = vweird.f32 %v13302_v43  ;;  %v13510_v6 = vadd.f32 1e-05, %v3488_v2  ;;  %v3490_v31 = vmul.f32 %v3348_v32, %v12466_v45 }
 0x561   : > { %v4496_v12 = vmul.f32 1.442695, %v13488_v49  ;;  %v13515_v55 = vmul.f32 %v3683_v16, %v12613_v54  ;;  %v3785_v11 = vmul.f32 %v13500_v59, %v13424_v7  ;;  %v3486_v62 = vmul.f32 %v3336_v19, %v12466_v45 }
 0x562   : > { %v4302_v58 = vmul.f32 %v13145_v28, %v13286_v40  ;;  %v3729_v26 = vmul.f32 %v13347_v20, %v3728_v15  ;;  %v3708_v24 = vsub.f32 1.5, %v3707_v18  ;;  %v4300_v0 = vmul.f32 %v13145_v28, %v13275_v35  ;;  %v3351_v15 = vpop.xlane.xlu0 %3350 }
 0x563   : > { %9315 = vpow2.f32 %v4496_v12  ;;  %v3758_v29 = vsub.f32 1.5, %v3757_v33  ;;  %v3778_v25 = vsub.f32 1.5, %v3777_v27  ;;  %v3737_v57 = vmul.f32 0.5, %v3736_v13 }
 0x564   : > { %9317 = vrsqrt.f32 %v13504_v50  ;;  %v3749_v54 = vmul.f32 %v13377_v30, %v3748_v38  ;;  %vm3780_vm6 = vweird.f32 %v13315_v48  ;;  %v13529_v1 = vadd.f32 1e-05, %v3490_v31 }
 0x565   : > { %9319 = vrsqrt.f32 %v13510_v6  ;;  %v13531_v40 = vpop.eup %9313  ;;  %v3786_v47 = vmul.f32 %v13500_v59, %v3785_v11  ;;  %v13542_v56 = vadd.f32 1e-05, %v3486_v62  ;;  %v13545_v52 = vadd.f32 %v13174_v14, %v4302_v58 }
 0x566   : > { %v13548_v34 = vadd.f32 %v13174_v14, %v4300_v0  ;;  %v3733_v17 = vsel %vm13537_vm7, %v13347_v20, %v3729_v26  ;;  %v3709_v21 = vmul.f32 %v13380_v37, %v3708_v24  ;;  %vm3761_vm8 = vweird.f32 %v13393_v51 }
 0x567   : > { %vm3740_vm9 = vweird.f32 %v13356_v4  ;;  %v3759_v16 = vmul.f32 %v13393_v51, %v3758_v29  ;;  %v3779_v32 = vmul.f32 %v13416_v36, %v3778_v25  ;;  %vm3781_vm11 = vweird.f32 %v13416_v36  ;;  %vm13588_vm13 = vmor %vm3760_vm4, %vm3761_vm8 }
 0x568   : > { %v3738_v20 = vsub.f32 1.5, %v3737_v57  ;;  %v3753_v19 = vsel %vm13560_vm10, %v13377_v30, %v3749_v54  ;;  %v3805_v33 = vmul.f32 %v13531_v40, %v13476_v61  ;;  %9321 = vrsqrt.f32 %v13529_v1  ;;  %vm13603_vm14 = vmor %vm3780_vm6, %vm3781_vm11 }
 0x569   : > { %v9316_v18 = vpop.eup %9315  ;;  %v4498_v27 = vmul.f32 1.442695, %v13545_v52  ;;  %v3787_v44 = vmul.f32 0.5, %v3786_v47  ;;  %9323 = vrsqrt.f32 %v13542_v56  ;;  %v4494_v31 = vmul.f32 1.442695, %v13548_v34 }
 0x56a   : > { %v13582_v13 = vpop.eup %9317  ;;  %v8353_v38 = vadd.f32 -1.0, %v9316_v18  ;;  %v3713_v11 = vsel %vm13574_vm12, %v13380_v37, %v3709_v21  ;;  %vm3741_vm15 = vweird.f32 %v13449_v42  ;;  %v3491_v62 = vmul.f32 %v3351_v15, %v12466_v45 }
 0x56b   : > { %v13594_v12 = vpop.eup %9319  ;;  %9325 = vpow2.f32 %v4498_v27  ;;  %v3763_v58 = vsel %vm13588_vm13, %v13393_v51, %v3759_v16  ;;  %v3783_v37 = vsel %vm13603_vm14, %v13416_v36, %v3779_v32  ;;  %v13616_v26 = vmul.f32 %v13449_v42, %v3738_v20  ;;  %vm13649_vm1 = vmor %vm3740_vm9, %vm3741_vm15  ;;  %v3357_v20 = vpop.xlane.xlu2 %3356 }
 0x56c   : > { %v4686_v48 = vmul.f32 1.6732632, %v8353_v38  ;;  %v3765_v24 = vmul.f32 %v13582_v13, %v13504_v50  ;;  %vm4430_vm0 = vcmp.gt.f32.partialorder %v13488_v49, 0.0  ;;  %9327 = vpow2.f32 %v4494_v31 }
 0x56d   : > { %v4304_v0 = vmul.f32 %v13145_v28, %v13436_v8  ;;  %v3788_v29 = vsub.f32 1.5, %v3787_v44  ;;  %v3806_v51 = vmul.f32 %v13531_v40, %v3805_v33  ;;  %v3815_v25 = vmul.f32 %v13594_v12, %v13510_v6 }
 0x56e   : > { %v4750_v36 = vsel %vm4430_vm0, %v13488_v49, %v4686_v48  ;;  %v13627_v57 = vpop.eup %9321  ;;  %v13630_v54 = vmul.f32 %v3733_v17, %v12635_v5  ;;  %v13633_v35 = vmul.f32 %v3753_v19, %v12638_v22  ;;  %v13635_v21 = vadd.f32 1e-05, %v3491_v62  ;;  %v18720_v49 = vld [vmem:[#allocation96_spill] sm:$0xff] }
 0x56f   : > { %v4814_v47 = vmul.f32 1.050701, %v4750_v36  ;;  %v13637_v8 = vpop.eup %9323  ;;  %v13640_v2 = vmul.f32 %v3713_v11, %v12643_v63  ;;  %v13643_v16 = vmul.f32 %v3763_v58, %v12665_v60  ;;  %vm3790_vm2 = vweird.f32 %v13424_v7 }
 0x570   : > { %vm3791_vm3 = vweird.f32 %v13500_v59  ;;  %v13656_v22 = vadd.f32 %v13174_v14, %v4304_v0  ;;  %v13659_v17 = vmul.f32 %v3783_v37, %v18720_v49  ;;  %v3743_v60 = vsel %vm13649_vm1, %v13449_v42, %v13616_v26 }
 0x571   : > { %v9326_v63 = vpop.eup %9325  ;;  %v3766_v4 = vmul.f32 %v13582_v13, %v3765_v24  ;;  %v4879_v32 = vmul.f32 %v13414_v9, %v4814_v47  ;;  %v13668_v15 = vmul.f32 %v13500_v59, %v3788_v29  ;;  %v3807_v18 = vmul.f32 0.5, %v3806_v51  ;;  %v3345_v24 = vpop.xlane.xlu1 %3344  ;;  %vm13704_vm11 = vmor %vm3790_vm2, %vm3791_vm3 }
 0x572   : > { %v3816_v19 = vmul.f32 %v13594_v12, %v3815_v25  ;;  %v8354_v23 = vadd.f32 -1.0, %v9326_v63  ;;  %v9328_v33 = vpop.eup %9327  ;;  %v3835_v27 = vmul.f32 %v13627_v57, %v13529_v1  ;;  %9329 = vrsqrt.f32 %v13635_v21 }
 0x573   : > { %v4947_v30 = vsel %vm2882_vm5, %v4879_v32, 0.0  ;;  %v4502_v42 = vmul.f32 1.442695, %v13656_v22  ;;  %vm3811_vm4 = vweird.f32 %v13531_v40  ;;  %v3795_v44 = vmul.f32 %v13637_v8, %v13542_v56 }
 0x574   : > { %4948 = vadd.xlane.f32.xlu2 %v4947_v30  ;;  %v4687_v38 = vmul.f32 1.6732632, %v8354_v23  ;;  %v8352_v31 = vadd.f32 -1.0, %v9328_v33  ;;  %v3493_v11 = vmul.f32 %v3357_v20, %v12466_v45  ;;  %vm4431_vm6 = vcmp.gt.f32.partialorder %v13545_v52, 0.0 }
 0x575   : > { %9331 = vpow2.f32 %v4502_v42  ;;  %v4303_v43 = vmul.f32 %v13145_v28, %v13350_v41  ;;  %v4305_v62 = vmul.f32 %v13145_v28, %v13359_v53  ;;  %v3808_v58 = vsub.f32 1.5, %v3807_v18 }
 0x576   : > { %vm3810_vm7 = vweird.f32 %v13476_v61  ;;  %v3767_v37 = vmul.f32 0.5, %v3766_v4  ;;  %vm3771_vm8 = vweird.f32 %v13582_v13  ;;  %v4751_v26 = vsel %vm4431_vm6, %v13545_v52, %v4687_v38  ;;  %v18723_v4 = vld [vmem:[#allocation29_spill] sm:$0xff] }
 0x577   : > { %v4685_v48 = vmul.f32 1.6732632, %v8352_v31  ;;  %v3817_v0 = vmul.f32 0.5, %v3816_v19  ;;  %v3836_v29 = vmul.f32 %v13627_v57, %v3835_v27  ;;  %v4815_v51 = vmul.f32 1.050701, %v4751_v26  ;;  %vm13742_vm14 = vmor %vm3810_vm7, %vm3811_vm4 }
 0x578   : > { %vm4429_vm9 = vcmp.gt.f32.partialorder %v13548_v34, 0.0  ;;  %vm3770_vm10 = vweird.f32 %v13504_v50  ;;  %v3796_v41 = vmul.f32 %v13637_v8, %v3795_v44  ;;  %v13693_v25 = vadd.f32 1e-05, %v3493_v11  ;;  %v13698_v52 = vpop.eup %9329 }
 0x579   : > { %v4749_v53 = vsel %vm4429_vm9, %v13548_v34, %v4685_v48  ;;  %v13696_v36 = vadd.f32 %v13174_v14, %v4303_v43  ;;  %v4880_v5 = vmul.f32 %v13414_v9, %v4815_v51  ;;  %v3489_v34 = vmul.f32 %v3345_v24, %v12466_v45  ;;  %v18726_v48 = vld [vmem:[#allocation98_spill] sm:$0xff]  ;;  %vm13765_vm0 = vmor %vm3770_vm10, %vm3771_vm8 }
 0x57a   : > { %v4813_v63 = vmul.f32 1.050701, %v4749_v53  ;;  %v13711_v49 = vadd.f32 %v13174_v14, %v4305_v62  ;;  %v13714_v32 = vmul.f32 %v3743_v60, %v18723_v4  ;;  %v3793_v7 = vsel %vm13704_vm11, %v13500_v59, %v13668_v15  ;;  %v3360_v15 = vpop.xlane.xlu0 %3359 }
 0x57b   : > { %v13721_v20 = vmul.f32 %v13531_v40, %v3808_v58  ;;  %v3768_v18 = vsub.f32 1.5, %v3767_v37  ;;  %vm3820_vm12 = vweird.f32 %v13510_v6  ;;  %v9332_v19 = vpop.eup %9331  ;;  %v3818_v23 = vsub.f32 1.5, %v3817_v0 }
 0x57c   : > { %v4950_v33 = vsel %vm2882_vm5, %v4880_v5, 0.0  ;;  %v4878_v27 = vmul.f32 %v13414_v9, %v4813_v63  ;;  %v4500_v60 = vmul.f32 1.442695, %v13696_v36  ;;  %v3837_v30 = vmul.f32 0.5, %v3836_v29 }
 0x57d   : > { %v3797_v42 = vmul.f32 0.5, %v3796_v41  ;;  %4951 = vadd.xlane.f32.xlu0 %v4950_v33  ;;  %9333 = vrsqrt.f32 %v13693_v25  ;;  %v8356_v59 = vadd.f32 -1.0, %v9332_v19  ;;  %v13729_v38 = vadd.f32 1e-05, %v3489_v34  ;;  %v18732_v34 = vld [vmem:[#allocation17_spill] sm:$0xff] }
 0x57e   : > { %v4944_v44 = vsel %vm2882_vm5, %v4878_v27, 0.0  ;;  %9335 = vpow2.f32 %v4500_v60  ;;  %v4504_v31 = vmul.f32 1.442695, %v13711_v49  ;;  %v13733_v11 = vmul.f32 %v13582_v13, %v3768_v18 }
 0x57f   : > { %vm3821_vm13 = vweird.f32 %v13594_v12  ;;  %4945 = vadd.xlane.f32.xlu1 %v4944_v44  ;;  %v3845_v43 = vmul.f32 %v13698_v52, %v13635_v21  ;;  %v4689_v62 = vmul.f32 1.6732632, %v8356_v59  ;;  %vm4433_vm15 = vcmp.gt.f32.partialorder %v13656_v22, 0.0 }
 0x580   : > { %9337 = vpow2.f32 %v4504_v31  ;;  %v3494_v37 = vmul.f32 %v3360_v15, %v12466_v45  ;;  %v4307_v26 = vmul.f32 %v13145_v28, %v13515_v55  ;;  %v13751_v24 = vmul.f32 %v3793_v7, %v18726_v48  ;;  %vm13787_vm3 = vmor %vm3820_vm12, %vm3821_vm13 }
 0x581   : > { %v3813_v61 = vsel %vm13742_vm14, %v13531_v40, %v13721_v20  ;;  %v13758_v0 = vmul.f32 %v13594_v12, %v3818_v23  ;;  %v4753_v29 = vsel %vm4433_vm15, %v13656_v22, %v4689_v62  ;;  %v3838_v55 = vsub.f32 1.5, %v3837_v30  ;;  %v3366_v40 = vpop.xlane.xlu2 %3365 }
 0x582   : > { %vm3841_vm1 = vweird.f32 %v13627_v57  ;;  %v3798_v41 = vsub.f32 1.5, %v3797_v42  ;;  %v4817_v53 = vmul.f32 1.050701, %v4753_v29  ;;  %9339 = vrsqrt.f32 %v13729_v38  ;;  %v3354_v42 = vpop.xlane.xlu1 %3353 }
 0x583   : > { %v13771_v47 = vpop.eup %9333  ;;  %v3773_v22 = vsel %vm13765_vm0, %v13582_v13, %v13733_v11  ;;  %vm3801_vm2 = vweird.f32 %v13637_v8  ;;  %v13779_v50 = vadd.f32 %v13174_v14, %v4307_v26  ;;  %v4306_v5 = vmul.f32 %v13145_v28, %v13396_v46 }
 0x584   : > { %v9336_v63 = vpop.eup %9335  ;;  %vm3840_vm4 = vweird.f32 %v13529_v1  ;;  %v3846_v13 = vmul.f32 %v13698_v52, %v3845_v43  ;;  %v4882_v4 = vmul.f32 %v13414_v9, %v4817_v53  ;;  %v13794_v7 = vadd.f32 1e-05, %v3494_v37  ;;  %v3369_v37 = vpop.xlane.xlu0 %3368 }
 0x585   : > { %v4308_v46 = vmul.f32 %v13145_v28, %v13430_v39  ;;  %v3823_v6 = vsel %vm13787_vm3, %v13594_v12, %v13758_v0  ;;  %vm3800_vm6 = vweird.f32 %v13542_v56  ;;  %v8355_v20 = vadd.f32 -1.0, %v9336_v63  ;;  %vm13848_vm9 = vmor %vm3840_vm4, %vm3841_vm1 }
 0x586   : > { %v3496_v18 = vmul.f32 %v3366_v40, %v12466_v45  ;;  %v4508_v19 = vmul.f32 1.442695, %v13779_v50  ;;  %v9338_v23 = vpop.eup %9337  ;;  %v3839_v33 = vmul.f32 %v13627_v57, %v3838_v55  ;;  %v13807_v27 = vmul.f32 %v13637_v8, %v3798_v41  ;;  %vm13859_vm10 = vmor %vm3800_vm6, %vm3801_vm2 }
 0x587   : > { %v3865_v39 = vmul.f32 %v13771_v47, %v13693_v25  ;;  %v4956_v60 = vsel %vm2882_vm5, %v4882_v4, 0.0  ;;  %v4688_v12 = vmul.f32 1.6732632, %v8355_v20  ;;  %v8357_v30 = vadd.f32 -1.0, %v9338_v23  ;;  %v18733_v4 = vld [vmem:[#allocation23_spill] sm:$0xff] }
 0x588   : > { %4957 = vadd.xlane.f32.xlu2 %v4956_v60  ;;  %9341 = vpow2.f32 %v4508_v19  ;;  %v13813_v59 = vadd.f32 %v13174_v14, %v4306_v5  ;;  %v13815_v15 = vpop.eup %9339  ;;  %v3847_v44 = vmul.f32 0.5, %v3846_v13  ;;  %vm4432_vm7 = vcmp.gt.f32.partialorder %v13696_v36, 0.0  ;;  %v18731_v5 = vld [vmem:[#allocation97_spill] sm:$0xff] }
 0x589   : > { %9343 = vrsqrt.f32 %v13794_v7  ;;  %v13820_v31 = vadd.f32 %v13174_v14, %v4308_v46  ;;  %v4752_v11 = vsel %vm4432_vm7, %v13696_v36, %v4688_v12  ;;  %v4690_v43 = vmul.f32 1.6732632, %v8357_v30 }
 0x58a   : > { %v13823_v62 = vadd.f32 1e-05, %v3496_v18  ;;  %v4506_v58 = vmul.f32 1.442695, %v13813_v59  ;;  %v4816_v26 = vmul.f32 1.050701, %v4752_v11  ;;  %v3492_v48 = vmul.f32 %v3354_v42, %v12466_v45 }
 0x58b   : > { %vm4434_vm8 = vcmp.gt.f32.partialorder %v13711_v49, 0.0  ;;  %v4510_v0 = vmul.f32 1.442695, %v13820_v31  ;;  %v3866_v29 = vmul.f32 %v13771_v47, %v3865_v39  ;;  %v3825_v51 = vmul.f32 %v13815_v15, %v13729_v38 }
 0x58c   : > { %v4754_v36 = vsel %vm4434_vm8, %v13711_v49, %v4690_v43  ;;  %9345 = vpow2.f32 %v4506_v58  ;;  %v4881_v55 = vmul.f32 %v13414_v9, %v4816_v26  ;;  %v3497_v53 = vmul.f32 %v3369_v37, %v12466_v45  ;;  %v18739_v26 = vld [vmem:[#allocation99_spill] sm:$0xff] }
 0x58d   : > { %v4818_v41 = vmul.f32 1.050701, %v4754_v36  ;;  %9347 = vpow2.f32 %v4510_v0  ;;  %v13836_v63 = vmul.f32 %v3813_v61, %v18731_v5  ;;  %v13839_v13 = vmul.f32 %v3773_v22, %v18732_v34 }
 0x58e   : > { %v9342_v40 = vpop.eup %9341  ;;  %v13842_v46 = vmul.f32 %v3823_v6, %v18733_v4  ;;  %9349 = vrsqrt.f32 %v13823_v62  ;;  %vm3850_vm11 = vweird.f32 %v13635_v21  ;;  %v4953_v1 = vsel %vm2882_vm5, %v4881_v55, 0.0 }
 0x58f   : > { %v13853_v20 = vpop.eup %9343  ;;  %v4883_v22 = vmul.f32 %v13414_v9, %v4818_v41  ;;  %v8359_v6 = vadd.f32 -1.0, %v9342_v40  ;;  %v13866_v18 = vadd.f32 1e-05, %v3492_v48  ;;  %v3843_v19 = vsel %vm13848_vm9, %v13627_v57, %v3839_v33  ;;  %4954 = vadd.xlane.f32.xlu1 %v4953_v1 }
 0x590   : > { %v3803_v56 = vsel %vm13859_vm10, %v13637_v8, %v13807_v27  ;;  %v3848_v23 = vsub.f32 1.5, %v3847_v44  ;;  %v3867_v39 = vmul.f32 0.5, %v3866_v29  ;;  %v3826_v60 = vmul.f32 %v13815_v15, %v3825_v51  ;;  %v18738_v27 = vld [vmem:[#allocation38_spill] sm:$0xff] }
 0x591   : > { %v4959_v12 = vsel %vm2882_vm5, %v4883_v22, 0.0  ;;  %v4692_v30 = vmul.f32 1.6732632, %v8359_v6  ;;  %v13877_v42 = vadd.f32 1e-05, %v3497_v53  ;;  %vm3851_vm12 = vweird.f32 %v13698_v52  ;;  %v3363_v6 = vpop.xlane.xlu1 %3362 }
 0x592   : > { %v9346_v11 = vpop.eup %9345  ;;  %4960 = vadd.xlane.f32.xlu0 %v4959_v12  ;;  %v3875_v57 = vmul.f32 %v13853_v20, %v13794_v7  ;;  %vm4436_vm13 = vcmp.gt.f32.partialorder %v13779_v50, 0.0  ;;  %v4310_v8 = vmul.f32 %v13145_v28, %v13640_v2  ;;  %v13886_v44 = vmul.f32 %v3843_v19, %v18738_v27  ;;  %vm13913_vm2 = vmor %vm3850_vm11, %vm3851_vm12 }
 0x593   : > { %v9348_v33 = vpop.eup %9347  ;;  %v4756_v43 = vsel %vm4436_vm13, %v13779_v50, %v4692_v30  ;;  %9351 = vrsqrt.f32 %v13866_v18  ;;  %v8358_v58 = vadd.f32 -1.0, %v9346_v11  ;;  %v13893_v48 = vmul.f32 %v3803_v56, %v18739_v26  ;;  %v3375_v50 = vpop.xlane.xlu2 %3374 }
 0x594   : > { %v13890_v37 = vpop.eup %9349  ;;  %v3849_v0 = vmul.f32 %v13698_v52, %v3848_v23  ;;  %v3868_v29 = vsub.f32 1.5, %v3867_v39  ;;  %v4820_v51 = vmul.f32 1.050701, %v4756_v43  ;;  %vm3870_vm14 = vweird.f32 %v13693_v25 }
 0x595   : > { %v3827_v2 = vmul.f32 0.5, %v3826_v60  ;;  %v4691_v36 = vmul.f32 1.6732632, %v8358_v58  ;;  %v8360_v55 = vadd.f32 -1.0, %v9348_v33  ;;  %9353 = vrsqrt.f32 %v13877_v42 }
 0x596   : > { %v3876_v41 = vmul.f32 %v13853_v20, %v3875_v57  ;;  %v4885_v53 = vmul.f32 %v13414_v9, %v4820_v51  ;;  %vm4435_vm15 = vcmp.gt.f32.partialorder %v13813_v59, 0.0  ;;  %v13902_v40 = vadd.f32 %v13174_v14, %v4310_v8 }
 0x597   : > { %vm3871_vm0 = vweird.f32 %v13771_v47  ;;  %vm3830_vm1 = vweird.f32 %v13729_v38  ;;  %v3895_v5 = vmul.f32 %v13890_v37, %v13823_v62  ;;  %v4755_v34 = vsel %vm4435_vm15, %v13813_v59, %v4691_v36  ;;  %v3378_v36 = vpop.xlane.xlu0 %3377 }
 0x598   : > { %v4693_v4 = vmul.f32 1.6732632, %v8360_v55  ;;  %v4965_v61 = vsel %vm2882_vm5, %v4885_v53, 0.0  ;;  %v4819_v1 = vmul.f32 1.050701, %v4755_v34  ;;  %vm4437_vm3 = vcmp.gt.f32.partialorder %v13820_v31, 0.0  ;;  %vm13952_vm6 = vmor %vm3870_vm14, %vm3871_vm0 }
 0x599   : > { %v3499_v22 = vmul.f32 %v3375_v50, %v12466_v45  ;;  %v13920_v19 = vpop.eup %9351  ;;  %v3853_v59 = vsel %vm13913_vm2, %v13698_v52, %v3849_v0  ;;  %v3869_v21 = vmul.f32 %v13771_v47, %v3868_v29  ;;  %v3828_v56 = vsub.f32 1.5, %v3827_v2  ;;  %4966 = vadd.xlane.f32.xlu2 %v4965_v61  ;;  %v18744_v55 = vld [vmem:[#allocation22_spill] sm:$0xff] }
 0x59a   : > { %v4757_v23 = vsel %vm4437_vm3, %v13820_v31, %v4693_v4  ;;  %v3877_v39 = vmul.f32 0.5, %v3876_v41  ;;  %v4884_v60 = vmul.f32 %v13414_v9, %v4819_v1  ;;  %v4514_v30 = vmul.f32 1.442695, %v13902_v40 }
 0x59b   : > { %v4821_v12 = vmul.f32 1.050701, %v4757_v23  ;;  %v13929_v11 = vpop.eup %9353  ;;  %v3896_v57 = vmul.f32 %v13890_v37, %v3895_v5  ;;  %v3495_v8 = vmul.f32 %v3363_v6, %v12466_v45  ;;  %v4309_v52 = vmul.f32 %v13145_v28, %v13491_v10  ;;  %v3384_v49 = vpop.xlane.xlu2 %3383 }
 0x59c   : > { %v4311_v33 = vmul.f32 %v13145_v28, %v13494_v3  ;;  %v3855_v31 = vmul.f32 %v13920_v19, %v13866_v18  ;;  %v4962_v27 = vsel %vm2882_vm5, %v4884_v60, 0.0  ;;  %v13941_v58 = vadd.f32 1e-05, %v3499_v22 }
 0x59d   : > { %v4886_v43 = vmul.f32 %v13414_v9, %v4821_v12  ;;  %v3829_v26 = vmul.f32 %v13815_v15, %v3828_v56  ;;  %vm3831_vm4 = vweird.f32 %v13815_v15  ;;  %4963 = vadd.xlane.f32.xlu1 %v4962_v27  ;;  %9355 = vpow2.f32 %v4514_v30  ;;  %v18748_v30 = vld [vmem:[#allocation103_spill] sm:$0xff] }
 0x59e   : > { %v13946_v10 = vadd.f32 %v13174_v14, %v4309_v52  ;;  %v3878_v0 = vsub.f32 1.5, %v3877_v39  ;;  %v3905_v51 = vmul.f32 %v13929_v11, %v13877_v42  ;;  %v13960_v2 = vadd.f32 %v13174_v14, %v4311_v33  ;;  %vm13975_vm7 = vmor %vm3830_vm1, %vm3831_vm4 }
 0x59f   : > { %v4968_v29 = vsel %vm2882_vm5, %v4886_v43, 0.0  ;;  %v13963_v50 = vmul.f32 %v3853_v59, %v18744_v55  ;;  %v3873_v25 = vsel %vm13952_vm6, %v13771_v47, %v3869_v21  ;;  %v13968_v41 = vadd.f32 1e-05, %v3495_v8 }
 0x5a0   : > { %4969 = vadd.xlane.f32.xlu0 %v4968_v29  ;;  %v4512_v53 = vmul.f32 1.442695, %v13946_v10  ;;  %v3897_v34 = vmul.f32 0.5, %v3896_v57  ;;  %v3856_v4 = vmul.f32 %v13920_v19, %v3855_v31  ;;  %9357 = vrsqrt.f32 %v13941_v58 }
 0x5a1   : > { %v4516_v47 = vmul.f32 1.442695, %v13960_v2  ;;  %v3833_v61 = vsel %vm13975_vm7, %v13815_v15, %v3829_v26  ;;  %v3500_v1 = vmul.f32 %v3378_v36, %v12466_v45  ;;  %v4313_v38 = vmul.f32 %v13145_v28, %v13714_v32  ;;  %v18747_v32 = vld [vmem:[#allocation101_spill] sm:$0xff] }
 0x5a2   : > { %9359 = vpow2.f32 %v4512_v53  ;;  %v13989_v22 = vmul.f32 %v13853_v20, %v3878_v0  ;;  %vm3881_vm8 = vweird.f32 %v13853_v20  ;;  %v3906_v6 = vmul.f32 %v13929_v11, %v3905_v51  ;;  %v3372_v0 = vpop.xlane.xlu1 %3371 }
 0x5a3   : > { %9361 = vpow2.f32 %v4516_v47  ;;  %v9356_v59 = vpop.eup %9355  ;;  %v3502_v21 = vmul.f32 %v3384_v49, %v12466_v45  ;;  %v13996_v15 = vadd.f32 %v13174_v14, %v4313_v38  ;;  %v4312_v56 = vmul.f32 %v13145_v28, %v13630_v54 }
 0x5a4   : > { %9363 = vrsqrt.f32 %v13968_v41  ;;  %v14001_v23 = vmul.f32 %v3873_v25, %v18747_v32  ;;  %v3898_v39 = vsub.f32 1.5, %v3897_v34  ;;  %v3857_v60 = vmul.f32 0.5, %v3856_v4 }
 0x5a5   : > { %v8362_v12 = vadd.f32 -1.0, %v9356_v59  ;;  %v14004_v57 = vmul.f32 %v3833_v61, %v18748_v30  ;;  %vm3880_vm9 = vweird.f32 %v13794_v7  ;;  %v14007_v8 = vadd.f32 1e-05, %v3500_v1  ;;  %v18751_v30 = vld [vmem:[#allocation16_spill] sm:$0xff] }
 0x5a6   : > { %v4520_v52 = vmul.f32 1.442695, %v13996_v15  ;;  %v14010_v33 = vpop.eup %9357  ;;  %vm14014_vm10 = vmor %vm3880_vm9, %vm3881_vm8  ;;  %vm3900_vm11 = vweird.f32 %v13823_v62  ;;  %vm3901_vm12 = vweird.f32 %v13890_v37  ;;  %v3907_v31 = vmul.f32 0.5, %v3906_v6 }
 0x5a7   : > { %v4695_v27 = vmul.f32 1.6732632, %v8362_v12  ;;  %v14021_v7 = vadd.f32 %v13174_v14, %v4312_v56  ;;  %v3883_v26 = vsel %vm14014_vm10, %v13853_v20, %v13989_v22  ;;  %vm3861_vm13 = vweird.f32 %v13920_v19  ;;  %vm14066_vm3 = vmor %vm3900_vm11, %vm3901_vm12 }
 0x5a8   : > { %v9360_v43 = vpop.eup %9359  ;;  %vm4439_vm14 = vcmp.gt.f32.partialorder %v13902_v40, 0.0  ;;  %v14029_v3 = vadd.f32 1e-05, %v3502_v21  ;;  %9365 = vpow2.f32 %v4520_v52  ;;  %v14032_v51 = vmul.f32 %v13890_v37, %v3898_v39 }
 0x5a9   : > { %v9362_v29 = vpop.eup %9361  ;;  %v3858_v36 = vsub.f32 1.5, %v3857_v60  ;;  %v4759_v55 = vsel %vm4439_vm14, %v13902_v40, %v4695_v27  ;;  %v8361_v25 = vadd.f32 -1.0, %v9360_v43  ;;  %vm3860_vm15 = vweird.f32 %v13866_v18 }
 0x5aa   : > { %v14035_v53 = vpop.eup %9363  ;;  %v3925_v20 = vmul.f32 %v14010_v33, %v13941_v58  ;;  %v4823_v5 = vmul.f32 1.050701, %v4759_v55  ;;  %v8363_v34 = vadd.f32 -1.0, %v9362_v29  ;;  %9367 = vrsqrt.f32 %v14007_v8  ;;  %vm14091_vm6 = vmor %vm3860_vm15, %vm3861_vm13 }
 0x5ab   : > { %v3908_v4 = vsub.f32 1.5, %v3907_v31  ;;  %v4694_v47 = vmul.f32 1.6732632, %v8361_v25  ;;  %v3498_v49 = vmul.f32 %v3372_v0, %v12466_v45  ;;  %v4518_v61 = vmul.f32 1.442695, %v14021_v7  ;;  %v3387_v25 = vpop.xlane.xlu0 %3386 }
 0x5ac   : > { %v4888_v40 = vmul.f32 %v13414_v9, %v4823_v5  ;;  %vm4438_vm0 = vcmp.gt.f32.partialorder %v13946_v10, 0.0  ;;  %v4696_v1 = vmul.f32 1.6732632, %v8363_v34  ;;  %9369 = vrsqrt.f32 %v14029_v3 }
 0x5ad   : > { %v3885_v38 = vmul.f32 %v14035_v53, %v13968_v41  ;;  %v4758_v22 = vsel %vm4438_vm0, %v13946_v10, %v4694_v47  ;;  %vm4440_vm1 = vcmp.gt.f32.partialorder %v13960_v2, 0.0  ;;  %9371 = vpow2.f32 %v4518_v61 }
 0x5ae   : > { %v9366_v6 = vpop.eup %9365  ;;  %v4974_v59 = vsel %vm2882_vm5, %v4888_v40, 0.0  ;;  %v4822_v21 = vmul.f32 1.050701, %v4758_v22  ;;  %v4760_v56 = vsel %vm4440_vm1, %v13960_v2, %v4696_v1  ;;  %v4314_v32 = vmul.f32 %v13145_v28, %v13633_v35 }
 0x5af   : > { %vm3910_vm2 = vweird.f32 %v13877_v42  ;;  %4975 = vadd.xlane.f32.xlu2 %v4974_v59  ;;  %v4824_v39 = vmul.f32 1.050701, %v4760_v56  ;;  %v8365_v60 = vadd.f32 -1.0, %v9366_v6  ;;  %v14055_v12 = vadd.f32 1e-05, %v3498_v49  ;;  %v3393_v49 = vpop.xlane.xlu2 %3392  ;;  %v18758_v56 = vld [vmem:[#allocation2_spill] sm:$0xff] }
 0x5b0   : > { %v14057_v10 = vpop.eup %9367  ;;  %v14060_v52 = vmul.f32 %v3883_v26, %v18751_v30  ;;  %v3859_v35 = vmul.f32 %v13920_v19, %v3858_v36  ;;  %v3926_v54 = vmul.f32 %v14010_v33, %v3925_v20  ;;  %v4887_v31 = vmul.f32 %v13414_v9, %v4822_v21 }
 0x5b1   : > { %v3903_v27 = vsel %vm14066_vm3, %v13890_v37, %v14032_v51  ;;  %v3909_v43 = vmul.f32 %v13929_v11, %v3908_v4  ;;  %vm3911_vm4 = vweird.f32 %v13929_v11  ;;  %v4889_v62 = vmul.f32 %v13414_v9, %v4824_v39  ;;  %v18759_v39 = vld [vmem:[#allocation100_spill] sm:$0xff] }
 0x5b2   : > { %v14080_v26 = vpop.eup %9369  ;;  %v3886_v0 = vmul.f32 %v14035_v53, %v3885_v38  ;;  %v4971_v29 = vsel %vm2882_vm5, %v4887_v31, 0.0  ;;  %v4698_v36 = vmul.f32 1.6732632, %v8365_v60  ;;  %v14085_v55 = vadd.f32 %v13174_v14, %v4314_v32  ;;  %vm14108_vm8 = vmor %vm3910_vm2, %vm3911_vm4 }
 0x5b3   : > { %v9372_v20 = vpop.eup %9371  ;;  %4972 = vadd.xlane.f32.xlu1 %v4971_v29  ;;  %v4977_v51 = vsel %vm2882_vm5, %v4889_v62, 0.0  ;;  %v3935_v5 = vmul.f32 %v14057_v10, %v14007_v8  ;;  %vm4442_vm7 = vcmp.gt.f32.partialorder %v13996_v15, 0.0  ;;  %9373 = vrsqrt.f32 %v14055_v12 }
 0x5b4   : > { %v3863_v34 = vsel %vm14091_vm6, %v13920_v19, %v3859_v35  ;;  %v3927_v4 = vmul.f32 0.5, %v3926_v54  ;;  %4978 = vadd.xlane.f32.xlu0 %v4977_v51  ;;  %v4762_v18 = vsel %vm4442_vm7, %v13996_v15, %v4698_v36  ;;  %v8364_v47 = vadd.f32 -1.0, %v9372_v20 }
 0x5b5   : > { %v3955_v40 = vmul.f32 %v14080_v26, %v14029_v3  ;;  %v4826_v1 = vmul.f32 1.050701, %v4762_v18  ;;  %v4522_v19 = vmul.f32 1.442695, %v14085_v55  ;;  %v3503_v38 = vmul.f32 %v3387_v25, %v12466_v45 }
 0x5b6   : > { %v3913_v15 = vsel %vm14108_vm8, %v13929_v11, %v3909_v43  ;;  %v3887_v22 = vmul.f32 0.5, %v3886_v0  ;;  %vm4441_vm9 = vcmp.gt.f32.partialorder %v14021_v7, 0.0  ;;  %v4697_v42 = vmul.f32 1.6732632, %v8364_v47  ;;  %v3381_v0 = vpop.xlane.xlu1 %3380 }
 0x5b7   : > { %v3936_v6 = vmul.f32 %v14057_v10, %v3935_v5  ;;  %v4891_v59 = vmul.f32 %v13414_v9, %v4826_v1  ;;  %9375 = vpow2.f32 %v4522_v19  ;;  %v3505_v21 = vmul.f32 %v3393_v49, %v12466_v45 }
 0x5b8   : > { %v14124_v32 = vmul.f32 %v3903_v27, %v18758_v56  ;;  %v14127_v60 = vmul.f32 %v3863_v34, %v18759_v39  ;;  %vm3931_vm10 = vweird.f32 %v14010_v33  ;;  %v4761_v11 = vsel %vm4441_vm9, %v14021_v7, %v4697_v42  ;;  %v18760_v27 = vld [vmem:[#allocation13_spill] sm:$0xff] }
 0x5b9   : > { %v14131_v30 = vpop.eup %9373  ;;  %vm3930_vm11 = vweird.f32 %v13941_v58  ;;  %v3956_v2 = vmul.f32 %v14080_v26, %v3955_v40  ;;  %v4983_v35 = vsel %vm2882_vm5, %v4891_v59, 0.0  ;;  %v4825_v54 = vmul.f32 1.050701, %v4761_v11 }
 0x5ba   : > { %v14136_v31 = vadd.f32 1e-05, %v3503_v38  ;;  %v14139_v43 = vmul.f32 %v3913_v15, %v18760_v27  ;;  %4984 = vadd.xlane.f32.xlu2 %v4983_v35  ;;  %v14141_v62 = vadd.f32 1e-05, %v3505_v21  ;;  %v4316_v7 = vmul.f32 %v13145_v28, %v13839_v13  ;;  %vm14183_vm0 = vmor %vm3930_vm11, %vm3931_vm10 }
 0x5bb   : > { %v4315_v29 = vmul.f32 %v13145_v28, %v13643_v16  ;;  %v3928_v36 = vsub.f32 1.5, %v3927_v4  ;;  %v3888_v25 = vsub.f32 1.5, %v3887_v22  ;;  %vm3890_vm12 = vweird.f32 %v13968_v41  ;;  %v3396_v16 = vpop.xlane.xlu0 %3395  ;;  %v3402_v41 = vpop.xlane.xlu2 %3401 }
 0x5bc   : > { %v3937_v20 = vmul.f32 0.5, %v3936_v6  ;;  %v4890_v37 = vmul.f32 %v13414_v9, %v4825_v54  ;;  %v3915_v51 = vmul.f32 %v14131_v30, %v14055_v12  ;;  %v14152_v5 = vadd.f32 %v13174_v14, %v4316_v7 }
 0x5bd   : > { %v14155_v34 = vadd.f32 %v13174_v14, %v4315_v29  ;;  %v4317_v13 = vmul.f32 %v13145_v28, %v13659_v17  ;;  %v9376_v4 = vpop.eup %9375  ;;  %v3957_v18 = vmul.f32 0.5, %v3956_v2  ;;  %9377 = vrsqrt.f32 %v14136_v31 }
 0x5be   : > { %v4980_v47 = vsel %vm2882_vm5, %v4890_v37, 0.0  ;;  %v3501_v49 = vmul.f32 %v3381_v0, %v12466_v45  ;;  %vm3940_vm13 = vweird.f32 %v14007_v8  ;;  %v8366_v61 = vadd.f32 -1.0, %v9376_v4 }
 0x5bf   : > { %4981 = vadd.xlane.f32.xlu1 %v4980_v47  ;;  %9379 = vrsqrt.f32 %v14141_v62  ;;  %v4526_v40 = vmul.f32 1.442695, %v14152_v5  ;;  %v4319_v17 = vmul.f32 %v13145_v28, %v13893_v48  ;;  %v3929_v1 = vmul.f32 %v14010_v33, %v3928_v36 }
 0x5c0   : > { %vm3891_vm14 = vweird.f32 %v14035_v53  ;;  %v3938_v19 = vsub.f32 1.5, %v3937_v20  ;;  %v3506_v38 = vmul.f32 %v3396_v16, %v12466_v45  ;;  %v4699_v15 = vmul.f32 1.6732632, %v8366_v61 }
 0x5c1   : > { %9381 = vpow2.f32 %v4526_v40  ;;  %v4524_v22 = vmul.f32 1.442695, %v14155_v34  ;;  %v14172_v42 = vadd.f32 %v13174_v14, %v4317_v13  ;;  %v3889_v6 = vmul.f32 %v14035_v53, %v3888_v25  ;;  %vm14204_vm2 = vmor %vm3890_vm12, %vm3891_vm14  ;;  %v18765_v13 = vld [vmem:[#allocation8_spill] sm:$0xff] }
 0x5c2   : > { %v3916_v59 = vmul.f32 %v14131_v30, %v3915_v51  ;;  %vm4443_vm15 = vcmp.gt.f32.partialorder %v14085_v55, 0.0  ;;  %v14177_v48 = vadd.f32 1e-05, %v3501_v49  ;;  %v3958_v56 = vsub.f32 1.5, %v3957_v18  ;;  %v18768_v40 = vld [vmem:[#allocation4_spill] sm:$0xff] }
 0x5c3   : > { %v4763_v39 = vsel %vm4443_vm15, %v14085_v55, %v4699_v15  ;;  %9383 = vpow2.f32 %v4524_v22  ;;  %v14189_v11 = vadd.f32 %v13174_v14, %v4319_v17  ;;  %v14191_v2 = vpop.eup %9377  ;;  %v3933_v35 = vsel %vm14183_vm0, %v14010_v33, %v3929_v1  ;;  %v3390_v15 = vpop.xlane.xlu1 %3389 }
 0x5c4   : > { %vm3960_vm1 = vweird.f32 %v14029_v3  ;;  %v4827_v58 = vmul.f32 1.050701, %v4763_v39  ;;  %v4528_v54 = vmul.f32 1.442695, %v14172_v42  ;;  %v3939_v7 = vmul.f32 %v14057_v10, %v3938_v19 }
 0x5c5   : > { %v14198_v27 = vpop.eup %9379  ;;  %vm3941_vm3 = vweird.f32 %v14057_v10  ;;  %vm3961_vm4 = vweird.f32 %v14080_v26  ;;  %v14211_v33 = vadd.f32 1e-05, %v3506_v38  ;;  %v3893_v0 = vsel %vm14204_vm2, %v14035_v53, %v3889_v6 }
 0x5c6   : > { %v3917_v29 = vmul.f32 0.5, %v3916_v59  ;;  %v4892_v36 = vmul.f32 %v13414_v9, %v4827_v58  ;;  %9385 = vrsqrt.f32 %v14177_v48  ;;  %v3959_v20 = vmul.f32 %v14080_v26, %v3958_v56  ;;  %vm14227_vm6 = vmor %vm3940_vm13, %vm3941_vm3  ;;  %v18771_v59 = vld [vmem:[#allocation28_spill] sm:$0xff] }
 0x5c7   : > { %v9382_v25 = vpop.eup %9381  ;;  %v3965_v37 = vmul.f32 %v14191_v2, %v14136_v31  ;;  %9387 = vpow2.f32 %v4528_v54  ;;  %v4532_v51 = vmul.f32 1.442695, %v14189_v11  ;;  %v14223_v16 = vmul.f32 %v3933_v35, %v18765_v13  ;;  %vm14247_vm8 = vmor %vm3960_vm1, %vm3961_vm4 }
 0x5c8   : > { %v4986_v4 = vsel %vm2882_vm5, %v4892_v36, 0.0  ;;  %v3985_v18 = vmul.f32 %v14198_v27, %v14141_v62  ;;  %v8368_v47 = vadd.f32 -1.0, %v9382_v25  ;;  %v3943_v61 = vsel %vm14227_vm6, %v14057_v10, %v3939_v7  ;;  %v18772_v7 = vld [vmem:[#allocation25_spill] sm:$0xff] }
 0x5c9   : > { %v9384_v49 = vpop.eup %9383  ;;  %vm3921_vm7 = vweird.f32 %v14131_v30  ;;  %4987 = vadd.xlane.f32.xlu0 %v4986_v4  ;;  %9389 = vrsqrt.f32 %v14211_v33  ;;  %v3508_v8 = vmul.f32 %v3402_v41, %v12466_v45  ;;  %v14241_v17 = vmul.f32 %v3893_v0, %v18768_v40 }
 0x5ca   : > { %v3918_v19 = vsub.f32 1.5, %v3917_v29  ;;  %vm3920_vm9 = vweird.f32 %v14055_v12  ;;  %v4701_v10 = vmul.f32 1.6732632, %v8368_v47  ;;  %v8367_v38 = vadd.f32 -1.0, %v9384_v49 }
 0x5cb   : > { %v3963_v22 = vsel %vm14247_vm8, %v14080_v26, %v3959_v20  ;;  %v3966_v6 = vmul.f32 %v14191_v2, %v3965_v37  ;;  %vm4445_vm10 = vcmp.gt.f32.partialorder %v14152_v5, 0.0  ;;  %9391 = vpow2.f32 %v4532_v51  ;;  %vm14296_vm13 = vmor %vm3920_vm9, %vm3921_vm7 }
 0x5cc   : > { %v14257_v3 = vpop.eup %9385  ;;  %v14260_v21 = vmul.f32 %v3943_v61, %v18771_v59  ;;  %v3986_v56 = vmul.f32 %v14198_v27, %v3985_v18  ;;  %v4765_v39 = vsel %vm4445_vm10, %v14152_v5, %v4701_v10  ;;  %v4700_v35 = vmul.f32 1.6732632, %v8367_v38 }
 0x5cd   : > { %v9388_v58 = vpop.eup %9387  ;;  %v4829_v54 = vmul.f32 1.050701, %v4765_v39  ;;  %vm4444_vm11 = vcmp.gt.f32.partialorder %v14155_v34, 0.0  ;;  %v14265_v26 = vadd.f32 1e-05, %v3508_v8  ;;  %v3504_v55 = vmul.f32 %v3390_v15, %v12466_v45 }
 0x5ce   : > { %v14269_v0 = vmul.f32 %v3963_v22, %v18772_v7  ;;  %v4764_v29 = vsel %vm4444_vm11, %v14155_v34, %v4700_v35  ;;  %v8369_v36 = vadd.f32 -1.0, %v9388_v58  ;;  %v4318_v41 = vmul.f32 %v13145_v28, %v13751_v24  ;;  %v3405_v35 = vpop.xlane.xlu0 %3404  ;;  %v3411_v58 = vpop.xlane.xlu2 %3410 }
 0x5cf   : > { %v14274_v25 = vpop.eup %9389  ;;  %v3919_v5 = vmul.f32 %v14131_v30, %v3918_v19  ;;  %v3967_v20 = vmul.f32 0.5, %v3966_v6  ;;  %v4894_v37 = vmul.f32 %v13414_v9, %v4829_v54  ;;  %v4828_v51 = vmul.f32 1.050701, %v4764_v29 }
 0x5d0   : > { %v3987_v13 = vmul.f32 0.5, %v3986_v56  ;;  %v3945_v53 = vmul.f32 %v14257_v3, %v14177_v48  ;;  %vm4446_vm12 = vcmp.gt.f32.partialorder %v14172_v42, 0.0  ;;  %v4702_v4 = vmul.f32 1.6732632, %v8369_v36 }
 0x5d1   : > { %v9392_v34 = vpop.eup %9391  ;;  %v4992_v18 = vsel %vm2882_vm5, %v4894_v37, 0.0  ;;  %v4893_v24 = vmul.f32 %v13414_v9, %v4828_v51  ;;  %9393 = vrsqrt.f32 %v14265_v26  ;;  %v14284_v47 = vadd.f32 1e-05, %v3504_v55  ;;  %v18775_v55 = vld [vmem:[#allocation7_spill] sm:$0xff] }
 0x5d2   : > { %4993 = vadd.xlane.f32.xlu2 %v4992_v18  ;;  %v4766_v49 = vsel %vm4446_vm12, %v14172_v42, %v4702_v4  ;;  %v3995_v61 = vmul.f32 %v14274_v25, %v14211_v33  ;;  %v8371_v8 = vadd.f32 -1.0, %v9392_v34  ;;  %v14290_v40 = vadd.f32 %v13174_v14, %v4318_v41 }
 0x5d3   : > { %vm3970_vm14 = vweird.f32 %v14136_v31  ;;  %v4989_v19 = vsel %vm2882_vm5, %v4893_v24, 0.0  ;;  %v4830_v42 = vmul.f32 1.050701, %v4766_v49  ;;  %v4320_v10 = vmul.f32 %v13145_v28, %v13836_v63 }
 0x5d4   : > { %v3923_v38 = vsel %vm14296_vm13, %v14131_v30, %v3919_v5  ;;  %v3968_v15 = vsub.f32 1.5, %v3967_v20  ;;  %v3946_v22 = vmul.f32 %v14257_v3, %v3945_v53  ;;  %4990 = vadd.xlane.f32.xlu1 %v4989_v19  ;;  %v4704_v12 = vmul.f32 1.6732632, %v8371_v8  ;;  %v3399_v5 = vpop.xlane.xlu1 %3398 }
 0x5d5   : > { %v3988_v6 = vsub.f32 1.5, %v3987_v13  ;;  %v4895_v59 = vmul.f32 %v13414_v9, %v4830_v42  ;;  %vm4448_vm15 = vcmp.gt.f32.partialorder %v14189_v11, 0.0  ;;  %v4530_v56 = vmul.f32 1.442695, %v14290_v40 }
 0x5d6   : > { %v3996_v39 = vmul.f32 %v14274_v25, %v3995_v61  ;;  %v4768_v63 = vsel %vm4448_vm15, %v14189_v11, %v4704_v12  ;;  %9395 = vrsqrt.f32 %v14284_v47  ;;  %v14315_v30 = vadd.f32 %v13174_v14, %v4320_v10 }
 0x5d7   : > { %v14317_v54 = vpop.eup %9393  ;;  %v14320_v7 = vmul.f32 %v3923_v38, %v18775_v55  ;;  %v4995_v29 = vsel %vm2882_vm5, %v4895_v59, 0.0  ;;  %v4832_v36 = vmul.f32 1.050701, %v4768_v63  ;;  %9397 = vpow2.f32 %v4530_v56 }
 0x5d8   : > { %v14324_v41 = vmul.f32 %v14191_v2, %v3968_v15  ;;  %vm3971_vm0 = vweird.f32 %v14191_v2  ;;  %vm3991_vm1 = vweird.f32 %v14198_v27  ;;  %v3947_v11 = vmul.f32 0.5, %v3946_v22  ;;  %4996 = vadd.xlane.f32.xlu0 %v4995_v29 }
 0x5d9   : > { %v4897_v20 = vmul.f32 %v13414_v9, %v4832_v36  ;;  %v4534_v37 = vmul.f32 1.442695, %v14315_v30  ;;  %v3509_v51 = vmul.f32 %v3405_v35, %v12466_v45  ;;  %v3511_v13 = vmul.f32 %v3411_v58, %v12466_v45  ;;  %vm14349_vm2 = vmor %vm3970_vm14, %vm3971_vm0  ;;  %v9884_v35 = vld [vmem:[%s18031_s3] sm:$0xff] }
 0x5da   : > { %v14333_v53 = vmul.f32 %v14198_v27, %v3988_v6  ;;  %v3997_v4 = vmul.f32 0.5, %v3996_v39  ;;  %v4015_v34 = vmul.f32 %v14317_v54, %v14265_v26  ;;  %v4322_v18 = vmul.f32 %v13145_v28, %v14004_v57 }
 0x5db   : > { %v5001_v24 = vsel %vm2882_vm5, %v4897_v20, 0.0  ;;  %9399 = vpow2.f32 %v4534_v37  ;;  %v14340_v49 = vadd.f32 1e-05, %v3509_v51  ;;  %v3507_v61 = vmul.f32 %v3399_v5, %v12466_v45 }
 0x5dc   : > { %v14343_v8 = vpop.eup %9395  ;;  %vm3990_vm3 = vweird.f32 %v14141_v62  ;;  %vm3951_vm4 = vweird.f32 %v14257_v3  ;;  %5002 = vadd.xlane.f32.xlu2 %v5001_v24  ;;  %v14355_v57 = vadd.f32 1e-05, %v3511_v13  ;;  %v14358_v19 = vadd.f32 %v13174_v14, %v4322_v18 }
 0x5dd   : > { %v9398_v42 = vpop.eup %9397  ;;  %v3973_v31 = vsel %vm14349_vm2, %v14191_v2, %v14324_v41  ;;  %vm14366_vm6 = vmor %vm3990_vm3, %vm3991_vm1  ;;  %9401 = vrsqrt.f32 %v14340_v49  ;;  %v4321_v62 = vmul.f32 %v13145_v28, %v13842_v46  ;;  %v4323_v38 = vmul.f32 %v13145_v28, %v13886_v44 }
 0x5de   : > { %v3993_v15 = vsel %vm14366_vm6, %v14198_v27, %v14333_v53  ;;  %v3948_v2 = vsub.f32 1.5, %v3947_v11  ;;  %vm3950_vm7 = vweird.f32 %v14177_v48  ;;  %v4016_v22 = vmul.f32 %v14317_v54, %v4015_v34  ;;  %v3414_v11 = vpop.xlane.xlu0 %3413 }
 0x5df   : > { %v8370_v12 = vadd.f32 -1.0, %v9398_v42  ;;  %v3998_v6 = vsub.f32 1.5, %v3997_v4  ;;  %vm4000_vm8 = vweird.f32 %v14211_v33  ;;  %9403 = vrsqrt.f32 %v14355_v57  ;;  %v3420_v4 = vpop.xlane.xlu2 %3419  ;;  %vm14430_vm12 = vmor %vm3950_vm7, %vm3951_vm4 }
 0x5e0   : > { %v4538_v46 = vmul.f32 1.442695, %v14358_v19  ;;  %v14384_v59 = vadd.f32 1e-05, %v3507_v61  ;;  %v3975_v44 = vmul.f32 %v14343_v8, %v14284_v47  ;;  %v14389_v27 = vadd.f32 %v13174_v14, %v4321_v62  ;;  %v18780_v61 = vld [vmem:[#allocation26_spill] sm:$0xff] }
 0x5e1   : > { %v4703_v56 = vmul.f32 1.6732632, %v8370_v12  ;;  %v14392_v39 = vadd.f32 %v13174_v14, %v4323_v38  ;;  %v9400_v63 = vpop.eup %9399  ;;  %vm4001_vm9 = vweird.f32 %v14274_v25  ;;  %vm4447_vm10 = vcmp.gt.f32.partialorder %v14290_v40, 0.0 }
 0x5e2   : > { %9405 = vpow2.f32 %v4538_v46  ;;  %v5134_v58 = vrot.slane %v9884_v35, 7  ;;  %v4017_v55 = vmul.f32 0.5, %v4016_v22  ;;  %v8372_v36 = vadd.f32 -1.0, %v9400_v63  ;;  %vm14444_vm13 = vmor %vm4000_vm8, %vm4001_vm9 }
 0x5e3   : > { %v4767_v29 = vsel %vm4447_vm10, %v14290_v40, %v4703_v56  ;;  %v4536_v41 = vmul.f32 1.442695, %v14389_v27  ;;  %v14401_v5 = vpop.eup %9401  ;;  %v14404_v20 = vmul.f32 %v14257_v3, %v3948_v2  ;;  %9407 = vrsqrt.f32 %v14384_v59  ;;  %v18781_v2 = vld [vmem:[#allocation3_spill] sm:$0xff] }
 0x5e4   : > { %v4831_v37 = vmul.f32 1.050701, %v4767_v29  ;;  %v4540_v51 = vmul.f32 1.442695, %v14392_v39  ;;  %8755 = vpush %v5134_v58  ;;  %v14409_v13 = vmul.f32 %v14274_v25, %v3998_v6  ;;  %v3976_v40 = vmul.f32 %v14343_v8, %v3975_v44 }
 0x5e5   : > { %v4705_v53 = vmul.f32 1.6732632, %v8372_v36  ;;  %9409 = vpow2.f32 %v4536_v41  ;;  %v14412_v34 = vpop.eup %9403  ;;  %vm4449_vm11 = vcmp.gt.f32.partialorder %v14315_v30, 0.0  ;;  %v3512_v24 = vmul.f32 %v3414_v11, %v12466_v45 }
 0x5e6   : > { %v4896_v18 = vmul.f32 %v13414_v9, %v4831_v37  ;;  %9411 = vpow2.f32 %v4540_v51  ;;  %v14418_v1 = vmul.f32 %v3973_v31, %v18780_v61  ;;  %v4018_v42 = vsub.f32 1.5, %v4017_v55 }
 0x5e7   : > { %v4769_v10 = vsel %vm4449_vm11, %v14315_v30, %v4705_v53  ;;  %v4025_v62 = vmul.f32 %v14401_v5, %v14340_v49  ;;  %v14424_v22 = vmul.f32 %v3993_v15, %v18781_v2  ;;  %v3514_v30 = vmul.f32 %v3420_v4, %v12466_v45 }
 0x5e8   : > { %v9406_v38 = vpop.eup %9405  ;;  %v4998_v31 = vsel %vm2882_vm5, %v4896_v18, 0.0  ;;  %v4833_v6 = vmul.f32 1.050701, %v4769_v10  ;;  %v3953_v46 = vsel %vm14430_vm12, %v14257_v3, %v14404_v20  ;;  %vm4020_vm14 = vweird.f32 %v14265_v26 }
 0x5e9   : > { %vm4021_vm15 = vweird.f32 %v14317_v54  ;;  %4999 = vadd.xlane.f32.xlu1 %v4998_v31  ;;  %v4045_v15 = vmul.f32 %v14412_v34, %v14355_v57  ;;  %v8374_v44 = vadd.f32 -1.0, %v9406_v38  ;;  %v14452_v56 = vpop.eup %9407  ;;  %v4003_v33 = vsel %vm14444_vm13, %v14274_v25, %v14409_v13 }
 0x5ea   : > { %v3977_v3 = vmul.f32 0.5, %v3976_v40  ;;  %v4898_v63 = vmul.f32 %v13414_v9, %v4833_v6  ;;  %v14459_v35 = vadd.f32 1e-05, %v3512_v24  ;;  %v14462_v55 = vmul.f32 %v14317_v54, %v4018_v42  ;;  %v3408_v42 = vpop.xlane.xlu1 %3407  ;;  %v18786_v6 = vld [vmem:[#allocation12_spill] sm:$0xff]  ;;  %vm14493_vm3 = vmor %vm4020_vm14, %vm4021_vm15 }
 0x5eb   : > { %v9410_v58 = vpop.eup %9409  ;;  %v4026_v29 = vmul.f32 %v14401_v5, %v4025_v62  ;;  %vm4451_vm0 = vcmp.gt.f32.partialorder %v14358_v19, 0.0  ;;  %v4707_v36 = vmul.f32 1.6732632, %v8374_v44  ;;  %v14467_v37 = vadd.f32 1e-05, %v3514_v30 }
 0x5ec   : > { %v9412_v41 = vpop.eup %9411  ;;  %v5004_v11 = vsel %vm2882_vm5, %v4898_v63, 0.0  ;;  %v8373_v20 = vadd.f32 -1.0, %v9410_v58  ;;  %v4325_v25 = vmul.f32 %v13145_v28, %v14127_v60  ;;  %v4046_v51 = vmul.f32 %v14412_v34, %v4045_v15 }
 0x5ed   : > { %5005 = vadd.xlane.f32.xlu0 %v5004_v11  ;;  %v4771_v13 = vsel %vm4451_vm0, %v14358_v19, %v4707_v36  ;;  %v4005_v40 = vmul.f32 %v14452_v56, %v14384_v59  ;;  %v8375_v53 = vadd.f32 -1.0, %v9412_v41  ;;  %v3978_v4 = vsub.f32 1.5, %v3977_v3  ;;  %v18789_v3 = vld [vmem:[#allocation14_spill] sm:$0xff] }
 0x5ee   : > { %v4835_v18 = vmul.f32 1.050701, %v4771_v13  ;;  %v4706_v24 = vmul.f32 1.6732632, %v8373_v20  ;;  %9413 = vrsqrt.f32 %v14459_v35  ;;  %v4027_v61 = vmul.f32 0.5, %v4026_v29 }
 0x5ef   : > { %vm4450_vm1 = vcmp.gt.f32.partialorder %v14389_v27, 0.0  ;;  %vm4452_vm2 = vcmp.gt.f32.partialorder %v14392_v39, 0.0  ;;  %v4708_v60 = vmul.f32 1.6732632, %v8375_v53  ;;  %9415 = vrsqrt.f32 %v14467_v37 }
 0x5f0   : > { %v4900_v10 = vmul.f32 %v13414_v9, %v4835_v18  ;;  %v4770_v19 = vsel %vm4450_vm1, %v14389_v27, %v4706_v24  ;;  %v14482_v62 = vadd.f32 %v13174_v14, %v4325_v25  ;;  %v4047_v38 = vmul.f32 0.5, %v4046_v51  ;;  %v3429_v25 = vpop.xlane.xlu2 %3428 }
 0x5f1   : > { %v4006_v2 = vmul.f32 %v14452_v56, %v4005_v40  ;;  %v4834_v12 = vmul.f32 1.050701, %v4770_v19  ;;  %v4772_v31 = vsel %vm4452_vm2, %v14392_v39, %v4708_v60  ;;  %v14487_v30 = vmul.f32 %v3953_v46, %v18786_v6 }
 0x5f2   : > { %vm3980_vm4 = vweird.f32 %v14284_v47  ;;  %v5010_v48 = vsel %vm2882_vm5, %v4900_v10, 0.0  ;;  %v4836_v15 = vmul.f32 1.050701, %v4772_v31  ;;  %v3510_v44 = vmul.f32 %v3408_v42, %v12466_v45  ;;  %v3417_v27 = vpop.xlane.xlu1 %3416 }
 0x5f3   : > { %v14501_v39 = vmul.f32 %v4003_v33, %v18789_v3  ;;  %v4023_v46 = vsel %vm14493_vm3, %v14317_v54, %v14462_v55  ;;  %vm3981_vm6 = vweird.f32 %v14343_v8  ;;  %5011 = vadd.xlane.f32.xlu2 %v5010_v48  ;;  %v4899_v26 = vmul.f32 %v13414_v9, %v4834_v12  ;;  %v3423_v55 = vpop.xlane.xlu0 %3422 }
 0x5f4   : > { %v14509_v63 = vpop.eup %9413  ;;  %v3979_v58 = vmul.f32 %v14343_v8, %v3978_v4  ;;  %v4028_v29 = vsub.f32 1.5, %v4027_v61  ;;  %v4901_v36 = vmul.f32 %v13414_v9, %v4836_v15  ;;  %v4544_v33 = vmul.f32 1.442695, %v14482_v62  ;;  %vm14550_vm10 = vmor %vm3980_vm4, %vm3981_vm6  ;;  %v18792_v15 = vld [vmem:[#allocation36_spill] sm:$0xff] }
 0x5f5   : > { %v4048_v41 = vsub.f32 1.5, %v4047_v38  ;;  %v4007_v11 = vmul.f32 0.5, %v4006_v2  ;;  %v5007_v20 = vsel %vm2882_vm5, %v4899_v26, 0.0  ;;  %v4324_v54 = vmul.f32 %v13145_v28, %v13963_v50  ;;  %v14517_v51 = vpop.eup %9415 }
 0x5f6   : > { %5008 = vadd.xlane.f32.xlu1 %v5007_v20  ;;  %v5013_v13 = vsel %vm2882_vm5, %v4901_v36, 0.0  ;;  %9417 = vpow2.f32 %v4544_v33  ;;  %v14520_v40 = vadd.f32 1e-05, %v3510_v44  ;;  %v4326_v53 = vmul.f32 %v13145_v28, %v14001_v23 }
 0x5f7   : > { %vm4030_vm7 = vweird.f32 %v14340_v49  ;;  %vm4031_vm8 = vweird.f32 %v14401_v5  ;;  %5014 = vadd.xlane.f32.xlu0 %v5013_v13  ;;  %v4055_v50 = vmul.f32 %v14509_v63, %v14459_v35  ;;  %v14529_v4 = vadd.f32 %v13174_v14, %v4324_v54  ;;  %v18797_v54 = vld [vmem:[#allocation19_spill] sm:$0xff] }
 0x5f8   : > { %vm4051_vm9 = vweird.f32 %v14412_v34  ;;  %v14533_v18 = vadd.f32 %v13174_v14, %v4326_v53  ;;  %v3515_v24 = vmul.f32 %v3423_v55, %v12466_v45  ;;  %v3517_v23 = vmul.f32 %v3429_v25, %v12466_v45  ;;  %vm14567_vm11 = vmor %vm4030_vm7, %vm4031_vm8 }
 0x5f9   : > { %v4029_v61 = vmul.f32 %v14401_v5, %v4028_v29  ;;  %v4075_v60 = vmul.f32 %v14517_v51, %v14467_v37  ;;  %v4542_v42 = vmul.f32 1.442695, %v14529_v4  ;;  %v4328_v10 = vmul.f32 %v13145_v28, %v14241_v17 }
 0x5fa   : > { %v4049_v19 = vmul.f32 %v14412_v34, %v4048_v41  ;;  %v4008_v38 = vsub.f32 1.5, %v4007_v11  ;;  %9419 = vrsqrt.f32 %v14520_v40  ;;  %v4546_v2 = vmul.f32 1.442695, %v14533_v18 }
 0x5fb   : > { %v4056_v31 = vmul.f32 %v14509_v63, %v4055_v50  ;;  %9421 = vpow2.f32 %v4542_v42  ;;  %v14555_v6 = vadd.f32 1e-05, %v3515_v24  ;;  %v14558_v17 = vadd.f32 %v13174_v14, %v4328_v10  ;;  %v18799_v24 = vld [vmem:[#allocation44_spill] sm:$0xff] }
 0x5fc   : > { %v9418_v48 = vpop.eup %9417  ;;  %v14561_v44 = vmul.f32 %v4023_v46, %v18792_v15  ;;  %vm4050_vm12 = vweird.f32 %v14355_v57  ;;  %9423 = vpow2.f32 %v4546_v2  ;;  %v14572_v3 = vadd.f32 1e-05, %v3517_v23 }
 0x5fd   : > { %v3983_v26 = vsel %vm14550_vm10, %v14343_v8, %v3979_v58  ;;  %vm14579_vm13 = vmor %vm4050_vm12, %vm4051_vm9  ;;  %vm4011_vm14 = vweird.f32 %v14452_v56  ;;  %v4076_v49 = vmul.f32 %v14517_v51, %v4075_v60  ;;  %v8377_v29 = vadd.f32 -1.0, %v9418_v48 }
 0x5fe   : > { %v4033_v57 = vsel %vm14567_vm11, %v14401_v5, %v4029_v61  ;;  %v4053_v36 = vsel %vm14579_vm13, %v14412_v34, %v4049_v19  ;;  %v4009_v8 = vmul.f32 %v14452_v56, %v4008_v38  ;;  %v3513_v58 = vmul.f32 %v3417_v27, %v12466_v45  ;;  %v18798_v34 = vld [vmem:[#allocation37_spill] sm:$0xff] }
 0x5ff   : > { %v4057_v33 = vmul.f32 0.5, %v4056_v31  ;;  %v4710_v41 = vmul.f32 1.6732632, %v8377_v29  ;;  %9425 = vrsqrt.f32 %v14555_v6  ;;  %v4550_v11 = vmul.f32 1.442695, %v14558_v17 }
 0x600   : > { %v14595_v20 = vpop.eup %9419  ;;  %v14598_v55 = vmul.f32 %v3983_v26, %v18797_v54  ;;  %vm4010_vm15 = vweird.f32 %v14384_v59  ;;  %vm4454_vm0 = vcmp.gt.f32.partialorder %v14482_v62, 0.0  ;;  %9427 = vrsqrt.f32 %v14572_v3  ;;  %v3432_v54 = vpop.xlane.xlu0 %3431 }
 0x601   : > { %v9422_v5 = vpop.eup %9421  ;;  %v14604_v25 = vmul.f32 %v4033_v57, %v18798_v34  ;;  %vm4060_vm1 = vweird.f32 %v14459_v35  ;;  %v4077_v13 = vmul.f32 0.5, %v4076_v49  ;;  %v4774_v53 = vsel %vm4454_vm0, %v14482_v62, %v4710_v41  ;;  %vm14613_vm2 = vmor %vm4010_vm15, %vm4011_vm14 }
 0x602   : > { %9429 = vpow2.f32 %v4550_v11  ;;  %v9424_v50 = vpop.eup %9423  ;;  %v14609_v23 = vmul.f32 %v4053_v36, %v18799_v24  ;;  %v4838_v61 = vmul.f32 1.050701, %v4774_v53  ;;  %v8376_v60 = vadd.f32 -1.0, %v9422_v5 }
 0x603   : > { %v14617_v42 = vadd.f32 1e-05, %v3513_v58  ;;  %v4013_v10 = vsel %vm14613_vm2, %v14452_v56, %v4009_v8  ;;  %v4058_v62 = vsub.f32 1.5, %v4057_v33  ;;  %v8378_v19 = vadd.f32 -1.0, %v9424_v50  ;;  %v18802_v8 = vld [vmem:[#allocation24_spill] sm:$0xff] }
 0x604   : > { %v4327_v38 = vmul.f32 %v13145_v28, %v14060_v52  ;;  %vm4061_vm3 = vweird.f32 %v14509_v63  ;;  %v4903_v2 = vmul.f32 %v13414_v9, %v4838_v61  ;;  %v4035_v12 = vmul.f32 %v14595_v20, %v14520_v40  ;;  %v3438_v61 = vpop.xlane.xlu2 %3437 }
 0x605   : > { %v4709_v31 = vmul.f32 1.6732632, %v8376_v60  ;;  %v14628_v27 = vpop.eup %9425  ;;  %v4078_v48 = vsub.f32 1.5, %v4077_v13  ;;  %vm4453_vm4 = vcmp.gt.f32.partialorder %v14529_v4, 0.0  ;;  %vm4455_vm6 = vcmp.gt.f32.partialorder %v14533_v18, 0.0  ;;  %vm14660_vm9 = vmor %vm4060_vm1, %vm4061_vm3 }
 0x606   : > { %v4711_v56 = vmul.f32 1.6732632, %v8378_v19  ;;  %v14632_v15 = vpop.eup %9427  ;;  %v5019_v52 = vsel %vm2882_vm5, %v4903_v2, 0.0  ;;  %9431 = vrsqrt.f32 %v14617_v42  ;;  %v4329_v26 = vmul.f32 %v13145_v28, %v14124_v32 }
 0x607   : > { %v4773_v47 = vsel %vm4453_vm4, %v14529_v4, %v4709_v31  ;;  %v4059_v49 = vmul.f32 %v14509_v63, %v4058_v62  ;;  %5020 = vadd.xlane.f32.xlu2 %v5019_v52  ;;  %v14642_v36 = vadd.f32 %v13174_v14, %v4327_v38  ;;  %v14645_v58 = vmul.f32 %v4013_v10, %v18802_v8 }
 0x608   : > { %v9430_v46 = vpop.eup %9429  ;;  %v4837_v29 = vmul.f32 1.050701, %v4773_v47  ;;  %v4775_v57 = vsel %vm4455_vm6, %v14533_v18, %v4711_v56  ;;  %vm4080_vm7 = vweird.f32 %v14467_v37  ;;  %v4036_v4 = vmul.f32 %v14595_v20, %v4035_v12  ;;  %v18805_v47 = vld [vmem:[#allocation20_spill] sm:$0xff] }
 0x609   : > { %v4839_v33 = vmul.f32 1.050701, %v4775_v57  ;;  %v8380_v41 = vadd.f32 -1.0, %v9430_v46  ;;  %v14650_v32 = vmul.f32 %v14517_v51, %v4078_v48  ;;  %vm4081_vm8 = vweird.f32 %v14517_v51 }
 0x60a   : > { %v4902_v11 = vmul.f32 %v13414_v9, %v4837_v29  ;;  %v4085_v18 = vmul.f32 %v14628_v27, %v14555_v6  ;;  %v4105_v13 = vmul.f32 %v14632_v15, %v14572_v3  ;;  %v14668_v50 = vadd.f32 %v13174_v14, %v4329_v26  ;;  %vm14704_vm12 = vmor %vm4080_vm7, %vm4081_vm8 }
 0x60b   : > { %v4904_v34 = vmul.f32 %v13414_v9, %v4839_v33  ;;  %v4713_v53 = vmul.f32 1.6732632, %v8380_v41  ;;  %v4063_v24 = vsel %vm14660_vm9, %v14509_v63, %v4059_v49  ;;  %vm4457_vm10 = vcmp.gt.f32.partialorder %v14558_v17, 0.0 }
 0x60c   : > { %v5016_v59 = vsel %vm2882_vm5, %v4902_v11, 0.0  ;;  %v4548_v35 = vmul.f32 1.442695, %v14642_v36  ;;  %v14676_v60 = vpop.eup %9431  ;;  %v4037_v10 = vmul.f32 0.5, %v4036_v4  ;;  %v4331_v38 = vmul.f32 %v13145_v28, %v14320_v7 }
 0x60d   : > { %5017 = vadd.xlane.f32.xlu1 %v5016_v59  ;;  %v5022_v62 = vsel %vm2882_vm5, %v4904_v34, 0.0  ;;  %v4777_v19 = vsel %vm4457_vm10, %v14558_v17, %v4713_v53  ;;  %v4086_v63 = vmul.f32 %v14628_v27, %v4085_v18  ;;  %v4330_v12 = vmul.f32 %v13145_v28, %v14139_v43  ;;  %v3426_v17 = vpop.xlane.xlu1 %3425 }
 0x60e   : > { %5023 = vadd.xlane.f32.xlu0 %v5022_v62  ;;  %v4841_v2 = vmul.f32 1.050701, %v4777_v19  ;;  %9433 = vpow2.f32 %v4548_v35  ;;  %v4106_v31 = vmul.f32 %v14632_v15, %v4105_v13  ;;  %v4552_v48 = vmul.f32 1.442695, %v14668_v50  ;;  %v3441_v13 = vpop.xlane.xlu0 %3440 }
 0x60f   : > { %v3518_v56 = vmul.f32 %v3432_v54, %v12466_v45  ;;  %v3520_v52 = vmul.f32 %v3438_v61, %v12466_v45  ;;  %v14690_v26 = vmul.f32 %v4063_v24, %v18805_v47  ;;  %vm4040_vm11 = vweird.f32 %v14520_v40 }
 0x610   : > { %v4906_v7 = vmul.f32 %v13414_v9, %v4841_v2  ;;  %v4065_v46 = vmul.f32 %v14676_v60, %v14617_v42  ;;  %v4038_v43 = vsub.f32 1.5, %v4037_v10  ;;  %9435 = vpow2.f32 %v4552_v48  ;;  %v3447_v2 = vpop.xlane.xlu2 %3446 }
 0x611   : > { %v14696_v49 = vadd.f32 1e-05, %v3518_v56  ;;  %v14698_v29 = vadd.f32 1e-05, %v3520_v52  ;;  %v4087_v8 = vmul.f32 0.5, %v4086_v63  ;;  %v14710_v33 = vadd.f32 %v13174_v14, %v4331_v38 }
 0x612   : > { %v5028_v4 = vsel %vm2882_vm5, %v4906_v7, 0.0  ;;  %v3516_v41 = vmul.f32 %v3426_v17, %v12466_v45  ;;  %v4083_v11 = vsel %vm14704_vm12, %v14517_v51, %v14650_v32  ;;  %v4107_v18 = vmul.f32 0.5, %v4106_v31 }
 0x613   : > { %5029 = vadd.xlane.f32.xlu2 %v5028_v4  ;;  %9437 = vrsqrt.f32 %v14696_v49  ;;  %v14719_v37 = vadd.f32 %v13174_v14, %v4330_v12  ;;  %vm4041_vm13 = vweird.f32 %v14595_v20  ;;  %vm4090_vm14 = vweird.f32 %v14555_v6 }
 0x614   : > { %v9434_v54 = vpop.eup %9433  ;;  %v4066_v5 = vmul.f32 %v14676_v60, %v4065_v46  ;;  %9439 = vrsqrt.f32 %v14698_v29  ;;  %v4556_v34 = vmul.f32 1.442695, %v14710_v33  ;;  %v14727_v53 = vmul.f32 %v14595_v20, %v4038_v43  ;;  %vm14742_vm2 = vmor %vm4040_vm11, %vm4041_vm13 }
 0x615   : > { %vm4091_vm15 = vweird.f32 %v14628_v27  ;;  %v8379_v24 = vadd.f32 -1.0, %v9434_v54  ;;  %v14730_v59 = vadd.f32 1e-05, %v3516_v41  ;;  %v4088_v35 = vsub.f32 1.5, %v4087_v8  ;;  %s8756_s19 = spop %8755 }
 0x616   : > { %vm4110_vm0 = vweird.f32 %v14572_v3  ;;  %9441 = vpow2.f32 %v4556_v34  ;;  %v4554_v61 = vmul.f32 1.442695, %v14719_v37  ;;  %v4332_v10 = vmul.f32 %v13145_v28, %v14223_v16  ;;  %v9436_v62 = vpop.eup %9435  ;;  %vm14776_vm7 = vmor %vm4090_vm14, %vm4091_vm15 }
 0x617   : > { %v4108_v19 = vsub.f32 1.5, %v4107_v18  ;;  %vm4456_vm1 = vcmp.gt.f32.partialorder %v14642_v36, 0.0  ;;  %v4712_v38 = vmul.f32 1.6732632, %v8379_v24  ;;  %v3521_v63 = vmul.f32 %v3441_v13, %v12466_v45 }
 0x618   : > { %v4067_v31 = vmul.f32 0.5, %v4066_v5  ;;  %v8381_v48 = vadd.f32 -1.0, %v9436_v62  ;;  %9443 = vpow2.f32 %v4554_v61  ;;  %v14747_v16 = vadd.f32 %v13174_v14, %v4332_v10 }
 0x619   : > { %v14749_v56 = vpop.eup %9437  ;;  %v4043_v52 = vsel %vm14742_vm2, %v14595_v20, %v14727_v53  ;;  %vm4111_vm3 = vweird.f32 %v14632_v15  ;;  %v4776_v40 = vsel %vm4456_vm1, %v14642_v36, %v4712_v38  ;;  %9445 = vrsqrt.f32 %v14730_v59 }
 0x61a   : > { %v14758_v17 = vpop.eup %9439  ;;  %v4089_v47 = vmul.f32 %v14628_v27, %v4088_v35  ;;  %vm4070_vm4 = vweird.f32 %v14617_v42  ;;  %v4840_v7 = vmul.f32 1.050701, %v4776_v40  ;;  %v4714_v46 = vmul.f32 1.6732632, %v8381_v48  ;;  %vm14795_vm9 = vmor %vm4110_vm0, %vm4111_vm3  ;;  %v18819_v42 = vld [vmem:[#allocation50_spill] sm:$0xff] }
 0x61b   : > { %v3523_v43 = vmul.f32 %v3447_v2, %v12466_v45  ;;  %v4109_v8 = vmul.f32 %v14632_v15, %v4108_v19  ;;  %vm4458_vm6 = vcmp.gt.f32.partialorder %v14668_v50, 0.0  ;;  %v4558_v20 = vmul.f32 1.442695, %v14747_v16 }
 0x61c   : > { %v14766_v4 = vadd.f32 1e-05, %v3521_v63  ;;  %v9442_v36 = vpop.eup %9441  ;;  %v4068_v41 = vsub.f32 1.5, %v4067_v31  ;;  %v4905_v18 = vmul.f32 %v13414_v9, %v4840_v7  ;;  %v4778_v54 = vsel %vm4458_vm6, %v14668_v50, %v4714_v46  ;;  %v18814_v46 = vld [vmem:[#allocation43_spill] sm:$0xff] }
 0x61d   : > { %v4115_v5 = vmul.f32 %v14749_v56, %v14696_v49  ;;  %v4842_v13 = vmul.f32 1.050701, %v4778_v54  ;;  %v4135_v53 = vmul.f32 %v14758_v17, %v14698_v29  ;;  %v8383_v24 = vadd.f32 -1.0, %v9442_v36 }
 0x61e   : > { %9447 = vpow2.f32 %v4558_v20  ;;  %v9444_v35 = vpop.eup %9443  ;;  %v4093_v50 = vsel %vm14776_vm7, %v14628_v27, %v4089_v47  ;;  %vm4071_vm8 = vweird.f32 %v14676_v60  ;;  %v5025_v61 = vsel %vm2882_vm5, %v4905_v18, 0.0  ;;  %v18816_v20 = vld [vmem:[#allocation6_spill] sm:$0xff]  ;;  %v3435_v18 = vpop.xlane.xlu1 %3434 }
 0x61f   : > { %v14787_v6 = vadd.f32 1e-05, %v3523_v43  ;;  %v14789_v10 = vpop.eup %9445  ;;  %5026 = vadd.xlane.f32.xlu1 %v5025_v61  ;;  %v4907_v19 = vmul.f32 %v13414_v9, %v4842_v13  ;;  %v4716_v27 = vmul.f32 1.6732632, %v8383_v24  ;;  %v8382_v38 = vadd.f32 -1.0, %v9444_v35  ;;  %vm14832_vm13 = vmor %vm4070_vm4, %vm4071_vm8 }
 0x620   : > { %9449 = vrsqrt.f32 %v14766_v4  ;;  %v4113_v63 = vsel %vm14795_vm9, %v14632_v15, %v4109_v8  ;;  %v4069_v2 = vmul.f32 %v14676_v60, %v4068_v41  ;;  %v4116_v12 = vmul.f32 %v14749_v56, %v4115_v5  ;;  %v3456_v41 = vpop.xlane.xlu2 %3455 }
 0x621   : > { %vm4460_vm10 = vcmp.gt.f32.partialorder %v14710_v33, 0.0  ;;  %v5031_v3 = vsel %vm2882_vm5, %v4907_v19, 0.0  ;;  %v4136_v31 = vmul.f32 %v14758_v17, %v4135_v53  ;;  %v4715_v40 = vmul.f32 1.6732632, %v8382_v38 }
 0x622   : > { %v4780_v48 = vsel %vm4460_vm10, %v14710_v33, %v4716_v27  ;;  %5032 = vadd.xlane.f32.xlu0 %v5031_v3  ;;  %v4095_v7 = vmul.f32 %v14789_v10, %v14730_v59  ;;  %vm4459_vm11 = vcmp.gt.f32.partialorder %v14719_v37, 0.0  ;;  %9451 = vrsqrt.f32 %v14787_v6  ;;  %v18815_v33 = vld [vmem:[#allocation31_spill] sm:$0xff] }
 0x623   : > { %v4844_v47 = vmul.f32 1.050701, %v4780_v48  ;;  %v14820_v43 = vmul.f32 %v4083_v11, %v18814_v46  ;;  %v14823_v8 = vmul.f32 %v4043_v52, %v18815_v33  ;;  %v14826_v36 = vmul.f32 %v4093_v50, %v18816_v20  ;;  %v18820_v50 = vld [vmem:[#allocation35_spill] sm:$0xff]  ;;  %v3450_v20 = vpop.xlane.xlu0 %3449 }
 0x624   : > { %v9448_v15 = vpop.eup %9447  ;;  %v4779_v57 = vsel %vm4459_vm11, %v14719_v37, %v4715_v40  ;;  %v4073_v51 = vsel %vm14832_vm13, %v14676_v60, %v4069_v2  ;;  %v4334_v52 = vmul.f32 %v13145_v28, %v14487_v30  ;;  %v14846_v5 = vmul.f32 %v4113_v63, %v18819_v42 }
 0x625   : > { %v4909_v32 = vmul.f32 %v13414_v9, %v4844_v47  ;;  %v4843_v11 = vmul.f32 1.050701, %v4779_v57  ;;  %v4117_v34 = vmul.f32 0.5, %v4116_v12  ;;  %v4137_v13 = vmul.f32 0.5, %v4136_v31 }
 0x626   : > { %v14843_v54 = vpop.eup %9449  ;;  %v8384_v53 = vadd.f32 -1.0, %v9448_v15  ;;  %v4096_v24 = vmul.f32 %v14789_v10, %v4095_v7  ;;  %v4333_v35 = vmul.f32 %v13145_v28, %v14260_v21  ;;  %v14854_v61 = vmul.f32 %v4073_v51, %v18820_v50 }
 0x627   : > { %v5037_v37 = vsel %vm2882_vm5, %v4909_v32, 0.0  ;;  %v4908_v60 = vmul.f32 %v13414_v9, %v4843_v11  ;;  %vm4120_vm12 = vweird.f32 %v14696_v49  ;;  %vm4461_vm14 = vcmp.gt.f32.partialorder %v14747_v16, 0.0 }
 0x628   : > { %5038 = vadd.xlane.f32.xlu2 %v5037_v37  ;;  %v4717_v30 = vmul.f32 1.6732632, %v8384_v53  ;;  %v14858_v62 = vpop.eup %9451  ;;  %v4145_v27 = vmul.f32 %v14843_v54, %v14766_v4  ;;  %v14864_v38 = vadd.f32 %v13174_v14, %v4334_v52  ;;  %v3519_v21 = vmul.f32 %v3435_v18, %v12466_v45 }
 0x629   : > { %v5034_v19 = vsel %vm2882_vm5, %v4908_v60, 0.0  ;;  %v4118_v63 = vsub.f32 1.5, %v4117_v34  ;;  %vm4121_vm15 = vweird.f32 %v14749_v56  ;;  %v4138_v2 = vsub.f32 1.5, %v4137_v13 }
 0x62a   : > { %vm4140_vm0 = vweird.f32 %v14698_v29  ;;  %5035 = vadd.xlane.f32.xlu1 %v5034_v19  ;;  %v4781_v12 = vsel %vm4461_vm14, %v14747_v16, %v4717_v30  ;;  %v4097_v3 = vmul.f32 0.5, %v4096_v24  ;;  %v4562_v48 = vmul.f32 1.442695, %v14864_v38  ;;  %vm14902_vm4 = vmor %vm4120_vm12, %vm4121_vm15 }
 0x62b   : > { %v4845_v31 = vmul.f32 1.050701, %v4781_v12  ;;  %v14872_v40 = vadd.f32 %v13174_v14, %v4333_v35  ;;  %vm4141_vm1 = vweird.f32 %v14758_v17  ;;  %v4165_v47 = vmul.f32 %v14858_v62, %v14787_v6 }
 0x62c   : > { %v14877_v7 = vadd.f32 1e-05, %v3519_v21  ;;  %v4335_v15 = vmul.f32 %v13145_v28, %v14269_v0  ;;  %vm4100_vm2 = vweird.f32 %v14730_v59  ;;  %v4146_v46 = vmul.f32 %v14843_v54, %v4145_v27  ;;  %v3444_v0 = vpop.xlane.xlu1 %3443  ;;  %vm14925_vm7 = vmor %vm4140_vm0, %vm4141_vm1 }
 0x62d   : > { %v4910_v16 = vmul.f32 %v13414_v9, %v4845_v31  ;;  %9453 = vpow2.f32 %v4562_v48  ;;  %v4560_v33 = vmul.f32 1.442695, %v14872_v40  ;;  %v4119_v57 = vmul.f32 %v14749_v56, %v4118_v63  ;;  %v18825_v31 = vld [vmem:[#allocation32_spill] sm:$0xff] }
 0x62e   : > { %v4139_v18 = vmul.f32 %v14758_v17, %v4138_v2  ;;  %vm4101_vm3 = vweird.f32 %v14789_v10  ;;  %9455 = vrsqrt.f32 %v14877_v7  ;;  %v4098_v51 = vsub.f32 1.5, %v4097_v3 }
 0x62f   : > { %v5040_v32 = vsel %vm2882_vm5, %v4910_v16, 0.0  ;;  %9457 = vpow2.f32 %v4560_v33  ;;  %v14891_v11 = vadd.f32 %v13174_v14, %v4335_v15  ;;  %v4166_v52 = vmul.f32 %v14858_v62, %v4165_v47  ;;  %vm14952_vm9 = vmor %vm4100_vm2, %vm4101_vm3 }
 0x630   : > { %5041 = vadd.xlane.f32.xlu0 %v5040_v32  ;;  %v3524_v42 = vmul.f32 %v3450_v20, %v12466_v45  ;;  %v3526_v34 = vmul.f32 %v3456_v41, %v12466_v45  ;;  %v4337_v13 = vmul.f32 %v13145_v28, %v14598_v55  ;;  %v4147_v37 = vmul.f32 0.5, %v4146_v46  ;;  %v18828_v20 = vld [vmem:[#allocation40_spill] sm:$0xff] }
 0x631   : > { %vm4151_vm6 = vweird.f32 %v14843_v54  ;;  %v4564_v24 = vmul.f32 1.442695, %v14891_v11  ;;  %v3522_v60 = vmul.f32 %v3444_v0, %v12466_v45  ;;  %v4336_v35 = vmul.f32 %v13145_v28, %v14418_v1 }
 0x632   : > { %v4123_v55 = vsel %vm14902_vm4, %v14749_v56, %v4119_v57  ;;  %v14914_v50 = vadd.f32 1e-05, %v3524_v42  ;;  %v14916_v49 = vadd.f32 1e-05, %v3526_v34  ;;  %v14919_v30 = vadd.f32 %v13174_v14, %v4337_v13 }
 0x633   : > { %v9454_v19 = vpop.eup %9453  ;;  %v4099_v1 = vmul.f32 %v14789_v10, %v4098_v51  ;;  %vm4150_vm8 = vweird.f32 %v14766_v4  ;;  %9459 = vpow2.f32 %v4564_v24  ;;  %v14931_v56 = vadd.f32 1e-05, %v3522_v60 }
 0x634   : > { %v14934_v21 = vadd.f32 %v13174_v14, %v4336_v35  ;;  %v14936_v63 = vpop.eup %9455  ;;  %v4143_v29 = vsel %vm14925_vm7, %v14758_v17, %v4139_v18  ;;  %v4167_v2 = vmul.f32 0.5, %v4166_v52  ;;  %v8386_v12 = vadd.f32 -1.0, %v9454_v19  ;;  %v18829_v19 = vld [vmem:[#allocation49_spill] sm:$0xff]  ;;  %vm14991_vm14 = vmor %vm4150_vm8, %vm4151_vm6 }
 0x635   : > { %9461 = vrsqrt.f32 %v14914_v50  ;;  %v9458_v3 = vpop.eup %9457  ;;  %v14943_v48 = vmul.f32 %v4123_v55, %v18825_v31  ;;  %v4148_v47 = vsub.f32 1.5, %v4147_v37  ;;  %v4125_v15 = vmul.f32 %v14936_v63, %v14877_v7 }
 0x636   : > { %9463 = vrsqrt.f32 %v14916_v49  ;;  %vm4170_vm10 = vweird.f32 %v14787_v6  ;;  %v4719_v16 = vmul.f32 1.6732632, %v8386_v12  ;;  %v8385_v46 = vadd.f32 -1.0, %v9458_v3 }
 0x637   : > { %v4568_v33 = vmul.f32 1.442695, %v14919_v30  ;;  %9465 = vrsqrt.f32 %v14931_v56  ;;  %v14960_v41 = vmul.f32 %v4143_v29, %v18828_v20  ;;  %v4103_v57 = vsel %vm14952_vm9, %v14789_v10, %v4099_v1 }
 0x638   : > { %vm4463_vm11 = vcmp.gt.f32.partialorder %v14864_v38, 0.0  ;;  %v4566_v59 = vmul.f32 1.442695, %v14934_v21  ;;  %v4168_v18 = vsub.f32 1.5, %v4167_v2  ;;  %v4718_v51 = vmul.f32 1.6732632, %v8385_v46  ;;  %v3459_v2 = vpop.xlane.xlu0 %3458 }
 0x639   : > { %v4783_v0 = vsel %vm4463_vm11, %v14864_v38, %v4719_v16  ;;  %9467 = vpow2.f32 %v4568_v33  ;;  %v9460_v32 = vpop.eup %9459  ;;  %v4149_v52 = vmul.f32 %v14843_v54, %v4148_v47  ;;  %vm4462_vm13 = vcmp.gt.f32.partialorder %v14872_v40, 0.0 }
 0x63a   : > { %v4847_v42 = vmul.f32 1.050701, %v4783_v0  ;;  %9469 = vpow2.f32 %v4566_v59  ;;  %v4126_v10 = vmul.f32 %v14936_v63, %v4125_v15  ;;  %v4782_v13 = vsel %vm4462_vm13, %v14872_v40, %v4718_v51  ;;  %v3465_v59 = vpop.xlane.xlu2 %3464 }
 0x63b   : > { %v14970_v34 = vpop.eup %9461  ;;  %v8387_v53 = vadd.f32 -1.0, %v9460_v32  ;;  %v4338_v37 = vmul.f32 %v13145_v28, %v14424_v22  ;;  %vm4171_vm12 = vweird.f32 %v14858_v62  ;;  %v4846_v60 = vmul.f32 1.050701, %v4782_v13 }
 0x63c   : > { %v14976_v38 = vpop.eup %9463  ;;  %v4912_v24 = vmul.f32 %v13414_v9, %v4847_v42  ;;  %v4175_v35 = vmul.f32 %v14970_v34, %v14914_v50  ;;  %v14985_v27 = vmul.f32 %v4103_v57, %v18829_v19  ;;  %v14996_v40 = vmul.f32 %v14858_v62, %v4168_v18  ;;  %vm15016_vm0 = vmor %vm4170_vm10, %vm4171_vm12  ;;  %v18834_v18 = vld [vmem:[#allocation18_spill] sm:$0xff] }
 0x63d   : > { %v14982_v55 = vpop.eup %9465  ;;  %v4720_v1 = vmul.f32 1.6732632, %v8387_v53  ;;  %v4195_v29 = vmul.f32 %v14976_v38, %v14916_v49  ;;  %v4153_v12 = vsel %vm14991_vm14, %v14843_v54, %v4149_v52  ;;  %v4911_v4 = vmul.f32 %v13414_v9, %v4846_v60 }
 0x63e   : > { %v5046_v3 = vsel %vm2882_vm5, %v4912_v24, 0.0  ;;  %vm4464_vm15 = vcmp.gt.f32.partialorder %v14891_v11, 0.0  ;;  %v4127_v47 = vmul.f32 0.5, %v4126_v10  ;;  %v4155_v17 = vmul.f32 %v14982_v55, %v14931_v56 }
 0x63f   : > { %v9468_v31 = vpop.eup %9467  ;;  %5047 = vadd.xlane.f32.xlu2 %v5046_v3  ;;  %v4784_v15 = vsel %vm4464_vm15, %v14891_v11, %v4720_v1  ;;  %v15010_v16 = vadd.f32 %v13174_v14, %v4338_v37  ;;  %v5043_v33 = vsel %vm2882_vm5, %v4911_v4, 0.0  ;;  %v4176_v11 = vmul.f32 %v14970_v34, %v4175_v35  ;;  %v3453_v4 = vpop.xlane.xlu1 %3452 }
 0x640   : > { %v9470_v46 = vpop.eup %9469  ;;  %v4848_v20 = vmul.f32 1.050701, %v4784_v15  ;;  %v3527_v57 = vmul.f32 %v3459_v2, %v12466_v45  ;;  %v15024_v0 = vmul.f32 %v4153_v12, %v18834_v18  ;;  %v4173_v6 = vsel %vm15016_vm0, %v14858_v62, %v14996_v40  ;;  %5044 = vadd.xlane.f32.xlu1 %v5043_v33 }
 0x641   : > { %v4196_v51 = vmul.f32 %v14976_v38, %v4195_v29  ;;  %v8389_v32 = vadd.f32 -1.0, %v9468_v31  ;;  %vm4466_vm1 = vcmp.gt.f32.partialorder %v14919_v30, 0.0  ;;  %v4156_v42 = vmul.f32 %v14982_v55, %v4155_v17 }
 0x642   : > { %v4913_v52 = vmul.f32 %v13414_v9, %v4848_v20  ;;  %v8388_v10 = vadd.f32 -1.0, %v9470_v46  ;;  %v4128_v13 = vsub.f32 1.5, %v4127_v47  ;;  %vm4130_vm2 = vweird.f32 %v14877_v7 }
 0x643   : > { %v4722_v53 = vmul.f32 1.6732632, %v8389_v32  ;;  %v4570_v37 = vmul.f32 1.442695, %v15010_v16  ;;  %v3529_v24 = vmul.f32 %v3465_v59, %v12466_v45  ;;  %v4177_v35 = vmul.f32 0.5, %v4176_v11 }
 0x644   : > { %v5049_v60 = vsel %vm2882_vm5, %v4913_v52, 0.0  ;;  %v4721_v19 = vmul.f32 1.6732632, %v8388_v10  ;;  %v15038_v22 = vadd.f32 1e-05, %v3527_v57  ;;  %v4197_v1 = vmul.f32 0.5, %v4196_v51 }
 0x645   : > { %5050 = vadd.xlane.f32.xlu0 %v5049_v60  ;;  %v4786_v29 = vsel %vm4466_vm1, %v14919_v30, %v4722_v53  ;;  %vm4465_vm3 = vcmp.gt.f32.partialorder %v14934_v21, 0.0  ;;  %9471 = vpow2.f32 %v4570_v37  ;;  %vm4180_vm4 = vweird.f32 %v14914_v50 }
 0x646   : > { %v4850_v2 = vmul.f32 1.050701, %v4786_v29  ;;  %v4157_v12 = vmul.f32 0.5, %v4156_v42  ;;  %v4785_v3 = vsel %vm4465_vm3, %v14934_v21, %v4721_v19  ;;  %9473 = vrsqrt.f32 %v15038_v22  ;;  %v18846_v42 = vld [vmem:[#allocation48_spill] sm:$0xff] }
 0x647   : > { %vm4131_vm6 = vweird.f32 %v14936_v63  ;;  %vm4181_vm7 = vweird.f32 %v14970_v34  ;;  %vm4200_vm8 = vweird.f32 %v14916_v49  ;;  %vm4201_vm9 = vweird.f32 %v14976_v38 }
 0x648   : > { %v4849_v30 = vmul.f32 1.050701, %v4785_v3  ;;  %v4129_v31 = vmul.f32 %v14936_v63, %v4128_v13  ;;  %v4178_v47 = vsub.f32 1.5, %v4177_v35  ;;  %v4915_v15 = vmul.f32 %v13414_v9, %v4850_v2  ;;  %vm15075_vm13 = vmor %vm4130_vm2, %vm4131_vm6 }
 0x649   : > { %vm4160_vm10 = vweird.f32 %v14931_v56  ;;  %v15052_v21 = vadd.f32 1e-05, %v3529_v24  ;;  %v4198_v17 = vsub.f32 1.5, %v4197_v1  ;;  %v4340_v33 = vmul.f32 %v13145_v28, %v14645_v58  ;;  %vm15100_vm12 = vmor %vm4180_vm4, %vm4181_vm7  ;;  %v18845_v56 = vld [vmem:[#allocation41_spill] sm:$0xff] }
 0x64a   : > { %v4914_v46 = vmul.f32 %v13414_v9, %v4849_v30  ;;  %v3525_v20 = vmul.f32 %v3453_v4, %v12466_v45  ;;  %v5055_v11 = vsel %vm2882_vm5, %v4915_v15, 0.0  ;;  %v4158_v57 = vsub.f32 1.5, %v4157_v12  ;;  %vm15118_vm15 = vmor %vm4200_vm8, %vm4201_vm9  ;;  %v18841_v15 = vld [vmem:[#allocation46_spill] sm:$0xff] }
 0x64b   : > { %vm4161_vm11 = vweird.f32 %v14982_v55  ;;  %9475 = vrsqrt.f32 %v15052_v21  ;;  %v9472_v59 = vpop.eup %9471  ;;  %5056 = vadd.xlane.f32.xlu2 %v5055_v11  ;;  %v15063_v51 = vadd.f32 %v13174_v14, %v4340_v33  ;;  %v4339_v58 = vmul.f32 %v13145_v28, %v14501_v39 }
 0x64c   : > { %v5052_v18 = vsel %vm2882_vm5, %v4914_v46, 0.0  ;;  %v15065_v32 = vadd.f32 1e-05, %v3525_v20  ;;  %v15069_v52 = vpop.eup %9473  ;;  %v4179_v10 = vmul.f32 %v14970_v34, %v4178_v47  ;;  %v8390_v13 = vadd.f32 -1.0, %v9472_v59  ;;  %v4949_v47 = vpop.xlane.xlu2 %4948  ;;  %vm15142_vm1 = vmor %vm4160_vm10, %vm4161_vm11 }
 0x64d   : > { %5053 = vadd.xlane.f32.xlu1 %v5052_v18  ;;  %v4341_v53 = vmul.f32 %v13145_v28, %v14561_v44  ;;  %v4343_v39 = vmul.f32 %v13145_v28, %v14823_v8  ;;  %v4133_v37 = vsel %vm15075_vm13, %v14936_v63, %v4129_v31  ;;  %v4199_v7 = vmul.f32 %v14976_v38, %v4198_v17  ;;  %v4943_v8 = vpop.xlane.xlu0 %4942  ;;  %v3462_v31 = vpop.xlane.xlu1 %3461 }
 0x64e   : > { %v4205_v24 = vmul.f32 %v15069_v52, %v15038_v22  ;;  %v4574_v60 = vmul.f32 1.442695, %v15063_v51  ;;  %v4159_v35 = vmul.f32 %v14982_v55, %v4158_v57  ;;  %v4723_v19 = vmul.f32 1.6732632, %v8390_v13  ;;  %v18847_v13 = vld [vmem:[#allocation42_spill] sm:$0xff] }
 0x64f   : > { %9477 = vrsqrt.f32 %v15065_v32  ;;  %v15094_v44 = vadd.f32 %v13174_v14, %v4339_v58  ;;  %vm4467_vm14 = vcmp.gt.f32.partialorder %v15010_v16, 0.0  ;;  %v15107_v29 = vadd.f32 %v13174_v14, %v4341_v53 }
 0x650   : > { %v4206_v1 = vmul.f32 %v15069_v52, %v4205_v24  ;;  %9479 = vpow2.f32 %v4574_v60  ;;  %v4183_v12 = vsel %vm15100_vm12, %v14970_v34, %v4179_v10  ;;  %v4787_v3 = vsel %vm4467_vm14, %v15010_v16, %v4723_v19  ;;  %v18842_v34 = vld [vmem:[#allocation56_spill] sm:$0xff] }
 0x651   : > { %v15109_v2 = vpop.eup %9475  ;;  %v4572_v4 = vmul.f32 1.442695, %v15094_v44  ;;  %v15125_v30 = vadd.f32 %v13174_v14, %v4343_v39  ;;  %v15133_v49 = vmul.f32 %v4173_v6, %v18841_v15  ;;  %v15136_v17 = vmul.f32 %v4133_v37, %v18842_v34  ;;  %v18848_v15 = vld [vmem:[#allocation102_spill] sm:$0xff] }
 0x652   : > { %v4851_v46 = vmul.f32 1.050701, %v4787_v3  ;;  %v4225_v54 = vmul.f32 %v15109_v2, %v15052_v21  ;;  %v4203_v62 = vsel %vm15118_vm15, %v14976_v38, %v4199_v7  ;;  %v4163_v40 = vsel %vm15142_vm1, %v14982_v55, %v4159_v35 }
 0x653   : > { %9481 = vpow2.f32 %v4572_v4  ;;  %v4576_v6 = vmul.f32 1.442695, %v15107_v29  ;;  %v15156_v33 = vmul.f32 %v4183_v12, %v18845_v56  ;;  %v4207_v11 = vmul.f32 0.5, %v4206_v1 }
 0x654   : > { %v4916_v20 = vmul.f32 %v13414_v9, %v4851_v46  ;;  %v15159_v57 = vstv %s8756_s19  ;;  %v4226_v18 = vmul.f32 %v15109_v2, %v4225_v54  ;;  %v4580_v38 = vmul.f32 1.442695, %v15125_v30  ;;  %v15200_v54 = vpop.xlane.xlu2 %4957 }
 0x655   : > { %v15161_v59 = vpop.eup %9477  ;;  %9483 = vpow2.f32 %v4576_v6  ;;  %v3528_v55 = vmul.f32 %v3462_v31, %v12466_v45  ;;  %v15167_v10 = vmul.f32 %v4203_v62, %v18846_v42  ;;  %v15170_v53 = vmul.f32 %v4163_v40, %v18847_v13  ;;  %v15186_v12 = vpop.xlane.xlu0 %4951 }
 0x656   : > { %v9480_v58 = vpop.eup %9479  ;;  %v5058_v39 = vsel %vm2882_vm5, %v4916_v20, 0.0  ;;  %v4185_v37 = vmul.f32 %v15161_v59, %v15065_v32  ;;  %vm4210_vm0 = vweird.f32 %v15038_v22  ;;  %v15177_v24 = vadd.f32 %v15159_v57, %v4943_v8  ;;  %v15198_v46 = vpop.xlane.xlu1 %4945 }
 0x657   : > { %5059 = vadd.xlane.f32.xlu0 %v5058_v39  ;;  %v8392_v7 = vadd.f32 -1.0, %v9480_v58  ;;  %9485 = vpow2.f32 %v4580_v38  ;;  %v15179_v45 = vadd.f32 1e-05, %v3528_v55  ;;  %vm4211_vm2 = vweird.f32 %v15069_v52 }
 0x658   : > { %vm4469_vm3 = vcmp.gt.f32.partialorder %v15063_v51, 0.0  ;;  %v4186_v60 = vmul.f32 %v15161_v59, %v4185_v37  ;;  %vm4468_vm4 = vcmp.gt.f32.partialorder %v15094_v44, 0.0  ;;  %v4208_v19 = vsub.f32 1.5, %v4207_v11  ;;  %vm15225_vm13 = vmor %vm4210_vm0, %vm4211_vm2 }
 0x659   : > { %v9482_v35 = vpop.eup %9481  ;;  %v4227_v63 = vmul.f32 0.5, %v4226_v18  ;;  %v4725_v1 = vmul.f32 1.6732632, %v8392_v7  ;;  %9487 = vrsqrt.f32 %v15179_v45  ;;  %vm4231_vm6 = vweird.f32 %v15109_v2 }
 0x65a   : > { %v8391_v8 = vadd.f32 -1.0, %v9482_v35  ;;  %vm4470_vm7 = vcmp.gt.f32.partialorder %v15107_v29, 0.0  ;;  %v4342_v50 = vmul.f32 %v13145_v28, %v14604_v25  ;;  %vm4230_vm8 = vweird.f32 %v15052_v21 }
 0x65b   : > { %v9484_v3 = vpop.eup %9483  ;;  %v4789_v4 = vsel %vm4469_vm3, %v15063_v51, %v4725_v1  ;;  %v4187_v31 = vmul.f32 0.5, %v4186_v60  ;;  %v5266_v34 = vperm.slane %v15177_v24, %v18848_v15  ;;  %v4344_v16 = vmul.f32 %v13145_v28, %v14609_v23  ;;  %vm15254_vm12 = vmor %vm4230_vm8, %vm4231_vm6 }
 0x65c   : > { %v4853_v62 = vmul.f32 1.050701, %v4789_v4  ;;  %v4724_v40 = vmul.f32 1.6732632, %v8391_v8  ;;  %vm4472_vm9 = vcmp.gt.f32.partialorder %v15125_v30, 0.0  ;;  %v15204_v25 = vadd.f32 %v15159_v57, %v4949_v47 }
 0x65d   : > { %v9486_v6 = vpop.eup %9485  ;;  %v4209_v51 = vmul.f32 %v15069_v52, %v4208_v19  ;;  %v4228_v56 = vsub.f32 1.5, %v4227_v63  ;;  %vm4190_vm10 = vweird.f32 %v15065_v32  ;;  %vm4191_vm11 = vweird.f32 %v15161_v59 }
 0x65e   : > { %v8393_v23 = vadd.f32 -1.0, %v9484_v3  ;;  %v4918_v20 = vmul.f32 %v13414_v9, %v4853_v62  ;;  %v4788_v11 = vsel %vm4468_vm4, %v15094_v44, %v4724_v40  ;;  %v8395_v18 = vadd.f32 -1.0, %v9486_v6  ;;  %vm15279_vm14 = vmor %vm4190_vm10, %vm4191_vm11 }
 0x65f   : > { %v15214_v38 = vadd.f32 %v13174_v14, %v4342_v50  ;;  %v15216_v47 = vpop.eup %9487  ;;  %v4188_v55 = vsub.f32 1.5, %v4187_v31  ;;  %v4852_v58 = vmul.f32 1.050701, %v4788_v11  ;;  %v15219_v13 = vadd.f32 %v13174_v14, %v4344_v16  ;;  %v4961_v16 = vpop.xlane.xlu0 %4960 }
 0x660   : > { %v4726_v42 = vmul.f32 1.6732632, %v8393_v23  ;;  %v5064_v44 = vsel %vm2882_vm5, %v4918_v20, 0.0  ;;  %v4728_v37 = vmul.f32 1.6732632, %v8395_v18  ;;  %v4215_v7 = vmul.f32 %v15216_v47, %v15179_v45  ;;  %v15270_v23 = vpop.xlane.xlu2 %4966  ;;  %v18853_v20 = vld [vmem:[#allocation62_spill] sm:$0xff] }
 0x661   : > { %v4346_v60 = vmul.f32 %v13145_v28, %v14854_v61  ;;  %v4213_v35 = vsel %vm15225_vm13, %v15069_v52, %v4209_v51  ;;  %v4229_v19 = vmul.f32 %v15109_v2, %v4228_v56  ;;  %5065 = vadd.xlane.f32.xlu2 %v5064_v44  ;;  %v4917_v22 = vmul.f32 %v13414_v9, %v4852_v58  ;;  %v15268_v56 = vpop.xlane.xlu1 %4954  ;;  %v18856_v44 = vld [vmem:[#allocation52_spill] sm:$0xff] }
 0x662   : > { %v4790_v63 = vsel %vm4470_vm7, %v15107_v29, %v4726_v42  ;;  %v4792_v8 = vsel %vm4472_vm9, %v15125_v30, %v4728_v37  ;;  %v4216_v61 = vmul.f32 %v15216_v47, %v4215_v7  ;;  %v4578_v50 = vmul.f32 1.442695, %v15214_v38 }
 0x663   : > { %v4854_v1 = vmul.f32 1.050701, %v4790_v63  ;;  %v4189_v52 = vmul.f32 %v15161_v59, %v4188_v55  ;;  %v5061_v3 = vsel %vm2882_vm5, %v4917_v22, 0.0  ;;  %v4856_v4 = vmul.f32 1.050701, %v4792_v8 }
 0x664   : > { %v4582_v31 = vmul.f32 1.442695, %v15219_v13  ;;  %5062 = vadd.xlane.f32.xlu1 %v5061_v3  ;;  %v4217_v62 = vmul.f32 0.5, %v4216_v61  ;;  %9489 = vpow2.f32 %v4578_v50  ;;  %v15260_v40 = vadd.f32 %v13174_v14, %v4346_v60 }
 0x665   : > { %v4919_v30 = vmul.f32 %v13414_v9, %v4854_v1  ;;  %v4233_v6 = vsel %vm15254_vm12, %v15109_v2, %v4229_v19  ;;  %v4921_v51 = vmul.f32 %v13414_v9, %v4856_v4  ;;  %v5268_v21 = vperm.slane %v15204_v25, %v18848_v15 }
 0x666   : > { %9491 = vpow2.f32 %v4582_v31  ;;  %v15273_v11 = vmul.f32 %v4213_v35, %v18853_v20  ;;  %vm4220_vm15 = vweird.f32 %v15179_v45  ;;  %v4586_v55 = vmul.f32 1.442695, %v15260_v40  ;;  %v18857_v35 = vld [vmem:[#allocation30_spill] sm:$0xff] }
 0x667   : > { %v5067_v2 = vsel %vm2882_vm5, %v4919_v30, 0.0  ;;  %v4193_v58 = vsel %vm15279_vm14, %v15161_v59, %v4189_v52  ;;  %v5073_v42 = vsel %vm2882_vm5, %v4921_v51, 0.0  ;;  %v15292_v32 = vadd.f32 %v15159_v57, %v15186_v12  ;;  %v15334_v29 = vpop.xlane.xlu0 %4969 }
 0x668   : > { %5068 = vadd.xlane.f32.xlu0 %v5067_v2  ;;  %v4345_v39 = vmul.f32 %v13145_v28, %v14690_v26  ;;  %v15297_v37 = vmul.f32 %v4233_v6, %v18856_v44  ;;  %v4218_v7 = vsub.f32 1.5, %v4217_v62  ;;  %9493 = vpow2.f32 %v4586_v55  ;;  %v15354_v2 = vpop.xlane.xlu2 %4975 }
 0x669   : > { %v4347_v60 = vmul.f32 %v13145_v28, %v14820_v43  ;;  %5074 = vadd.xlane.f32.xlu2 %v5073_v42  ;;  %vm4471_vm1 = vcmp.gt.f32.partialorder %v15214_v38, 0.0  ;;  %vm4473_vm0 = vcmp.gt.f32.partialorder %v15219_v13, 0.0  ;;  %v4349_v12 = vmul.f32 %v13145_v28, %v14985_v27  ;;  %v15352_v18 = vpop.xlane.xlu1 %4963 }
 0x66a   : > { %v15304_v59 = vadd.f32 %v13174_v14, %v4345_v39  ;;  %v9490_v26 = vpop.eup %9489  ;;  %v15309_v19 = vmul.f32 %v4193_v58, %v18857_v35  ;;  %vm4221_vm2 = vweird.f32 %v15216_v47  ;;  %v15314_v43 = vadd.f32 %v15159_v57, %v15198_v46 }
 0x66b   : > { %v15317_v22 = vadd.f32 %v13174_v14, %v4347_v60  ;;  %v8394_v1 = vadd.f32 -1.0, %v9490_v26  ;;  %v5269_v8 = vperm.slane %v15292_v32, %v18848_v15  ;;  %vm5330_vm3 = vcmask 1041409   ;;  %vm15343_vm7 = vmor %vm4220_vm15, %vm4221_vm2 }
 0x66c   : > { %v9492_v63 = vpop.eup %9491  ;;  %v15323_v27 = vadd.f32 %v15159_v57, %v15200_v54  ;;  %v4219_v61 = vmul.f32 %v15216_v47, %v4218_v7  ;;  %vm5332_vm4 = vcmask 1042434   ;;  %v4584_v46 = vmul.f32 1.442695, %v15304_v59 }
 0x66d   : > { %v8396_v50 = vadd.f32 -1.0, %v9492_v63  ;;  %v4727_v52 = vmul.f32 1.6732632, %v8394_v1  ;;  %v4588_v3 = vmul.f32 1.442695, %v15317_v22  ;;  %v15329_v4 = vadd.f32 %v15159_v57, %v4961_v16  ;;  %v18860_v63 = vld [vmem:[#allocation47_spill] sm:$0xff] }
 0x66e   : > { %v15332_v31 = vadd.f32 %v13174_v14, %v4349_v12  ;;  %v9494_v30 = vpop.eup %9493  ;;  %vm4475_vm6 = vcmp.gt.f32.partialorder %v15260_v40, 0.0  ;;  %v5267_v62 = vperm.slane %v15314_v43, %v18848_v15  ;;  %9495 = vpow2.f32 %v4584_v46 }
 0x66f   : > { %v4729_v54 = vmul.f32 1.6732632, %v8396_v50  ;;  %v4791_v6 = vsel %vm4471_vm1, %v15214_v38, %v4727_v52  ;;  %v8398_v51 = vadd.f32 -1.0, %v9494_v30  ;;  %v5271_v20 = vperm.slane %v15323_v27, %v18848_v15 }
 0x670   : > { %9497 = vpow2.f32 %v4588_v3  ;;  %v4223_v45 = vsel %vm15343_vm7, %v15216_v47, %v4219_v61  ;;  %v4855_v55 = vmul.f32 1.050701, %v4791_v6  ;;  %v4592_v38 = vmul.f32 1.442695, %v15332_v31 }
 0x671   : > { %v4793_v58 = vsel %vm4473_vm0, %v15219_v13, %v4729_v54  ;;  %v4731_v39 = vmul.f32 1.6732632, %v8398_v51  ;;  %v5272_v44 = vperm.slane %v15329_v4, %v18848_v15  ;;  %v4348_v7 = vmul.f32 %v13145_v28, %v14826_v36 }
 0x672   : > { %v4857_v42 = vmul.f32 1.050701, %v4793_v58  ;;  %v4920_v60 = vmul.f32 %v13414_v9, %v4855_v55  ;;  %9499 = vpow2.f32 %v4592_v38  ;;  %vm5334_vm8 = vcmask 1043459   ;;  %v15407_v38 = vpop.xlane.xlu1 %4972 }
 0x673   : > { %v4350_v47 = vmul.f32 %v13145_v28, %v14846_v5  ;;  %v4795_v13 = vsel %vm4475_vm6, %v15260_v40, %v4731_v39  ;;  %v5331_v26 = vsel %vm5330_vm3, %v5267_v62, %v5266_v34  ;;  %v15379_v36 = vadd.f32 %v13174_v14, %v4348_v7 }
 0x674   : > { %v4922_v12 = vmul.f32 %v13414_v9, %v4857_v42  ;;  %v9496_v35 = vpop.eup %9495  ;;  %v15382_v1 = vmul.f32 %v4223_v45, %v18860_v63  ;;  %v5070_v5 = vsel %vm2882_vm5, %v4920_v60, 0.0  ;;  %v4859_v61 = vmul.f32 1.050701, %v4795_v13  ;;  %v15403_v45 = vpop.xlane.xlu0 %4978 }
 0x675   : > { %v15386_v50 = vadd.f32 %v13174_v14, %v4350_v47  ;;  %5071 = vadd.xlane.f32.xlu1 %v5070_v5  ;;  %vm4474_vm9 = vcmp.gt.f32.partialorder %v15304_v59, 0.0  ;;  %v8397_v34 = vadd.f32 -1.0, %v9496_v35  ;;  %v4590_v52 = vmul.f32 1.442695, %v15379_v36  ;;  %v15409_v42 = vpop.xlane.xlu2 %4984 }
 0x676   : > { %v9498_v46 = vpop.eup %9497  ;;  %v5076_v40 = vsel %vm2882_vm5, %v4922_v12, 0.0  ;;  %v4924_v3 = vmul.f32 %v13414_v9, %v4859_v61  ;;  %v5333_v30 = vsel %vm5332_vm4, %v5268_v21, %v5331_v26  ;;  %v15399_v6 = vadd.f32 %v15159_v57, %v15268_v56 }
 0x677   : > { %5077 = vadd.xlane.f32.xlu0 %v5076_v40  ;;  %v8399_v54 = vadd.f32 -1.0, %v9498_v46  ;;  %v4594_v62 = vmul.f32 1.442695, %v15386_v50  ;;  %v4730_v16 = vmul.f32 1.6732632, %v8397_v34  ;;  %9501 = vpow2.f32 %v4590_v52 }
 0x678   : > { %v4352_v51 = vmul.f32 %v13145_v28, %v15136_v17  ;;  %v9500_v55 = vpop.eup %9499  ;;  %v5082_v58 = vsel %vm2882_vm5, %v4924_v3, 0.0  ;;  %vm4476_vm10 = vcmp.gt.f32.partialorder %v15317_v22, 0.0  ;;  %v5335_v17 = vsel %vm5334_vm8, %v5269_v8, %v5333_v30 }
 0x679   : > { %v4732_v21 = vmul.f32 1.6732632, %v8399_v54  ;;  %9503 = vpow2.f32 %v4594_v62  ;;  %5083 = vadd.xlane.f32.xlu2 %v5082_v58  ;;  %v4794_v56 = vsel %vm4474_vm9, %v15304_v59, %v4730_v16  ;;  %v8401_v39 = vadd.f32 -1.0, %v9500_v55 }
 0x67a   : > { %v15419_v7 = vadd.f32 %v13174_v14, %v4352_v51  ;;  %v4858_v60 = vmul.f32 1.050701, %v4794_v56  ;;  %vm4478_vm11 = vcmp.gt.f32.partialorder %v15332_v31, 0.0  ;;  %vm5336_vm13 = vcmask 1044484  }
 0x67b   : > { %v4796_v47 = vsel %vm4476_vm10, %v15317_v22, %v4732_v21  ;;  %v4734_v13 = vmul.f32 1.6732632, %v8401_v39  ;;  %v5270_v59 = vperm.slane %v15399_v6, %v18848_v15  ;;  %v4351_v26 = vmul.f32 %v13145_v28, %v14943_v48 }
 0x67c   : > { %v4860_v12 = vmul.f32 1.050701, %v4796_v47  ;;  %v4923_v35 = vmul.f32 %v13414_v9, %v4858_v60  ;;  %v15430_v8 = vadd.f32 %v15159_v57, %v15270_v23  ;;  %v4598_v63 = vmul.f32 1.442695, %v15419_v7  ;;  %v15457_v58 = vpop.xlane.xlu0 %4987  ;;  %v15466_v47 = vpop.xlane.xlu1 %4981 }
 0x67d   : > { %v4353_v22 = vmul.f32 %v13145_v28, %v14960_v41  ;;  %v9502_v5 = vpop.eup %9501  ;;  %v4798_v46 = vsel %vm4478_vm11, %v15332_v31, %v4734_v13  ;;  %v15439_v40 = vadd.f32 %v15159_v57, %v15334_v29  ;;  %v15442_v48 = vadd.f32 %v13174_v14, %v4351_v26 }
 0x67e   : > { %v4925_v61 = vmul.f32 %v13414_v9, %v4860_v12  ;;  %v5079_v23 = vsel %vm2882_vm5, %v4923_v35, 0.0  ;;  %v4862_v52 = vmul.f32 1.050701, %v4798_v46  ;;  %v8400_v3 = vadd.f32 -1.0, %v9502_v5  ;;  %v15468_v12 = vpop.xlane.xlu2 %4993 }
 0x67f   : > { %v9504_v34 = vpop.eup %9503  ;;  %9505 = vpow2.f32 %v4598_v63  ;;  %5080 = vadd.xlane.f32.xlu1 %v5079_v23  ;;  %vm4477_vm12 = vcmp.gt.f32.partialorder %v15379_v36, 0.0  ;;  %v4596_v31 = vmul.f32 1.442695, %v15442_v48  ;;  %vm4479_vm14 = vcmp.gt.f32.partialorder %v15386_v50, 0.0 }
 0x680   : > { %v5085_v41 = vsel %vm2882_vm5, %v4925_v61, 0.0  ;;  %v8402_v30 = vadd.f32 -1.0, %v9504_v34  ;;  %v4927_v29 = vmul.f32 %v13414_v9, %v4862_v52  ;;  %v4733_v54 = vmul.f32 1.6732632, %v8400_v3 }
 0x681   : > { %5086 = vadd.xlane.f32.xlu0 %v5085_v41  ;;  %v15451_v62 = vadd.f32 %v13174_v14, %v4353_v22  ;;  %v5275_v51 = vperm.slane %v15439_v40, %v18848_v15  ;;  %9507 = vpow2.f32 %v4596_v31  ;;  %v4355_v55 = vmul.f32 %v13145_v28, %v15170_v53 }
 0x682   : > { %v4735_v16 = vmul.f32 1.6732632, %v8402_v30  ;;  %v5091_v21 = vsel %vm2882_vm5, %v4927_v29, 0.0  ;;  %v4797_v56 = vsel %vm4477_vm12, %v15379_v36, %v4733_v54  ;;  %v15463_v39 = vadd.f32 %v15159_v57, %v15352_v18 }
 0x683   : > { %v4600_v60 = vmul.f32 1.442695, %v15451_v62  ;;  %5092 = vadd.xlane.f32.xlu2 %v5091_v21  ;;  %v5274_v53 = vperm.slane %v15430_v8, %v18848_v15  ;;  %v4861_v13 = vmul.f32 1.050701, %v4797_v56  ;;  %v15476_v36 = vadd.f32 %v13174_v14, %v4355_v55 }
 0x684   : > { %v4799_v26 = vsel %vm4479_vm14, %v15386_v50, %v4735_v16  ;;  %v15479_v35 = vsel %vm5336_vm13, %v5270_v59, %v5335_v17  ;;  %v4354_v22 = vmul.f32 %v13145_v28, %v15024_v0  ;;  %v5273_v23 = vperm.slane %v15463_v39, %v18848_v15  ;;  %v15515_v55 = vpop.xlane.xlu0 %4996 }
 0x685   : > { %v9506_v18 = vpop.eup %9505  ;;  %v4863_v63 = vmul.f32 1.050701, %v4799_v26  ;;  %9509 = vpow2.f32 %v4600_v60  ;;  %v4926_v5 = vmul.f32 %v13414_v9, %v4861_v13  ;;  %v15485_v61 = vsel %vm5330_vm3, %v5275_v51, %v5274_v53  ;;  %v15526_v53 = vpop.xlane.xlu1 %4990 }
 0x686   : > { %v8404_v46 = vadd.f32 -1.0, %v9506_v18  ;;  %v4604_v50 = vmul.f32 1.442695, %v15476_v36  ;;  %v15493_v17 = vadd.f32 %v15159_v57, %v15354_v2  ;;  %v15496_v59 = vadd.f32 %v13174_v14, %v4354_v22 }
 0x687   : > { %v4928_v34 = vmul.f32 %v13414_v9, %v4863_v63  ;;  %v9508_v0 = vpop.eup %9507  ;;  %v5088_v52 = vsel %vm2882_vm5, %v4926_v5, 0.0  ;;  %vm4481_vm15 = vcmp.gt.f32.partialorder %v15419_v7, 0.0  ;;  %v15503_v31 = vadd.f32 %v15159_v57, %v15403_v45 }
 0x688   : > { %v4737_v3 = vmul.f32 1.6732632, %v8404_v46  ;;  %9511 = vpow2.f32 %v4604_v50  ;;  %5089 = vadd.xlane.f32.xlu1 %v5088_v52  ;;  %v8403_v30 = vadd.f32 -1.0, %v9508_v0  ;;  %v4602_v2 = vmul.f32 1.442695, %v15496_v59 }
 0x689   : > { %v5094_v41 = vsel %vm2882_vm5, %v4928_v34, 0.0  ;;  %v15509_v54 = vadd.f32 %v15159_v57, %v15407_v38  ;;  %v4356_v16 = vmul.f32 %v13145_v28, %v15133_v49  ;;  %v4358_v51 = vmul.f32 %v13145_v28, %v15309_v19  ;;  %v15528_v19 = vpop.xlane.xlu2 %5002 }
 0x68a   : > { %5095 = vadd.xlane.f32.xlu0 %v5094_v41  ;;  %v4801_v29 = vsel %vm4481_vm15, %v15419_v7, %v4737_v3  ;;  %v5277_v56 = vperm.slane %v15493_v17, %v18848_v15  ;;  %v4736_v60 = vmul.f32 1.6732632, %v8403_v30  ;;  %9513 = vpow2.f32 %v4602_v2 }
 0x68b   : > { %v9510_v21 = vpop.eup %9509  ;;  %v4865_v45 = vmul.f32 1.050701, %v4801_v29  ;;  %vm4480_vm1 = vcmp.gt.f32.partialorder %v15442_v48, 0.0  ;;  %v15521_v38 = vadd.f32 %v13174_v14, %v4356_v16  ;;  %v15524_v49 = vadd.f32 %v13174_v14, %v4358_v51 }
 0x68c   : > { %v8405_v7 = vadd.f32 -1.0, %v9510_v21  ;;  %v4800_v26 = vsel %vm4480_vm1, %v15442_v48, %v4736_v60  ;;  %vm4482_vm0 = vcmp.gt.f32.partialorder %v15451_v62, 0.0  ;;  %v5278_v18 = vperm.slane %v15503_v31, %v18848_v15 }
 0x68d   : > { %v4930_v13 = vmul.f32 %v13414_v9, %v4865_v45  ;;  %v4864_v22 = vmul.f32 1.050701, %v4800_v26  ;;  %v5276_v46 = vperm.slane %v15509_v54, %v18848_v15  ;;  %v15539_v50 = vadd.f32 %v15159_v57, %v15409_v42 }
 0x68e   : > { %v9512_v63 = vpop.eup %9511  ;;  %v4738_v5 = vmul.f32 1.6732632, %v8405_v7  ;;  %v4606_v48 = vmul.f32 1.442695, %v15521_v38  ;;  %v4610_v52 = vmul.f32 1.442695, %v15524_v49  ;;  %v4357_v30 = vmul.f32 %v13145_v28, %v15156_v33 }
 0x68f   : > { %v5100_v34 = vsel %vm2882_vm5, %v4930_v13, 0.0  ;;  %v8407_v0 = vadd.f32 -1.0, %v9512_v63  ;;  %v4929_v3 = vmul.f32 %v13414_v9, %v4864_v22  ;;  %vm4484_vm2 = vcmp.gt.f32.partialorder %v15476_v36, 0.0 }
 0x690   : > { %5101 = vadd.xlane.f32.xlu2 %v5100_v34  ;;  %v4802_v41 = vsel %vm4482_vm0, %v15451_v62, %v4738_v5  ;;  %v9514_v2 = vpop.eup %9513  ;;  %9515 = vpow2.f32 %v4606_v48  ;;  %v4359_v16 = vmul.f32 %v13145_v28, %v15167_v10  ;;  %v15553_v45 = vadd.f32 %v13174_v14, %v4357_v30  ;;  %v15555_v62 = vpop.xlane.xlu0 %5005 }
 0x691   : > { %v4866_v42 = vmul.f32 1.050701, %v4802_v41  ;;  %v4740_v29 = vmul.f32 1.6732632, %v8407_v0  ;;  %v5097_v51 = vsel %vm2882_vm5, %v4929_v3, 0.0  ;;  %v8406_v21 = vadd.f32 -1.0, %v9514_v2  ;;  %v15570_v5 = vpop.xlane.xlu1 %4999  ;;  %v15572_v34 = vpop.xlane.xlu2 %5011 }
 0x692   : > { %9517 = vpow2.f32 %v4610_v52  ;;  %5098 = vadd.xlane.f32.xlu1 %v5097_v51  ;;  %v5345_v7 = vsel %vm5332_vm4, %v5276_v46, %v15485_v61  ;;  %v15562_v13 = vadd.f32 %v13174_v14, %v4359_v16  ;;  %v15566_v63 = vadd.f32 %v15159_v57, %v15457_v58 }
 0x693   : > { %v4931_v60 = vmul.f32 %v13414_v9, %v4866_v42  ;;  %v4804_v33 = vsel %vm4484_vm2, %v15476_v36, %v4740_v29  ;;  %v4739_v26 = vmul.f32 1.6732632, %v8406_v21  ;;  %v4361_v22 = vmul.f32 %v13145_v28, %v15382_v1 }
 0x694   : > { %v4868_v10 = vmul.f32 1.050701, %v4804_v33  ;;  %vm4483_vm6 = vcmp.gt.f32.partialorder %v15496_v59, 0.0  ;;  %v4608_v61 = vmul.f32 1.442695, %v15553_v45  ;;  %v5280_v58 = vperm.slane %v15539_v50, %v18848_v15 }
 0x695   : > { %v5103_v36 = vsel %vm2882_vm5, %v4931_v60, 0.0  ;;  %v4612_v46 = vmul.f32 1.442695, %v15562_v13  ;;  %v4803_v1 = vsel %vm4483_vm6, %v15496_v59, %v4739_v26  ;;  %v15583_v48 = vadd.f32 %v13174_v14, %v4361_v22 }
 0x696   : > { %5104 = vadd.xlane.f32.xlu0 %v5103_v36  ;;  %v4933_v0 = vmul.f32 %v13414_v9, %v4868_v10  ;;  %v9516_v52 = vpop.eup %9515  ;;  %v15586_v3 = vsel %vm5334_vm8, %v5277_v56, %v5345_v7  ;;  %v4867_v41 = vmul.f32 1.050701, %v4803_v1  ;;  %v15590_v30 = vadd.f32 %v15159_v57, %v15466_v47 }
 0x697   : > { %9519 = vpow2.f32 %v4608_v61  ;;  %v8408_v29 = vadd.f32 -1.0, %v9516_v52  ;;  %v5281_v59 = vperm.slane %v15566_v63, %v18848_v15  ;;  %v15598_v56 = vadd.f32 %v15159_v57, %v15468_v12 }
 0x698   : > { %v9518_v2 = vpop.eup %9517  ;;  %v5109_v42 = vsel %vm2882_vm5, %v4933_v0, 0.0  ;;  %9521 = vpow2.f32 %v4612_v46  ;;  %v4932_v16 = vmul.f32 %v13414_v9, %v4867_v41  ;;  %v4616_v47 = vmul.f32 1.442695, %v15583_v48  ;;  %v15606_v7 = vpop.xlane.xlu0 %5014 }
 0x699   : > { %5110 = vadd.xlane.f32.xlu2 %v5109_v42  ;;  %v8410_v51 = vadd.f32 -1.0, %v9518_v2  ;;  %vm4485_vm7 = vcmp.gt.f32.partialorder %v15521_v38, 0.0  ;;  %v4741_v21 = vmul.f32 1.6732632, %v8408_v29  ;;  %v4360_v60 = vmul.f32 %v13145_v28, %v15273_v11  ;;  %v15623_v36 = vpop.xlane.xlu2 %5020 }
 0x69a   : > { %v4362_v33 = vmul.f32 %v13145_v28, %v15297_v37  ;;  %v5106_v10 = vsel %vm2882_vm5, %v4932_v16, 0.0  ;;  %vm4487_vm9 = vcmp.gt.f32.partialorder %v15524_v49, 0.0  ;;  %9523 = vpow2.f32 %v4616_v47  ;;  %v15621_v37 = vpop.xlane.xlu1 %5008 }
 0x69b   : > { %v4743_v26 = vmul.f32 1.6732632, %v8410_v51  ;;  %5107 = vadd.xlane.f32.xlu1 %v5106_v10  ;;  %v4805_v12 = vsel %vm4485_vm7, %v15521_v38, %v4741_v21  ;;  %v15613_v22 = vadd.f32 %v15159_v57, %v15526_v53  ;;  %v15616_v11 = vadd.f32 %v13174_v14, %v4360_v60 }
 0x69c   : > { %v15619_v28 = vadd.f32 %v13174_v14, %v4362_v33  ;;  %v4869_v46 = vmul.f32 1.050701, %v4805_v12  ;;  %v5279_v38 = vperm.slane %v15590_v30, %v18848_v15  ;;  %v5283_v53 = vperm.slane %v15598_v56, %v18848_v15 }
 0x69d   : > { %v9520_v61 = vpop.eup %9519  ;;  %v4807_v0 = vsel %vm4487_vm9, %v15524_v49, %v4743_v26  ;;  %v15632_v14 = vadd.f32 %v15159_v57, %v15515_v55  ;;  %v4614_v2 = vmul.f32 1.442695, %v15616_v11  ;;  %v15638_v49 = vadd.f32 %v15159_v57, %v15528_v19 }
 0x69e   : > { %v9522_v1 = vpop.eup %9521  ;;  %v4871_v52 = vmul.f32 1.050701, %v4807_v0  ;;  %v8409_v41 = vadd.f32 -1.0, %v9520_v61  ;;  %v4934_v42 = vmul.f32 %v13414_v9, %v4869_v46  ;;  %v4618_v16 = vmul.f32 1.442695, %v15619_v28 }
 0x69f   : > { %v8411_v29 = vadd.f32 -1.0, %v9522_v1  ;;  %v5282_v21 = vperm.slane %v15613_v22, %v18848_v15  ;;  %9525 = vpow2.f32 %v4614_v2  ;;  %vm4486_vm10 = vcmp.gt.f32.partialorder %v15553_v45, 0.0 }
 0x6a0   : > { %v4936_v51 = vmul.f32 %v13414_v9, %v4871_v52  ;;  %v4742_v47 = vmul.f32 1.6732632, %v8409_v41  ;;  %v9524_v55 = vpop.eup %9523  ;;  %v5112_v60 = vsel %vm2882_vm5, %v4934_v42, 0.0  ;;  %9527 = vpow2.f32 %v4618_v16  ;;  %v5024_v12 = vpop.xlane.xlu0 %5023 }
 0x6a1   : > { %v4744_v33 = vmul.f32 1.6732632, %v8411_v29  ;;  %5113 = vadd.xlane.f32.xlu0 %v5112_v60  ;;  %vm4488_vm11 = vcmp.gt.f32.partialorder %v15562_v13, 0.0  ;;  %v8413_v26 = vadd.f32 -1.0, %v9524_v55  ;;  %v5284_v0 = vperm.slane %v15632_v14, %v18848_v15  ;;  %v5030_v55 = vpop.xlane.xlu2 %5029 }
 0x6a2   : > { %v5118_v19 = vsel %vm2882_vm5, %v4936_v51, 0.0  ;;  %v4806_v10 = vsel %vm4486_vm10, %v15553_v45, %v4742_v47  ;;  %vm4490_vm12 = vcmp.gt.f32.partialorder %v15583_v48, 0.0  ;;  %v5351_v41 = vsel %vm5330_vm3, %v5283_v53, %v5282_v21  ;;  %v5018_v2 = vpop.xlane.xlu1 %5017 }
 0x6a3   : > { %5119 = vadd.xlane.f32.xlu2 %v5118_v19  ;;  %v4870_v61 = vmul.f32 1.050701, %v4806_v10  ;;  %v4808_v46 = vsel %vm4488_vm11, %v15562_v13, %v4744_v33  ;;  %v4746_v52 = vmul.f32 1.6732632, %v8413_v26  ;;  %v5286_v45 = vperm.slane %v15638_v49, %v18848_v15 }
 0x6a4   : > { %v4872_v1 = vmul.f32 1.050701, %v4808_v46  ;;  %vm18221_vm14 = vcmask 1045509   ;;  %v5347_v13 = vsel %vm5336_vm13, %v5278_v18, %v15586_v3  ;;  %v15664_v29 = vadd.f32 %v15159_v57, %v15570_v5 }
 0x6a5   : > { %v4935_v42 = vmul.f32 %v13414_v9, %v4870_v61  ;;  %v9526_v16 = vpop.eup %9525  ;;  %v4810_v51 = vsel %vm4490_vm12, %v15583_v48, %v4746_v52  ;;  %v15670_v47 = vadd.f32 %v15159_v57, %v15555_v62  ;;  %v5348_v21 = vsel %vm18221_vm14, %v5279_v38, %v5347_v13 }
 0x6a6   : > { %v4937_v53 = vmul.f32 %v13414_v9, %v4872_v1  ;;  %v9528_v60 = vpop.eup %9527  ;;  %v4874_v18 = vmul.f32 1.050701, %v4810_v51  ;;  %v8412_v3 = vadd.f32 -1.0, %v9526_v16  ;;  %v5285_v5 = vperm.slane %v15664_v29, %v18848_v15 }
 0x6a7   : > { %v5115_v33 = vsel %vm2882_vm5, %v4935_v42, 0.0  ;;  %vm4489_vm15 = vcmp.gt.f32.partialorder %v15616_v11, 0.0  ;;  %vm4491_vm1 = vcmp.gt.f32.partialorder %v15619_v28, 0.0  ;;  %v8414_v48 = vadd.f32 -1.0, %v9528_v60 }
 0x6a8   : > { %5116 = vadd.xlane.f32.xlu1 %v5115_v33  ;;  %vm18220_vm0 = vcmask 1046534   ;;  %v5121_v62 = vsel %vm2882_vm5, %v4937_v53, 0.0  ;;  %v4939_v38 = vmul.f32 %v13414_v9, %v4874_v18  ;;  %v4745_v19 = vmul.f32 1.6732632, %v8412_v3  ;;  %v5033_v16 = vpop.xlane.xlu0 %5032 }
 0x6a9   : > { %v5352_v10 = vsel %vm5332_vm4, %v5284_v0, %v5351_v41  ;;  %5122 = vadd.xlane.f32.xlu0 %v5121_v62  ;;  %v4747_v26 = vmul.f32 1.6732632, %v8414_v48  ;;  %v5349_v61 = vsel %vm18220_vm0, %v5280_v58, %v5348_v21  ;;  %v15688_v1 = vadd.f32 %v15159_v57, %v15621_v37 }
 0x6aa   : > { %v5353_v46 = vsel %vm5334_vm8, %v5285_v5, %v5352_v10  ;;  %v5127_v52 = vsel %vm2882_vm5, %v4939_v38, 0.0  ;;  %v4809_v42 = vsel %vm4489_vm15, %v15616_v11, %v4745_v19  ;;  %v5287_v0 = vperm.slane %v15670_v47, %v18848_v15  ;;  %v5027_v11 = vpop.xlane.xlu1 %5026  ;;  %v5039_v5 = vpop.xlane.xlu2 %5038 }
 0x6ab   : > { %v15696_v41 = vadd.f32 %v15159_v57, %v15606_v7  ;;  %5128 = vadd.xlane.f32.xlu2 %v5127_v52  ;;  %v4873_v13 = vmul.f32 1.050701, %v4809_v42  ;;  %v4811_v58 = vsel %vm4491_vm1, %v15619_v28, %v4747_v26  ;;  %vm18219_vm2 = vcmask 1047559  }
 0x6ac   : > { %v15703_v37 = vadd.f32 %v15159_v57, %v15623_v36  ;;  %v4875_v53 = vmul.f32 1.050701, %v4811_v58  ;;  %v15709_v7 = vsel %vm18219_vm2, %v5281_v59, %v5349_v61  ;;  %v5288_v51 = vperm.slane %v15688_v1, %v18848_v15 }
 0x6ad   : > { %18861 = vst [vmem:[#allocation39_spill] sm:$0xff] %v15709_v7  ;;  %v5354_v21 = vsel %vm5336_vm13, %v5286_v45, %v5353_v46  ;;  %v4938_v28 = vmul.f32 %v13414_v9, %v4873_v13  ;;  %v15717_v36 = vadd.f32 %v15159_v57, %v15572_v34  ;;  %v15720_v60 = vadd.f32 %v15159_v57, %v5024_v12 }
 0x6ae   : > { %v15723_v33 = vadd.f32 %v15159_v57, %v5018_v2  ;;  %v4940_v59 = vmul.f32 %v13414_v9, %v4875_v53  ;;  %v5339_v45 = vsel %vm18221_vm14, %v5271_v20, %v15479_v35  ;;  %v5290_v18 = vperm.slane %v15696_v41, %v18848_v15 }
 0x6af   : > { %v15734_v34 = vadd.f32 %v15159_v57, %v5027_v11  ;;  %v5124_v12 = vsel %vm2882_vm5, %v4938_v28, 0.0  ;;  %v5292_v2 = vperm.slane %v15703_v37, %v18848_v15  ;;  %v5355_v3 = vsel %vm18221_vm14, %v5287_v0, %v5354_v21 }
 0x6b0   : > { %v5291_v9 = vperm.slane %v15723_v33, %v18848_v15  ;;  %5125 = vadd.xlane.f32.xlu1 %v5124_v12  ;;  %v5130_v20 = vsel %vm2882_vm5, %v4940_v59, 0.0  ;;  %v5356_v35 = vsel %vm18220_vm0, %v5288_v51, %v5355_v3  ;;  %v15745_v48 = vadd.f32 %v15159_v57, %v5030_v55  ;;  %v5042_v53 = vpop.xlane.xlu0 %5041 }
 0x6b1   : > { %v5294_v62 = vperm.slane %v15734_v34, %v18848_v15  ;;  %5131 = vadd.xlane.f32.xlu0 %v5130_v20  ;;  %vm5401_vm6 = vcmask 64512   ;;  %v5289_v38 = vperm.slane %v15717_v36, %v18848_v15  ;;  %v5293_v19 = vperm.slane %v15720_v60, %v18848_v15 }
 0x6b2   : > { %v5358_v10 = vsel %vm5330_vm3, %v5291_v9, %v5290_v18  ;;  %v5405_v26 = vsel %vm5401_vm6, %v15709_v7, -inf  ;;  %v5341_v55 = vsel %vm18220_vm0, %v5272_v44, %v5339_v45  ;;  %v15765_v52 = vadd.f32 %v15159_v57, %v5033_v16  ;;  %v5036_v0 = vpop.xlane.xlu1 %5035  ;;  %v5048_v45 = vpop.xlane.xlu2 %5047 }
 0x6b3   : > { %v5359_v61 = vsel %vm5332_vm4, %v5292_v2, %v5358_v10  ;;  %5406 = vmax.xlane.f32.xlu2 %v5405_v26  ;;  %v15762_v46 = vsel %vm18219_vm2, %v5289_v38, %v5356_v35  ;;  %v15772_v13 = vsel %vm18219_vm2, %v5273_v23, %v5341_v55  ;;  %v5295_v58 = vperm.slane %v15745_v48, %v18848_v15 }
 0x6b4   : > { %18862 = vst [vmem:[#allocation53_spill] sm:$0xff] %v15762_v46  ;;  %v5360_v42 = vsel %vm5334_vm8, %v5293_v19, %v5359_v61  ;;  %v15778_v11 = vadd.f32 %v15159_v57, %v5036_v0  ;;  %v5408_v16 = vsel %vm5401_vm6, %v15762_v46, -inf  ;;  %v5402_v23 = vsel %vm5401_vm6, %v15772_v13, -inf }
 0x6b5   : > { %18863 = vst [vmem:[#allocation58_spill] sm:$0xff] %v15772_v13  ;;  %v5361_v44 = vsel %vm5336_vm13, %v5294_v62, %v5360_v42  ;;  %v5296_v28 = vperm.slane %v15765_v52, %v18848_v15  ;;  %v15790_v59 = vadd.f32 %v15159_v57, %v5042_v53  ;;  %v15797_v2 = vadd.f32 %v15159_v57, %v5039_v5 }
 0x6b6   : > { %v5297_v51 = vperm.slane %v15778_v11, %v18848_v15  ;;  %v5362_v21 = vsel %vm18221_vm14, %v5295_v58, %v5361_v44  ;;  %v15811_v19 = vadd.f32 %v15159_v57, %v5048_v45 }
 0x6b7   : > { %v5363_v18 = vsel %vm18220_vm0, %v5296_v28, %v5362_v21  ;;  %v5299_v20 = vperm.slane %v15790_v59, %v18848_v15  ;;  %v5298_v38 = vperm.slane %v15797_v2, %v18848_v15 }
 0x6b8   : > { %5403 = vmax.xlane.f32.xlu1 %v5402_v23  ;;  %v15794_v12 = vsel %vm18219_vm2, %v5297_v51, %v5363_v18  ;;  %v5051_v5 = vpop.xlane.xlu0 %5050  ;;  %v5301_v55 = vperm.slane %v15811_v19, %v18848_v15 }
 0x6b9   : > { %5409 = vmax.xlane.f32.xlu0 %v5408_v16  ;;  %18864 = vst [vmem:[#allocation59_spill] sm:$0xff] %v15794_v12  ;;  %v5411_v35 = vsel %vm5401_vm6, %v15794_v12, -inf  ;;  %v5365_v10 = vsel %vm5330_vm3, %v5299_v20, %v5298_v38  ;;  %v15815_v26 = vadd.f32 %v15159_v57, %v5051_v5 }
 0x6ba   : > { %v5045_v3 = vpop.xlane.xlu1 %5044 }
 0x6bb   : > { %v15800_v9 = vadd.f32 %v15159_v57, %v5045_v3  ;;  %v5302_v53 = vperm.slane %v15815_v26, %v18848_v15 }
 0x6bd   : > { %v5300_v62 = vperm.slane %v15800_v9, %v18848_v15 }
 0x6be   : > { %v5057_v42 = vpop.xlane.xlu2 %5056 }
 0x6bf   : > { %v5366_v61 = vsel %vm5332_vm4, %v5300_v62, %v5365_v10  ;;  %v15827_v16 = vadd.f32 %v15159_v57, %v5057_v42 }
 0x6c0   : > { %5412 = vmax.xlane.f32.xlu1 %v5411_v35  ;;  %v5367_v44 = vsel %vm5334_vm8, %v5301_v55, %v5366_v61 }
 0x6c1   : > { %v5368_v21 = vsel %vm5336_vm13, %v5302_v53, %v5367_v44  ;;  %v5304_v28 = vperm.slane %v15827_v16, %v18848_v15 }
 0x6c2   : > { %v5054_v0 = vpop.xlane.xlu1 %5053 }
 0x6c3   : > { %v15821_v58 = vadd.f32 %v15159_v57, %v5054_v0 }
 0x6c5   : > { %v5303_v51 = vperm.slane %v15821_v58, %v18848_v15 }
 0x6c7   : > { %v5369_v23 = vsel %vm18221_vm14, %v5303_v51, %v5368_v21 }
 0x6c8   : > { %v5370_v3 = vsel %vm18220_vm0, %v5304_v28, %v5369_v23 }
 0x6ca   : > { %v5060_v45 = vpop.xlane.xlu0 %5059 }
 0x6cb   : > { %v15836_v18 = vadd.f32 %v15159_v57, %v5060_v45 }
 0x6cd   : > { %v5305_v20 = vperm.slane %v15836_v18, %v18848_v15 }
 0x6cf   : > { %v15842_v35 = vsel %vm18219_vm2, %v5305_v20, %v5370_v3 }
 0x6d0   : > { %18865 = vst [vmem:[#allocation55_spill] sm:$0xff] %v15842_v35  ;;  %v5414_v62 = vsel %vm5401_vm6, %v15842_v35, -inf }
 0x6d1   : > { %5415 = vmax.xlane.f32.xlu2 %v5414_v62 }
 0x6d4   : > { %v5066_v38 = vpop.xlane.xlu2 %5065 }
 0x6d5   : > { %v15850_v42 = vadd.f32 %v15159_v57, %v5066_v38 }
 0x6d7   : > { %v5063_v5 = vpop.xlane.xlu1 %5062  ;;  %v5307_v21 = vperm.slane %v15850_v42, %v18848_v15 }
 0x6d8   : > { %v15847_v61 = vadd.f32 %v15159_v57, %v5063_v5 }
 0x6da   : > { %v5306_v44 = vperm.slane %v15847_v61, %v18848_v15 }
 0x6db   : > { %v5069_v10 = vpop.xlane.xlu0 %5068 }
 0x6dc   : > { %v5075_v55 = vpop.xlane.xlu2 %5074  ;;  %v15853_v0 = vadd.f32 %v15159_v57, %v5069_v10  ;;  %v5372_v45 = vsel %vm5330_vm3, %v5307_v21, %v5306_v44 }
 0x6dd   : > { %v15868_v20 = vadd.f32 %v15159_v57, %v5075_v55 }
 0x6de   : > { %18866 = vst [vmem:[#allocation70_spill] sm:$0xff] %v15853_v0  ;;  %v5308_v23 = vperm.slane %v15853_v0, %v18848_v15 }
 0x6e0   : > { %v5373_v62 = vsel %vm5332_vm4, %v5308_v23, %v5372_v45 }
 0x6e8   : > { %v5072_v53 = vpop.xlane.xlu1 %5071 }
 0x6e9   : > { %v15858_v51 = vadd.f32 %v15159_v57, %v5072_v53  ;;  %v5310_v53 = vperm.slane %v15868_v20, %v18848_v15 }
 0x6ea   : > { %v5078_v28 = vpop.xlane.xlu0 %5077 }
 0x6eb   : > { %v5309_v3 = vperm.slane %v15858_v51, %v18848_v15  ;;  %v15872_v5 = vadd.f32 %v15159_v57, %v5078_v28 }
 0x6ec   : > { %v5084_v38 = vpop.xlane.xlu2 %5083 }
 0x6ed   : > { %18867 = vst [vmem:[#allocation60_spill] sm:$0xff] %v15872_v5  ;;  %v5374_v10 = vsel %vm5334_vm8, %v5309_v3, %v5373_v62  ;;  %v15878_v35 = vadd.f32 %v15159_v57, %v5084_v38  ;;  %v5311_v23 = vperm.slane %v15872_v5, %v18848_v15 }
 0x6ee   : > { %v5375_v55 = vsel %vm5336_vm13, %v5310_v53, %v5374_v10 }
 0x6ef   : > { %18868 = vst [vmem:[#allocation77_spill] sm:$0xff] %v15878_v35  ;;  %v5313_v3 = vperm.slane %v15878_v35, %v18848_v15  ;;  %v5376_v62 = vsel %vm18221_vm14, %v5311_v23, %v5375_v55 }
 0x6f2   : > { %v5081_v44 = vpop.xlane.xlu1 %5080 }
 0x6f3   : > { %v15881_v21 = vadd.f32 %v15159_v57, %v5081_v44 }
 0x6f4   : > { %v5087_v45 = vpop.xlane.xlu0 %5086 }
 0x6f5   : > { %v5312_v28 = vperm.slane %v15881_v21, %v18848_v15  ;;  %v15901_v46 = vadd.f32 %v15159_v57, %v5087_v45 }
 0x6f6   : > { %v5093_v44 = vpop.xlane.xlu2 %5092 }
 0x6f7   : > { %v5377_v38 = vsel %vm18220_vm0, %v5312_v28, %v5376_v62  ;;  %18870 = vst [vmem:[#allocation71_spill] sm:$0xff] %v15901_v46  ;;  %v15906_v23 = vadd.f32 %v15159_v57, %v5093_v44  ;;  %v5314_v28 = vperm.slane %v15901_v46, %v18848_v15 }
 0x6f8   : > { %v15893_v7 = vsel %vm18219_vm2, %v5313_v3, %v5377_v38 }
 0x6f9   : > { %18869 = vst [vmem:[#allocation65_spill] sm:$0xff] %v15893_v7  ;;  %v5417_v10 = vsel %vm5401_vm6, %v15893_v7, -inf  ;;  %v5316_v45 = vperm.slane %v15906_v23, %v18848_v15 }
 0x6fa   : > { %5418 = vmax.xlane.f32.xlu0 %v5417_v10  ;;  %18871 = vst [vmem:[#allocation68_spill] sm:$0xff] %v15906_v23 }
 0x6fb   : > { %v5090_v53 = vpop.xlane.xlu1 %5089 }
 0x6fc   : > { %v15898_v12 = vadd.f32 %v15159_v57, %v5090_v53 }
 0x6fd   : > { %v5096_v13 = vpop.xlane.xlu0 %5095 }
 0x6fe   : > { %v5315_v55 = vperm.slane %v15898_v12, %v18848_v15  ;;  %v15911_v3 = vadd.f32 %v15159_v57, %v5096_v13 }
 0x700   : > { %18872 = vst [vmem:[#allocation57_spill] sm:$0xff] %v15911_v3  ;;  %v5379_v62 = vsel %vm5330_vm3, %v5315_v55, %v5314_v28  ;;  %v5317_v46 = vperm.slane %v15911_v3, %v18848_v15 }
 0x701   : > { %v5380_v7 = vsel %vm5332_vm4, %v5316_v45, %v5379_v62 }
 0x702   : > { %v5381_v28 = vsel %vm5334_vm8, %v5317_v46, %v5380_v7 }
 0x703   : > { %v5102_v10 = vpop.xlane.xlu2 %5101 }
 0x704   : > { %v15925_v13 = vadd.f32 %v15159_v57, %v5102_v10 }
 0x705   : > { %v5099_v38 = vpop.xlane.xlu1 %5098 }
 0x706   : > { %v15917_v53 = vadd.f32 %v15159_v57, %v5099_v38  ;;  %18874 = vst [vmem:[#allocation74_spill] sm:$0xff] %v15925_v13  ;;  %v5319_v62 = vperm.slane %v15925_v13, %v18848_v15 }
 0x708   : > { %18873 = vst [vmem:[#allocation73_spill] sm:$0xff] %v15917_v53  ;;  %v5318_v44 = vperm.slane %v15917_v53, %v18848_v15  ;;  %v9902_v53 = vmov 0  }
 0x709   : > { %v5105_v55 = vpop.xlane.xlu0 %5104  ;;  %9266 = vset.pattern.permute.xlu1 %v9902_v53  ;;  %9265 = vset.pattern.permute.xlu0 %v9902_v53 }
 0x70a   : > { %v15929_v23 = vadd.f32 %v15159_v57, %v5105_v55  ;;  %v5382_v38 = vsel %vm5336_vm13, %v5318_v44, %v5381_v28  ;;  %9267 = vset.pattern.permute.xlu2 %v9902_v53 }
 0x70b   : > { %v5383_v3 = vsel %vm18221_vm14, %v5319_v62, %v5382_v38 }
 0x70c   : > { %18875 = vst [vmem:[#allocation66_spill] sm:$0xff] %v15929_v23  ;;  %v5320_v10 = vperm.slane %v15929_v23, %v18848_v15  ;;  %v5111_v28 = vpop.xlane.xlu2 %5110 }
 0x70e   : > { %v5108_v45 = vpop.xlane.xlu1 %5107  ;;  %v5384_v46 = vsel %vm18220_vm0, %v5320_v10, %v5383_v3  ;;  %v15955_v10 = vadd.f32 %v15159_v57, %v5111_v28 }
 0x70f   : > { %v15935_v5 = vadd.f32 %v15159_v57, %v5108_v45 }
 0x710   : > { %18880 = vst [vmem:[#allocation64_spill] sm:$0xff] %v15955_v10  ;;  %v5322_v53 = vperm.slane %v15955_v10, %v18848_v15 }
 0x711   : > { %18876 = vst [vmem:[#allocation45_spill] sm:$0xff] %v15935_v5  ;;  %v5321_v7 = vperm.slane %v15935_v5, %v18848_v15 }
 0x713   : > { %v15944_v55 = vsel %vm18219_vm2, %v5321_v7, %v5384_v46 }
 0x714   : > { %18877 = vst [vmem:[#allocation51_spill] sm:$0xff] %v15944_v55  ;;  %v5420_v44 = vsel %vm5401_vm6, %v15944_v55, -inf  ;;  %v5114_v45 = vpop.xlane.xlu0 %5113 }
 0x715   : > { %5421 = vmax.xlane.f32.xlu1 %v5420_v44  ;;  %v15949_v38 = vadd.f32 %v15159_v57, %v5114_v45 }
 0x716   : > { %v5120_v62 = vpop.xlane.xlu2 %5119 }
 0x717   : > { %18878 = vst [vmem:[#allocation54_spill] sm:$0xff] %v15949_v38  ;;  %v5323_v7 = vperm.slane %v15949_v38, %v18848_v15  ;;  %v15964_v45 = vadd.f32 %v15159_v57, %v5120_v62 }
 0x719   : > { %v5386_v55 = vsel %vm5330_vm3, %v5323_v7, %v5322_v53  ;;  %v5325_v5 = vperm.slane %v15964_v45, %v18848_v15 }
 0x71b   : > { %v5117_v13 = vpop.xlane.xlu1 %5116 }
 0x71c   : > { %v5123_v23 = vpop.xlane.xlu0 %5122  ;;  %v15952_v3 = vadd.f32 %v15159_v57, %v5117_v13 }
 0x71d   : > { %v15971_v28 = vadd.f32 %v15159_v57, %v5123_v23 }
 0x71e   : > { %18879 = vst [vmem:[#allocation75_spill] sm:$0xff] %v15952_v3  ;;  %v5324_v44 = vperm.slane %v15952_v3, %v18848_v15  ;;  %v5129_v3 = vpop.xlane.xlu2 %5128 }
 0x71f   : > { %18882 = vst [vmem:[#allocation61_spill] sm:$0xff] %v15971_v28  ;;  %v5326_v7 = vperm.slane %v15971_v28, %v18848_v15  ;;  %v15984_v23 = vadd.f32 %v15159_v57, %v5129_v3 }
 0x720   : > { %v5387_v38 = vsel %vm5332_vm4, %v5324_v44, %v5386_v55 }
 0x721   : > { %v5388_v10 = vsel %vm5334_vm8, %v5325_v5, %v5387_v38  ;;  %18883 = vst [vmem:[#allocation80_spill] sm:$0xff] %v15984_v23  ;;  %v5328_v53 = vperm.slane %v15984_v23, %v18848_v15 }
 0x722   : > { %v5389_v5 = vsel %vm5336_vm13, %v5326_v7, %v5388_v10 }
 0x723   : > { %v5126_v46 = vpop.xlane.xlu1 %5125 }
 0x724   : > { %v15968_v13 = vadd.f32 %v15159_v57, %v5126_v46  ;;  %v5132_v35 = vpop.xlane.xlu0 %5131 }
 0x725   : > { %v15987_v55 = vadd.f32 %v15159_v57, %v5132_v35 }
 0x726   : > { %18881 = vst [vmem:[#allocation67_spill] sm:$0xff] %v15968_v13  ;;  %v5327_v62 = vperm.slane %v15968_v13, %v18848_v15 }
 0x727   : > { %18884 = vst [vmem:[#allocation78_spill] sm:$0xff] %v15987_v55  ;;  %v5329_v13 = vperm.slane %v15987_v55, %v18848_v15 }
 0x728   : > { %v5390_v38 = vsel %vm18221_vm14, %v5327_v62, %v5389_v5 }
 0x729   : > { %v5391_v57 = vsel %vm18220_vm0, %v5328_v53, %v5390_v38 }
 0x72a   : > { %v16001_v35 = vsel %vm18219_vm2, %v5329_v13, %v5391_v57  ;;  %v16010_v13 = vpop.xlane.xlu2 %5406 }
 0x72b   : > { %v15979_v0 = vpop.xlane.xlu1 %5403  ;;  %18885 = vst [vmem:[#allocation85_spill] sm:$0xff] %v16001_v35  ;;  %v5423_v10 = vsel %vm5401_vm6, %v16001_v35, -inf  ;;  %v5444_v38 = vperm.slane %v16010_v13, 2 }
 0x72c   : > { %v5435_v46 = vperm.slane %v15979_v0, 1  ;;  %v5434_v44 = vperm.slane %v15979_v0, 0  ;;  %v5437_v62 = vperm.slane %v15979_v0, 3  ;;  %5424 = vmax.xlane.f32.xlu2 %v5423_v10  ;;  %v5441_v5 = vperm.slane %v15979_v0, 7 }
 0x72e   : > { %v5563_v3 = vsub.f32 %v15314_v43, %v5435_v46  ;;  %v5562_v28 = vsub.f32 %v15177_v24, %v5434_v44  ;;  %v5565_v55 = vsub.f32 %v15292_v32, %v5437_v62  ;;  %v5436_v24 = vperm.slane %v15979_v0, 2 }
 0x72f   : > { %v5569_v43 = vsub.f32 %v15463_v39, %v5441_v5  ;;  %v5439_v46 = vperm.slane %v15979_v0, 5  ;;  %v5572_v39 = vsub.f32 %v15509_v54, %v5444_v38  ;;  %v5447_v62 = vperm.slane %v16010_v13, 5  ;;  %v16036_v38 = vpop.xlane.xlu0 %5409 }
 0x730   : > { %v5628_v7 = vmul.f32 1.442695, %v5563_v3  ;;  %v5626_v23 = vmul.f32 1.442695, %v5562_v28  ;;  %v5632_v44 = vmul.f32 1.442695, %v5565_v55  ;;  %v5564_v53 = vsub.f32 %v15204_v25, %v5436_v24 }
 0x731   : > { %v5640_v3 = vmul.f32 1.442695, %v5569_v43  ;;  %v5567_v32 = vsub.f32 %v15323_v27, %v5439_v46  ;;  %v5442_v25 = vperm.slane %v16010_v13, 0  ;;  %v5575_v43 = vsub.f32 %v15590_v30, %v5447_v62 }
 0x732   : > { %9529 = vpow2.f32 %v5628_v7  ;;  %v5630_v55 = vmul.f32 1.442695, %v5564_v53  ;;  %v5646_v7 = vmul.f32 1.442695, %v5572_v39  ;;  %v5440_v46 = vperm.slane %v15979_v0, 6 }
 0x733   : > { %9531 = vpow2.f32 %v5626_v23  ;;  %v5438_v23 = vperm.slane %v15979_v0, 4  ;;  %v5636_v10 = vmul.f32 1.442695, %v5567_v32  ;;  %v5570_v54 = vsub.f32 %v15430_v8, %v5442_v25 }
 0x734   : > { %9533 = vpow2.f32 %v5632_v44  ;;  %v5445_v53 = vperm.slane %v16010_v13, 3  ;;  %v5652_v32 = vmul.f32 1.442695, %v5575_v43  ;;  %v5568_v8 = vsub.f32 %v15329_v4, %v5440_v46 }
 0x735   : > { %9535 = vpow2.f32 %v5640_v3  ;;  %v5566_v5 = vsub.f32 %v15399_v6, %v5438_v23  ;;  %v5642_v3 = vmul.f32 1.442695, %v5570_v54  ;;  %v5450_v39 = vperm.slane %v16036_v38, 0 }
 0x736   : > { %9537 = vpow2.f32 %v5630_v55  ;;  %v5573_v23 = vsub.f32 %v15493_v17, %v5445_v53  ;;  %v5443_v55 = vperm.slane %v16010_v13, 1  ;;  %v5638_v25 = vmul.f32 1.442695, %v5568_v8 }
 0x737   : > { %9539 = vpow2.f32 %v5636_v10  ;;  %v5634_v44 = vmul.f32 1.442695, %v5566_v5  ;;  %v5578_v10 = vsub.f32 %v15613_v22, %v5450_v39  ;;  %v5448_v62 = vperm.slane %v16010_v13, 6 }
 0x738   : > { %v16015_v57 = vpop.eup %9529  ;;  %9541 = vpow2.f32 %v5646_v7  ;;  %v5648_v7 = vmul.f32 1.442695, %v5573_v23  ;;  %v5571_v5 = vsub.f32 %v15439_v40, %v5443_v55  ;;  %v5453_v17 = vperm.slane %v16036_v38, 3 }
 0x739   : > { %v16017_v28 = vpop.eup %9531  ;;  %5822 = vperm.xlu1 %9266, %v16015_v57   ;;  %9543 = vpow2.f32 %v5634_v44  ;;  %v5658_v54 = vmul.f32 1.442695, %v5578_v10  ;;  %v5576_v22 = vsub.f32 %v15539_v50, %v5448_v62  ;;  %v5446_v44 = vperm.slane %v16010_v13, 4 }
 0x73a   : > { %5819 = vperm.xlu0 %9265, %v16017_v28   ;;  %v16027_v24 = vpop.eup %9533  ;;  %9545 = vpow2.f32 %v5642_v3  ;;  %v5644_v53 = vmul.f32 1.442695, %v5571_v5  ;;  %v5581_v40 = vsub.f32 %v15664_v29, %v5453_v17  ;;  %v5451_v8 = vperm.slane %v16036_v38, 1 }
 0x73b   : > { %v16029_v27 = vpop.eup %9535  ;;  %9547 = vpow2.f32 %v5652_v32  ;;  %v5654_v32 = vmul.f32 1.442695, %v5576_v22  ;;  %v5574_v39 = vsub.f32 %v15503_v31, %v5446_v44  ;;  %v5456_v50 = vperm.slane %v16036_v38, 6 }
 0x73c   : > { %v16038_v6 = vpop.eup %9537  ;;  %9549 = vpow2.f32 %v5638_v25  ;;  %v5664_v23 = vmul.f32 1.442695, %v5581_v40  ;;  %v5579_v29 = vsub.f32 %v15598_v56, %v5451_v8  ;;  %v5449_v10 = vperm.slane %v16010_v13, 7 }
 0x73d   : > { %18886 = vst [vmem:[#allocation72_spill] sm:$0xff] %v16038_v6  ;;  %v16044_v30 = vpop.eup %9539  ;;  %9551 = vpow2.f32 %v5648_v7  ;;  %v5650_v62 = vmul.f32 1.442695, %v5574_v39  ;;  %v5584_v31 = vsub.f32 %v15688_v1, %v5456_v50  ;;  %v16083_v7 = vpop.xlane.xlu1 %5412  ;;  %v5454_v17 = vperm.slane %v16036_v38, 4 }
 0x73e   : > { %18887 = vst [vmem:[#allocation69_spill] sm:$0xff] %v16044_v30  ;;  %v16046_v0 = vpop.eup %9541  ;;  %9553 = vpow2.f32 %v5658_v54  ;;  %v5660_v54 = vmul.f32 1.442695, %v5579_v29  ;;  %v5577_v56 = vsub.f32 %v15566_v63, %v5449_v10  ;;  %v5459_v44 = vperm.slane %v16083_v7, 1 }
 0x73f   : > { %v16053_v4 = vpop.eup %9543  ;;  %9555 = vpow2.f32 %v5644_v53  ;;  %v5670_v22 = vmul.f32 1.442695, %v5584_v31  ;;  %v5582_v1 = vsub.f32 %v15638_v49, %v5454_v17  ;;  %v5457_v39 = vperm.slane %v16036_v38, 7 }
 0x740   : > { %v16059_v43 = vpop.eup %9545  ;;  %9557 = vpow2.f32 %v5654_v32  ;;  %v5656_v40 = vmul.f32 1.442695, %v5577_v56  ;;  %v5452_v32 = vperm.slane %v16036_v38, 2  ;;  %v5587_v63 = vsub.f32 %v15723_v33, %v5459_v44 }
 0x741   : > { %5828 = vperm.xlu1 %9266, %v16027_v24   ;;  %18888 = vst [vmem:[#allocation63_spill] sm:$0xff] %v16059_v43  ;;  %v16061_v46 = vpop.eup %9547  ;;  %9559 = vpow2.f32 %v5664_v23  ;;  %v5666_v50 = vmul.f32 1.442695, %v5582_v1  ;;  %v5462_v49 = vperm.slane %v16083_v7, 4  ;;  %v5585_v33 = vsub.f32 %v15717_v36, %v5457_v39 }
 0x742   : > { %5840 = vperm.xlu0 %9265, %v16029_v27   ;;  %v16068_v3 = vpop.eup %9549  ;;  %9561 = vpow2.f32 %v5650_v62  ;;  %v5580_v23 = vsub.f32 %v15632_v14, %v5452_v32  ;;  %v5676_v29 = vmul.f32 1.442695, %v5587_v63  ;;  %v5455_v31 = vperm.slane %v16036_v38, 5 }
 0x743   : > { %v16074_v55 = vpop.eup %9551  ;;  %9563 = vpow2.f32 %v5660_v54  ;;  %v5590_v14 = vsub.f32 %v15734_v34, %v5462_v49  ;;  %v5672_v56 = vmul.f32 1.442695, %v5585_v33  ;;  %v5465_v36 = vperm.slane %v16083_v7, 7 }
 0x744   : > { %5825 = vperm.xlu2 %9267, %v16038_v6   ;;  %18889 = vst [vmem:[#allocation83_spill] sm:$0xff] %v16074_v55  ;;  %v16076_v25 = vpop.eup %9553  ;;  %9565 = vpow2.f32 %v5670_v22  ;;  %v5662_v17 = vmul.f32 1.442695, %v5580_v23  ;;  %v5460_v22 = vperm.slane %v16083_v7, 2  ;;  %v5583_v44 = vsub.f32 %v15670_v47, %v5455_v31  ;;  %v16130_v39 = vpop.xlane.xlu2 %5415 }
 0x745   : > { %v16085_v5 = vpop.eup %9555  ;;  %9567 = vpow2.f32 %v5656_v40  ;;  %v5682_v1 = vmul.f32 1.442695, %v5590_v14  ;;  %v5458_v63 = vperm.slane %v16083_v7, 0  ;;  %v5593_v47 = vsub.f32 %v15778_v11, %v5465_v36 }
 0x746   : > { %v16091_v13 = vpop.eup %9557  ;;  %9569 = vpow2.f32 %v5666_v50  ;;  %v5588_v34 = vsub.f32 %v15703_v37, %v5460_v22  ;;  %v5668_v32 = vmul.f32 1.442695, %v5583_v44  ;;  %v5463_v23 = vperm.slane %v16083_v7, 5 }
 0x747   : > { %18890 = vst [vmem:[#allocation76_spill] sm:$0xff] %v16091_v13  ;;  %v16093_v53 = vpop.eup %9559  ;;  %9571 = vpow2.f32 %v5676_v29  ;;  %v5586_v37 = vsub.f32 %v15696_v41, %v5458_v63  ;;  %v5688_v29 = vmul.f32 1.442695, %v5593_v47  ;;  %v5468_v33 = vperm.slane %v16130_v39, 2 }
 0x748   : > { %v16100_v8 = vpop.eup %9561  ;;  %9573 = vpow2.f32 %v5662_v17  ;;  %v5678_v49 = vmul.f32 1.442695, %v5588_v34  ;;  %v5591_v11 = vsub.f32 %v15745_v48, %v5463_v23  ;;  %v5461_v14 = vperm.slane %v16083_v7, 3 }
 0x749   : > { %5834 = vperm.xlu1 %9266, %v16044_v30   ;;  %v16106_v10 = vpop.eup %9563  ;;  %9575 = vpow2.f32 %v5672_v56  ;;  %v5674_v56 = vmul.f32 1.442695, %v5586_v37  ;;  %v5596_v41 = vsub.f32 %v15800_v9, %v5468_v33  ;;  %v5466_v36 = vperm.slane %v16130_v39, 0 }
 0x74a   : > { %5849 = vperm.xlu0 %9265, %v16046_v0   ;;  %18891 = vst [vmem:[#allocation81_spill] sm:$0xff] %v16106_v10  ;;  %v16108_v62 = vpop.eup %9565  ;;  %9577 = vpow2.f32 %v5682_v1  ;;  %v5684_v44 = vmul.f32 1.442695, %v5591_v11  ;;  %v5589_v1 = vsub.f32 %v15720_v60, %v5461_v14  ;;  %v5471_v48 = vperm.slane %v16130_v39, 5 }
 0x74b   : > { %v16115_v54 = vpop.eup %9567  ;;  %9579 = vpow2.f32 %v5668_v32  ;;  %v5694_v34 = vmul.f32 1.442695, %v5596_v41  ;;  %v5594_v9 = vsub.f32 %v15797_v2, %v5466_v36  ;;  %v5464_v47 = vperm.slane %v16083_v7, 6 }
 0x74c   : > { %5831 = vperm.xlu2 %9267, %v16053_v4   ;;  %v16121_v40 = vpop.eup %9569  ;;  %9581 = vpow2.f32 %v5678_v49  ;;  %v5680_v23 = vmul.f32 1.442695, %v5589_v1  ;;  %v5599_v60 = vsub.f32 %v15821_v58, %v5471_v48  ;;  %v5472_v1 = vperm.slane %v16130_v39, 6 }
 0x74d   : > { %18892 = vst [vmem:[#allocation87_spill] sm:$0xff] %v16121_v40  ;;  %v16123_v38 = vpop.eup %9571  ;;  %9583 = vpow2.f32 %v5688_v29  ;;  %v5469_v29 = vperm.slane %v16130_v39, 3  ;;  %v5690_v33 = vmul.f32 1.442695, %v5594_v9  ;;  %v5592_v2 = vsub.f32 %v15765_v52, %v5464_v47 }
 0x74e   : > { %v16132_v50 = vpop.eup %9573  ;;  %9585 = vpow2.f32 %v5674_v56  ;;  %v5700_v11 = vmul.f32 1.442695, %v5599_v60  ;;  %v5470_v60 = vperm.slane %v16130_v39, 4 }
 0x74f   : > { %v16138_v31 = vpop.eup %9575  ;;  %9587 = vpow2.f32 %v5684_v44  ;;  %v5597_v58 = vsub.f32 %v15811_v19, %v5469_v29  ;;  %v5686_v41 = vmul.f32 1.442695, %v5592_v2  ;;  %v5467_v44 = vperm.slane %v16130_v39, 1 }
 0x750   : > { %18893 = vst [vmem:[#allocation90_spill] sm:$0xff] %v16138_v31  ;;  %v16140_v17 = vpop.eup %9577  ;;  %9589 = vpow2.f32 %v5694_v34 }
 0x751   : > { %5843 = vperm.xlu1 %9266, %v16059_v43   ;;  %v16147_v22 = vpop.eup %9579  ;;  %9591 = vpow2.f32 %v5680_v23  ;;  %v5696_v48 = vmul.f32 1.442695, %v5597_v58  ;;  %v5595_v34 = vsub.f32 %v15790_v59, %v5467_v44 }
 0x752   : > { %5858 = vperm.xlu0 %9265, %v16061_v46   ;;  %v16153_v32 = vpop.eup %9581  ;;  %9593 = vpow2.f32 %v5690_v33 }
 0x753   : > { %18894 = vst [vmem:[#allocation79_spill] sm:$0xff] %v16153_v32  ;;  %v16155_v63 = vpop.eup %9583  ;;  %9595 = vpow2.f32 %v5700_v11  ;;  %v5692_v29 = vmul.f32 1.442695, %v5595_v34 }
 0x754   : > { %5837 = vperm.xlu2 %9267, %v16068_v3   ;;  %v16164_v37 = vpop.eup %9585  ;;  %9597 = vpow2.f32 %v5686_v41 }
 0x755   : > { %v16170_v7 = vpop.eup %9587  ;;  %9599 = vpow2.f32 %v5696_v48 }
 0x756   : > { %18895 = vst [vmem:[#allocation10_spill] sm:$0xff] %v16170_v7  ;;  %v16172_v56 = vpop.eup %9589 }
 0x757   : > { %v16179_v36 = vpop.eup %9591 }
 0x758   : > { %v16185_v47 = vpop.eup %9593 }
 0x759   : > { %5852 = vperm.xlu1 %9266, %v16074_v55   ;;  %18896 = vst [vmem:[#allocation88_spill] sm:$0xff] %v16185_v47  ;;  %v16187_v23 = vpop.eup %9595 }
 0x75a   : > { %5867 = vperm.xlu0 %9265, %v16076_v25   ;;  %v16194_v33 = vpop.eup %9597 }
 0x75b   : > { %v16200_v41 = vpop.eup %9599 }
 0x75c   : > { %5846 = vperm.xlu2 %9267, %v16085_v5   ;;  %18897 = vst [vmem:[#allocation5_spill] sm:$0xff] %v16200_v41 }
 0x761   : > { %5861 = vperm.xlu1 %9266, %v16091_v13  }
 0x762   : > { %5876 = vperm.xlu0 %9265, %v16093_v53  }
 0x764   : > { %5855 = vperm.xlu2 %9267, %v16100_v8  }
 0x769   : > { %5870 = vperm.xlu1 %9266, %v16106_v10  }
 0x76a   : > { %5885 = vperm.xlu0 %9265, %v16108_v62  }
 0x76c   : > { %5864 = vperm.xlu2 %9267, %v16115_v54  }
 0x76d   : > { %v16162_v49 = vpop.xlane.xlu0 %5418 }
 0x76e   : > { %v5474_v14 = vperm.slane %v16162_v49, 0  ;;  %v5477_v19 = vperm.slane %v16162_v49, 3  ;;  %v5475_v11 = vperm.slane %v16162_v49, 1 }
 0x770   : > { %v5602_v52 = vsub.f32 %v15847_v61, %v5474_v14  ;;  %v5600_v61 = vsub.f32 %v15827_v16, %v5472_v1  ;;  %v5605_v59 = vsub.f32 %v15858_v51, %v5477_v19  ;;  %v5598_v14 = vsub.f32 %v15815_v26, %v5470_v60 }
 0x771   : > { %5879 = vperm.xlu1 %9266, %v16121_v40   ;;  %v5480_v16 = vperm.slane %v16162_v49, 6  ;;  %v5603_v51 = vsub.f32 %v15850_v42, %v5475_v11  ;;  %v5478_v19 = vperm.slane %v16162_v49, 4 }
 0x772   : > { %5894 = vperm.xlu0 %9265, %v16123_v38   ;;  %v5706_v9 = vmul.f32 1.442695, %v5602_v52  ;;  %v5702_v2 = vmul.f32 1.442695, %v5600_v61  ;;  %v5712_v58 = vmul.f32 1.442695, %v5605_v59 }
 0x773   : > { %v5473_v52 = vperm.slane %v16130_v39, 7  ;;  %v5698_v1 = vmul.f32 1.442695, %v5598_v14  ;;  %v5608_v26 = vsub.f32 %v15881_v21, %v5480_v16  ;;  %v5606_v59 = vsub.f32 %v15868_v20, %v5478_v19 }
 0x774   : > { %5873 = vperm.xlu2 %9267, %v16132_v50   ;;  %9601 = vpow2.f32 %v5706_v9  ;;  %v5708_v9 = vmul.f32 1.442695, %v5603_v51  ;;  %v5481_v16 = vperm.slane %v16162_v49, 7  ;;  %v18899_v51 = vld [vmem:[#allocation70_spill] sm:$0xff] }
 0x775   : > { %9603 = vpow2.f32 %v5692_v29  ;;  %v5601_v42 = vsub.f32 %v15836_v18, %v5473_v52  ;;  %v5718_v61 = vmul.f32 1.442695, %v5608_v26  ;;  %v5476_v18 = vperm.slane %v16162_v49, 2 }
 0x776   : > { %9605 = vpow2.f32 %v5702_v2 }
 0x777   : > { %9607 = vpow2.f32 %v5712_v58  ;;  %v5704_v2 = vmul.f32 1.442695, %v5601_v42  ;;  %v5714_v58 = vmul.f32 1.442695, %v5606_v59  ;;  %v5604_v52 = vsub.f32 %v18899_v51, %v5476_v18  ;;  %v18902_v59 = vld [vmem:[#allocation73_spill] sm:$0xff] }
 0x778   : > { %9609 = vpow2.f32 %v5698_v1 }
 0x779   : > { %5888 = vperm.xlu1 %9266, %v16138_v31   ;;  %9611 = vpow2.f32 %v5708_v9 }
 0x77a   : > { %5903 = vperm.xlu0 %9265, %v16140_v17   ;;  %v16202_v44 = vpop.eup %9601  ;;  %9613 = vpow2.f32 %v5718_v61  ;;  %v5479_v61 = vperm.slane %v16162_v49, 5 }
 0x77b   : > { %v16211_v34 = vpop.eup %9603  ;;  %9615 = vpow2.f32 %v5704_v2 }
 0x77c   : > { %5882 = vperm.xlu2 %9267, %v16147_v22   ;;  %v16217_v39 = vpop.eup %9605  ;;  %9617 = vpow2.f32 %v5714_v58 }
 0x77d   : > { %18898 = vst [vmem:[#allocation86_spill] sm:$0xff] %v16217_v39  ;;  %v16219_v29 = vpop.eup %9607 }
 0x77e   : > { %v16228_v14 = vpop.eup %9609 }
 0x77f   : > { %v16234_v26 = vpop.eup %9611 }
 0x780   : > { %18900 = vst [vmem:[#allocation93_spill] sm:$0xff] %v16234_v26  ;;  %v16236_v19 = vpop.eup %9613 }
 0x781   : > { %5897 = vperm.xlu1 %9266, %v16153_v32   ;;  %v16249_v51 = vpop.eup %9615 }
 0x782   : > { %5912 = vperm.xlu0 %9265, %v16155_v63  }
 0x784   : > { %5891 = vperm.xlu2 %9267, %v16164_v37  }
 0x788   : > { %v16209_v48 = vpop.xlane.xlu1 %5421 }
 0x789   : > { %5906 = vperm.xlu1 %9266, %v16170_v7   ;;  %v5483_v60 = vperm.slane %v16209_v48, 1  ;;  %v5486_v20 = vperm.slane %v16209_v48, 4  ;;  %v5489_v58 = vperm.slane %v16209_v48, 7 }
 0x78a   : > { %5921 = vperm.xlu0 %9265, %v16172_v56  }
 0x78b   : > { %v5611_v11 = vsub.f32 %v15898_v12, %v5483_v60  ;;  %v18901_v12 = vld [vmem:[#allocation77_spill] sm:$0xff]  ;;  %v5710_v60 = vmul.f32 1.442695, %v5604_v52  ;;  %v5614_v18 = vsub.f32 %v18902_v59, %v5486_v20  ;;  %v16255_v52 = vpop.eup %9617  ;;  %v18905_v59 = vld [vmem:[#allocation68_spill] sm:$0xff] }
 0x78c   : > { %5900 = vperm.xlu2 %9267, %v16179_v36   ;;  %v5609_v42 = vsub.f32 %v18901_v12, %v5481_v16  ;;  %v18903_v16 = vld [vmem:[#allocation60_spill] sm:$0xff]  ;;  %18904 = vst [vmem:[#allocation91_spill] sm:$0xff] %v16255_v52 }
 0x78d   : > { %v5724_v1 = vmul.f32 1.442695, %v5611_v11  ;;  %v5607_v12 = vsub.f32 %v18903_v16, %v5479_v61  ;;  %v5730_v49 = vmul.f32 1.442695, %v5614_v18 }
 0x78e   : > { %v5720_v35 = vmul.f32 1.442695, %v5609_v42 }
 0x78f   : > { %9619 = vpow2.f32 %v5724_v1 }
 0x790   : > { %9621 = vpow2.f32 %v5710_v60 }
 0x791   : > { %5915 = vperm.xlu1 %9266, %v16185_v47   ;;  %9623 = vpow2.f32 %v5720_v35  ;;  %v5487_v47 = vperm.slane %v16209_v48, 5 }
 0x792   : > { %5930 = vperm.xlu0 %9265, %v16187_v23   ;;  %9625 = vpow2.f32 %v5730_v49 }
 0x794   : > { %5909 = vperm.xlu2 %9267, %v16194_v33  }
 0x795   : > { %v16257_v20 = vpop.eup %9619 }
 0x796   : > { %v16269_v18 = vpop.eup %9621 }
 0x797   : > { %18907 = vst [vmem:[#allocation82_spill] sm:$0xff] %v16269_v18 }
 0x799   : > { %5924 = vperm.xlu1 %9266, %v16200_v41   ;;  %v18906_v41 = vld [vmem:[#allocation45_spill] sm:$0xff] }
 0x79a   : > { %5939 = vperm.xlu0 %9265, %v16202_v44   ;;  %v5617_v61 = vsub.f32 %v18906_v41, %v5489_v58  ;;  %v18910_v41 = vld [vmem:[#allocation74_spill] sm:$0xff] }
 0x79b   : > { %v5615_v58 = vsub.f32 %v18910_v41, %v5487_v47 }
 0x79c   : > { %5918 = vperm.xlu2 %9267, %v16211_v34  }
 0x79f   : > { %v16221_v21 = vpop.xlane.xlu2 %5424 }
 0x7a1   : > { %5933 = vperm.xlu1 %9266, %v16217_v39   ;;  %v5716_v39 = vmul.f32 1.442695, %v5607_v12 }
 0x7a2   : > { %5948 = vperm.xlu0 %9265, %v16219_v29  }
 0x7a3   : > { %9627 = vpow2.f32 %v5716_v39  ;;  %v5732_v39 = vmul.f32 1.442695, %v5615_v58  ;;  %v5493_v58 = vperm.slane %v16221_v21, 3 }
 0x7a4   : > { %5927 = vperm.xlu2 %9267, %v16228_v14  }
 0x7a7   : > { %v16238_v9 = vpop.permute.xlu2 %5825 }
 0x7a9   : > { %5942 = vperm.xlu1 %9266, %v16234_v26   ;;  %v5484_v26 = vperm.slane %v16209_v48, 2 }
 0x7aa   : > { %5957 = vperm.xlu0 %9265, %v16236_v19  }
 0x7ab   : > { %v16245_v11 = vpop.permute.xlu1 %5822  ;;  %v5612_v42 = vsub.f32 %v18905_v59, %v5484_v26  ;;  %v16273_v26 = vpop.eup %9623 }
 0x7ac   : > { %v16247_v2 = vpop.permute.xlu0 %5819  ;;  %5936 = vperm.xlu2 %9267, %v16249_v51   ;;  %18908 = vst [vmem:[#allocation89_spill] sm:$0xff] %v16273_v26  ;;  %v16275_v35 = vpop.eup %9625 }
 0x7ad   : > { %v5726_v7 = vmul.f32 1.442695, %v5612_v42  ;;  %18909 = vst [vmem:[#allocation94_spill] sm:$0xff] %v16275_v35  ;;  %v16284_v42 = vpop.eup %9627 }
 0x7ae   : > { %18911 = vst [vmem:[#allocation84_spill] sm:$0xff] %v16284_v42 }
 0x7af   : > { %v16259_v1 = vpop.permute.xlu2 %5831  ;;  %9629 = vpow2.f32 %v5726_v7  ;;  %v18914_v7 = vld [vmem:[#allocation64_spill] sm:$0xff] }
 0x7b1   : > { %5951 = vperm.xlu1 %9266, %v16255_v52   ;;  %v5736_v52 = vmul.f32 1.442695, %v5617_v61  ;;  %v5490_v61 = vperm.slane %v16221_v21, 0 }
 0x7b2   : > { %5966 = vperm.xlu0 %9265, %v16257_v20  }
 0x7b3   : > { %v16265_v16 = vpop.permute.xlu1 %5828  ;;  %9631 = vpow2.f32 %v5736_v52  ;;  %v5618_v47 = vsub.f32 %v18914_v7, %v5490_v61 }
 0x7b4   : > { %v16267_v60 = vpop.permute.xlu0 %5840  ;;  %5945 = vperm.xlu2 %9267, %v16269_v18   ;;  %9633 = vpow2.f32 %v5732_v39  ;;  %v5496_v39 = vperm.slane %v16221_v21, 6 }
 0x7b5   : > { %v16288_v32 = vpop.eup %9629  ;;  %v5738_v40 = vmul.f32 1.442695, %v5618_v47  ;;  %v18917_v47 = vld [vmem:[#allocation80_spill] sm:$0xff] }
 0x7b6   : > { %18912 = vst [vmem:[#allocation34_spill] sm:$0xff] %v16288_v32  ;;  %v5624_v6 = vsub.f32 %v18917_v47, %v5496_v39 }
 0x7b7   : > { %v16277_v12 = vpop.permute.xlu2 %5837  ;;  %9635 = vpow2.f32 %v5738_v40  ;;  %v6010_v40 = vperm.slane %v16247_v2, %v18848_v15 }
 0x7b9   : > { %5960 = vperm.xlu1 %9266, %v16273_v26   ;;  %v16290_v31 = vpop.eup %9631 }
 0x7ba   : > { %5975 = vperm.xlu0 %9265, %v16275_v35   ;;  %18913 = vst [vmem:[#allocation92_spill] sm:$0xff] %v16290_v31  ;;  %v16302_v10 = vpop.eup %9633 }
 0x7bb   : > { %v5835_v49 = vpop.permute.xlu1 %5834  ;;  %18915 = vst [vmem:[#allocation95_spill] sm:$0xff] %v16302_v10 }
 0x7bc   : > { %v16282_v59 = vpop.permute.xlu0 %5849  ;;  %5954 = vperm.xlu2 %9267, %v16284_v42   ;;  %v6015_v35 = vperm.slane %v5835_v49, %v18848_v15  ;;  %v6016_v49 = vperm.slane %v16277_v12, %v18848_v15 }
 0x7bd   : > { %v16311_v43 = vpop.eup %9635 }
 0x7be   : > { %18916 = vst [vmem:[#allocation9_spill] sm:$0xff] %v16311_v43 }
 0x7bf   : > { %v16292_v26 = vpop.permute.xlu2 %5846 }
 0x7c1   : > { %5969 = vperm.xlu1 %9266, %v16288_v32   ;;  %v5621_v32 = vsub.f32 %v15964_v45, %v5493_v58  ;;  %v5750_v45 = vmul.f32 1.442695, %v5624_v6  ;;  %v6011_v58 = vperm.slane %v16245_v11, %v18848_v15  ;;  %v6012_v6 = vperm.slane %v16238_v9, %v18848_v15 }
 0x7c2   : > { %5984 = vperm.xlu0 %9265, %v16290_v31  }
 0x7c3   : > { %v16297_v52 = vpop.permute.xlu1 %5843  ;;  %v5744_v55 = vmul.f32 1.442695, %v5621_v32 }
 0x7c4   : > { %v16299_v41 = vpop.permute.xlu0 %5858 }
 0x7c5   : > { %9637 = vpow2.f32 %v5744_v55  ;;  %v6013_v55 = vperm.slane %v16265_v16, %v18848_v15 }
 0x7c6   : > { %9639 = vpow2.f32 %v5750_v45 }
 0x7c7   : > { %v16304_v13 = vpop.permute.xlu2 %5855 }
 0x7c9   : > { %5978 = vperm.xlu1 %9266, %v16302_v10  }
 0x7cb   : > { %v16308_v61 = vpop.permute.xlu1 %5852  ;;  %v16323_v32 = vpop.eup %9637 }
 0x7cc   : > { %v5868_v7 = vpop.permute.xlu0 %5867  ;;  %18918 = vst [vmem:[#allocation11_spill] sm:$0xff] %v16323_v32  ;;  %v16338_v16 = vpop.eup %9639 }
 0x7cd   : > { %18919 = vst [vmem:[#allocation21_spill] sm:$0xff] %v16338_v16 }
 0x7cf   : > { %v16313_v30 = vpop.permute.xlu2 %5864 }
 0x7d1   : > { %5987 = vperm.xlu1 %9266, %v16311_v43   ;;  %v6074_v43 = vsel %vm5330_vm3, %v6011_v58, %v6010_v40  ;;  %v6014_v40 = vperm.slane %v16259_v1, %v18848_v15 }
 0x7d2   : > { %v6075_v11 = vsel %vm5332_vm4, %v6012_v6, %v6074_v43 }
 0x7d3   : > { %v16317_v42 = vpop.permute.xlu1 %5861  ;;  %v6076_v18 = vsel %vm5334_vm8, %v6013_v55, %v6075_v11 }
 0x7d4   : > { %v5877_v10 = vpop.permute.xlu0 %5876  ;;  %v6077_v9 = vsel %vm5336_vm13, %v6014_v40, %v6076_v18 }
 0x7d5   : > { %v6078_v43 = vsel %vm18221_vm14, %v6015_v35, %v6077_v9  ;;  %v6029_v1 = vperm.slane %v5877_v10, %v18848_v15 }
 0x7d6   : > { %v6079_v18 = vsel %vm18220_vm0, %v6016_v49, %v6078_v43 }
 0x7d7   : > { %v5874_v31 = vpop.permute.xlu2 %5873 }
 0x7d8   : > { %v6028_v58 = vperm.slane %v5874_v31, %v18848_v15  ;;  %v6017_v31 = vperm.slane %v16267_v60, %v18848_v15 }
 0x7d9   : > { %5996 = vperm.xlu1 %9266, %v16323_v32   ;;  %v6026_v32 = vperm.slane %v5868_v7, %v18848_v15 }
 0x7da   : > { %v6080_v12 = vsel %vm18219_vm2, %v6017_v31, %v6079_v18  ;;  %v6018_v31 = vperm.slane %v16297_v52, %v18848_v15 }
 0x7db   : > { %v5871_v39 = vpop.permute.xlu1 %5870  ;;  %v6138_v9 = vsel %vm5401_vm6, %v6080_v12, 0.0 }
 0x7dc   : > { %v5886_v47 = vpop.permute.xlu0 %5885  ;;  %v6027_v2 = vperm.slane %v5871_v39, %v18848_v15 }
 0x7dd   : > { %v6032_v10 = vperm.slane %v5886_v47, %v18848_v15 }
 0x7de   : > { %v6088_v45 = vsel %vm5330_vm3, %v6027_v2, %v6026_v32 }
 0x7df   : > { %v5883_v39 = vpop.permute.xlu2 %5882  ;;  %v6089_v7 = vsel %vm5332_vm4, %v6028_v58, %v6088_v45 }
 0x7e0   : > { %v6090_v2 = vsel %vm5334_vm8, %v6029_v1, %v6089_v7  ;;  %v6031_v11 = vperm.slane %v5883_v39, %v18848_v15 }
 0x7e1   : > { %6005 = vperm.xlu1 %9266, %v16338_v16  }
 0x7e3   : > { %v5880_v55 = vpop.permute.xlu1 %5879 }
 0x7e4   : > { %v5895_v6 = vpop.permute.xlu0 %5894  ;;  %v6030_v32 = vperm.slane %v5880_v55, %v18848_v15 }
 0x7e5   : > { %v6035_v47 = vperm.slane %v5895_v6, %v18848_v15  ;;  %v6021_v6 = vperm.slane %v16308_v61, %v18848_v15  ;;  %v6022_v61 = vperm.slane %v16304_v13, %v18848_v15 }
 0x7e6   : > { %v6091_v35 = vsel %vm5336_vm13, %v6030_v32, %v6090_v2 }
 0x7e7   : > { %v5892_v40 = vpop.permute.xlu2 %5891  ;;  %v6092_v45 = vsel %vm18221_vm14, %v6031_v11, %v6091_v35  ;;  %v6019_v11 = vperm.slane %v16292_v26, %v18848_v15 }
 0x7e8   : > { %v6093_v49 = vsel %vm18220_vm0, %v6032_v10, %v6092_v45  ;;  %v6034_v1 = vperm.slane %v5892_v40, %v18848_v15 }
 0x7e9   : > { %v6081_v40 = vsel %vm5330_vm3, %v6019_v11, %v6018_v31 }
 0x7ea   : > { %v6095_v2 = vsel %vm5330_vm3, %v6035_v47, %v6034_v1  ;;  %v6024_v47 = vperm.slane %v16317_v42, %v18848_v15 }
 0x7eb   : > { %v5889_v58 = vpop.permute.xlu1 %5888 }
 0x7ec   : > { %v5904_v43 = vpop.permute.xlu0 %5903  ;;  %6139 = vadd.xlane.f32.xlu0 %v6138_v9  ;;  %v6033_v60 = vperm.slane %v5889_v58, %v18848_v15  ;;  %v6020_v9 = vperm.slane %v16282_v59, %v18848_v15 }
 0x7ed   : > { %v6038_v58 = vperm.slane %v5904_v43, %v18848_v15 }
 0x7ee   : > { %v6094_v7 = vsel %vm18219_vm2, %v6033_v60, %v6093_v49  ;;  %v6082_v26 = vsel %vm5332_vm4, %v6020_v9, %v6081_v40  ;;  %v6025_v40 = vperm.slane %v16313_v30, %v18848_v15 }
 0x7ef   : > { %v6144_v39 = vsel %vm5401_vm6, %v6094_v7, 0.0  ;;  %v5901_v55 = vpop.permute.xlu2 %5900  ;;  %v6083_v7 = vsel %vm5334_vm8, %v6021_v6, %v6082_v26 }
 0x7f0   : > { %6145 = vadd.xlane.f32.xlu2 %v6144_v39  ;;  %v6037_v45 = vperm.slane %v5901_v55, %v18848_v15 }
 0x7f3   : > { %v5898_v32 = vpop.permute.xlu1 %5897 }
 0x7f4   : > { %v6036_v18 = vperm.slane %v5898_v32, %v18848_v15  ;;  %v5913_v35 = vpop.permute.xlu0 %5912  ;;  %v6084_v32 = vsel %vm5336_vm13, %v6022_v61, %v6083_v7 }
 0x7f5   : > { %v6041_v59 = vperm.slane %v5913_v35, %v18848_v15 }
 0x7f6   : > { %v6096_v12 = vsel %vm5332_vm4, %v6036_v18, %v6095_v2  ;;  %v6023_v2 = vperm.slane %v16299_v41, %v18848_v15 }
 0x7f7   : > { %v5910_v10 = vpop.permute.xlu2 %5909  ;;  %v6097_v52 = vsel %vm5334_vm8, %v6037_v45, %v6096_v12 }
 0x7f8   : > { %v6040_v39 = vperm.slane %v5910_v10, %v18848_v15  ;;  %v6098_v55 = vsel %vm5336_vm13, %v6038_v58, %v6097_v52  ;;  %v6085_v12 = vsel %vm18221_vm14, %v6023_v2, %v6084_v32 }
 0x7f9   : > { %v6086_v45 = vsel %vm18220_vm0, %v6024_v47, %v6085_v12 }
 0x7fa   : > { %v6087_v6 = vsel %vm18219_vm2, %v6025_v40, %v6086_v45 }
 0x7fb   : > { %v5907_v60 = vpop.permute.xlu1 %5906  ;;  %v6141_v52 = vsel %vm5401_vm6, %v6087_v6, 0.0 }
 0x7fc   : > { %v6039_v49 = vperm.slane %v5907_v60, %v18848_v15  ;;  %v5922_v18 = vpop.permute.xlu0 %5921 }
 0x7fd   : > { %v6044_v26 = vperm.slane %v5922_v18, %v18848_v15 }
 0x7fe   : > { %v6099_v1 = vsel %vm18221_vm14, %v6039_v49, %v6098_v55 }
 0x7ff   : > { %v6100_v43 = vsel %vm18220_vm0, %v6040_v39, %v6099_v1  ;;  %v5919_v11 = vpop.permute.xlu2 %5918 }
 0x800   : > { %v6101_v31 = vsel %vm18219_vm2, %v6041_v59, %v6100_v43  ;;  %v6043_v10 = vperm.slane %v5919_v11, %v18848_v15 }
 0x801   : > { %v6147_v13 = vsel %vm5401_vm6, %v6101_v31, 0.0 }
 0x802   : > { %6148 = vadd.xlane.f32.xlu0 %v6147_v13 }
 0x803   : > { %v5916_v35 = vpop.permute.xlu1 %5915 }
 0x804   : > { %v6042_v42 = vperm.slane %v5916_v35, %v18848_v15  ;;  %v5931_v41 = vpop.permute.xlu0 %5930 }
 0x805   : > { %v6047_v59 = vperm.slane %v5931_v41, %v18848_v15 }
 0x806   : > { %v6102_v58 = vsel %vm5330_vm3, %v6043_v10, %v6042_v42 }
 0x807   : > { %v5928_v9 = vpop.permute.xlu2 %5927  ;;  %v6103_v30 = vsel %vm5332_vm4, %v6044_v26, %v6102_v58 }
 0x808   : > { %v6046_v39 = vperm.slane %v5928_v9, %v18848_v15 }
 0x80b   : > { %6142 = vadd.xlane.f32.xlu1 %v6141_v52  ;;  %v5925_v60 = vpop.permute.xlu1 %5924 }
 0x80c   : > { %v6045_v49 = vperm.slane %v5925_v60, %v18848_v15  ;;  %v5940_v43 = vpop.permute.xlu0 %5939 }
 0x80d   : > { %v6050_v45 = vperm.slane %v5940_v43, %v18848_v15 }
 0x80e   : > { %v6104_v7 = vsel %vm5334_vm8, %v6045_v49, %v6103_v30 }
 0x80f   : > { %v5937_v55 = vpop.permute.xlu2 %5936  ;;  %v6105_v61 = vsel %vm5336_vm13, %v6046_v39, %v6104_v7 }
 0x810   : > { %v6049_v47 = vperm.slane %v5937_v55, %v18848_v15  ;;  %v6106_v18 = vsel %vm18221_vm14, %v6047_v59, %v6105_v61 }
 0x813   : > { %v5934_v1 = vpop.permute.xlu1 %5933 }
 0x814   : > { %v6048_v32 = vperm.slane %v5934_v1, %v18848_v15  ;;  %v5949_v40 = vpop.permute.xlu0 %5948 }
 0x815   : > { %v6053_v41 = vperm.slane %v5949_v40, %v18848_v15 }
 0x816   : > { %v6107_v31 = vsel %vm18220_vm0, %v6048_v32, %v6106_v18  ;;  %v5482_v32 = vperm.slane %v16209_v48, 0 }
 0x817   : > { %v6108_v2 = vsel %vm18219_vm2, %v6049_v47, %v6107_v31  ;;  %v5946_v13 = vpop.permute.xlu2 %5945  ;;  %v18920_v47 = vld [vmem:[#allocation71_spill] sm:$0xff]  ;;  %v5485_v31 = vperm.slane %v16209_v48, 3 }
 0x818   : > { %v6150_v11 = vsel %vm5401_vm6, %v6108_v2, 0.0  ;;  %v6052_v6 = vperm.slane %v5946_v13, %v18848_v15  ;;  %v5610_v18 = vsub.f32 %v18920_v47, %v5482_v32  ;;  %v18929_v47 = vld [vmem:[#allocation78_spill] sm:$0xff] }
 0x819   : > { %6151 = vadd.xlane.f32.xlu1 %v6150_v11  ;;  %v18921_v11 = vld [vmem:[#allocation57_spill] sm:$0xff] }
 0x81a   : > { %v5722_v2 = vmul.f32 1.442695, %v5610_v18  ;;  %v5613_v13 = vsub.f32 %v18921_v11, %v5485_v31 }
 0x81b   : > { %v5943_v35 = vpop.permute.xlu1 %5942 }
 0x81c   : > { %v6051_v12 = vperm.slane %v5943_v35, %v18848_v15  ;;  %v5958_v49 = vpop.permute.xlu0 %5957  ;;  %9641 = vpow2.f32 %v5722_v2 }
 0x81d   : > { %v6056_v39 = vperm.slane %v5958_v49, %v18848_v15 }
 0x81e   : > { %v6109_v42 = vsel %vm5330_vm3, %v6051_v12, %v6050_v45  ;;  %v5488_v12 = vperm.slane %v16209_v48, 6  ;;  %v5728_v45 = vmul.f32 1.442695, %v5613_v13  ;;  %v18925_v48 = vld [vmem:[#allocation54_spill] sm:$0xff] }
 0x81f   : > { %v6110_v10 = vsel %vm5332_vm4, %v6052_v6, %v6109_v42  ;;  %v5955_v58 = vpop.permute.xlu2 %5954  ;;  %v18923_v42 = vld [vmem:[#allocation66_spill] sm:$0xff] }
 0x820   : > { %v6111_v60 = vsel %vm5334_vm8, %v6053_v41, %v6110_v10  ;;  %v6055_v30 = vperm.slane %v5955_v58, %v18848_v15  ;;  %v5616_v6 = vsub.f32 %v18923_v42, %v5488_v12  ;;  %9643 = vpow2.f32 %v5728_v45 }
 0x822   : > { %v16443_v40 = vpop.eup %9641  ;;  %v5734_v10 = vmul.f32 1.442695, %v5616_v6 }
 0x823   : > { %v5952_v9 = vpop.permute.xlu1 %5951  ;;  %18922 = vst [vmem:[#allocation15_spill] sm:$0xff] %v16443_v40 }
 0x824   : > { %v6054_v52 = vperm.slane %v5952_v9, %v18848_v15  ;;  %v16440_v35 = vpop.permute.xlu0 %5966  ;;  %v5491_v9 = vperm.slane %v16221_v21, 1  ;;  %9645 = vpow2.f32 %v5734_v10 }
 0x826   : > { %v6112_v26 = vsel %vm5336_vm13, %v6054_v52, %v6111_v60  ;;  %v16452_v58 = vpop.eup %9643  ;;  %v5619_v60 = vsub.f32 %v18925_v48, %v5491_v9 }
 0x827   : > { %v6113_v7 = vsel %vm18221_vm14, %v6055_v30, %v6112_v26  ;;  %18924 = vst [vmem:[#allocation33_spill] sm:$0xff] %v16452_v58  ;;  %v5494_v26 = vperm.slane %v16221_v21, 4 }
 0x828   : > { %v6114_v59 = vsel %vm18220_vm0, %v6056_v39, %v6113_v7  ;;  %v5740_v49 = vmul.f32 1.442695, %v5619_v60 }
 0x82a   : > { %v16457_v30 = vpop.eup %9645  ;;  %9647 = vpow2.f32 %v5740_v49 }
 0x82b   : > { %v5961_v55 = vpop.permute.xlu1 %5960  ;;  %18926 = vst [vmem:[#allocation27_spill] sm:$0xff] %v16457_v30 }
 0x82c   : > { %v6057_v61 = vperm.slane %v5961_v55, %v18848_v15  ;;  %v16448_v41 = vpop.permute.xlu0 %5975  ;;  %v18927_v55 = vld [vmem:[#allocation61_spill] sm:$0xff] }
 0x82e   : > { %v6115_v1 = vsel %vm18219_vm2, %v6057_v61, %v6114_v59  ;;  %v5622_v61 = vsub.f32 %v18927_v55, %v5494_v26  ;;  %v5497_v59 = vperm.slane %v16221_v21, 7 }
 0x82f   : > { %v6153_v43 = vsel %vm5401_vm6, %v6115_v1, 0.0 }
 0x830   : > { %6154 = vadd.xlane.f32.xlu2 %v6153_v43  ;;  %v5746_v1 = vmul.f32 1.442695, %v5622_v61  ;;  %v16466_v43 = vpop.eup %9647  ;;  %v5625_v18 = vsub.f32 %v18929_v47, %v5497_v59 }
 0x831   : > { %18928 = vst [vmem:[#allocation96_spill] sm:$0xff] %v16466_v43 }
 0x832   : > { %9649 = vpow2.f32 %v5746_v1  ;;  %v5752_v13 = vmul.f32 1.442695, %v5625_v18 }
 0x833   : > { %v16450_v52 = vpop.permute.xlu1 %5969 }
 0x834   : > { %v16459_v7 = vpop.permute.xlu0 %5984 }
 0x838   : > { %v16477_v45 = vpop.eup %9649 }
 0x839   : > { %18930 = vst [vmem:[#allocation29_spill] sm:$0xff] %v16477_v45 }
 0x83b   : > { %v16461_v39 = vpop.permute.xlu1 %5978 }
 0x843   : > { %v16473_v2 = vpop.permute.xlu1 %5987 }
 0x848   : > { %5963 = vperm.xlu2 %9267, %v16443_v40  }
 0x84b   : > { %v16480_v48 = vpop.permute.xlu1 %5996 }
 0x850   : > { %5972 = vperm.xlu2 %9267, %v16452_v58  }
 0x853   : > { %v16485_v58 = vpop.permute.xlu1 %6005 }
 0x854   : > { %18932 = vst [vmem:[#allocation97_spill] sm:$0xff] %v16485_v58 }
 0x858   : > { %5981 = vperm.xlu2 %9267, %v16457_v30  }
 0x85f   : > { %v16468_v32 = vpop.xlane.xlu0 %6139 }
 0x860   : > { %v6170_v31 = vperm.slane %v16468_v32, 0  ;;  %5990 = vperm.xlu2 %9267, %v16466_v43   ;;  %v6174_v11 = vperm.slane %v16468_v32, 4  ;;  %v6177_v12 = vperm.slane %v16468_v32, 7 }
 0x862   : > { %9651 = vrcp.f32 %v6170_v31  ;;  %v6309_v26 = vand.u32 2147483648, %v6170_v31  ;;  %v6307_v61 = vand.u32 2147483647, %v6170_v31  ;;  %vm6303_vm7 = vweird.f32 %v6170_v31 }
 0x863   : > { %9653 = vrcp.f32 %v6174_v11  ;;  %v6369_v30 = vand.u32 2147483648, %v6174_v11  ;;  %vm6363_vm12 = vweird.f32 %v6174_v11 }
 0x864   : > { %9655 = vpow2.f32 %v5752_v13  ;;  %vm6308_vm10 = vcmp.eq.f32.partialorder %v6307_v61, 8.507059e+37  ;;  %v6414_v61 = vand.u32 2147483648, %v6177_v12 }
 0x865   : > { %9657 = vrcp.f32 %v6177_v12 }
 0x868   : > { %v9652_v42 = vpop.eup %9651  ;;  %5999 = vperm.xlu2 %9267, %v16477_v45  }
 0x869   : > { %v6299_v6 = vmul.f32 %v9652_v42, %v6170_v31  ;;  %v9654_v9 = vpop.eup %9653  ;;  %vm6304_vm5 = vweird.f32 %v9652_v42  ;;  %v6367_v31 = vand.u32 2147483647, %v6174_v11 }
 0x86a   : > { %v6359_v49 = vmul.f32 %v9654_v9, %v6174_v11  ;;  %v16482_v55 = vpop.eup %9655  ;;  %vm6305_vm9 = vmor %vm6303_vm7, %vm6304_vm5  ;;  %vm6364_vm11 = vweird.f32 %v9654_v9  ;;  %vm6408_vm7 = vweird.f32 %v6177_v12 }
 0x86b   : > { %v6300_v10 = vsub.f32 1.0, %v6299_v6  ;;  %18931 = vst [vmem:[#allocation98_spill] sm:$0xff] %v16482_v55  ;;  %v9658_v59 = vpop.eup %9657  ;;  %v6310_v6 = vor.u32 1.1754944e-38, %v6309_v26  ;;  %vm6365_vm15 = vmor %vm6363_vm12, %vm6364_vm11  ;;  %vm6368_vm1 = vcmp.eq.f32.partialorder %v6367_v31, 8.507059e+37 }
 0x86c   : > { %v6360_v47 = vsub.f32 1.0, %v6359_v49  ;;  %v6404_v18 = vmul.f32 %v9658_v59, %v6177_v12  ;;  %vm6409_vm5 = vweird.f32 %v9658_v59 }
 0x86d   : > { %v6301_v60 = vmul.f32 %v9652_v42, %v6300_v10 }
 0x86e   : > { %v6361_v16 = vmul.f32 %v9654_v9, %v6360_v47  ;;  %v6405_v43 = vsub.f32 1.0, %v6404_v18 }
 0x86f   : > { %v6302_v1 = vadd.f32 %v9652_v42, %v6301_v60 }
 0x870   : > { %6008 = vperm.xlu2 %9267, %v16482_v55   ;;  %v6362_v10 = vadd.f32 %v9654_v9, %v6361_v16  ;;  %v6406_v49 = vmul.f32 %v9658_v59, %v6405_v43  ;;  %v6370_v55 = vor.u32 1.1754944e-38, %v6369_v30  ;;  %v16488_v16 = vpop.xlane.xlu2 %6145  ;;  %v6415_v43 = vor.u32 1.1754944e-38, %v6414_v61 }
 0x871   : > { %v6306_v13 = vsel %vm6305_vm9, %v9652_v42, %v6302_v1  ;;  %vm6410_vm9 = vmor %vm6408_vm7, %vm6409_vm5  ;;  %v16495_v30 = vperm.slane %v16488_v16, 0  ;;  %v16506_v61 = vperm.slane %v16488_v16, 6 }
 0x872   : > { %v6311_v45 = vsel %vm6308_vm10, %v6310_v6, %v6306_v13  ;;  %v6366_v60 = vsel %vm6365_vm15, %v9654_v9, %v6362_v10  ;;  %v6407_v26 = vadd.f32 %v9658_v59, %v6406_v49 }
 0x873   : > { %v6312_v40 = vmul.f32 %v16017_v28, %v6311_v45  ;;  %v6371_v42 = vsel %vm6368_vm1, %v6370_v55, %v6366_v60  ;;  %v6412_v28 = vand.u32 2147483647, %v6177_v12  ;;  %v16501_v55 = vperm.slane %v16488_v16, 3 }
 0x874   : > { %v6372_v47 = vmul.f32 %v16053_v4, %v6371_v42 }
 0x875   : > { %vm6413_vm10 = vcmp.eq.f32.partialorder %v6412_v28, 8.507059e+37 }
 0x878   : > { %7339 = vperm.xlu2 %9267, %v6312_v40   ;;  %v6411_v40 = vsel %vm6410_vm9, %v9658_v59, %v6407_v26 }
 0x879   : > { %v6416_v9 = vsel %vm6413_vm10, %v6415_v43, %v6411_v40 }
 0x87a   : > { %v6417_v4 = vmul.f32 %v16029_v27, %v6416_v9 }
 0x87e   : > { %v16490_v1 = vpop.xlane.xlu1 %6142 }
 0x87f   : > { %v6180_v11 = vperm.slane %v16490_v1, 2  ;;  %v6183_v45 = vperm.slane %v16490_v1, 5 }
 0x880   : > { %7351 = vperm.xlu2 %9267, %v6372_v47  }
 0x881   : > { %9659 = vrcp.f32 %v6180_v11  ;;  %v6459_v10 = vand.u32 2147483648, %v6180_v11  ;;  %v6457_v49 = vand.u32 2147483647, %v6180_v11  ;;  %vm6453_vm12 = vweird.f32 %v6180_v11 }
 0x882   : > { %9661 = vrcp.f32 %v16495_v30  ;;  %vm6498_vm7 = vweird.f32 %v6183_v45 }
 0x883   : > { %9663 = vrcp.f32 %v6183_v45  ;;  %v6460_v47 = vor.u32 1.1754944e-38, %v6459_v10  ;;  %vm6458_vm1 = vcmp.eq.f32.partialorder %v6457_v49, 8.507059e+37 }
 0x884   : > { %9665 = vrcp.f32 %v16501_v55 }
 0x885   : > { %9667 = vrcp.f32 %v16506_v61 }
 0x887   : > { %v9660_v12 = vpop.eup %9659 }
 0x888   : > { %7360 = vperm.xlu2 %9267, %v6417_v4   ;;  %v6449_v59 = vmul.f32 %v9660_v12, %v6180_v11  ;;  %v9662_v18 = vpop.eup %9661  ;;  %vm6454_vm11 = vweird.f32 %v9660_v12  ;;  %v16510_v11 = vpop.xlane.xlu0 %6148 }
 0x889   : > { %v9664_v13 = vpop.eup %9663  ;;  %v6539_v31 = vmul.f32 %v9662_v18, %v16495_v30  ;;  %vm6455_vm15 = vmor %vm6453_vm12, %vm6454_vm11  ;;  %vm6544_vm11 = vweird.f32 %v9662_v18  ;;  %vm6543_vm12 = vweird.f32 %v16495_v30 }
 0x88a   : > { %v6450_v6 = vsub.f32 1.0, %v6449_v59  ;;  %v6494_v42 = vmul.f32 %v9664_v13, %v6183_v45  ;;  %vm6499_vm5 = vweird.f32 %v9664_v13  ;;  %v9666_v9 = vpop.eup %9665  ;;  %v6504_v59 = vand.u32 2147483648, %v6183_v45 }
 0x88b   : > { %v6540_v28 = vsub.f32 1.0, %v6539_v31  ;;  %vm6500_vm9 = vmor %vm6498_vm7, %vm6499_vm5  ;;  %vm6589_vm5 = vweird.f32 %v9666_v9  ;;  %vm6588_vm7 = vweird.f32 %v16501_v55 }
 0x88c   : > { %v6451_v60 = vmul.f32 %v9660_v12, %v6450_v6  ;;  %v6495_v27 = vsub.f32 1.0, %v6494_v42  ;;  %v6505_v49 = vor.u32 1.1754944e-38, %v6504_v59  ;;  %v16514_v42 = vperm.slane %v16510_v11, 1 }
 0x88d   : > { %v6541_v31 = vmul.f32 %v9662_v18, %v6540_v28  ;;  %v16523_v59 = vperm.slane %v16510_v11, 4 }
 0x88e   : > { %v6452_v26 = vadd.f32 %v9660_v12, %v6451_v60  ;;  %v6496_v43 = vmul.f32 %v9664_v13, %v6495_v27  ;;  %v6502_v60 = vand.u32 2147483647, %v6183_v45  ;;  %v9668_v45 = vpop.eup %9667  ;;  %9669 = vrcp.f32 %v16514_v42 }
 0x88f   : > { %9671 = vrcp.f32 %v16523_v59 }
 0x890   : > { %v6456_v40 = vsel %vm6455_vm15, %v9660_v12, %v6452_v26  ;;  %v6497_v58 = vadd.f32 %v9664_v13, %v6496_v43  ;;  %v6584_v12 = vmul.f32 %v9666_v9, %v16501_v55  ;;  %vm6503_vm10 = vcmp.eq.f32.partialorder %v6502_v60, 8.507059e+37  ;;  %vm6545_vm15 = vmor %vm6543_vm12, %vm6544_vm11 }
 0x891   : > { %v6461_v4 = vsel %vm6458_vm1, %v6460_v47, %v6456_v40  ;;  %v6549_v47 = vand.u32 2147483648, %v16495_v30  ;;  %v6629_v43 = vmul.f32 %v9668_v45, %v16506_v61  ;;  %vm6634_vm11 = vweird.f32 %v9668_v45 }
 0x892   : > { %v6462_v6 = vmul.f32 %v16046_v0, %v6461_v4  ;;  %v6501_v10 = vsel %vm6500_vm9, %v9664_v13, %v6497_v58  ;;  %v6542_v0 = vadd.f32 %v9662_v18, %v6541_v31  ;;  %v6585_v27 = vsub.f32 1.0, %v6584_v12  ;;  %vm6590_vm9 = vmor %vm6588_vm7, %vm6589_vm5 }
 0x893   : > { %v6506_v26 = vsel %vm6503_vm10, %v6505_v49, %v6501_v10  ;;  %v6547_v58 = vand.u32 2147483647, %v16495_v30  ;;  %v6550_v4 = vor.u32 1.1754944e-38, %v6549_v47  ;;  %v6630_v10 = vsub.f32 1.0, %v6629_v43 }
 0x894   : > { %7369 = vperm.xlu2 %9267, %v6462_v6   ;;  %v6507_v40 = vmul.f32 %v16061_v46, %v6506_v26  ;;  %v6546_v13 = vsel %vm6545_vm15, %v9662_v18, %v6542_v0  ;;  %v6586_v28 = vmul.f32 %v9666_v9, %v6585_v27  ;;  %v16527_v30 = vpop.eup %9669  ;;  %v6594_v31 = vand.u32 2147483648, %v16501_v55 }
 0x895   : > { %vm6548_vm1 = vcmp.eq.f32.partialorder %v6547_v58, 8.507059e+37  ;;  %v6592_v12 = vand.u32 2147483647, %v16501_v55  ;;  %v6631_v26 = vmul.f32 %v9668_v45, %v6630_v10  ;;  %v6674_v0 = vmul.f32 %v16527_v30, %v16514_v42  ;;  %v16539_v55 = vpop.eup %9671 }
 0x896   : > { %v6551_v6 = vsel %vm6548_vm1, %v6550_v4, %v6546_v13  ;;  %v6587_v46 = vadd.f32 %v9666_v9, %v6586_v28  ;;  %v6595_v27 = vor.u32 1.1754944e-38, %v6594_v31  ;;  %v16537_v47 = vperm.slane %v16510_v11, 7  ;;  %v16552_v31 = vpop.xlane.xlu1 %6151 }
 0x897   : > { %v6552_v18 = vmul.f32 %v16076_v25, %v6551_v6  ;;  %vm6593_vm10 = vcmp.eq.f32.partialorder %v6592_v12, 8.507059e+37  ;;  %v6632_v58 = vadd.f32 %v9668_v45, %v6631_v26  ;;  %v6675_v13 = vsub.f32 1.0, %v6674_v0 }
 0x898   : > { %v6591_v49 = vsel %vm6590_vm9, %v9666_v9, %v6587_v46  ;;  %v6059_v28 = vperm.slane %v16440_v35, %v18848_v15  ;;  %v6639_v43 = vand.u32 2147483648, %v16506_v61  ;;  %v6060_v4 = vperm.slane %v16450_v52, %v18848_v15 }
 0x899   : > { %vm6633_vm12 = vweird.f32 %v16506_v61  ;;  %v6637_v46 = vand.u32 2147483647, %v16506_v61  ;;  %9673 = vrcp.f32 %v16537_v47  ;;  %v6676_v12 = vmul.f32 %v16527_v30, %v6675_v13 }
 0x89a   : > { %vm6635_vm15 = vmor %vm6633_vm12, %vm6634_vm11  ;;  %v6640_v52 = vor.u32 1.1754944e-38, %v6639_v43  ;;  %v16559_v61 = vperm.slane %v16552_v31, 2  ;;  %vm6679_vm5 = vweird.f32 %v16527_v30  ;;  %vm6678_vm7 = vweird.f32 %v16514_v42 }
 0x89b   : > { %vm6638_vm1 = vcmp.eq.f32.partialorder %v6637_v46, 8.507059e+37  ;;  %v6677_v0 = vadd.f32 %v16527_v30, %v6676_v12  ;;  %vm6680_vm9 = vmor %vm6678_vm7, %vm6679_vm5  ;;  %vm6724_vm11 = vweird.f32 %v16539_v55  ;;  %vm6723_vm12 = vweird.f32 %v16523_v59 }
 0x89c   : > { %7378 = vperm.xlu2 %9267, %v6507_v40   ;;  %v6596_v40 = vsel %vm6593_vm10, %v6595_v27, %v6591_v49  ;;  %9675 = vrcp.f32 %v16559_v61  ;;  %vm6768_vm7 = vweird.f32 %v16537_v47 }
 0x89d   : > { %v6597_v6 = vmul.f32 %v16093_v53, %v6596_v40  ;;  %v6719_v53 = vmul.f32 %v16539_v55, %v16523_v59 }
 0x89f   : > { %v6720_v27 = vsub.f32 1.0, %v6719_v53  ;;  %v16563_v40 = vpop.eup %9673 }
 0x8a0   : > { %vm6769_vm5 = vweird.f32 %v16563_v40 }
 0x8a3   : > { %v16525_v60 = vpop.xlane.xlu2 %6154 }
 0x8a4   : > { %7387 = vperm.xlu2 %9267, %v6552_v18   ;;  %v6636_v18 = vsel %vm6635_vm15, %v9668_v45, %v6632_v58  ;;  %v6062_v58 = vperm.slane %v16448_v41, %v18848_v15  ;;  %v6721_v41 = vmul.f32 %v16539_v55, %v6720_v27  ;;  %vm6725_vm15 = vmor %vm6723_vm12, %vm6724_vm11  ;;  %vm6813_vm12 = vweird.f32 %v16559_v61 }
 0x8a5   : > { %v6641_v49 = vsel %vm6638_vm1, %v6640_v52, %v6636_v18  ;;  %v6729_v52 = vand.u32 2147483648, %v16523_v59 }
 0x8a6   : > { %v6642_v13 = vmul.f32 %v16108_v62, %v6641_v49  ;;  %v6764_v62 = vmul.f32 %v16563_v40, %v16537_v47  ;;  %v6722_v18 = vadd.f32 %v16539_v55, %v6721_v41  ;;  %v6065_v49 = vperm.slane %v16459_v7, %v18848_v15  ;;  %v18933_v41 = vld [vmem:[#allocation75_spill] sm:$0xff] }
 0x8a8   : > { %v6765_v12 = vsub.f32 1.0, %v6764_v62 }
 0x8ab   : > { %v5964_v25 = vpop.permute.xlu2 %5963 }
 0x8ac   : > { %v6058_v9 = vperm.slane %v5964_v25, %v18848_v15  ;;  %7396 = vperm.xlu2 %9267, %v6597_v6   ;;  %v6684_v25 = vand.u32 2147483648, %v16514_v42  ;;  %v6681_v6 = vsel %vm6680_vm9, %v16527_v30, %v6677_v0  ;;  %v16587_v30 = vpop.eup %9675  ;;  %v6727_v0 = vand.u32 2147483647, %v16523_v59  ;;  %vm6770_vm9 = vmor %vm6768_vm7, %vm6769_vm5 }
 0x8ad   : > { %v6809_v7 = vmul.f32 %v16587_v30, %v16559_v61  ;;  %vm6814_vm11 = vweird.f32 %v16587_v30 }
 0x8ae   : > { %v6116_v10 = vsel %vm5330_vm3, %v6059_v28, %v6058_v9  ;;  %v6682_v28 = vand.u32 2147483647, %v16514_v42  ;;  %v6063_v9 = vperm.slane %v16461_v39, %v18848_v15  ;;  %v6685_v46 = vor.u32 1.1754944e-38, %v6684_v25 }
 0x8af   : > { %v6117_v35 = vsel %vm5332_vm4, %v6060_v4, %v6116_v10  ;;  %v16583_v39 = vperm.slane %v16552_v31, 5  ;;  %v6726_v25 = vsel %vm6725_vm15, %v16539_v55, %v6722_v18  ;;  %vm6728_vm1 = vcmp.eq.f32.partialorder %v6727_v0, 8.507059e+37  ;;  %vm6815_vm15 = vmor %vm6813_vm12, %vm6814_vm11 }
 0x8b0   : > { %vm6683_vm10 = vcmp.eq.f32.partialorder %v6682_v28, 8.507059e+37  ;;  %v6730_v28 = vor.u32 1.1754944e-38, %v6729_v52 }
 0x8b1   : > { %v6686_v10 = vsel %vm6683_vm10, %v6685_v46, %v6681_v6  ;;  %9677 = vrcp.f32 %v16583_v39  ;;  %v6774_v46 = vand.u32 2147483648, %v16537_v47  ;;  %vm6858_vm7 = vweird.f32 %v16583_v39 }
 0x8b3   : > { %v5973_v26 = vpop.permute.xlu2 %5972 }
 0x8b4   : > { %v6061_v45 = vperm.slane %v5973_v26, %v18848_v15  ;;  %7405 = vperm.xlu2 %9267, %v6642_v13   ;;  %v6687_v26 = vmul.f32 %v16123_v38, %v6686_v10  ;;  %v5492_v38 = vperm.slane %v16221_v21, 2  ;;  %v16605_v13 = vperm.slane %v16468_v32, 1 }
 0x8b5   : > { %v6772_v10 = vand.u32 2147483647, %v16537_v47 }
 0x8b6   : > { %v6118_v43 = vsel %vm5334_vm8, %v6061_v45, %v6117_v35  ;;  %v5620_v62 = vsub.f32 %v18933_v41, %v5492_v38  ;;  %9679 = vrcp.f32 %v16605_v13  ;;  %v6817_v38 = vand.u32 2147483647, %v16559_v61 }
 0x8b7   : > { %v6119_v4 = vsel %vm5336_vm13, %v6062_v58, %v6118_v43  ;;  %v6766_v58 = vmul.f32 %v16563_v40, %v6765_v12  ;;  %v6731_v43 = vsel %vm6728_vm1, %v6730_v28, %v6726_v25  ;;  %v16613_v6 = vpop.eup %9677  ;;  %vm6773_vm10 = vcmp.eq.f32.partialorder %v6772_v10, 8.507059e+37  ;;  %v18934_v25 = vld [vmem:[#allocation67_spill] sm:$0xff] }
 0x8b8   : > { %v6120_v42 = vsel %vm18221_vm14, %v6063_v9, %v6119_v4  ;;  %v16609_v9 = vperm.slane %v16525_v60, 0  ;;  %v6810_v4 = vsub.f32 1.0, %v6809_v7  ;;  %v5742_v52 = vmul.f32 1.442695, %v5620_v62 }
 0x8b9   : > { %v6767_v55 = vadd.f32 %v16563_v40, %v6766_v58  ;;  %v6819_v58 = vand.u32 2147483648, %v16559_v61  ;;  %v16649_v28 = vperm.slane %v16468_v32, 6  ;;  %vm6818_vm1 = vcmp.eq.f32.partialorder %v6817_v38, 8.507059e+37 }
 0x8ba   : > { %9681 = vrcp.f32 %v16609_v9  ;;  %v6811_v12 = vmul.f32 %v16587_v30, %v6810_v4  ;;  %vm6859_vm5 = vweird.f32 %v16613_v6  ;;  %vm6318_vm12 = vweird.f32 %v16605_v13 }
 0x8bb   : > { %v5982_v35 = vpop.permute.xlu2 %5981  ;;  %v6771_v18 = vsel %vm6770_vm9, %v16563_v40, %v6767_v55  ;;  %v6820_v41 = vor.u32 1.1754944e-38, %v6819_v58  ;;  %vm6860_vm9 = vmor %vm6858_vm7, %vm6859_vm5  ;;  %vm6903_vm5 = vweird.f32 %v16609_v9 }
 0x8bc   : > { %v6064_v53 = vperm.slane %v5982_v35, %v18848_v15  ;;  %7414 = vperm.xlu2 %9267, %v6687_v26   ;;  %v16623_v35 = vperm.slane %v16468_v32, 3  ;;  %v16630_v47 = vpop.eup %9679  ;;  %v16633_v26 = vperm.slane %v16525_v60, 3  ;;  %v6812_v40 = vadd.f32 %v16587_v30, %v6811_v12 }
 0x8bd   : > { %vm6319_vm11 = vweird.f32 %v16630_v47 }
 0x8be   : > { %v6121_v27 = vsel %vm18220_vm0, %v6064_v53, %v6120_v42  ;;  %v6732_v42 = vmul.f32 %v16140_v17, %v6731_v43  ;;  %v6854_v53 = vmul.f32 %v16613_v6, %v16583_v39  ;;  %v5495_v17 = vperm.slane %v16221_v21, 5 }
 0x8bf   : > { %v6122_v45 = vsel %vm18219_vm2, %v6065_v49, %v6121_v27  ;;  %v6775_v49 = vor.u32 1.1754944e-38, %v6774_v46  ;;  %9683 = vrcp.f32 %v16623_v35  ;;  %v6816_v43 = vsel %vm6815_vm15, %v16587_v30, %v6812_v40 }
 0x8c0   : > { %v6156_v59 = vsel %vm5401_vm6, %v6122_v45, 0.0  ;;  %v6855_v27 = vsub.f32 1.0, %v6854_v53  ;;  %v16638_v45 = vpop.eup %9681  ;;  %v5623_v21 = vsub.f32 %v18934_v25, %v5495_v17  ;;  %9685 = vpow2.f32 %v5742_v52 }
 0x8c1   : > { %6157 = vadd.xlane.f32.xlu0 %v6156_v59  ;;  %v6776_v0 = vsel %vm6773_vm10, %v6775_v49, %v6771_v18  ;;  %v6314_v59 = vmul.f32 %v16630_v47, %v16605_v13  ;;  %9687 = vrcp.f32 %v16633_v26  ;;  %v6821_v10 = vsel %vm6818_vm1, %v6820_v41, %v6816_v43  ;;  %vm16701_vm1 = vmor %vm6318_vm12, %vm6319_vm11 }
 0x8c2   : > { %v6777_v7 = vmul.f32 %v16155_v63, %v6776_v0  ;;  %v6856_v55 = vmul.f32 %v16613_v6, %v6855_v27  ;;  %v6899_v63 = vmul.f32 %v16638_v45, %v16609_v9  ;;  %v5748_v4 = vmul.f32 1.442695, %v5623_v21 }
 0x8c3   : > { %v6315_v62 = vsub.f32 1.0, %v6314_v59  ;;  %9689 = vrcp.f32 %v16649_v28  ;;  %v6864_v53 = vand.u32 2147483648, %v16583_v39  ;;  %v6822_v52 = vmul.f32 %v16172_v56, %v6821_v10 }
 0x8c4   : > { %7423 = vperm.xlu2 %9267, %v6732_v42   ;;  %v16660_v42 = vperm.slane %v16525_v60, 6  ;;  %v6857_v30 = vadd.f32 %v16613_v6, %v6856_v55  ;;  %v6900_v18 = vsub.f32 1.0, %v6899_v63  ;;  %9691 = vpow2.f32 %v5748_v4 }
 0x8c5   : > { %v16655_v61 = vpop.eup %9683  ;;  %v6862_v49 = vand.u32 2147483647, %v16583_v39  ;;  %v6316_v0 = vmul.f32 %v16630_v47, %v6315_v62  ;;  %v16681_v56 = vperm.slane %v16490_v1, 1  ;;  %v6865_v21 = vor.u32 1.1754944e-38, %v6864_v53 }
 0x8c6   : > { %v16657_v46 = vpop.eup %9685  ;;  %v6344_v17 = vmul.f32 %v16655_v61, %v16623_v35  ;;  %9693 = vrcp.f32 %v16660_v42  ;;  %v6861_v40 = vsel %vm6860_vm9, %v16613_v6, %v6857_v30  ;;  %v6901_v27 = vmul.f32 %v16638_v45, %v6900_v18 }
 0x8c7   : > { %v16665_v12 = vpop.eup %9687  ;;  %vm6863_vm10 = vcmp.eq.f32.partialorder %v6862_v49, 8.507059e+37  ;;  %v6317_v39 = vadd.f32 %v16630_v47, %v6316_v0  ;;  %v16690_v6 = vperm.slane %v16490_v1, 4  ;;  %v6324_v43 = vand.u32 2147483648, %v16605_v13 }
 0x8c8   : > { %v6944_v25 = vmul.f32 %v16665_v12, %v16633_v26  ;;  %v6345_v58 = vsub.f32 1.0, %v6344_v17  ;;  %v6866_v59 = vsel %vm6863_vm10, %v6865_v21, %v6861_v40  ;;  %v6902_v55 = vadd.f32 %v16638_v45, %v6901_v27 }
 0x8c9   : > { %vm6904_vm15 = vweird.f32 %v16638_v45  ;;  %v6322_v63 = vand.u32 2147483647, %v16605_v13  ;;  %9695 = vrcp.f32 %v16681_v56  ;;  %v6909_v62 = vand.u32 2147483648, %v16609_v9 }
 0x8ca   : > { %v6945_v4 = vsub.f32 1.0, %v6944_v25  ;;  %v6346_v30 = vmul.f32 %v16655_v61, %v6345_v58  ;;  %v6867_v53 = vmul.f32 %v16187_v23, %v6866_v59  ;;  %v6907_v13 = vand.u32 2147483647, %v16609_v9  ;;  %vm16715_vm7 = vmor %vm6903_vm5, %vm6904_vm15 }
 0x8cb   : > { %v6321_v17 = vsel %vm16701_vm1, %v16630_v47, %v6317_v39  ;;  %v6325_v49 = vor.u32 1.1754944e-38, %v6324_v43  ;;  %vm6349_vm9 = vweird.f32 %v16655_v61  ;;  %v6906_v23 = vsel %vm16715_vm7, %v16638_v45, %v6902_v55 }
 0x8cc   : > { %7432 = vperm.xlu2 %9267, %v6777_v7   ;;  %v16683_v7 = vpop.eup %9689  ;;  %vm6323_vm10 = vcmp.eq.f32.partialorder %v6322_v63, 8.507059e+37  ;;  %v6946_v0 = vmul.f32 %v16665_v12, %v6945_v4  ;;  %v6910_v40 = vor.u32 1.1754944e-38, %v6909_v62  ;;  %v6347_v27 = vadd.f32 %v16655_v61, %v6346_v30 }
 0x8cd   : > { %v16687_v38 = vpop.eup %9691  ;;  %v6389_v18 = vmul.f32 %v16683_v7, %v16649_v28  ;;  %v6326_v47 = vsel %vm6323_vm10, %v6325_v49, %v6321_v17  ;;  %9697 = vrcp.f32 %v16690_v6  ;;  %vm6908_vm11 = vcmp.eq.f32.partialorder %v6907_v13, 8.507059e+37 }
 0x8ce   : > { %v16697_v41 = vpop.eup %9693  ;;  %v6911_v58 = vsel %vm6908_vm11, %v6910_v40, %v6906_v23  ;;  %vm6348_vm12 = vweird.f32 %v16623_v35  ;;  %v6352_v45 = vand.u32 2147483647, %v16623_v35  ;;  %v6354_v39 = vand.u32 2147483648, %v16623_v35 }
 0x8cf   : > { %v6989_v9 = vmul.f32 %v16697_v41, %v16660_v42  ;;  %v6390_v25 = vsub.f32 1.0, %v6389_v18  ;;  %v16728_v21 = vpop.eup %9695  ;;  %v6327_v59 = vmul.f32 %v16015_v57, %v6326_v47  ;;  %v6947_v43 = vadd.f32 %v16665_v12, %v6946_v0  ;;  %vm16738_vm1 = vmor %vm6348_vm12, %vm6349_vm9 }
 0x8d0   : > { %vm6949_vm15 = vweird.f32 %v16665_v12  ;;  %v6954_v4 = vand.u32 2147483648, %v16633_v26  ;;  %v6351_v62 = vsel %vm16738_vm1, %v16655_v61, %v6347_v27  ;;  %v6912_v57 = vmul.f32 %v16202_v44, %v6911_v58 }
 0x8d1   : > { %v6990_v63 = vsub.f32 1.0, %v6989_v9  ;;  %v6391_v35 = vmul.f32 %v16683_v7, %v6390_v25  ;;  %vm6948_vm5 = vweird.f32 %v16633_v26  ;;  %v6952_v10 = vand.u32 2147483647, %v16633_v26 }
 0x8d2   : > { %v6434_v30 = vmul.f32 %v16728_v21, %v16681_v56  ;;  %vm6950_vm7 = vmor %vm6948_vm5, %vm6949_vm15  ;;  %v6355_v18 = vor.u32 1.1754944e-38, %v6354_v39  ;;  %v16755_v13 = vperm.slane %v16490_v1, 7  ;;  %vm6353_vm9 = vcmp.eq.f32.partialorder %v6352_v45, 8.507059e+37 }
 0x8d3   : > { %v6951_v61 = vsel %vm6950_vm7, %v16665_v12, %v6947_v43  ;;  %v6991_v44 = vmul.f32 %v16697_v41, %v6990_v63  ;;  %v6955_v17 = vor.u32 1.1754944e-38, %v6954_v4  ;;  %v6392_v26 = vadd.f32 %v16683_v7, %v6391_v35 }
 0x8d4   : > { %7441 = vperm.xlu2 %9267, %v6822_v52   ;;  %v6356_v52 = vsel %vm6353_vm9, %v6355_v18, %v6351_v62  ;;  %vm6394_vm10 = vweird.f32 %v16683_v7  ;;  %vm6953_vm11 = vcmp.eq.f32.partialorder %v6952_v10, 8.507059e+37  ;;  %v6435_v49 = vsub.f32 1.0, %v6434_v30 }
 0x8d5   : > { %5993 = vperm.xlu0 %9265, %v16657_v46   ;;  %v6956_v23 = vsel %vm6953_vm11, %v6955_v17, %v6951_v61  ;;  %vm6393_vm12 = vweird.f32 %v16649_v28  ;;  %v6399_v0 = vand.u32 2147483648, %v16649_v28  ;;  %v6357_v9 = vmul.f32 %v16027_v24, %v6356_v52 }
 0x8d6   : > { %v6992_v12 = vadd.f32 %v16697_v41, %v6991_v44  ;;  %vm6994_vm15 = vweird.f32 %v16697_v41  ;;  %vm16766_vm1 = vmor %vm6393_vm12, %vm6394_vm10  ;;  %v6397_v47 = vand.u32 2147483647, %v16649_v28  ;;  %9699 = vrcp.f32 %v16755_v13 }
 0x8d7   : > { %v6999_v27 = vand.u32 2147483648, %v16660_v42  ;;  %v6396_v25 = vsel %vm16766_vm1, %v16683_v7, %v6392_v26  ;;  %v6957_v58 = vmul.f32 %v16219_v29, %v6956_v23  ;;  %vm6993_vm5 = vweird.f32 %v16660_v42 }
 0x8d8   : > { %v6997_v45 = vand.u32 2147483647, %v16660_v42  ;;  %v6436_v28 = vmul.f32 %v16728_v21, %v6435_v49  ;;  %vm6995_vm7 = vmor %vm6993_vm5, %vm6994_vm15  ;;  %v6400_v39 = vor.u32 1.1754944e-38, %v6399_v0  ;;  %vm6398_vm9 = vcmp.eq.f32.partialorder %v6397_v47, 8.507059e+37 }
 0x8d9   : > { %v16784_v7 = vperm.slane %v16488_v16, 2  ;;  %v7000_v43 = vor.u32 1.1754944e-38, %v6999_v27  ;;  %vm6439_vm11 = vweird.f32 %v16728_v21  ;;  %v6444_v62 = vand.u32 2147483648, %v16681_v56 }
 0x8da   : > { %v6401_v55 = vsel %vm6398_vm9, %v6400_v39, %v6396_v25  ;;  %vm6998_vm10 = vcmp.eq.f32.partialorder %v6997_v45, 8.507059e+37  ;;  %v6437_v29 = vadd.f32 %v16728_v21, %v6436_v28  ;;  %vm6438_vm12 = vweird.f32 %v16681_v56 }
 0x8db   : > { %v6402_v35 = vmul.f32 %v16068_v3, %v6401_v55  ;;  %9701 = vrcp.f32 %v16784_v7  ;;  %vm6440_vm15 = vmor %vm6438_vm12, %vm6439_vm11  ;;  %v6445_v61 = vor.u32 1.1754944e-38, %v6444_v62  ;;  %v16798_v3 = vperm.slane %v16488_v16, 5 }
 0x8dc   : > { %7450 = vperm.xlu2 %9267, %v6867_v53   ;;  %v16752_v53 = vpop.eup %9697  ;;  %v6441_v10 = vsel %vm6440_vm15, %v16728_v21, %v6437_v29  ;;  %v6489_v52 = vand.u32 2147483648, %v16690_v6  ;;  %v6487_v26 = vand.u32 2147483647, %v16690_v6  ;;  %vm6528_vm12 = vweird.f32 %v16755_v13 }
 0x8dd   : > { %6002 = vperm.xlu0 %9265, %v16687_v38   ;;  %v6479_v24 = vmul.f32 %v16752_v53, %v16690_v6  ;;  %v9700_v42 = vpop.eup %9699  ;;  %vm6484_vm5 = vweird.f32 %v16752_v53  ;;  %9703 = vrcp.f32 %v16798_v3  ;;  %v16819_v39 = vperm.slane %v16510_v11, 3 }
 0x8de   : > { %v6524_v18 = vmul.f32 %v9700_v42, %v16755_v13  ;;  %vm6529_vm11 = vweird.f32 %v9700_v42 }
 0x8df   : > { %v6480_v63 = vsub.f32 1.0, %v6479_v24  ;;  %vm6530_vm15 = vmor %vm6528_vm12, %vm6529_vm11  ;;  %vm6618_vm12 = vweird.f32 %v16798_v3 }
 0x8e0   : > { %v6525_v17 = vsub.f32 1.0, %v6524_v18 }
 0x8e1   : > { %v6481_v30 = vmul.f32 %v16752_v53, %v6480_v63  ;;  %v6577_v63 = vand.u32 2147483647, %v16784_v7 }
 0x8e2   : > { %v6526_v23 = vmul.f32 %v9700_v42, %v6525_v17 }
 0x8e4   : > { %7459 = vperm.xlu2 %9267, %v6912_v57  }
 0x8e5   : > { %7342 = vperm.xlu0 %9265, %v6327_v59   ;;  %v6996_v59 = vsel %vm6995_vm7, %v16697_v41, %v6992_v12  ;;  %v6442_v41 = vand.u32 2147483647, %v16681_v56  ;;  %v6482_v56 = vadd.f32 %v16752_v53, %v6481_v30  ;;  %vm6483_vm7 = vweird.f32 %v16690_v6 }
 0x8e6   : > { %v7001_v4 = vsel %vm6998_vm10, %v7000_v43, %v6996_v59  ;;  %vm6485_vm9 = vmor %vm6483_vm7, %vm6484_vm5  ;;  %vm6488_vm10 = vcmp.eq.f32.partialorder %v6487_v26, 8.507059e+37  ;;  %v16810_v12 = vperm.slane %v16510_v11, 0  ;;  %v6534_v6 = vand.u32 2147483648, %v16755_v13 }
 0x8e7   : > { %v7002_v57 = vmul.f32 %v16236_v19, %v7001_v4  ;;  %vm6443_vm1 = vcmp.eq.f32.partialorder %v6442_v41, 8.507059e+37  ;;  %v9702_v19 = vpop.eup %9701  ;;  %v6486_v49 = vsel %vm6485_vm9, %v16752_v53, %v6482_v56  ;;  %v6532_v53 = vand.u32 2147483647, %v16755_v13 }
 0x8e8   : > { %v6446_v44 = vsel %vm6443_vm1, %v6445_v61, %v6441_v10  ;;  %v6569_v0 = vmul.f32 %v9702_v19, %v16784_v7  ;;  %v9704_v27 = vpop.eup %9703  ;;  %9705 = vrcp.f32 %v16810_v12  ;;  %v6535_v28 = vor.u32 1.1754944e-38, %v6534_v6 }
 0x8e9   : > { %v6447_v21 = vmul.f32 %v16085_v5, %v6446_v44  ;;  %v6527_v5 = vadd.f32 %v9700_v42, %v6526_v23  ;;  %v6614_v45 = vmul.f32 %v9704_v27, %v16798_v3  ;;  %vm6533_vm1 = vcmp.eq.f32.partialorder %v6532_v53, 8.507059e+37  ;;  %v16835_v44 = vpop.permute.xlu2 %5990 }
 0x8ea   : > { %v6570_v47 = vsub.f32 1.0, %v6569_v0  ;;  %vm6574_vm5 = vweird.f32 %v9702_v19  ;;  %v6579_v13 = vand.u32 2147483648, %v16784_v7  ;;  %vm6573_vm7 = vweird.f32 %v16784_v7 }
 0x8eb   : > { %v6531_v24 = vsel %vm6530_vm15, %v9700_v42, %v6527_v5  ;;  %9707 = vrcp.f32 %v16819_v39  ;;  %vm6575_vm9 = vmor %vm6573_vm7, %vm6574_vm5  ;;  %v16828_v41 = vperm.slane %v16510_v11, 6  ;;  %vm6619_vm11 = vweird.f32 %v9704_v27 }
 0x8ec   : > { %7468 = vperm.xlu2 %9267, %v6957_v58   ;;  %v6571_v58 = vmul.f32 %v9702_v19, %v6570_v47  ;;  %v6536_v59 = vsel %vm6533_vm1, %v6535_v28, %v6531_v24  ;;  %v6624_v7 = vand.u32 2147483648, %v16798_v3  ;;  %v6622_v61 = vand.u32 2147483647, %v16798_v3  ;;  %vm6620_vm15 = vmor %vm6618_vm12, %vm6619_vm11 }
 0x8ed   : > { %7348 = vperm.xlu0 %9265, %v6357_v9   ;;  %v6490_v9 = vor.u32 1.1754944e-38, %v6489_v52  ;;  %v6537_v29 = vmul.f32 %v16115_v54, %v6536_v59  ;;  %9709 = vrcp.f32 %v16828_v41  ;;  %v6669_v23 = vand.u32 2147483648, %v16810_v12 }
 0x8ee   : > { %v6572_v43 = vadd.f32 %v9702_v19, %v6571_v58  ;;  %v9706_v55 = vpop.eup %9705  ;;  %v6625_v52 = vor.u32 1.1754944e-38, %v6624_v7  ;;  %vm6623_vm1 = vcmp.eq.f32.partialorder %v6622_v61, 8.507059e+37  ;;  %vm6663_vm7 = vweird.f32 %v16810_v12 }
 0x8ef   : > { %v6491_v40 = vsel %vm6488_vm10, %v6490_v9, %v6486_v49  ;;  %v6659_v62 = vmul.f32 %v9706_v55, %v16810_v12  ;;  %vm6578_vm10 = vcmp.eq.f32.partialorder %v6577_v63, 8.507059e+37  ;;  %vm6664_vm5 = vweird.f32 %v9706_v55 }
 0x8f0   : > { %v6492_v25 = vmul.f32 %v16100_v8, %v6491_v40  ;;  %v6615_v8 = vsub.f32 1.0, %v6614_v45  ;;  %v6576_v42 = vsel %vm6575_vm9, %v9702_v19, %v6572_v43  ;;  %v6667_v9 = vand.u32 2147483647, %v16810_v12  ;;  %vm6665_vm9 = vmor %vm6663_vm7, %vm6664_vm5 }
 0x8f1   : > { %v6660_v54 = vsub.f32 1.0, %v6659_v62  ;;  %v9708_v30 = vpop.eup %9707  ;;  %v16847_v6 = vpop.permute.xlu2 %5999  ;;  %v6714_v58 = vand.u32 2147483648, %v16819_v39  ;;  %vm6708_vm12 = vweird.f32 %v16819_v39  ;;  %v6712_v28 = vand.u32 2147483647, %v16819_v39 }
 0x8f2   : > { %v6616_v4 = vmul.f32 %v9704_v27, %v6615_v8  ;;  %v6704_v19 = vmul.f32 %v9708_v30, %v16819_v39  ;;  %vm6709_vm11 = vweird.f32 %v9708_v30  ;;  %v16857_v59 = vperm.slane %v16552_v31, 7 }
 0x8f3   : > { %v6661_v17 = vmul.f32 %v9706_v55, %v6660_v54  ;;  %v9710_v3 = vpop.eup %9709  ;;  %vm6753_vm7 = vweird.f32 %v16828_v41 }
 0x8f4   : > { %7477 = vperm.xlu2 %9267, %v7002_v57   ;;  %v6617_v10 = vadd.f32 %v9704_v27, %v6616_v4  ;;  %v6705_v49 = vsub.f32 1.0, %v6704_v19  ;;  %v6749_v47 = vmul.f32 %v9710_v3, %v16828_v41  ;;  %vm6754_vm5 = vweird.f32 %v9710_v3 }
 0x8f5   : > { %7357 = vperm.xlu0 %9265, %v6402_v35   ;;  %v6580_v35 = vor.u32 1.1754944e-38, %v6579_v13  ;;  %v6662_v26 = vadd.f32 %v9706_v55, %v6661_v17  ;;  %v6715_v13 = vor.u32 1.1754944e-38, %v6714_v58  ;;  %v6759_v4 = vand.u32 2147483648, %v16828_v41 }
 0x8f6   : > { %v6621_v56 = vsel %vm6620_vm15, %v9704_v27, %v6617_v10  ;;  %v6706_v5 = vmul.f32 %v9708_v30, %v6705_v49  ;;  %v6670_v27 = vor.u32 1.1754944e-38, %v6669_v23  ;;  %v6750_v24 = vsub.f32 1.0, %v6749_v47  ;;  %vm6710_vm15 = vmor %vm6708_vm12, %vm6709_vm11 }
 0x8f7   : > { %v6581_v57 = vsel %vm6578_vm10, %v6580_v35, %v6576_v42  ;;  %v6666_v40 = vsel %vm6665_vm9, %v9706_v55, %v6662_v26  ;;  %vm6668_vm10 = vcmp.eq.f32.partialorder %v6667_v9, 8.507059e+37  ;;  %v6757_v35 = vand.u32 2147483647, %v16828_v41  ;;  %vm6755_vm9 = vmor %vm6753_vm7, %vm6754_vm5 }
 0x8f8   : > { %v6582_v18 = vmul.f32 %v16132_v50, %v6581_v57  ;;  %v6626_v50 = vsel %vm6623_vm1, %v6625_v52, %v6621_v56  ;;  %v6707_v53 = vadd.f32 %v9708_v30, %v6706_v5  ;;  %v6751_v8 = vmul.f32 %v9710_v3, %v6750_v24 }
 0x8f9   : > { %v6627_v0 = vmul.f32 %v16147_v22, %v6626_v50  ;;  %v6671_v22 = vsel %vm6668_vm10, %v6670_v27, %v6666_v40  ;;  %vm6713_vm1 = vcmp.eq.f32.partialorder %v6712_v28, 8.507059e+37  ;;  %v16871_v57 = vperm.slane %v16525_v60, 2 }
 0x8fa   : > { %v6672_v45 = vmul.f32 %v16164_v37, %v6671_v22  ;;  %v6711_v43 = vsel %vm6710_vm15, %v9708_v30, %v6707_v53  ;;  %v6752_v63 = vadd.f32 %v9710_v3, %v6751_v8  ;;  %vm6758_vm10 = vcmp.eq.f32.partialorder %v6757_v35, 8.507059e+37 }
 0x8fb   : > { %v6716_v37 = vsel %vm6713_vm1, %v6715_v13, %v6711_v43  ;;  %v16882_v19 = vperm.slane %v16525_v60, 5  ;;  %v6069_v28 = vperm.slane %v16480_v48, %v18848_v15  ;;  %v16920_v43 = vperm.slane %v16468_v32, 2 }
 0x8fc   : > { %v6717_v62 = vmul.f32 %v16179_v36, %v6716_v37  ;;  %v6756_v10 = vsel %vm6755_vm9, %v9710_v3, %v6752_v63  ;;  %v6067_v8 = vperm.slane %v16835_v44, %v18848_v15  ;;  %v6892_v37 = vand.u32 2147483647, %v16857_v59 }
 0x8fd   : > { %7366 = vperm.xlu0 %9265, %v6447_v21   ;;  %v16839_v21 = vperm.slane %v16552_v31, 1 }
 0x8ff   : > { %9711 = vrcp.f32 %v16839_v21  ;;  %v6804_v17 = vand.u32 2147483648, %v16839_v21  ;;  %vm6798_vm12 = vweird.f32 %v16839_v21  ;;  %v6802_v26 = vand.u32 2147483647, %v16839_v21 }
 0x901   : > { %v6805_v5 = vor.u32 1.1754944e-38, %v6804_v17  ;;  %vm6803_vm1 = vcmp.eq.f32.partialorder %v6802_v26, 8.507059e+37 }
 0x905   : > { %7375 = vperm.xlu0 %9265, %v6492_v25   ;;  %v16850_v25 = vperm.slane %v16552_v31, 4  ;;  %v9712_v12 = vpop.eup %9711 }
 0x906   : > { %v6794_v55 = vmul.f32 %v9712_v12, %v16839_v21  ;;  %vm6799_vm11 = vweird.f32 %v9712_v12 }
 0x907   : > { %9713 = vrcp.f32 %v16850_v25  ;;  %vm6800_vm15 = vmor %vm6798_vm12, %vm6799_vm11  ;;  %v6849_v53 = vand.u32 2147483648, %v16850_v25  ;;  %vm6843_vm7 = vweird.f32 %v16850_v25  ;;  %v6847_v58 = vand.u32 2147483647, %v16850_v25 }
 0x908   : > { %9715 = vrcp.f32 %v16857_v59  ;;  %v6795_v39 = vsub.f32 1.0, %v6794_v55  ;;  %vm6888_vm12 = vweird.f32 %v16857_v59 }
 0x909   : > { %9717 = vrcp.f32 %v16871_v57  ;;  %v6850_v63 = vor.u32 1.1754944e-38, %v6849_v53  ;;  %vm6848_vm11 = vcmp.eq.f32.partialorder %v6847_v58, 8.507059e+37 }
 0x90a   : > { %v6796_v54 = vmul.f32 %v9712_v12, %v6795_v39  ;;  %9719 = vrcp.f32 %v16882_v19  ;;  %v6894_v39 = vand.u32 2147483648, %v16857_v59 }
 0x90c   : > { %v6797_v61 = vadd.f32 %v9712_v12, %v6796_v54 }
 0x90d   : > { %7384 = vperm.xlu0 %9265, %v6537_v29   ;;  %v16862_v29 = vpop.permute.xlu2 %6008  ;;  %v16864_v42 = vpop.eup %9713 }
 0x90e   : > { %v6839_v30 = vmul.f32 %v16864_v42, %v16850_v25  ;;  %v16875_v7 = vpop.eup %9715  ;;  %v6801_v23 = vsel %vm6800_vm15, %v9712_v12, %v6797_v61  ;;  %vm6844_vm5 = vweird.f32 %v16864_v42 }
 0x90f   : > { %v6884_v56 = vmul.f32 %v16875_v7, %v16857_v59  ;;  %v16895_v40 = vpop.eup %9717  ;;  %v6806_v21 = vsel %vm6803_vm1, %v6805_v5, %v6801_v23  ;;  %vm16924_vm9 = vmor %vm6843_vm7, %vm6844_vm5  ;;  %vm6893_vm1 = vcmp.eq.f32.partialorder %v6892_v37, 8.507059e+37 }
 0x910   : > { %v6840_v41 = vsub.f32 1.0, %v6839_v30  ;;  %v6929_v24 = vmul.f32 %v16895_v40, %v16871_v57  ;;  %v6807_v12 = vmul.f32 %v16211_v34, %v6806_v21  ;;  %v16928_v34 = vpop.eup %9719  ;;  %vm6934_vm7 = vweird.f32 %v16895_v40 }
 0x911   : > { %v6885_v9 = vsub.f32 1.0, %v6884_v56 }
 0x913   : > { %v6886_v27 = vmul.f32 %v16875_v7, %v6885_v9 }
 0x915   : > { %7393 = vperm.xlu0 %9265, %v6582_v18   ;;  %v6760_v18 = vor.u32 1.1754944e-38, %v6759_v4  ;;  %v16884_v52 = vpop.permute.xlu2 %7339  ;;  %v6887_v25 = vadd.f32 %v16875_v7, %v6886_v27  ;;  %v6930_v4 = vsub.f32 1.0, %v6929_v24 }
 0x917   : > { %v6761_v36 = vsel %vm6758_vm10, %v6760_v18, %v6756_v10  ;;  %vm6889_vm10 = vweird.f32 %v16875_v7  ;;  %v6931_v17 = vmul.f32 %v16895_v40, %v6930_v4  ;;  %v6939_v4 = vand.u32 2147483648, %v16871_v57 }
 0x918   : > { %v6762_v50 = vmul.f32 %v16194_v33, %v6761_v36  ;;  %vm16952_vm15 = vmor %vm6888_vm12, %vm6889_vm10  ;;  %v6974_v36 = vmul.f32 %v16928_v34, %v16882_v19 }
 0x919   : > { %v6891_v59 = vsel %vm16952_vm15, %v16875_v7, %v6887_v25 }
 0x91d   : > { %7402 = vperm.xlu0 %9265, %v6627_v0   ;;  %v6841_v0 = vmul.f32 %v16864_v42, %v6840_v41  ;;  %v16930_v13 = vpop.permute.xlu2 %7351  ;;  %v6895_v41 = vor.u32 1.1754944e-38, %v6894_v39 }
 0x91f   : > { %v6842_v47 = vadd.f32 %v16864_v42, %v6841_v0  ;;  %v6896_v7 = vsel %vm6893_vm1, %v6895_v41, %v6891_v59  ;;  %v18951_v59 = vld [vmem:[#allocation97_spill] sm:$0xff]  ;;  %v6070_v41 = vperm.slane %v16847_v6, %v18848_v15 }
 0x920   : > { %v6072_v48 = vperm.slane %v18951_v59, %v18848_v15  ;;  %v18958_v59 = vld [vmem:[#allocation92_spill] sm:$0xff] }
 0x925   : > { %7411 = vperm.xlu0 %9265, %v6672_v45   ;;  %v6066_v45 = vperm.slane %v16473_v2, %v18848_v15  ;;  %v6846_v2 = vsel %vm16924_vm9, %v16864_v42, %v6842_v47  ;;  %v16983_v58 = vpop.permute.xlu2 %7360 }
 0x926   : > { %v6851_v54 = vsel %vm6848_vm11, %v6850_v63, %v6846_v2 }
 0x927   : > { %v6123_v42 = vsel %vm5330_vm3, %v6067_v8, %v6066_v45 }
 0x92d   : > { %7420 = vperm.xlu0 %9265, %v6717_v62   ;;  %v16941_v62 = vperm.slane %v16468_v32, 5 }
 0x934   : > { %v16889_v49 = vpop.xlane.xlu0 %6157 }
 0x935   : > { %v16892_v3 = vperm.slane %v16889_v49, 1  ;;  %7429 = vperm.xlu0 %9265, %v6762_v50   ;;  %v16899_v33 = vperm.slane %v16889_v49, 4  ;;  %v16906_v22 = vperm.slane %v16889_v49, 7  ;;  %v16948_v10 = vperm.slane %v16889_v49, 0 }
 0x936   : > { %v6852_v50 = vmul.f32 %v16228_v14, %v6851_v54  ;;  %v6975_v14 = vsub.f32 1.0, %v6974_v36  ;;  %v16979_v27 = vperm.slane %v16889_v49, 3  ;;  %v6897_v54 = vmul.f32 %v16249_v51, %v6896_v7 }
 0x937   : > { %9721 = vrcp.f32 %v16892_v3  ;;  %v7044_v61 = vand.u32 2147483648, %v16892_v3  ;;  %v7042_v23 = vand.u32 2147483647, %v16892_v3  ;;  %vm7038_vm9 = vweird.f32 %v16892_v3 }
 0x938   : > { %9723 = vrcp.f32 %v16899_v33  ;;  %v7089_v37 = vand.u32 2147483648, %v16899_v33  ;;  %vm7083_vm15 = vweird.f32 %v16899_v33  ;;  %v7087_v39 = vand.u32 2147483647, %v16899_v33 }
 0x939   : > { %9725 = vrcp.f32 %v16906_v22  ;;  %v7045_v53 = vor.u32 1.1754944e-38, %v7044_v61  ;;  %vm7043_vm11 = vcmp.eq.f32.partialorder %v7042_v23, 8.507059e+37  ;;  %v6940_v36 = vor.u32 1.1754944e-38, %v6939_v4 }
 0x93a   : > { %9727 = vrcp.f32 %v16920_v43  ;;  %v17034_v23 = vperm.slane %v16889_v49, 6  ;;  %v7134_v6 = vand.u32 2147483648, %v16906_v22 }
 0x93b   : > { %9729 = vrcp.f32 %v16948_v10 }
 0x93c   : > { %9731 = vrcp.f32 %v16979_v27 }
 0x93d   : > { %7438 = vperm.xlu0 %9265, %v6807_v12   ;;  %v9722_v44 = vpop.eup %9721  ;;  %v6932_v12 = vadd.f32 %v16895_v40, %v6931_v17  ;;  %9733 = vrcp.f32 %v16941_v62 }
 0x93e   : > { %v7034_v35 = vmul.f32 %v9722_v44, %v16892_v3  ;;  %v16956_v32 = vpop.eup %9723  ;;  %vm7039_vm5 = vweird.f32 %v9722_v44  ;;  %9735 = vrcp.f32 %v17034_v23 }
 0x93f   : > { %v7079_v56 = vmul.f32 %v16956_v32, %v16899_v33  ;;  %v16969_v0 = vpop.eup %9725  ;;  %vm7040_vm10 = vmor %vm7038_vm9, %vm7039_vm5  ;;  %vm7084_vm12 = vweird.f32 %v16956_v32  ;;  %vm6933_vm5 = vweird.f32 %v16871_v57 }
 0x940   : > { %v7035_v18 = vsub.f32 1.0, %v7034_v35  ;;  %v7124_v21 = vmul.f32 %v16969_v0, %v16906_v22  ;;  %v16976_v47 = vpop.eup %9727  ;;  %vm16997_vm1 = vmor %vm7083_vm15, %vm7084_vm12  ;;  %vm7129_vm12 = vweird.f32 %v16969_v0  ;;  %vm7128_vm15 = vweird.f32 %v16906_v22 }
 0x941   : > { %v7080_v9 = vsub.f32 1.0, %v7079_v56  ;;  %vm17012_vm9 = vmor %vm6933_vm5, %vm6934_vm7  ;;  %vm7088_vm7 = vcmp.eq.f32.partialorder %v7087_v39, 8.507059e+37  ;;  %vm6978_vm5 = vweird.f32 %v16882_v19  ;;  %v6982_v39 = vand.u32 2147483647, %v16882_v19 }
 0x942   : > { %v7036_v26 = vmul.f32 %v9722_v44, %v7035_v18  ;;  %v7125_v3 = vsub.f32 1.0, %v7124_v21  ;;  %v18952_v21 = vld [vmem:[#allocation94_spill] sm:$0xff]  ;;  %v6329_v51 = vmul.f32 %v16976_v47, %v16920_v43 }
 0x943   : > { %v7081_v24 = vmul.f32 %v16956_v32, %v7080_v9  ;;  %v17039_v9 = vpop.permute.xlu2 %7369 }
 0x944   : > { %v7037_v5 = vadd.f32 %v9722_v44, %v7036_v26  ;;  %v7126_v18 = vmul.f32 %v16969_v0, %v7125_v3  ;;  %v7074_v3 = vand.u32 2147483648, %v16979_v27 }
 0x945   : > { %7447 = vperm.xlu0 %9265, %v6852_v50   ;;  %v7082_v25 = vadd.f32 %v16956_v32, %v7081_v24 }
 0x946   : > { %v7041_v8 = vsel %vm7040_vm10, %v9722_v44, %v7037_v5  ;;  %v16993_v44 = vpop.eup %9729  ;;  %v7127_v26 = vadd.f32 %v16969_v0, %v7126_v18 }
 0x947   : > { %v5994_v45 = vpop.permute.xlu0 %5993  ;;  %v7046_v2 = vsel %vm7043_vm11, %v7045_v53, %v7041_v8  ;;  %v7019_v61 = vmul.f32 %v16993_v44, %v16948_v10  ;;  %vm6979_vm11 = vweird.f32 %v16928_v34  ;;  %v7132_v53 = vand.u32 2147483647, %v16906_v22  ;;  %v18955_v22 = vld [vmem:[#allocation82_spill] sm:$0xff] }
 0x948   : > { %v6068_v55 = vperm.slane %v5994_v45, %v18848_v15  ;;  %v7047_v63 = vmul.f32 %v16257_v20, %v7046_v2  ;;  %v6937_v20 = vand.u32 2147483647, %v16871_v57  ;;  %v6976_v57 = vmul.f32 %v16928_v34, %v6975_v14 }
 0x949   : > { %v7020_v24 = vsub.f32 1.0, %v7019_v61  ;;  %v6073_v45 = vperm.slane %v16862_v29, %v18848_v15  ;;  %v17089_v61 = vperm.slane %v16490_v1, 0 }
 0x94a   : > { %v6124_v35 = vsel %vm5332_vm4, %v6068_v55, %v6123_v42  ;;  %7486 = vperm.xlu2 %9267, %v7047_v63   ;;  %v7086_v42 = vsel %vm16997_vm1, %v16956_v32, %v7082_v25  ;;  %v6936_v32 = vsel %vm17012_vm9, %v16895_v40, %v6932_v12  ;;  %vm6938_vm10 = vcmp.eq.f32.partialorder %v6937_v20, 8.507059e+37  ;;  %v17044_v12 = vpop.eup %9731  ;;  %vm17049_vm1 = vmor %vm7128_vm15, %vm7129_vm12 }
 0x94b   : > { %v6125_v33 = vsel %vm5334_vm8, %v6069_v28, %v6124_v35  ;;  %v7090_v28 = vor.u32 1.1754944e-38, %v7089_v37  ;;  %v6941_v50 = vsel %vm6938_vm10, %v6940_v36, %v6936_v32  ;;  %v6977_v40 = vadd.f32 %v16928_v34, %v6976_v57  ;;  %v17055_v2 = vpop.eup %9733  ;;  %vm17064_vm9 = vmor %vm6978_vm5, %vm6979_vm11 }
 0x94c   : > { %v6126_v5 = vsel %vm5336_vm13, %v6070_v41, %v6125_v33  ;;  %v6984_v55 = vand.u32 2147483648, %v16882_v19  ;;  %v6942_v25 = vmul.f32 %v18955_v22, %v6941_v50  ;;  %v7131_v29 = vsel %vm17049_vm1, %v16969_v0, %v7127_v26  ;;  %v17086_v36 = vpop.eup %9735  ;;  %v18960_v22 = vld [vmem:[#allocation15_spill] sm:$0xff] }
 0x94d   : > { %7456 = vperm.xlu0 %9265, %v6897_v54   ;;  %v7091_v56 = vsel %vm7088_vm7, %v7090_v28, %v7086_v42  ;;  %v7135_v35 = vor.u32 1.1754944e-38, %v7134_v6  ;;  %v6981_v54 = vsel %vm17064_vm9, %v16928_v34, %v6977_v40  ;;  %vm7133_vm7 = vcmp.eq.f32.partialorder %v7132_v53, 8.507059e+37 }
 0x94e   : > { %v7092_v14 = vmul.f32 %v18952_v21, %v7091_v56  ;;  %v7021_v30 = vmul.f32 %v16993_v44, %v7020_v24  ;;  %v7064_v20 = vmul.f32 %v17044_v12, %v16979_v27  ;;  %v6985_v33 = vor.u32 1.1754944e-38, %v6984_v55  ;;  %v17095_v56 = vpop.permute.xlu2 %7378 }
 0x94f   : > { %v6003_v17 = vpop.permute.xlu0 %6002  ;;  %v7136_v19 = vsel %vm7133_vm7, %v7135_v35, %v7131_v29  ;;  %vm6983_vm10 = vcmp.eq.f32.partialorder %v6982_v39, 8.507059e+37  ;;  %v7530_v34 = vperm.slane %v16884_v52, %v18848_v15  ;;  %vm7024_vm11 = vweird.f32 %v16993_v44 }
 0x950   : > { %v6071_v7 = vperm.slane %v6003_v17, %v18848_v15  ;;  %v6986_v57 = vsel %vm6983_vm10, %v6985_v33, %v6981_v54  ;;  %v7022_v28 = vadd.f32 %v16993_v44, %v7021_v30  ;;  %v7065_v32 = vsub.f32 1.0, %v7064_v20  ;;  %v18959_v17 = vld [vmem:[#allocation84_spill] sm:$0xff] }
 0x951   : > { %v7029_v52 = vand.u32 2147483648, %v16948_v10  ;;  %v6987_v50 = vmul.f32 %v18959_v17, %v6986_v57  ;;  %vm7023_vm12 = vweird.f32 %v16948_v10  ;;  %v7027_v26 = vand.u32 2147483647, %v16948_v10 }
 0x952   : > { %v6127_v8 = vsel %vm18221_vm14, %v6071_v7, %v6126_v5  ;;  %7495 = vperm.xlu2 %9267, %v7092_v14   ;;  %v6330_v40 = vsub.f32 1.0, %v6329_v51  ;;  %vm7025_vm15 = vmor %vm7023_vm12, %vm7024_vm11  ;;  %v7066_v6 = vmul.f32 %v17044_v12, %v7065_v32  ;;  %v7109_v5 = vmul.f32 %v17086_v36, %v17034_v23 }
 0x953   : > { %v6128_v37 = vsel %vm18220_vm0, %v6072_v48, %v6127_v8  ;;  %v7137_v48 = vmul.f32 %v18958_v59, %v7136_v19  ;;  %v7026_v7 = vsel %vm7025_vm15, %v16993_v44, %v7022_v28  ;;  %9737 = vrcp.f32 %v17089_v61 }
 0x954   : > { %v6129_v4 = vsel %vm18219_vm2, %v6073_v45, %v6128_v37  ;;  %v7030_v21 = vor.u32 1.1754944e-38, %v7029_v52  ;;  %v6374_v14 = vmul.f32 %v17055_v2, %v16941_v62  ;;  %vm7028_vm1 = vcmp.eq.f32.partialorder %v7027_v26, 8.507059e+37 }
 0x955   : > { %7465 = vperm.xlu0 %9265, %v6942_v25   ;;  %v6159_v0 = vsel %vm5401_vm6, %v6129_v4, 0.0  ;;  %v6331_v10 = vmul.f32 %v16976_v47, %v6330_v40  ;;  %v7067_v45 = vadd.f32 %v17044_v12, %v7066_v6  ;;  %vm7069_vm5 = vweird.f32 %v17044_v12 }
 0x956   : > { %6160 = vadd.xlane.f32.xlu1 %v6159_v0  ;;  %v7031_v24 = vsel %vm7028_vm1, %v7030_v21, %v7026_v7  ;;  %v7110_v44 = vsub.f32 1.0, %v7109_v5  ;;  %v17113_v8 = vperm.slane %v16490_v1, 3  ;;  %vm6334_vm9 = vweird.f32 %v16976_v47  ;;  %v17128_v35 = vpop.permute.xlu2 %7387 }
 0x957   : > { %v7343_v42 = vpop.permute.xlu0 %7342  ;;  %v6375_v55 = vsub.f32 1.0, %v6374_v14  ;;  %v7032_v25 = vmul.f32 %v18960_v22, %v7031_v24  ;;  %vm7068_vm7 = vweird.f32 %v16979_v27  ;;  %v7072_v37 = vand.u32 2147483647, %v16979_v27 }
 0x958   : > { %v7531_v18 = vperm.slane %v7343_v42, %v18848_v15  ;;  %v6332_v29 = vadd.f32 %v16976_v47, %v6331_v10  ;;  %vm17123_vm10 = vmor %vm7068_vm7, %vm7069_vm5  ;;  %v6339_v4 = vand.u32 2147483648, %v16920_v43  ;;  %vm6333_vm11 = vweird.f32 %v16920_v43 }
 0x959   : > { %v17121_v63 = vpop.eup %9737  ;;  %v7071_v54 = vsel %vm17123_vm10, %v17044_v12, %v7067_v45  ;;  %v6337_v27 = vand.u32 2147483647, %v16920_v43  ;;  %v7111_v0 = vmul.f32 %v17086_v36, %v7110_v44  ;;  %9739 = vrcp.f32 %v17113_v8  ;;  %vm6335_vm12 = vmor %vm6333_vm11, %vm6334_vm9  ;;  %v18968_v44 = vld [vmem:[#allocation27_spill] sm:$0xff] }
 0x95a   : > { %v17092_v41 = vsel %vm5330_vm3, %v7531_v18, %v7530_v34  ;;  %7504 = vperm.xlu2 %9267, %v7137_v48   ;;  %v7075_v30 = vor.u32 1.1754944e-38, %v7074_v3  ;;  %v6376_v20 = vmul.f32 %v17055_v2, %v6375_v55  ;;  %vm7073_vm15 = vcmp.eq.f32.partialorder %v7072_v37, 8.507059e+37  ;;  %v18969_v37 = vld [vmem:[#allocation69_spill] sm:$0xff] }
 0x95b   : > { %v6336_v33 = vsel %vm6335_vm12, %v16976_v47, %v6332_v29  ;;  %v6419_v12 = vmul.f32 %v17121_v63, %v17089_v61  ;;  %v6340_v43 = vor.u32 1.1754944e-38, %v6339_v4  ;;  %v17146_v51 = vperm.slane %v16490_v1, 6  ;;  %v18963_v47 = vld [vmem:[#allocation33_spill] sm:$0xff] }
 0x95c   : > { %v7076_v42 = vsel %vm7073_vm15, %v7075_v30, %v7071_v54  ;;  %vm6338_vm1 = vcmp.eq.f32.partialorder %v6337_v27, 8.507059e+37  ;;  %v7112_v34 = vadd.f32 %v17086_v36, %v7111_v0  ;;  %vm7114_vm5 = vweird.f32 %v17086_v36 }
 0x95d   : > { %7474 = vperm.xlu0 %9265, %v6987_v50   ;;  %v6341_v18 = vsel %vm6338_vm1, %v6340_v43, %v6336_v33  ;;  %v7119_v57 = vand.u32 2147483648, %v17034_v23  ;;  %v6377_v59 = vadd.f32 %v17055_v2, %v6376_v20  ;;  %vm6379_vm9 = vweird.f32 %v17055_v2  ;;  %v18966_v50 = vld [vmem:[#allocation72_spill] sm:$0xff] }
 0x95e   : > { %v7077_v48 = vmul.f32 %v18963_v47, %v7076_v42  ;;  %vm7113_vm7 = vweird.f32 %v17034_v23  ;;  %v7117_v28 = vand.u32 2147483647, %v17034_v23  ;;  %v6420_v1 = vsub.f32 1.0, %v6419_v12  ;;  %v17172_v6 = vpop.permute.xlu2 %7396 }
 0x95f   : > { %v17107_v53 = vpop.permute.xlu0 %7348  ;;  %v17156_v32 = vpop.eup %9739  ;;  %vm17158_vm10 = vmor %vm7113_vm7, %vm7114_vm5  ;;  %v6384_v17 = vand.u32 2147483648, %v16941_v62  ;;  %v6342_v26 = vmul.f32 %v18966_v50, %v6341_v18  ;;  %vm6378_vm11 = vweird.f32 %v16941_v62  ;;  %v6382_v23 = vand.u32 2147483647, %v16941_v62  ;;  %18967 = vst [vmem:[#allocation17_spill] sm:$0xff] %v17172_v6 }
 0x960   : > { %v7116_v40 = vsel %vm17158_vm10, %v17086_v36, %v7112_v34  ;;  %9741 = vrcp.f32 %v17146_v51  ;;  %v7120_v7 = vor.u32 1.1754944e-38, %v7119_v57  ;;  %vm6380_vm12 = vmor %vm6378_vm11, %vm6379_vm9  ;;  %vm7118_vm15 = vcmp.eq.f32.partialorder %v7117_v28, 8.507059e+37  ;;  %v18971_v34 = vld [vmem:[#allocation63_spill] sm:$0xff] }
 0x961   : > { %v6381_v21 = vsel %vm6380_vm12, %v17055_v2, %v6377_v59  ;;  %v6421_v36 = vmul.f32 %v17121_v63, %v6420_v1  ;;  %v6464_v14 = vmul.f32 %v17156_v32, %v17113_v8  ;;  %v6385_v10 = vor.u32 1.1754944e-38, %v6384_v17 }
 0x962   : > { %v7121_v62 = vsel %vm7118_vm15, %v7120_v7, %v7116_v40  ;;  %vm6383_vm1 = vcmp.eq.f32.partialorder %v6382_v23, 8.507059e+37  ;;  %v17181_v24 = vperm.slane %v16488_v16, 1  ;;  %vm6424_vm5 = vweird.f32 %v17121_v63  ;;  %v18972_v7 = vld [vmem:[#allocation83_spill] sm:$0xff] }
 0x963   : > { %v6386_v45 = vsel %vm6383_vm1, %v6385_v10, %v6381_v21  ;;  %v7122_v3 = vmul.f32 %v18968_v44, %v7121_v62  ;;  %v6422_v55 = vadd.f32 %v17121_v63, %v6421_v36  ;;  %v6465_v22 = vsub.f32 1.0, %v6464_v14 }
 0x964   : > { %v6387_v29 = vmul.f32 %v18969_v37, %v6386_v45  ;;  %vm6423_vm9 = vweird.f32 %v17089_v61  ;;  %v6427_v39 = vand.u32 2147483647, %v17089_v61  ;;  %9743 = vrcp.f32 %v17181_v24  ;;  %v18974_v37 = vld [vmem:[#allocation76_spill] sm:$0xff] }
 0x965   : > { %7483 = vperm.xlu0 %9265, %v7032_v25   ;;  %v6429_v25 = vand.u32 2147483648, %v17089_v61  ;;  %vm6425_vm7 = vmor %vm6423_vm9, %vm6424_vm5  ;;  %v6466_v27 = vmul.f32 %v17156_v32, %v6465_v22  ;;  %v17199_v33 = vperm.slane %v16488_v16, 4  ;;  %vm6469_vm11 = vweird.f32 %v17156_v32 }
 0x966   : > { %v9742_v2 = vpop.eup %9741  ;;  %v6426_v54 = vsel %vm6425_vm7, %v17121_v63, %v6422_v55  ;;  %v17196_v20 = vpop.permute.xlu2 %7405  ;;  %vm6428_vm10 = vcmp.eq.f32.partialorder %v6427_v39, 8.507059e+37  ;;  %v6474_v63 = vand.u32 2147483648, %v17113_v8  ;;  %vm6468_vm12 = vweird.f32 %v17113_v8 }
 0x967   : > { %v17140_v19 = vpop.permute.xlu0 %7357  ;;  %v6509_v0 = vmul.f32 %v9742_v2, %v17146_v51  ;;  %v6430_v30 = vor.u32 1.1754944e-38, %v6429_v25  ;;  %18970 = vst [vmem:[#allocation23_spill] sm:$0xff] %v17196_v20  ;;  %v6467_v12 = vadd.f32 %v17156_v32, %v6466_v27  ;;  %v6472_v57 = vand.u32 2147483647, %v17113_v8  ;;  %vm6470_vm15 = vmor %vm6468_vm12, %vm6469_vm11 }
 0x968   : > { %9745 = vrcp.f32 %v17199_v33  ;;  %v6475_v1 = vor.u32 1.1754944e-38, %v6474_v63  ;;  %v17213_v52 = vperm.slane %v16488_v16, 7  ;;  %vm6514_vm5 = vweird.f32 %v9742_v2 }
 0x969   : > { %v6431_v61 = vsel %vm6428_vm10, %v6430_v30, %v6426_v54  ;;  %v6510_v42 = vsub.f32 1.0, %v6509_v0  ;;  %v6471_v47 = vsel %vm6470_vm15, %v17156_v32, %v6467_v12  ;;  %vm6473_vm1 = vcmp.eq.f32.partialorder %v6472_v57, 8.507059e+37 }
 0x96a   : > { %v9744_v43 = vpop.eup %9743  ;;  %v6432_v18 = vmul.f32 %v18971_v34, %v6431_v61  ;;  %v6476_v17 = vsel %vm6473_vm1, %v6475_v1, %v6471_v47  ;;  %v6519_v23 = vand.u32 2147483648, %v17146_v51  ;;  %vm6513_vm9 = vweird.f32 %v17146_v51 }
 0x96b   : > { %v6554_v28 = vmul.f32 %v9744_v43, %v17181_v24  ;;  %v6477_v21 = vmul.f32 %v18972_v7, %v6476_v17  ;;  %v6517_v32 = vand.u32 2147483647, %v17146_v51  ;;  %9747 = vrcp.f32 %v17213_v52  ;;  %vm6515_vm7 = vmor %vm6513_vm9, %vm6514_vm5 }
 0x96c   : > { %v6520_v10 = vor.u32 1.1754944e-38, %v6519_v23  ;;  %v17226_v45 = vperm.slane %v16510_v11, 2  ;;  %vm6559_vm11 = vweird.f32 %v9744_v43  ;;  %v6564_v22 = vand.u32 2147483648, %v17181_v24 }
 0x96d   : > { %7492 = vperm.xlu0 %9265, %v7077_v48   ;;  %v6511_v48 = vmul.f32 %v9742_v2, %v6510_v42  ;;  %vm6518_vm10 = vcmp.eq.f32.partialorder %v6517_v32, 8.507059e+37  ;;  %vm6558_vm12 = vweird.f32 %v17181_v24  ;;  %v17239_v61 = vperm.slane %v16510_v11, 5  ;;  %v18977_v32 = vld [vmem:[#allocation87_spill] sm:$0xff] }
 0x96e   : > { %v17215_v50 = vpop.permute.xlu2 %7414  ;;  %v9746_v40 = vpop.eup %9745  ;;  %9749 = vrcp.f32 %v17226_v45  ;;  %vm6560_vm15 = vmor %vm6558_vm12, %vm6559_vm11  ;;  %v6565_v30 = vor.u32 1.1754944e-38, %v6564_v22  ;;  %v6609_v34 = vand.u32 2147483648, %v17199_v33  ;;  %vm6603_vm9 = vweird.f32 %v17199_v33 }
 0x96f   : > { %7345 = vperm.xlu1 %9266, %v6342_v26   ;;  %v17174_v5 = vpop.permute.xlu0 %7366  ;;  %v6512_v8 = vadd.f32 %v9742_v2, %v6511_v48  ;;  %v6555_v26 = vsub.f32 1.0, %v6554_v28  ;;  %v6599_v62 = vmul.f32 %v9746_v40, %v17199_v33  ;;  %vm6604_vm5 = vweird.f32 %v9746_v40 }
 0x970   : > { %9751 = vrcp.f32 %v17239_v61  ;;  %v6610_v17 = vor.u32 1.1754944e-38, %v6609_v34  ;;  %vm6648_vm12 = vweird.f32 %v17213_v52  ;;  %v17265_v22 = vperm.slane %v16552_v31, 3 }
 0x971   : > { %v6516_v36 = vsel %vm6515_vm7, %v9742_v2, %v6512_v8  ;;  %v6556_v14 = vmul.f32 %v9744_v43, %v6555_v26  ;;  %v6600_v55 = vsub.f32 1.0, %v6599_v62  ;;  %v9748_v51 = vpop.eup %9747  ;;  %v6562_v2 = vand.u32 2147483647, %v17181_v24  ;;  %vm6605_vm7 = vmor %vm6603_vm9, %vm6604_vm5 }
 0x972   : > { %v6521_v44 = vsel %vm6518_vm10, %v6520_v10, %v6516_v36  ;;  %v6644_v0 = vmul.f32 %v9748_v51, %v17213_v52  ;;  %v17252_v8 = vperm.slane %v16552_v31, 0  ;;  %vm6649_vm11 = vweird.f32 %v9748_v51 }
 0x973   : > { %v6601_v27 = vmul.f32 %v9746_v40, %v6600_v55  ;;  %vm6563_vm1 = vcmp.eq.f32.partialorder %v6562_v2, 8.507059e+37  ;;  %vm6693_vm9 = vweird.f32 %v17226_v45 }
 0x974   : > { %v6645_v63 = vsub.f32 1.0, %v6644_v0  ;;  %v9750_v24 = vpop.eup %9749  ;;  %9753 = vrcp.f32 %v17252_v8 }
 0x975   : > { %7501 = vperm.xlu0 %9265, %v7122_v3   ;;  %v6557_v3 = vadd.f32 %v9744_v43, %v6556_v14  ;;  %v6602_v42 = vadd.f32 %v9746_v40, %v6601_v27  ;;  %v6689_v1 = vmul.f32 %v9750_v24, %v17226_v45  ;;  %vm6694_vm5 = vweird.f32 %v9750_v24  ;;  %v18979_v27 = vld [vmem:[#allocation90_spill] sm:$0xff] }
 0x976   : > { %v17229_v25 = vpop.permute.xlu2 %7423  ;;  %v6646_v28 = vmul.f32 %v9748_v51, %v6645_v63  ;;  %v9752_v7 = vpop.eup %9751  ;;  %9755 = vrcp.f32 %v17265_v22 }
 0x977   : > { %7354 = vperm.xlu1 %9266, %v6387_v29   ;;  %v17191_v4 = vpop.permute.xlu0 %7375  ;;  %v6522_v29 = vmul.f32 %v18974_v37, %v6521_v44  ;;  %v6561_v54 = vsel %vm6560_vm15, %v9744_v43, %v6557_v3  ;;  %v6607_v43 = vand.u32 2147483647, %v17199_v33  ;;  %v6606_v48 = vsel %vm6605_vm7, %v9746_v40, %v6602_v42  ;;  %vm6650_vm15 = vmor %vm6648_vm12, %vm6649_vm11 }
 0x978   : > { %v6566_v12 = vsel %vm6563_vm1, %v6565_v30, %v6561_v54  ;;  %v6647_v23 = vadd.f32 %v9748_v51, %v6646_v28  ;;  %v6690_v33 = vsub.f32 1.0, %v6689_v1  ;;  %v6652_v40 = vand.u32 2147483647, %v17213_v52  ;;  %vm6695_vm7 = vmor %vm6693_vm9, %vm6694_vm5  ;;  %v18981_v1 = vld [vmem:[#allocation79_spill] sm:$0xff] }
 0x979   : > { %vm6608_vm10 = vcmp.eq.f32.partialorder %v6607_v43, 8.507059e+37  ;;  %v6734_v44 = vmul.f32 %v9752_v7, %v17239_v61  ;;  %v6699_v54 = vand.u32 2147483648, %v17226_v45  ;;  %v17272_v30 = vperm.slane %v16552_v31, 6 }
 0x97a   : > { %v6611_v26 = vsel %vm6608_vm10, %v6610_v17, %v6606_v48  ;;  %v6651_v62 = vsel %vm6650_vm15, %v9748_v51, %v6647_v23  ;;  %v6691_v10 = vmul.f32 %v9750_v24, %v6690_v33  ;;  %vm6653_vm1 = vcmp.eq.f32.partialorder %v6652_v40, 8.507059e+37  ;;  %v9754_v2 = vpop.eup %9753 }
 0x97b   : > { %v6612_v36 = vmul.f32 %v18977_v32, %v6611_v26  ;;  %v6697_v51 = vand.u32 2147483647, %v17226_v45  ;;  %v6779_v34 = vmul.f32 %v9754_v2, %v17252_v8  ;;  %9757 = vrcp.f32 %v17272_v30 }
 0x97c   : > { %vm6739_vm11 = vweird.f32 %v9752_v7  ;;  %v17281_v48 = vpop.eup %9755  ;;  %v6744_v28 = vand.u32 2147483648, %v17239_v61  ;;  %vm6738_vm12 = vweird.f32 %v17239_v61  ;;  %vm6784_vm5 = vweird.f32 %v9754_v2 }
 0x97d   : > { %vm6698_vm10 = vcmp.eq.f32.partialorder %v6697_v51, 8.507059e+37  ;;  %v6780_v31 = vsub.f32 1.0, %v6779_v34  ;;  %vm6740_vm15 = vmor %vm6738_vm12, %vm6739_vm11  ;;  %vm6783_vm9 = vweird.f32 %v17252_v8  ;;  %vm6829_vm11 = vweird.f32 %v17281_v48 }
 0x97e   : > { %v17246_v47 = vpop.permute.xlu2 %7432  ;;  %v6745_v40 = vor.u32 1.1754944e-38, %v6744_v28  ;;  %vm6828_vm12 = vweird.f32 %v17265_v22 }
 0x97f   : > { %v17208_v59 = vpop.permute.xlu0 %7384  ;;  %7363 = vperm.xlu1 %9266, %v6432_v18   ;;  %v18976_v18 = vld [vmem:[#allocation81_spill] sm:$0xff]  ;;  %v6781_v33 = vmul.f32 %v9754_v2, %v6780_v31  ;;  %v18985_v31 = vld [vmem:[#allocation88_spill] sm:$0xff] }
 0x980   : > { %v6567_v57 = vmul.f32 %v18976_v18, %v6566_v12  ;;  %v6700_v18 = vor.u32 1.1754944e-38, %v6699_v54 }
 0x981   : > { %v17291_v32 = vpop.eup %9757 }
 0x986   : > { %v17262_v55 = vpop.permute.xlu2 %7441 }
 0x987   : > { %v17222_v16 = vpop.permute.xlu0 %7393  ;;  %7372 = vperm.xlu1 %9266, %v6477_v21   ;;  %v6654_v21 = vand.u32 2147483648, %v17213_v52  ;;  %18978 = vst [vmem:[#allocation22_spill] sm:$0xff] %v17262_v55  ;;  %v6735_v52 = vsub.f32 1.0, %v6734_v44 }
 0x988   : > { %18973 = vst [vmem:[#allocation38_spill] sm:$0xff] %v17222_v16 }
 0x989   : > { %v6655_v3 = vor.u32 1.1754944e-38, %v6654_v21  ;;  %v6736_v63 = vmul.f32 %v9752_v7, %v6735_v52  ;;  %v6824_v21 = vmul.f32 %v17281_v48, %v17265_v22  ;;  %v18983_v52 = vld [vmem:[#allocation10_spill] sm:$0xff] }
 0x98b   : > { %v6656_v37 = vsel %vm6653_vm1, %v6655_v3, %v6651_v62  ;;  %v6737_v45 = vadd.f32 %v9752_v7, %v6736_v63  ;;  %v17297_v62 = vperm.slane %v16525_v60, 4  ;;  %v6825_v44 = vsub.f32 1.0, %v6824_v21 }
 0x98c   : > { %v6657_v0 = vmul.f32 %v18979_v27, %v6656_v37  ;;  %v17302_v3 = vperm.slane %v16525_v60, 7  ;;  %v6789_v37 = vand.u32 2147483648, %v17252_v8  ;;  %v6787_v27 = vand.u32 2147483647, %v17252_v8 }
 0x98d   : > { %v6741_v23 = vsel %vm6740_vm15, %v9752_v7, %v6737_v45  ;;  %v6869_v7 = vmul.f32 %v17291_v32, %v17272_v30  ;;  %v6826_v51 = vmul.f32 %v17281_v48, %v6825_v44  ;;  %vm17329_vm15 = vmor %vm6828_vm12, %vm6829_vm11  ;;  %v6879_v44 = vand.u32 2147483648, %v17272_v30 }
 0x98e   : > { %v17279_v43 = vpop.permute.xlu2 %7450  ;;  %v6790_v63 = vor.u32 1.1754944e-38, %v6789_v37 }
 0x98f   : > { %v17235_v39 = vpop.permute.xlu0 %7402  ;;  %7381 = vperm.xlu1 %9266, %v6522_v29   ;;  %v6692_v29 = vadd.f32 %v9750_v24, %v6691_v10  ;;  %18980 = vst [vmem:[#allocation101_spill] sm:$0xff] %v17279_v43  ;;  %v6782_v10 = vadd.f32 %v9754_v2, %v6781_v33  ;;  %v6827_v45 = vadd.f32 %v17281_v48, %v6826_v51  ;;  %v6880_v51 = vor.u32 1.1754944e-38, %v6879_v44 }
 0x990   : > { %18975 = vst [vmem:[#allocation99_spill] sm:$0xff] %v17235_v39 }
 0x991   : > { %v6696_v42 = vsel %vm6695_vm7, %v9750_v24, %v6692_v29  ;;  %v6742_v24 = vand.u32 2147483647, %v17239_v61  ;;  %vm6785_vm7 = vmor %vm6783_vm9, %vm6784_vm5  ;;  %vm6873_vm9 = vweird.f32 %v17272_v30 }
 0x993   : > { %vm6743_vm1 = vcmp.eq.f32.partialorder %v6742_v24, 8.507059e+37 }
 0x994   : > { %v6746_v61 = vsel %vm6743_vm1, %v6745_v40, %v6741_v23  ;;  %vm6874_vm1 = vweird.f32 %v17291_v32 }
 0x995   : > { %v6747_v54 = vmul.f32 %v18983_v52, %v6746_v61 }
 0x996   : > { %v17307_v29 = vpop.permute.xlu2 %7459 }
 0x997   : > { %v17248_v11 = vpop.permute.xlu0 %7411  ;;  %7390 = vperm.xlu1 %9266, %v6567_v57   ;;  %v6701_v57 = vsel %vm6698_vm10, %v6700_v18, %v6696_v42  ;;  %18982 = vst [vmem:[#allocation103_spill] sm:$0xff] %v17307_v29  ;;  %v6870_v42 = vsub.f32 1.0, %v6869_v7  ;;  %vm6788_vm10 = vcmp.eq.f32.partialorder %v6787_v27, 8.507059e+37  ;;  %v6877_v7 = vand.u32 2147483647, %v17272_v30 }
 0x998   : > { %v6702_v17 = vmul.f32 %v18981_v1, %v6701_v57  ;;  %v6832_v1 = vand.u32 2147483647, %v17265_v22 }
 0x999   : > { %v6871_v8 = vmul.f32 %v17291_v32, %v6870_v42  ;;  %v18990_v42 = vld [vmem:[#allocation5_spill] sm:$0xff] }
 0x99a   : > { %vm6833_vm5 = vcmp.eq.f32.partialorder %v6832_v1, 8.507059e+37 }
 0x99b   : > { %v6872_v61 = vadd.f32 %v17291_v32, %v6871_v8 }
 0x99e   : > { %v17337_v21 = vpop.permute.xlu2 %7468 }
 0x99f   : > { %v17259_v14 = vpop.permute.xlu0 %7420  ;;  %7399 = vperm.xlu1 %9266, %v6612_v36   ;;  %v17294_v36 = vperm.slane %v16525_v60, 1  ;;  %v6786_v60 = vsel %vm6785_vm7, %v9754_v2, %v6782_v10  ;;  %v6834_v2 = vand.u32 2147483648, %v17265_v22  ;;  %18988 = vst [vmem:[#allocation2_spill] sm:$0xff] %v17337_v21  ;;  %v6831_v22 = vsel %vm17329_vm15, %v17281_v48, %v6827_v45  ;;  %vm6875_vm7 = vmor %vm6873_vm9, %vm6874_vm1 }
 0x9a0   : > { %v6791_v18 = vsel %vm6788_vm10, %v6790_v63, %v6786_v60  ;;  %v6876_v48 = vsel %vm6875_vm7, %v17291_v32, %v6872_v61  ;;  %v17353_v60 = vperm.slane %v16889_v49, 2  ;;  %vm6878_vm10 = vcmp.eq.f32.partialorder %v6877_v7, 8.507059e+37 }
 0x9a1   : > { %9759 = vrcp.f32 %v17294_v36  ;;  %v6792_v28 = vmul.f32 %v18985_v31, %v6791_v18  ;;  %v6835_v10 = vor.u32 1.1754944e-38, %v6834_v2  ;;  %v6881_v45 = vsel %vm6878_vm10, %v6880_v51, %v6876_v48 }
 0x9a2   : > { %9761 = vrcp.f32 %v17297_v62  ;;  %v17359_v2 = vperm.slane %v16889_v49, 5  ;;  %v6924_v32 = vand.u32 2147483648, %v17294_v36  ;;  %vm6918_vm15 = vweird.f32 %v17294_v36 }
 0x9a3   : > { %9763 = vrcp.f32 %v17302_v3  ;;  %v6836_v52 = vsel %vm6833_vm5, %v6835_v10, %v6831_v22  ;;  %v6922_v44 = vand.u32 2147483647, %v17294_v36  ;;  %v6969_v7 = vand.u32 2147483648, %v17297_v62 }
 0x9a4   : > { %v6837_v63 = vmul.f32 %v18990_v42, %v6836_v52  ;;  %9765 = vrcp.f32 %v17353_v60  ;;  %vm6963_vm5 = vweird.f32 %v17297_v62  ;;  %v7014_v42 = vand.u32 2147483648, %v17302_v3 }
 0x9a5   : > { %9767 = vrcp.f32 %v17359_v2  ;;  %vm6923_vm10 = vcmp.eq.f32.partialorder %v6922_v44, 8.507059e+37 }
 0x9a7   : > { %v17275_v12 = vpop.permute.xlu0 %7429  ;;  %7408 = vperm.xlu1 %9266, %v6657_v0   ;;  %v17316_v34 = vpop.eup %9759 }
 0x9a8   : > { %v17318_v57 = vpop.eup %9761  ;;  %vm6919_vm11 = vweird.f32 %v17316_v34 }
 0x9a9   : > { %v6959_v23 = vmul.f32 %v17318_v57, %v17297_v62  ;;  %v17335_v33 = vpop.eup %9763  ;;  %vm6964_vm12 = vweird.f32 %v17318_v57  ;;  %vm17388_vm1 = vmor %vm6918_vm15, %vm6919_vm11  ;;  %vm7008_vm11 = vweird.f32 %v17302_v3 }
 0x9aa   : > { %v7004_v27 = vmul.f32 %v17335_v33, %v17302_v3  ;;  %vm17403_vm9 = vmor %vm6963_vm5, %vm6964_vm12  ;;  %vm7009_vm7 = vweird.f32 %v17335_v33 }
 0x9ab   : > { %vm17434_vm15 = vmor %vm7008_vm11, %vm7009_vm7 }
 0x9ac   : > { %v7005_v8 = vsub.f32 1.0, %v7004_v27  ;;  %v6967_v27 = vand.u32 2147483647, %v17297_v62 }
 0x9ae   : > { %v7006_v10 = vmul.f32 %v17335_v33, %v7005_v8  ;;  %vm6968_vm12 = vcmp.eq.f32.partialorder %v6967_v27, 8.507059e+37 }
 0x9af   : > { %7417 = vperm.xlu1 %9266, %v6702_v17   ;;  %v17287_v26 = vpop.permute.xlu0 %7438  ;;  %v6914_v17 = vmul.f32 %v17316_v34, %v17294_v36 }
 0x9b1   : > { %v6915_v37 = vsub.f32 1.0, %v6914_v17  ;;  %v18993_v17 = vld [vmem:[#allocation86_spill] sm:$0xff] }
 0x9b2   : > { %v6882_v24 = vmul.f32 %v18993_v17, %v6881_v45 }
 0x9b3   : > { %v6916_v18 = vmul.f32 %v17316_v34, %v6915_v37 }
 0x9b7   : > { %7426 = vperm.xlu1 %9266, %v6747_v54   ;;  %v17312_v0 = vpop.permute.xlu0 %7447  ;;  %v6960_v54 = vsub.f32 1.0, %v6959_v23  ;;  %v6917_v23 = vadd.f32 %v17316_v34, %v6916_v18  ;;  %v17415_v18 = vadd.f32 %v17335_v33, %v7006_v10 }
 0x9b8   : > { %18984 = vst [vmem:[#allocation16_spill] sm:$0xff] %v17312_v0 }
 0x9b9   : > { %v6961_v30 = vmul.f32 %v17318_v57, %v6960_v54  ;;  %v6925_v54 = vor.u32 1.1754944e-38, %v6924_v32  ;;  %v6921_v36 = vsel %vm17388_vm1, %v17316_v34, %v6917_v23 }
 0x9bb   : > { %v6962_v61 = vadd.f32 %v17318_v57, %v6961_v30  ;;  %v6970_v30 = vor.u32 1.1754944e-38, %v6969_v7  ;;  %v6926_v8 = vsel %vm6923_vm10, %v6925_v54, %v6921_v36  ;;  %v17448_v54 = vor.u32 1.1754944e-38, %v7014_v42  ;;  %v19001_v36 = vld [vmem:[#allocation93_spill] sm:$0xff] }
 0x9bc   : > { %v6927_v51 = vmul.f32 %v19001_v36, %v6926_v8 }
 0x9bd   : > { %v6966_v62 = vsel %vm17403_vm9, %v17318_v57, %v6962_v61 }
 0x9be   : > { %v6971_v61 = vsel %vm6968_vm12, %v6970_v30, %v6966_v62 }
 0x9bf   : > { %v17339_v40 = vpop.permute.xlu0 %7456  ;;  %7435 = vperm.xlu1 %9266, %v6792_v28   ;;  %v17365_v28 = vpop.permute.xlu2 %7477 }
 0x9c0   : > { %18989 = vst [vmem:[#allocation100_spill] sm:$0xff] %v17339_v40 }
 0x9c1   : > { %18992 = vst [vmem:[#allocation8_spill] sm:$0xff] %v17365_v28 }
 0x9c7   : > { %v17361_v31 = vpop.permute.xlu0 %7465  ;;  %7444 = vperm.xlu1 %9266, %v6837_v63   ;;  %v17408_v63 = vpop.eup %9765 }
 0x9c8   : > { %18991 = vst [vmem:[#allocation13_spill] sm:$0xff] %v17361_v31  ;;  %v17426_v32 = vpop.eup %9767  ;;  %v7487_v17 = vpop.permute.xlu2 %7486  ;;  %v17440_v10 = vmul.f32 %v17408_v63, %v17353_v60 }
 0x9c9   : > { %v17367_v1 = vpop.xlane.xlu1 %6160  ;;  %v7579_v28 = vperm.slane %v7487_v17, %v18848_v15  ;;  %v17459_v42 = vmul.f32 %v17426_v32, %v17359_v2  ;;  %v19011_v17 = vand.u32 2147483647, %v17302_v3 }
 0x9ca   : > { %v17374_v49 = vperm.slane %v17367_v1, 1  ;;  %v17377_v22 = vperm.slane %v17367_v1, 2  ;;  %v17386_v37 = vperm.slane %v17367_v1, 4  ;;  %v17395_v48 = vperm.slane %v17367_v1, 5 }
 0x9cb   : > { %v17419_v34 = vperm.slane %v17367_v1, 7  ;;  %v17429_v23 = vperm.slane %v17367_v1, 0  ;;  %v7050_v8 = vsub.f32 1.0, %v17440_v10 }
 0x9cc   : > { %9769 = vrcp.f32 %v17374_v49  ;;  %v7177_v44 = vand.u32 2147483647, %v17377_v22  ;;  %v7179_v7 = vand.u32 2147483648, %v17377_v22  ;;  %v7162_v62 = vand.u32 2147483647, %v17374_v49 }
 0x9cd   : > { %9771 = vrcp.f32 %v17377_v22  ;;  %v7164_v30 = vand.u32 2147483648, %v17374_v49  ;;  %vm7173_vm1 = vweird.f32 %v17377_v22  ;;  %vm7158_vm9 = vweird.f32 %v17374_v49 }
 0x9ce   : > { %9773 = vrcp.f32 %v17386_v37  ;;  %vm17467_vm5 = vcmp.eq.f32.partialorder %v7177_v44, 8.507059e+37  ;;  %vm17474_vm7 = vcmp.eq.f32.partialorder %v7162_v62, 8.507059e+37  ;;  %vm7203_vm2 = vweird.f32 %v17386_v37 }
 0x9cf   : > { %v17421_v45 = vpop.permute.xlu0 %7474  ;;  %7453 = vperm.xlu1 %9266, %v6882_v24   ;;  %9775 = vrcp.f32 %v17395_v48  ;;  %v7165_v10 = vor.u32 1.1754944e-38, %v7164_v30 }
 0x9d0   : > { %18998 = vst [vmem:[#allocation4_spill] sm:$0xff] %v17421_v45  ;;  %9777 = vrcp.f32 %v17419_v34  ;;  %v19002_v45 = vld [vmem:[#allocation91_spill] sm:$0xff] }
 0x9d1   : > { %v6972_v21 = vmul.f32 %v19002_v45, %v6971_v61  ;;  %9779 = vrcp.f32 %v17429_v23  ;;  %v7180_v45 = vor.u32 1.1754944e-38, %v7179_v7 }
 0x9d2   : > { %v9770_v27 = vpop.eup %9769 }
 0x9d3   : > { %v9772_v57 = vpop.eup %9771  ;;  %v7154_v31 = vmul.f32 %v9770_v27, %v17374_v49  ;;  %vm7159_vm10 = vweird.f32 %v9770_v27 }
 0x9d4   : > { %v7169_v52 = vmul.f32 %v9772_v57, %v17377_v22  ;;  %v17465_v36 = vpop.eup %9773  ;;  %vm7174_vm11 = vweird.f32 %v9772_v57  ;;  %vm7160_vm12 = vmor %vm7158_vm9, %vm7159_vm10 }
 0x9d5   : > { %v7155_v61 = vsub.f32 1.0, %v7154_v31  ;;  %v17472_v29 = vpop.eup %9775  ;;  %v7199_v44 = vmul.f32 %v17465_v36, %v17386_v37  ;;  %vm7175_vm0 = vmor %vm7173_vm1, %vm7174_vm11  ;;  %vm7204_vm14 = vweird.f32 %v17465_v36  ;;  %vm7053_vm11 = vweird.f32 %v17353_v60 }
 0x9d6   : > { %v7170_v39 = vsub.f32 1.0, %v7169_v52  ;;  %v7214_v31 = vmul.f32 %v17472_v29, %v17395_v48  ;;  %v17483_v7 = vpop.eup %9777  ;;  %v7224_v52 = vand.u32 2147483648, %v17395_v48  ;;  %vm7219_vm9 = vweird.f32 %v17472_v29  ;;  %vm17516_vm1 = vmor %vm7203_vm2, %vm7204_vm14 }
 0x9d7   : > { %v7484_v20 = vpop.permute.xlu0 %7483  ;;  %7462 = vperm.xlu1 %9266, %v6927_v51   ;;  %v7156_v6 = vmul.f32 %v9770_v27, %v7155_v61  ;;  %v7200_v51 = vsub.f32 1.0, %v7199_v44  ;;  %v17491_v61 = vpop.eup %9779  ;;  %v7209_v44 = vand.u32 2147483648, %v17386_v37  ;;  %vm7054_vm2 = vweird.f32 %v17408_v63 }
 0x9d8   : > { %v7578_v43 = vperm.slane %v7484_v20, %v18848_v15  ;;  %v7171_v0 = vmul.f32 %v9772_v57, %v7170_v39  ;;  %v7215_v16 = vsub.f32 1.0, %v7214_v31  ;;  %v7244_v20 = vmul.f32 %v17483_v7, %v17419_v34 }
 0x9d9   : > { %v7157_v30 = vadd.f32 %v9770_v27, %v7156_v6  ;;  %v7201_v39 = vmul.f32 %v17465_v36, %v7200_v51 }
 0x9da   : > { %v17487_v62 = vsel %vm5330_vm3, %v7579_v28, %v7578_v43  ;;  %v7172_v55 = vadd.f32 %v9772_v57, %v7171_v0  ;;  %v7216_v43 = vmul.f32 %v17472_v29, %v7215_v16  ;;  %v7245_v28 = vsub.f32 1.0, %v7244_v20 }
 0x9db   : > { %19007 = vst [vmem:[#allocation28_spill] sm:$0xff] %v17487_v62  ;;  %v7161_v6 = vsel %vm7160_vm12, %v9770_v27, %v7157_v30  ;;  %v7202_v49 = vadd.f32 %v17465_v36, %v7201_v39  ;;  %v19008_v62 = vld [vmem:[#allocation96_spill] sm:$0xff]  ;;  %v7207_v16 = vand.u32 2147483647, %v17386_v37  ;;  %vm17559_vm12 = vmor %vm7053_vm11, %vm7054_vm2  ;;  %vm7143_vm11 = vweird.f32 %v17429_v23 }
 0x9dc   : > { %v7176_v31 = vsel %vm7175_vm0, %v9772_v57, %v7172_v55  ;;  %v7166_v0 = vsel %vm17474_vm7, %v7165_v10, %v7161_v6  ;;  %v7217_v27 = vadd.f32 %v17472_v29, %v7216_v43  ;;  %vm7218_vm0 = vweird.f32 %v17395_v48  ;;  %v19016_v43 = vld [vmem:[#allocation29_spill] sm:$0xff] }
 0x9dd   : > { %v7181_v51 = vsel %vm17467_vm5, %v7180_v45, %v7176_v31  ;;  %v7167_v22 = vmul.f32 %v19008_v62, %v7166_v0  ;;  %v7222_v55 = vand.u32 2147483647, %v17395_v48  ;;  %v7051_v57 = vmul.f32 %v17408_v63, %v7050_v8  ;;  %vm17523_vm7 = vmor %vm7218_vm0, %vm7219_vm9 }
 0x9de   : > { %v7182_v30 = vmul.f32 %v16657_v46, %v7181_v51  ;;  %vm7013_vm5 = vcmp.eq.f32.partialorder %v19011_v17, 8.507059e+37  ;;  %v7206_v46 = vsel %vm17516_vm1, %v17465_v36, %v7202_v49  ;;  %v7246_v37 = vmul.f32 %v17483_v7, %v7245_v28 }
 0x9df   : > { %7471 = vperm.xlu1 %9266, %v6972_v21   ;;  %7510 = vperm.xlu0 %9265, %v7167_v22   ;;  %v19014_v8 = vsel %vm17434_vm15, %v17335_v33, %v17415_v18  ;;  %v7221_v45 = vsel %vm17523_vm7, %v17472_v29, %v7217_v27  ;;  %v7210_v10 = vor.u32 1.1754944e-38, %v7209_v44  ;;  %v17543_v62 = vperm.slane %v17367_v1, 3  ;;  %v19015_v29 = vld [vmem:[#allocation89_spill] sm:$0xff] }
 0x9e0   : > { %7513 = vperm.xlu2 %9267, %v7182_v30   ;;  %v7016_v3 = vsel %vm7013_vm5, %v17448_v54, %v19014_v8  ;;  %v7225_v36 = vor.u32 1.1754944e-38, %v7224_v52  ;;  %vm7208_vm14 = vcmp.eq.f32.partialorder %v7207_v16, 8.507059e+37  ;;  %vm7223_vm10 = vcmp.eq.f32.partialorder %v7222_v55, 8.507059e+37 }
 0x9e1   : > { %v17531_v48 = vpop.permute.xlu1 %7345  ;;  %v7211_v20 = vsel %vm7208_vm14, %v7210_v10, %v7206_v46  ;;  %v7052_v24 = vadd.f32 %v17408_v63, %v7051_v57  ;;  %v7095_v33 = vsub.f32 1.0, %v17459_v42  ;;  %v7059_v54 = vand.u32 2147483648, %v17353_v60 }
 0x9e2   : > { %v7226_v18 = vsel %vm7223_vm10, %v7225_v36, %v7221_v45  ;;  %v7247_v39 = vadd.f32 %v17483_v7, %v7246_v37  ;;  %vm7249_vm15 = vweird.f32 %v17483_v7  ;;  %v7017_v44 = vmul.f32 %v19015_v29, %v7016_v3 }
 0x9e3   : > { %v7057_v52 = vand.u32 2147483647, %v17353_v60  ;;  %v7254_v6 = vand.u32 2147483648, %v17419_v34  ;;  %9781 = vrcp.f32 %v17543_v62  ;;  %v7212_v28 = vmul.f32 %v19016_v43, %v7211_v20 }
 0x9e4   : > { %vm7248_vm9 = vweird.f32 %v17419_v34  ;;  %v7252_v31 = vand.u32 2147483647, %v17419_v34  ;;  %v7227_v0 = vmul.f32 %v16687_v38, %v7226_v18  ;;  %v7056_v60 = vsel %vm17559_vm12, %v17408_v63, %v7052_v24 }
 0x9e5   : > { %vm7250_vm0 = vmor %vm7248_vm9, %vm7249_vm15  ;;  %v7096_v49 = vmul.f32 %v17426_v32, %v7095_v33  ;;  %v7139_v51 = vmul.f32 %v17491_v61, %v17429_v23  ;;  %v7060_v22 = vor.u32 1.1754944e-38, %v7059_v54  ;;  %vm7058_vm1 = vcmp.eq.f32.partialorder %v7057_v52, 8.507059e+37  ;;  %v19021_v54 = vld [vmem:[#allocation95_spill] sm:$0xff] }
 0x9e6   : > { %v7251_v27 = vsel %vm7250_vm0, %v17483_v7, %v7247_v39  ;;  %v7255_v34 = vor.u32 1.1754944e-38, %v7254_v6  ;;  %v17576_v38 = vperm.slane %v17367_v1, 6  ;;  %vm7253_vm5 = vcmp.eq.f32.partialorder %v7252_v31, 8.507059e+37  ;;  %v19019_v7 = vld [vmem:[#allocation34_spill] sm:$0xff] }
 0x9e7   : > { %7480 = vperm.xlu1 %9266, %v7017_v44   ;;  %7519 = vperm.xlu0 %9265, %v7212_v28   ;;  %v7061_v30 = vsel %vm7058_vm1, %v7060_v22, %v7056_v60  ;;  %v7097_v55 = vadd.f32 %v17426_v32, %v7096_v49  ;;  %vm7099_vm7 = vweird.f32 %v17426_v32  ;;  %v7140_v40 = vsub.f32 1.0, %v7139_v51  ;;  %v19020_v1 = vld [vmem:[#allocation98_spill] sm:$0xff]  ;;  %v19022_v60 = vld [vmem:[#allocation9_spill] sm:$0xff] }
 0x9e8   : > { %7522 = vperm.xlu2 %9267, %v7227_v0   ;;  %v7256_v63 = vsel %vm7253_vm5, %v7255_v34, %v7251_v27  ;;  %v7104_v17 = vand.u32 2147483648, %v17359_v2  ;;  %v7062_v21 = vmul.f32 %v19019_v7, %v7061_v30  ;;  %vm7098_vm14 = vweird.f32 %v17359_v2 }
 0x9e9   : > { %v17573_v16 = vpop.permute.xlu1 %7354  ;;  %v9782_v57 = vpop.eup %9781  ;;  %v7102_v46 = vand.u32 2147483647, %v17359_v2  ;;  %9783 = vrcp.f32 %v17576_v38  ;;  %v7257_v37 = vmul.f32 %v19020_v1, %v7256_v63  ;;  %vm7100_vm2 = vmor %vm7098_vm14, %vm7099_vm7  ;;  %v7141_v3 = vmul.f32 %v17491_v61, %v7140_v40 }
 0x9ea   : > { %v7101_v8 = vsel %vm7100_vm2, %v17426_v32, %v7097_v55  ;;  %v7184_v45 = vmul.f32 %v9782_v57, %v17543_v62  ;;  %v7105_v10 = vor.u32 1.1754944e-38, %v7104_v17  ;;  %vm7144_vm15 = vweird.f32 %v17491_v61  ;;  %v19023_v55 = vld [vmem:[#allocation11_spill] sm:$0xff] }
 0x9eb   : > { %vm7103_vm10 = vcmp.eq.f32.partialorder %v7102_v46, 8.507059e+37  ;;  %v7142_v24 = vadd.f32 %v17491_v61, %v7141_v3  ;;  %v7149_v18 = vand.u32 2147483648, %v17429_v23  ;;  %v7147_v32 = vand.u32 2147483647, %v17429_v23  ;;  %vm7145_vm12 = vmor %vm7143_vm11, %vm7144_vm15  ;;  %v19024_v46 = vld [vmem:[#allocation21_spill] sm:$0xff] }
 0x9ec   : > { %v7106_v20 = vsel %vm7103_vm10, %v7105_v10, %v7101_v8  ;;  %v7185_v2 = vsub.f32 1.0, %v7184_v45  ;;  %vm7189_vm0 = vweird.f32 %v9782_v57  ;;  %v7194_v0 = vand.u32 2147483648, %v17543_v62  ;;  %v19025_v8 = vld [vmem:[#allocation58_spill] sm:$0xff] }
 0x9ed   : > { %v7107_v39 = vmul.f32 %v19021_v54, %v7106_v20  ;;  %v7146_v29 = vsel %vm7145_vm12, %v17491_v61, %v7142_v24  ;;  %v7150_v6 = vor.u32 1.1754944e-38, %v7149_v18  ;;  %vm7148_vm9 = vcmp.eq.f32.partialorder %v7147_v32, 8.507059e+37  ;;  %v19026_v18 = vld [vmem:[#allocation53_spill] sm:$0xff] }
 0x9ee   : > { %v7186_v44 = vmul.f32 %v9782_v57, %v7185_v2  ;;  %vm7188_vm1 = vweird.f32 %v17543_v62  ;;  %v7192_v23 = vand.u32 2147483647, %v17543_v62  ;;  %v7195_v22 = vor.u32 1.1754944e-38, %v7194_v0  ;;  %v17668_v0 = vld [vmem:[%s17656_s23] sm:$0xff] }
 0x9ef   : > { %7489 = vperm.xlu1 %9266, %v7062_v21   ;;  %7528 = vperm.xlu0 %9265, %v7257_v37   ;;  %v9784_v33 = vpop.eup %9783  ;;  %v7151_v28 = vsel %vm7148_vm9, %v7150_v6, %v7146_v29  ;;  %vm7190_vm5 = vmor %vm7188_vm1, %vm7189_vm0  ;;  %v7239_v63 = vand.u32 2147483648, %v17576_v38  ;;  %vm7233_vm2 = vweird.f32 %v17576_v38  ;;  %v7237_v17 = vand.u32 2147483647, %v17576_v38 }
 0x9f0   : > { %v7229_v52 = vmul.f32 %v9784_v33, %v17576_v38  ;;  %v7187_v42 = vadd.f32 %v9782_v57, %v7186_v44  ;;  %v7152_v49 = vmul.f32 %v19022_v60, %v7151_v28  ;;  %vm7193_vm7 = vcmp.eq.f32.partialorder %v7192_v23, 8.507059e+37 }
 0x9f1   : > { %v7364_v36 = vpop.permute.xlu1 %7363  ;;  %vm7234_vm14 = vweird.f32 %v9784_v33  ;;  %vm7238_vm15 = vcmp.eq.f32.partialorder %v7237_v17, 8.507059e+37  ;;  %v7834_v3 = vsel %vm5401_vm6, %v19025_v8, 0.0  ;;  %v7532_v38 = vperm.slane %v17531_v48, %v18848_v15 }
 0x9f2   : > { %v7230_v31 = vsub.f32 1.0, %v7229_v52  ;;  %v7191_v61 = vsel %vm7190_vm5, %v9782_v57, %v7187_v42  ;;  %vm7235_vm10 = vmor %vm7233_vm2, %vm7234_vm14  ;;  %v7240_v57 = vor.u32 1.1754944e-38, %v7239_v63  ;;  %v7538_v37 = vperm.slane %v7364_v36, %v18848_v15 }
 0x9f3   : > { %v7196_v34 = vsel %vm7193_vm7, %v7195_v22, %v7191_v61  ;;  %v7539_v10 = vperm.slane %v17174_v5, %v18848_v15  ;;  %v7540_v36 = vperm.slane %v17039_v9, %v18848_v15  ;;  %v7595_v2 = vsel %vm5332_vm4, %v7532_v38, %v17092_v41  ;;  %v19027_v41 = vld [vmem:[#allocation59_spill] sm:$0xff] }
 0x9f4   : > { %v7231_v51 = vmul.f32 %v9784_v33, %v7230_v31  ;;  %v7197_v40 = vmul.f32 %v19023_v55, %v7196_v34  ;;  %v7533_v48 = vperm.slane %v17107_v53, %v18848_v15  ;;  %v7840_v5 = vsel %vm5401_vm6, %v19026_v18, 0.0  ;;  %v17665_v31 = vld [vmem:[%s17656_s23 + $0x8] sm:$0xff] }
 0x9f5   : > { %v7601_v20 = vsel %vm5330_vm3, %v7539_v10, %v7538_v37  ;;  %v7535_v9 = vperm.slane %v17573_v16, %v18848_v15  ;;  %v7843_v32 = vsel %vm5401_vm6, %v19027_v41, 0.0  ;;  %v7534_v53 = vperm.slane %v16930_v13, %v18848_v15 }
 0x9f6   : > { %v7232_v30 = vadd.f32 %v9784_v33, %v7231_v51  ;;  %v7596_v54 = vsel %vm5334_vm8, %v7533_v48, %v7595_v2  ;;  %v7542_v44 = vperm.slane %v17191_v4, %v18848_v15  ;;  %vm19028_vm11 = vcmask 1045509   ;;  %v19033_v51 = vld [vmem:[#allocation65_spill] sm:$0xff]  ;;  %v19039_v48 = vld [vmem:[#allocation39_spill] sm:$0xff] }
 0x9f7   : > { %7498 = vperm.xlu1 %9266, %v7107_v39   ;;  %v7597_v52 = vsel %vm5336_vm13, %v7534_v53, %v7596_v54  ;;  %v7536_v13 = vperm.slane %v17140_v19, %v18848_v15  ;;  %vm19029_vm12 = vmmov %vm19028_vm11  ;;  %v7554_v42 = vperm.slane %v17248_v11, %v18848_v15  ;;  %vm19030_vm9 = vcmask 1046534   ;;  %v19032_v19 = vld [vmem:[#allocation51_spill] sm:$0xff] }
 0x9f8   : > { %v7236_v62 = vsel %vm7235_vm10, %v9784_v33, %v7232_v30  ;;  %v7602_v33 = vsel %vm5332_vm4, %v7540_v36, %v7601_v20  ;;  %v7598_v28 = vsel %vm19028_vm11, %v7535_v9, %v7597_v52  ;;  %vm19031_vm0 = vmmov %vm19030_vm9  ;;  %v7545_v23 = vperm.slane %v17208_v59, %v18848_v15  ;;  %v19040_v9 = vld [vmem:[#allocation22_spill] sm:$0xff]  ;;  %v19042_v52 = vld [vmem:[#allocation16_spill] sm:$0xff] }
 0x9f9   : > { %v7373_v43 = vpop.permute.xlu1 %7372  ;;  %v7241_v21 = vsel %vm7238_vm15, %v7240_v57, %v7236_v62  ;;  %v7599_v60 = vsel %vm19031_vm0, %v7536_v13, %v7598_v28  ;;  %v7852_v61 = vsel %vm5401_vm6, %v19032_v19, 0.0  ;;  %v7849_v11 = vsel %vm5401_vm6, %v19033_v51, 0.0  ;;  %vm19036_vm2 = vmmov %vm19028_vm11 }
 0x9fa   : > { %v7242_v1 = vmul.f32 %v19024_v46, %v7241_v21  ;;  %v7541_v24 = vperm.slane %v7373_v43, %v18848_v15  ;;  %v7543_v43 = vperm.slane %v17095_v56, %v18848_v15  ;;  %vm7267_vm1 = vcmp.eq.f32.partialorder %v17665_v31, 0.0  ;;  %v17706_v46 = vld [vmem:[%s17656_s23 + $0x18] sm:$0xff]  ;;  %vm19037_vm15 = vmmov %vm19031_vm0 }
 0x9fb   : > { %vm19034_vm5 = vcmask 1047559   ;;  %vm7266_vm7 = vcmp.eq.f32.partialorder %v17668_v0, 0.0  ;;  %v7558_v62 = vperm.slane %v17229_v25, %v18848_v15  ;;  %v7560_v37 = vperm.slane %v17275_v12, %v18848_v15 }
 0x9fc   : > { %v7603_v39 = vsel %vm5334_vm8, %v7541_v24, %v7602_v33  ;;  %vm19035_vm14 = vmmov %vm19034_vm5  ;;  %v7561_v25 = vperm.slane %v17246_v47, %v18848_v15  ;;  %vm7269_vm10 = vcmp.eq.f32.partialorder %v17706_v46, 0.0  ;;  %v7563_v47 = vperm.slane %v17287_v26, %v18848_v15 }
 0x9fd   : > { %v7604_v16 = vsel %vm5336_vm13, %v7542_v44, %v7603_v39  ;;  %vm19038_vm11 = vmmov %vm19034_vm5  ;;  %v7837_v33 = vsel %vm5401_vm6, %v19039_v48, 0.0  ;;  %v7546_v54 = vperm.slane %v17128_v35, %v18848_v15  ;;  %v7564_v39 = vperm.slane %v19040_v9, %v18848_v15  ;;  %v19057_v9 = vld [vmem:[#allocation4_spill] sm:$0xff] }
 0x9fe   : > { %v7605_v4 = vsel %vm19029_vm12, %v7543_v43, %v7604_v16  ;;  %v7566_v16 = vperm.slane %v19042_v52, %v18848_v15  ;;  %v19043_v43 = vld [vmem:[#allocation17_spill] sm:$0xff]  ;;  %vm19047_vm12 = vmmov %vm19036_vm2 }
 0x9ff   : > { %7507 = vperm.xlu1 %9266, %v7152_v49   ;;  %v7537_v49 = vperm.slane %v16983_v58, %v18848_v15  ;;  %v7549_v28 = vperm.slane %v19043_v43, %v18848_v15 }
 0xa01   : > { %v7382_v27 = vpop.permute.xlu1 %7381  ;;  %v7600_v59 = vsel %vm19035_vm14, %v7537_v49, %v7599_v60  ;;  %v19045_v60 = vld [vmem:[#allocation101_spill] sm:$0xff]  ;;  %vm19049_vm14 = vmmov %vm19036_vm2 }
 0xa02   : > { %v7544_v6 = vperm.slane %v7382_v27, %v18848_v15  ;;  %v7555_v27 = vperm.slane %v17215_v50, %v18848_v15  ;;  %v7557_v50 = vperm.slane %v17259_v14, %v18848_v15  ;;  %v7567_v49 = vperm.slane %v19045_v60, %v18848_v15 }
 0xa04   : > { %v7606_v56 = vsel %vm19030_vm9, %v7544_v6, %v7605_v4  ;;  %v7615_v30 = vsel %vm5330_vm3, %v7555_v27, %v7554_v42  ;;  %v19044_v4 = vld [vmem:[#allocation55_spill] sm:$0xff] }
 0xa05   : > { %v7607_v58 = vsel %vm19034_vm5, %v7545_v23, %v7606_v56  ;;  %v7846_v42 = vsel %vm5401_vm6, %v19044_v4, 0.0  ;;  %v17753_v56 = vld [vmem:[%s17656_s23 + $0x20] sm:$0xff]  ;;  %v19048_v27 = vld [vmem:[#allocation99_spill] sm:$0xff] }
 0xa06   : > { %v17692_v55 = vsel %vm7267_vm1, 0.0, %v7607_v58  ;;  %vm7270_vm9 = vcmp.eq.f32.partialorder %v17753_v56, 0.0 }
 0xa07   : > { %7516 = vperm.xlu1 %9266, %v7197_v40   ;;  %v17696_v40 = vsel %vm7266_vm7, 0.0, %v7600_v59  ;;  %v7669_v57 = vsel %vm5401_vm6, %v17692_v55, 0.0 }
 0xa08   : > { %v7666_v21 = vsel %vm5401_vm6, %v17696_v40, 0.0 }
 0xa09   : > { %v17605_v7 = vpop.permute.xlu1 %7390 }
 0xa0a   : > { %v7547_v2 = vperm.slane %v17605_v7, %v18848_v15 }
 0xa0c   : > { %v7608_v26 = vsel %vm5330_vm3, %v7547_v2, %v7546_v54 }
 0xa0f   : > { %7525 = vperm.xlu1 %9266, %v7242_v1  }
 0xa11   : > { %v17613_v45 = vpop.permute.xlu1 %7399  ;;  %7835 = vadd.xlane.f32.xlu2 %v7834_v3 }
 0xa12   : > { %v7550_v35 = vperm.slane %v17613_v45, %v18848_v15 }
 0xa19   : > { %v17638_v29 = vpop.permute.xlu1 %7408  ;;  %7844 = vadd.xlane.f32.xlu2 %v7843_v32  ;;  %7841 = vadd.xlane.f32.xlu0 %v7840_v5  ;;  %v19041_v32 = vld [vmem:[#allocation38_spill] sm:$0xff] }
 0xa1a   : > { %v7548_v53 = vperm.slane %v19041_v32, %v18848_v15  ;;  %v17812_v32 = vpop.permute.xlu0 %7492 }
 0xa1c   : > { %v7609_v6 = vsel %vm5332_vm4, %v7548_v53, %v7608_v26  ;;  %v17814_v53 = vpop.permute.xlu2 %7495 }
 0xa1d   : > { %v7610_v19 = vsel %vm5334_vm8, %v7549_v28, %v7609_v6 }
 0xa21   : > { %v7418_v22 = vpop.permute.xlu1 %7417  ;;  %7853 = vadd.xlane.f32.xlu2 %v7852_v61  ;;  %7850 = vadd.xlane.f32.xlu0 %v7849_v11  ;;  %v19046_v61 = vld [vmem:[#allocation100_spill] sm:$0xff]  ;;  %v7611_v11 = vsel %vm5336_vm13, %v7550_v35, %v7610_v19  ;;  %v9903_v35 = vmov 8.0  }
 0xa22   : > { %v7556_v34 = vperm.slane %v7418_v22, %v18848_v15  ;;  %v7569_v51 = vperm.slane %v19046_v61, %v18848_v15  ;;  %v17816_v52 = vpop.permute.xlu0 %7501  ;;  %9785 = vrcp.f32 %v9903_v35 }
 0xa24   : > { %v7616_v63 = vsel %vm5332_vm4, %v7556_v34, %v7615_v30  ;;  %v7551_v34 = vperm.slane %v19048_v27, %v18848_v15 }
 0xa25   : > { %v7617_v17 = vsel %vm5334_vm8, %v7557_v50, %v7616_v63  ;;  %v7553_v63 = vperm.slane %v17638_v29, %v18848_v15 }
 0xa26   : > { %v7618_v8 = vsel %vm5336_vm13, %v7558_v62, %v7617_v17  ;;  %v7612_v30 = vsel %vm19049_vm14, %v7551_v34, %v7611_v11  ;;  %v19050_v17 = vld [vmem:[#allocation23_spill] sm:$0xff] }
 0xa27   : > { %v7552_v62 = vperm.slane %v19050_v17, %v18848_v15 }
 0xa28   : > { %v9786_v28 = vpop.eup %9785 }
 0xa29   : > { %v7427_v14 = vpop.permute.xlu1 %7426  ;;  %7670 = vadd.xlane.f32.xlu2 %v7669_v57  ;;  %7667 = vadd.xlane.f32.xlu0 %v7666_v21  ;;  %v17780_v21 = vld [vmem:[%s17656_s23 + $0x10] sm:$0xff] }
 0xa2a   : > { %v7559_v1 = vperm.slane %v7427_v14, %v18848_v15  ;;  %v19051_v14 = vld [vmem:[#allocation85_spill] sm:$0xff] }
 0xa2c   : > { %v7619_v3 = vsel %vm19036_vm2, %v7559_v1, %v7618_v8  ;;  %v7855_v1 = vsel %vm5401_vm6, %v19051_v14, 0.0  ;;  %vm19052_vm2 = vmmov %vm19031_vm0  ;;  %v19053_v8 = vld [vmem:[#allocation103_spill] sm:$0xff] }
 0xa2d   : > { %v7620_v38 = vsel %vm19037_vm15, %v7560_v37, %v7619_v3  ;;  %v7613_v29 = vsel %vm19052_vm2, %v7552_v62, %v7612_v30  ;;  %vm7268_vm15 = vcmp.eq.f32.partialorder %v17780_v21, 0.0  ;;  %v17840_v62 = vld [vmem:[%s18031_s3] sm:$0xff] }
 0xa2e   : > { %v7621_v10 = vsel %vm19038_vm11, %v7561_v25, %v7620_v38  ;;  %v7570_v25 = vperm.slane %v19053_v8, %v18848_v15  ;;  %vm19054_vm11 = vmmov %vm19034_vm5 }
 0xa2f   : > { %v17720_v20 = vsel %vm7269_vm10, 0.0, %v7621_v10  ;;  %v7614_v38 = vsel %vm19054_vm11, %v7553_v63, %v7613_v29  ;;  %v19055_v10 = vld [vmem:[#allocation13_spill] sm:$0xff]  ;;  %vm19063_vm14 = vmmov %vm19054_vm11 }
 0xa30   : > { %v7675_v12 = vsel %vm5401_vm6, %v17720_v20, 0.0  ;;  %v17798_v48 = vsel %vm7268_vm15, 0.0, %v7614_v38 }
 0xa31   : > { %v7436_v24 = vpop.permute.xlu1 %7435  ;;  %7676 = vadd.xlane.f32.xlu0 %v7675_v12  ;;  %v7572_v12 = vperm.slane %v19055_v10, %v18848_v15 }
 0xa32   : > { %v7562_v36 = vperm.slane %v7436_v24, %v18848_v15  ;;  %v19056_v24 = vld [vmem:[#allocation2_spill] sm:$0xff] }
 0xa34   : > { %v7622_v18 = vsel %vm5330_vm3, %v7563_v47, %v7562_v36  ;;  %v7573_v36 = vperm.slane %v19056_v24, %v18848_v15 }
 0xa35   : > { %v7623_v7 = vsel %vm5332_vm4, %v7564_v39, %v7622_v18  ;;  %v7672_v18 = vsel %vm5401_vm6, %v17798_v48, 0.0  ;;  %v7575_v39 = vperm.slane %v19057_v9, %v18848_v15 }
 0xa39   : > { %7838 = vadd.xlane.f32.xlu1 %v7837_v33  ;;  %v7445_v5 = vpop.permute.xlu1 %7444 }
 0xa3a   : > { %v7565_v41 = vperm.slane %v7445_v5, %v18848_v15 }
 0xa3c   : > { %v7624_v44 = vsel %vm5334_vm8, %v7565_v41, %v7623_v7 }
 0xa3d   : > { %v7625_v13 = vsel %vm5336_vm13, %v7566_v16, %v7624_v44  ;;  %v17818_v16 = vpop.permute.xlu2 %7504 }
 0xa3e   : > { %v7626_v22 = vsel %vm19047_vm12, %v7567_v49, %v7625_v13 }
 0xa41   : > { %7847 = vadd.xlane.f32.xlu1 %v7846_v42  ;;  %v7454_v23 = vpop.permute.xlu1 %7453 }
 0xa42   : > { %v7568_v45 = vperm.slane %v7454_v23, %v18848_v15  ;;  %v7859_v23 = vmul.f32 8.0, %v9786_v28 }
 0xa44   : > { %v7627_v58 = vsel %vm19031_vm0, %v7568_v45, %v7626_v22  ;;  %v7860_v61 = vsub.f32 1.0, %v7859_v23  ;;  %vm7863_vm0 = vweird.f32 %v9786_v28 }
 0xa45   : > { %v7628_v59 = vsel %vm19034_vm5, %v7569_v51, %v7627_v58  ;;  %v7514_v13 = vpop.permute.xlu2 %7513 }
 0xa46   : > { %v17773_v50 = vsel %vm7270_vm9, 0.0, %v7628_v59  ;;  %v7588_v49 = vperm.slane %v7514_v13, %v18848_v15  ;;  %v7861_v34 = vmul.f32 %v9786_v28, %v7860_v61 }
 0xa47   : > { %v7678_v57 = vsel %vm5401_vm6, %v17773_v50, 0.0 }
 0xa48   : > { %7679 = vadd.xlane.f32.xlu2 %v7678_v57  ;;  %v7862_v63 = vadd.f32 %v9786_v28, %v7861_v34  ;;  %v17843_v57 = vperm.slane %v17840_v62, 4 }
 0xa49   : > { %7856 = vadd.xlane.f32.xlu1 %v7855_v1  ;;  %v7463_v37 = vpop.permute.xlu1 %7462 }
 0xa4a   : > { %v7571_v3 = vperm.slane %v7463_v37, %v18848_v15  ;;  %v17835_v17 = vsel %vm7863_vm0, %v9786_v28, %v7862_v63  ;;  %v17848_v37 = vperm.slane %v17840_v62, 5 }
 0xa4c   : > { %v7629_v47 = vsel %vm5330_vm3, %v7571_v3, %v7570_v25  ;;  %v17854_v3 = vperm.slane %v17840_v62, 6 }
 0xa4d   : > { %v7630_v2 = vsel %vm5332_vm4, %v7572_v12, %v7629_v47  ;;  %v17830_v59 = vpop.permute.xlu2 %7522 }
 0xa4e   : > { %v7631_v33 = vsel %vm5334_vm8, %v7573_v36, %v7630_v2 }
 0xa51   : > { %7673 = vadd.xlane.f32.xlu1 %v7672_v18  ;;  %v7472_v5 = vpop.permute.xlu1 %7471  ;;  %v7511_v43 = vpop.permute.xlu0 %7510 }
 0xa52   : > { %v7574_v54 = vperm.slane %v7472_v5, %v18848_v15  ;;  %v7587_v42 = vperm.slane %v7511_v43, %v18848_v15 }
 0xa54   : > { %v7632_v41 = vsel %vm5336_vm13, %v7574_v54, %v7631_v33 }
 0xa55   : > { %v17808_v26 = vsel %vm19047_vm12, %v7575_v39, %v7632_v41 }
 0xa59   : > { %v17810_v7 = vpop.permute.xlu1 %7480  ;;  %v7520_v51 = vpop.permute.xlu0 %7519 }
 0xa5a   : > { %v7590_v27 = vperm.slane %v7520_v51, %v18848_v15 }
 0xa61   : > { %v7490_v44 = vpop.permute.xlu1 %7489  ;;  %v17845_v14 = vpop.permute.xlu0 %7528 }
 0xa62   : > { %v7580_v9 = vperm.slane %v7490_v44, %v18848_v15 }
 0xa69   : > { %v17820_v6 = vpop.permute.xlu1 %7498 }
 0xa71   : > { %v7508_v4 = vpop.permute.xlu1 %7507 }
 0xa72   : > { %v7586_v60 = vperm.slane %v7508_v4, %v18848_v15 }
 0xa74   : > { %v7643_v19 = vsel %vm5330_vm3, %v7587_v42, %v7586_v60  ;;  %vm7908_vm3 = vcmask 31744   ;;  %v7581_v60 = vperm.slane %v17812_v32, %v18848_v15  ;;  %v7583_v32 = vperm.slane %v17820_v6, %v18848_v15 }
 0xa75   : > { %v7644_v45 = vsel %vm5332_vm4, %v7588_v49, %v7643_v19  ;;  %v19058_v49 = vld [vmem:[#allocation28_spill] sm:$0xff]  ;;  %v7584_v6 = vperm.slane %v17816_v52, %v18848_v15 }
 0xa76   : > { %v7637_v23 = vsel %vm5332_vm4, %v7580_v9, %v19058_v49  ;;  %vm19059_vm4 = vmmov %vm19047_vm12 }
 0xa77   : > { %v7638_v51 = vsel %vm5334_vm8, %v7581_v60, %v7637_v23  ;;  %vm19064_vm12 = vmmov %vm19059_vm4 }
 0xa79   : > { %v7517_v11 = vpop.permute.xlu1 %7516 }
 0xa7a   : > { %v7589_v22 = vperm.slane %v7517_v11, %v18848_v15 }
 0xa7c   : > { %v7645_v58 = vsel %vm5334_vm8, %v7589_v22, %v7644_v45  ;;  %vm19061_vm8 = vmmov %vm19052_vm2 }
 0xa7d   : > { %v17833_v30 = vsel %vm5336_vm13, %v7590_v27, %v7645_v58  ;;  %v7582_v27 = vperm.slane %v17814_v53, %v18848_v15  ;;  %v17895_v53 = vld [vmem:[%s17656_s23 + $0x30] sm:$0xff]  ;;  %vm19065_vm0 = vmmov %vm19061_vm8 }
 0xa7e   : > { %vm7272_vm5 = vcmp.eq.f32.partialorder %v17895_v53, 0.0 }
 0xa7f   : > { %v7639_v63 = vsel %vm5336_vm13, %v7582_v27, %v7638_v51  ;;  %vm19062_vm13 = vmmov %vm19052_vm2 }
 0xa81   : > { %v7526_v52 = vpop.permute.xlu1 %7525 }
 0xa84   : > { %v7836_v1 = vpop.xlane.xlu2 %7835 }
 0xa85   : > { %v7865_v29 = vmul.f32 %v17835_v17, %v7836_v1  ;;  %v7640_v1 = vsel %vm19059_vm4, %v7583_v32, %v7639_v63  ;;  %vm19066_vm4 = vmmov %vm19054_vm11 }
 0xa87   : > { %v7874_v8 = vmul.f32 %v17843_v57, %v7865_v29 }
 0xa89   : > { %v7883_v25 = vadd.f32 %v17848_v37, %v7874_v8 }
 0xa8b   : > { %v7891_v38 = vmax.f32 %v7883_v25, 0.0  ;;  %v7577_v25 = vperm.slane %v17810_v7, %v18848_v15 }
 0xa8c   : > { %v7845_v10 = vpop.xlane.xlu2 %7844  ;;  %v7842_v12 = vpop.xlane.xlu0 %7841 }
 0xa8d   : > { %v7868_v24 = vmul.f32 %v17835_v17, %v7845_v10  ;;  %v7867_v36 = vmul.f32 %v17835_v17, %v7842_v12  ;;  %v7900_v47 = vmul.f32 %v17854_v3, %v7891_v38  ;;  %v19060_v38 = vld [vmem:[#allocation8_spill] sm:$0xff]  ;;  %v7641_v12 = vsel %vm19061_vm8, %v7584_v6, %v7640_v1 }
 0xa8e   : > { %v7576_v10 = vperm.slane %v19060_v38, %v18848_v15  ;;  %v9904_v1 = vmov 1  }
 0xa8f   : > { %v7877_v2 = vmul.f32 %v17843_v57, %v7868_v24  ;;  %v7876_v33 = vmul.f32 %v17843_v57, %v7867_v36  ;;  %v7909_v18 = vsel %vm7908_vm3, %v7900_v47, 0.0  ;;  %v17899_v24 = vld [vmem:[%s17656_s23 + $0x28] sm:$0xff]  ;;  %v7585_v36 = vperm.slane %v17818_v16, %v18848_v15  ;;  %9268 = vset.pattern.permute.xlu2 %v9904_v1  ;;  %9270 = vset.pattern.permute.xlu0 %v9904_v1 }
 0xa90   : > { %7910 = vadd.xlane.f32.xlu1 %v7909_v18  ;;  %v7634_v7 = vsel %vm19062_vm13, %v7576_v10, %v17808_v26  ;;  %vm7271_vm2 = vcmp.eq.f32.partialorder %v17899_v24, 0.0 }
 0xa91   : > { %v7886_v5 = vadd.f32 %v17848_v37, %v7877_v2  ;;  %v7885_v54 = vadd.f32 %v17848_v37, %v7876_v33  ;;  %v7642_v33 = vsel %vm19063_vm14, %v7585_v36, %v7641_v12  ;;  %v7635_v18 = vsel %vm19054_vm11, %v7577_v25, %v7634_v7  ;;  %9269 = vset.pattern.permute.xlu1 %v9904_v1 }
 0xa92   : > { %v17913_v16 = vsel %vm7272_vm5, 0.0, %v7642_v33 }
 0xa93   : > { %v7894_v39 = vmax.f32 %v7886_v5, 0.0  ;;  %v7893_v41 = vmax.f32 %v7885_v54, 0.0  ;;  %v17917_v5 = vsel %vm7271_vm2, 0.0, %v7635_v18  ;;  %v7684_v26 = vsel %vm5401_vm6, %v17913_v16, 0.0 }
 0xa94   : > { %v7854_v35 = vpop.xlane.xlu2 %7853  ;;  %v7851_v43 = vpop.xlane.xlu0 %7850  ;;  %v7681_v54 = vsel %vm5401_vm6, %v17917_v5, 0.0 }
 0xa95   : > { %v7871_v28 = vmul.f32 %v17835_v17, %v7854_v35  ;;  %v7870_v13 = vmul.f32 %v17835_v17, %v7851_v43  ;;  %v7903_v4 = vmul.f32 %v17854_v3, %v7894_v39  ;;  %v7902_v42 = vmul.f32 %v17854_v3, %v7893_v41 }
 0xa96   : > { %v7592_v39 = vperm.slane %v7526_v52, %v18848_v15  ;;  %v7591_v35 = vperm.slane %v17830_v59, %v18848_v15 }
 0xa97   : > { %v7880_v44 = vmul.f32 %v17843_v57, %v7871_v28  ;;  %v7879_v19 = vmul.f32 %v17843_v57, %v7870_v13  ;;  %v7918_v45 = vsel %vm7908_vm3, %v7903_v4, 0.0  ;;  %v7915_v61 = vsel %vm7908_vm3, %v7902_v42, 0.0 }
 0xa98   : > { %7919 = vadd.xlane.f32.xlu1 %v7918_v45  ;;  %7916 = vadd.xlane.f32.xlu2 %v7915_v61  ;;  %v7647_v28 = vsel %vm19064_vm12, %v7591_v35, %v17833_v30  ;;  %v7593_v42 = vperm.slane %v17845_v14, %v18848_v15 }
 0xa99   : > { %v7889_v11 = vadd.f32 %v17848_v37, %v7880_v44  ;;  %v7888_v22 = vadd.f32 %v17848_v37, %v7879_v19  ;;  %v7648_v13 = vsel %vm19065_vm0, %v7592_v39, %v7647_v28 }
 0xa9a   : > { %v7649_v23 = vsel %vm19066_vm4, %v7593_v42, %v7648_v13 }
 0xa9b   : > { %v7897_v34 = vmax.f32 %v7889_v11, 0.0  ;;  %v7896_v58 = vmax.f32 %v7888_v22, 0.0 }
 0xa9d   : > { %v7906_v29 = vmul.f32 %v17854_v3, %v7897_v34  ;;  %v7905_v8 = vmul.f32 %v17854_v3, %v7896_v58  ;;  %v17947_v58 = vld [vmem:[%s17656_s23 + $0x38] sm:$0xff] }
 0xa9e   : > { %vm7273_vm8 = vcmp.eq.f32.partialorder %v17947_v58, 0.0 }
 0xa9f   : > { %v7927_v47 = vsel %vm7908_vm3, %v7906_v29, 0.0  ;;  %v7924_v2 = vsel %vm7908_vm3, %v7905_v8, 0.0  ;;  %v7933_v29 = vperm.slane %v17840_v62, 7  ;;  %v7668_v62 = vpop.xlane.xlu0 %7667 }
 0xaa0   : > { %7928 = vadd.xlane.f32.xlu1 %v7927_v47  ;;  %7925 = vadd.xlane.f32.xlu2 %v7924_v2 }
 0xaa8   : > { %7685 = vadd.xlane.f32.xlu1 %v7684_v26  ;;  %7682 = vadd.xlane.f32.xlu2 %v7681_v54  ;;  %v7677_v26 = vpop.xlane.xlu0 %7676 }
 0xaa9   : > { %vm7693_vm13 = vcmp.gt.f32.partialorder %v7677_v26, 0.0 }
 0xaac   : > { %v7839_v9 = vpop.xlane.xlu1 %7838 }
 0xaad   : > { %v7866_v41 = vmul.f32 %v17835_v17, %v7839_v9 }
 0xaaf   : > { %v7875_v43 = vmul.f32 %v17843_v57, %v7866_v41 }
 0xab1   : > { %v7884_v4 = vadd.f32 %v17848_v37, %v7875_v43 }
 0xab3   : > { %v7892_v60 = vmax.f32 %v7884_v4, 0.0 }
 0xab4   : > { %v7848_v49 = vpop.xlane.xlu1 %7847 }
 0xab5   : > { %v7869_v44 = vmul.f32 %v17835_v17, %v7848_v49  ;;  %v7901_v59 = vmul.f32 %v17854_v3, %v7892_v60 }
 0xab7   : > { %v7878_v19 = vmul.f32 %v17843_v57, %v7869_v44  ;;  %v7912_v30 = vsel %vm7908_vm3, %v7901_v59, 0.0  ;;  %v7701_v44 = vsel %vm7693_vm13, %v7677_v26, 1.0 }
 0xab8   : > { %7913 = vadd.xlane.f32.xlu0 %v7912_v30 }
 0xab9   : > { %v7887_v45 = vadd.f32 %v17848_v37, %v7878_v19 }
 0xabb   : > { %v7895_v61 = vmax.f32 %v7887_v45, 0.0 }
 0xabc   : > { %v7857_v51 = vpop.xlane.xlu1 %7856 }
 0xabd   : > { %v7872_v15 = vmul.f32 %v17835_v17, %v7857_v51  ;;  %v7904_v14 = vmul.f32 %v17854_v3, %v7895_v61  ;;  %v17953_v17 = vsel %vm7273_vm8, 0.0, %v7649_v23 }
 0xabf   : > { %v7881_v32 = vmul.f32 %v17843_v57, %v7872_v15  ;;  %v7921_v11 = vsel %vm7908_vm3, %v7904_v14, 0.0  ;;  %v7687_v57 = vsel %vm5401_vm6, %v17953_v17, 0.0 }
 0xac0   : > { %7922 = vadd.xlane.f32.xlu0 %v7921_v11 }
 0xac1   : > { %v7890_v22 = vadd.f32 %v17848_v37, %v7881_v32  ;;  %v17957_v37 = vpop.xlane.xlu2 %7670 }
 0xac3   : > { %v7898_v27 = vmax.f32 %v7890_v22, 0.0 }
 0xac5   : > { %v7907_v34 = vmul.f32 %v17854_v3, %v7898_v27  ;;  %v17959_v3 = vpop.xlane.xlu1 %7673 }
 0xac7   : > { %v7930_v63 = vsel %vm7908_vm3, %v7907_v34, 0.0  ;;  %vm7690_vm3 = vcmp.gt.f32.partialorder %v7668_v62, 0.0 }
 0xac8   : > { %7931 = vadd.xlane.f32.xlu0 %v7930_v63  ;;  %v7698_v60 = vsel %vm7690_vm3, %v7668_v62, 1.0  ;;  %vm7692_vm3 = vcmp.gt.f32.partialorder %v17959_v3, 0.0 }
 0xac9   : > { %v17962_v8 = vpop.xlane.xlu2 %7679  ;;  %v7717_v22 = vand.u32 2147483648, %v7698_v60  ;;  %vm7711_vm12 = vweird.f32 %v7698_v60  ;;  %v7715_v27 = vand.u32 2147483647, %v7698_v60 }
 0xacb   : > { %v7718_v1 = vor.u32 1.1754944e-38, %v7717_v22  ;;  %vm7716_vm4 = vcmp.eq.f32.partialorder %v7715_v27, 8.507059e+37 }
 0xad0   : > { %7688 = vadd.xlane.f32.xlu0 %v7687_v57 }
 0xb03   : > { %v7911_v6 = vpop.xlane.xlu1 %7910 }
 0xb04   : > { %v7934_v25 = vadd.f32 %v7933_v29, %v7911_v6 }
 0xb06   : > { %9787 = vtanh.f32 %v7934_v25 }
 0xb0b   : > { %v7920_v38 = vpop.xlane.xlu1 %7919  ;;  %v7917_v10 = vpop.xlane.xlu2 %7916 }
 0xb0c   : > { %v9788_v12 = vpop.eup %9787  ;;  %v7937_v36 = vadd.f32 %v7933_v29, %v7920_v38  ;;  %v7936_v47 = vadd.f32 %v7933_v29, %v7917_v10  ;;  %v7762_v38 = vand.u32 2147483648, %v7701_v44  ;;  %v7700_v10 = vsel %vm7692_vm3, %v17959_v3, 1.0 }
 0xb0d   : > { %7952 = vperm.xlu2 %9268, %v9788_v12   ;;  %v7760_v12 = vand.u32 2147483647, %v7701_v44 }
 0xb0e   : > { %9789 = vtanh.f32 %v7937_v36 }
 0xb0f   : > { %9791 = vtanh.f32 %v7936_v47 }
 0xb13   : > { %v7926_v52 = vpop.xlane.xlu2 %7925  ;;  %v7929_v43 = vpop.xlane.xlu1 %7928 }
 0xb14   : > { %v9790_v2 = vpop.eup %9789  ;;  %v7939_v33 = vadd.f32 %v7933_v29, %v7926_v52  ;;  %v7940_v28 = vadd.f32 %v7933_v29, %v7929_v43 }
 0xb15   : > { %v9792_v7 = vpop.eup %9791  ;;  %7967 = vperm.xlu2 %9268, %v9790_v2  }
 0xb16   : > { %7962 = vperm.xlu0 %9270, %v9792_v7   ;;  %9793 = vtanh.f32 %v7939_v33  ;;  %v7763_v7 = vor.u32 1.1754944e-38, %v7762_v38 }
 0xb1b   : > { %v7683_v30 = vpop.xlane.xlu2 %7682 }
 0xb1c   : > { %v9794_v18 = vpop.eup %9793  ;;  %vm7695_vm14 = vcmp.gt.f32.partialorder %v7683_v30, 0.0 }
 0xb1d   : > { %7977 = vperm.xlu2 %9268, %v9794_v18   ;;  %v7703_v51 = vsel %vm7695_vm14, %v7683_v30, 1.0  ;;  %vm7756_vm14 = vweird.f32 %v7701_v44 }
 0xb1e   : > { %vm7786_vm3 = vweird.f32 %v7703_v51  ;;  %v7790_v0 = vand.u32 2147483647, %v7703_v51 }
 0xb2b   : > { %v7914_v54 = vpop.xlane.xlu0 %7913 }
 0xb2c   : > { %v7935_v9 = vadd.f32 %v7933_v29, %v7914_v54 }
 0xb2e   : > { %9795 = vtanh.f32 %v7935_v9 }
 0xb33   : > { %v7923_v39 = vpop.xlane.xlu0 %7922 }
 0xb34   : > { %v9796_v41 = vpop.eup %9795  ;;  %v7938_v35 = vadd.f32 %v7933_v29, %v7923_v39  ;;  %v7792_v39 = vand.u32 2147483648, %v7703_v51 }
 0xb35   : > { %7957 = vperm.xlu1 %9269, %v9796_v41  }
 0xb36   : > { %9797 = vtanh.f32 %v7938_v35 }
 0xb37   : > { %9799 = vtanh.f32 %v7940_v28 }
 0xb3b   : > { %v7932_v4 = vpop.xlane.xlu0 %7931 }
 0xb3c   : > { %v9798_v13 = vpop.eup %9797  ;;  %v7941_v42 = vadd.f32 %v7933_v29, %v7932_v4  ;;  %v7793_v4 = vor.u32 1.1754944e-38, %v7792_v39 }
 0xb3d   : > { %7972 = vperm.xlu1 %9269, %v9798_v13   ;;  %v9800_v49 = vpop.eup %9799 }
 0xb3e   : > { %9801 = vtanh.f32 %v7941_v42 }
 0xb3f   : > { %9803 = vrcp.f32 %v7698_v60 }
 0xb40   : > { %9805 = vrcp.f32 %v7701_v44 }
 0xb41   : > { %9807 = vrcp.f32 %v7703_v51 }
 0xb42   : > { %9809 = vrcp.f32 %v7700_v10 }
 0xb44   : > { %v9802_v23 = vpop.eup %9801 }
 0xb45   : > { %7982 = vperm.xlu1 %9269, %v9800_v49   ;;  %7987 = vperm.xlu2 %9268, %v9802_v23   ;;  %v9804_v59 = vpop.eup %9803 }
 0xb46   : > { %v7707_v19 = vmul.f32 %v9804_v59, %v7698_v60  ;;  %v9806_v61 = vpop.eup %9805  ;;  %vm7712_vm11 = vweird.f32 %v9804_v59 }
 0xb47   : > { %v7752_v14 = vmul.f32 %v9806_v61, %v7701_v44  ;;  %vm7713_vm0 = vmor %vm7711_vm12, %vm7712_vm11  ;;  %v9808_v34 = vpop.eup %9807  ;;  %vm7757_vm13 = vweird.f32 %v9806_v61  ;;  %vm7998_vm12 = vcmask 130048  }
 0xb48   : > { %v7708_v45 = vsub.f32 1.0, %v7707_v19  ;;  %v7782_v29 = vmul.f32 %v9808_v34, %v7703_v51  ;;  %vm7758_vm11 = vmor %vm7756_vm14, %vm7757_vm13  ;;  %v9810_v26 = vpop.eup %9809  ;;  %v7745_v51 = vand.u32 2147483647, %v7700_v10 }
 0xb49   : > { %v7753_v11 = vsub.f32 1.0, %v7752_v14  ;;  %v7737_v41 = vmul.f32 %v9810_v26, %v7700_v10 }
 0xb4a   : > { %v7709_v15 = vmul.f32 %v9804_v59, %v7708_v45  ;;  %v7783_v47 = vsub.f32 1.0, %v7782_v29  ;;  %v7747_v45 = vand.u32 2147483648, %v7700_v10 }
 0xb4b   : > { %v7754_v63 = vmul.f32 %v9806_v61, %v7753_v11  ;;  %v7738_v60 = vsub.f32 1.0, %v7737_v41 }
 0xb4c   : > { %v7710_v32 = vadd.f32 %v9804_v59, %v7709_v15  ;;  %v7784_v33 = vmul.f32 %v9808_v34, %v7783_v47  ;;  %v7748_v14 = vor.u32 1.1754944e-38, %v7747_v45 }
 0xb4d   : > { %v7755_v25 = vadd.f32 %v9806_v61, %v7754_v63  ;;  %v7739_v23 = vmul.f32 %v9810_v26, %v7738_v60 }
 0xb4e   : > { %v7714_v57 = vsel %vm7713_vm0, %v9804_v59, %v7710_v32  ;;  %vm7761_vm0 = vcmp.eq.f32.partialorder %v7760_v12, 8.507059e+37  ;;  %v7785_v9 = vadd.f32 %v9808_v34, %v7784_v33 }
 0xb4f   : > { %v7719_v6 = vsel %vm7716_vm4, %v7718_v1, %v7714_v57  ;;  %v7759_v2 = vsel %vm7758_vm11, %v9806_v61, %v7755_v25  ;;  %vm7787_vm4 = vweird.f32 %v9808_v34  ;;  %v7740_v46 = vadd.f32 %v9810_v26, %v7739_v23 }
 0xb50   : > { %v7720_v36 = vmul.f32 %v7719_v6, %v17696_v40  ;;  %v7764_v62 = vsel %vm7761_vm0, %v7763_v7, %v7759_v2  ;;  %vm7788_vm13 = vmor %vm7786_vm3, %vm7787_vm4  ;;  %vm7741_vm11 = vweird.f32 %v7700_v10  ;;  %vm7691_vm0 = vcmp.gt.f32.partialorder %v17957_v37, 0.0  ;;  %v7686_v6 = vpop.xlane.xlu1 %7685 }
 0xb51   : > { %v7765_v54 = vmul.f32 %v7764_v62, %v17720_v20  ;;  %v7789_v13 = vsel %vm7788_vm13, %v9808_v34, %v7785_v9  ;;  %v7689_v20 = vpop.xlane.xlu0 %7688  ;;  %v7699_v32 = vsel %vm7691_vm0, %v17957_v37, 1.0  ;;  %vm7746_vm3 = vcmp.eq.f32.partialorder %v7745_v51, 8.507059e+37 }
 0xb52   : > { %v7826_v3 = vsel %vm7266_vm7, -1.0, %v7720_v36  ;;  %vm7791_vm7 = vcmp.eq.f32.partialorder %v7790_v0, 8.507059e+37  ;;  %vm7697_vm14 = vcmp.gt.f32.partialorder %v7689_v20, 0.0  ;;  %vm7696_vm13 = vcmp.gt.f32.partialorder %v7686_v6, 0.0 }
 0xb53   : > { %v7829_v35 = vsel %vm7269_vm10, -1.0, %v7765_v54  ;;  %v7794_v49 = vsel %vm7791_vm7, %v7793_v4, %v7789_v13  ;;  %v7705_v59 = vsel %vm7697_vm14, %v7689_v20, 1.0  ;;  %vm7742_vm10 = vweird.f32 %v9810_v26 }
 0xb54   : > { %v7795_v44 = vmul.f32 %v7794_v49, %v17917_v5  ;;  %9811 = vrcp.f32 %v7705_v59  ;;  %vm7743_vm4 = vmor %vm7741_vm11, %vm7742_vm10  ;;  %v7704_v12 = vsel %vm7696_vm13, %v7686_v6, 1.0  ;;  %v7822_v47 = vand.u32 2147483648, %v7705_v59 }
 0xb55   : > { %v7744_v5 = vsel %vm7743_vm4, %v9810_v26, %v7740_v46  ;;  %9813 = vrcp.f32 %v7699_v32  ;;  %v7820_v21 = vand.u32 2147483647, %v7705_v59  ;;  %v7732_v26 = vand.u32 2147483648, %v7699_v32 }
 0xb56   : > { %v7831_v19 = vsel %vm7271_vm2, -1.0, %v7795_v44  ;;  %v7749_v24 = vsel %vm7746_vm3, %v7748_v14, %v7744_v5  ;;  %vm7694_vm2 = vcmp.gt.f32.partialorder %v17962_v8, 0.0  ;;  %vm7726_vm0 = vweird.f32 %v7699_v32 }
 0xb57   : > { %v7750_v22 = vmul.f32 %v7749_v24, %v17798_v48  ;;  %v7702_v34 = vsel %vm7694_vm2, %v17962_v8, 1.0  ;;  %vm7821_vm10 = vcmp.eq.f32.partialorder %v7820_v21, 8.507059e+37  ;;  %v7730_v54 = vand.u32 2147483647, %v7699_v32 }
 0xb58   : > { %9815 = vrcp.f32 %v7702_v34  ;;  %v7777_v20 = vand.u32 2147483648, %v7702_v34  ;;  %vm7771_vm13 = vweird.f32 %v7702_v34 }
 0xb59   : > { %v7828_v57 = vsel %vm7268_vm15, -1.0, %v7750_v22  ;;  %9817 = vrcp.f32 %v7704_v12  ;;  %vm7816_vm15 = vweird.f32 %v7705_v59  ;;  %vm7731_vm3 = vcmp.eq.f32.partialorder %v7730_v54, 8.507059e+37 }
 0xb5a   : > { %v9812_v11 = vpop.eup %9811 }
 0xb5b   : > { %v7812_v27 = vmul.f32 %v9812_v11, %v7705_v59  ;;  %v9814_v1 = vpop.eup %9813  ;;  %vm7817_vm7 = vweird.f32 %v9812_v11  ;;  %v7778_v59 = vor.u32 1.1754944e-38, %v7777_v20 }
 0xb5c   : > { %v7722_v38 = vmul.f32 %v9814_v1, %v7699_v32  ;;  %vm7818_vm14 = vmor %vm7816_vm15, %vm7817_vm7  ;;  %vm7727_vm11 = vweird.f32 %v9814_v1 }
 0xb5d   : > { %v7813_v29 = vsub.f32 1.0, %v7812_v27  ;;  %vm7728_vm4 = vmor %vm7726_vm0, %vm7727_vm11 }
 0xb5e   : > { %v7723_v10 = vsub.f32 1.0, %v7722_v38  ;;  %v9816_v36 = vpop.eup %9815 }
 0xb5f   : > { %v7814_v48 = vmul.f32 %v9812_v11, %v7813_v29  ;;  %v7767_v7 = vmul.f32 %v9816_v36, %v7702_v34  ;;  %vm7772_vm2 = vweird.f32 %v9816_v36 }
 0xb60   : > { %v7724_v2 = vmul.f32 %v9814_v1, %v7723_v10  ;;  %vm7773_vm7 = vmor %vm7771_vm13, %vm7772_vm2 }
 0xb61   : > { %v7815_v8 = vadd.f32 %v9812_v11, %v7814_v48 }
 0xb62   : > { %v7725_v33 = vadd.f32 %v9814_v1, %v7724_v2 }
 0xb64   : > { %v7729_v0 = vsel %vm7728_vm4, %v9814_v1, %v7725_v33 }
 0xb67   : > { %v7953_v52 = vpop.permute.xlu2 %7952 }
 0xb68   : > { %v7990_v40 = vsel %vm5401_vm6, %v7826_v3, %v7953_v52  ;;  %v7819_v3 = vsel %vm7818_vm14, %v9812_v11, %v7815_v8  ;;  %v7823_v52 = vor.u32 1.1754944e-38, %v7822_v47  ;;  %vm7801_vm14 = vweird.f32 %v7704_v12 }
 0xb69   : > { %v7999_v18 = vsel %vm7998_vm12, %v7990_v40, 0.0  ;;  %v7768_v40 = vsub.f32 1.0, %v7767_v7 }
 0xb6a   : > { %8007 = vst [vmem:[%s17972_s28] sm:$0xff] %v7999_v18  ;;  %v7824_v62 = vsel %vm7821_vm10, %v7823_v52, %v7819_v3  ;;  %v9818_v18 = vpop.eup %9817 }
 0xb6b   : > { %v7825_v9 = vmul.f32 %v7824_v62, %v17953_v17  ;;  %v7769_v39 = vmul.f32 %v9816_v36, %v7768_v40  ;;  %v7797_v41 = vmul.f32 %v9818_v18, %v7704_v12  ;;  %v7775_v17 = vand.u32 2147483647, %v7702_v34 }
 0xb6c   : > { %vm7802_vm15 = vweird.f32 %v9818_v18 }
 0xb6d   : > { %v7770_v4 = vadd.f32 %v9816_v36, %v7769_v39  ;;  %vm7803_vm10 = vmor %vm7801_vm14, %vm7802_vm15 }
 0xb6f   : > { %v7968_v43 = vpop.permute.xlu2 %7967  ;;  %v7774_v58 = vsel %vm7773_vm7, %v9816_v36, %v7770_v4 }
 0xb70   : > { %v7993_v28 = vsel %vm5401_vm6, %v7829_v35, %v7968_v43  ;;  %v7733_v35 = vor.u32 1.1754944e-38, %v7732_v26  ;;  %v7833_v43 = vsel %vm7273_vm8, -1.0, %v7825_v9  ;;  %vm7776_vm8 = vcmp.eq.f32.partialorder %v7775_v17, 8.507059e+37 }
 0xb71   : > { %v8002_v42 = vsel %vm7998_vm12, %v7993_v28, 0.0  ;;  %v7779_v45 = vsel %vm7776_vm8, %v7778_v59, %v7774_v58 }
 0xb72   : > { %8010 = vst [vmem:[%s17972_s28 + $0x18] sm:$0xff] %v8002_v42  ;;  %v7734_v13 = vsel %vm7731_vm3, %v7733_v35, %v7729_v0  ;;  %v7798_v42 = vsub.f32 1.0, %v7797_v41  ;;  %v7780_v5 = vmul.f32 %v7779_v45, %v17773_v50 }
 0xb73   : > { %v7735_v23 = vmul.f32 %v7734_v13, %v17692_v55  ;;  %v7805_v55 = vand.u32 2147483647, %v7704_v12 }
 0xb74   : > { %v7799_v44 = vmul.f32 %v9818_v18, %v7798_v42  ;;  %v7830_v32 = vsel %vm7270_vm9, -1.0, %v7780_v5 }
 0xb75   : > { %v7827_v46 = vsel %vm7267_vm1, -1.0, %v7735_v23  ;;  %vm7806_vm1 = vcmp.eq.f32.partialorder %v7805_v55, 8.507059e+37 }
 0xb77   : > { %v7978_v30 = vpop.permute.xlu2 %7977 }
 0xb78   : > { %v7995_v61 = vsel %vm5401_vm6, %v7831_v19, %v7978_v30 }
 0xb79   : > { %v8004_v15 = vsel %vm7998_vm12, %v7995_v61, 0.0  ;;  %v7800_v61 = vadd.f32 %v9818_v18, %v7799_v44 }
 0xb7a   : > { %8012 = vst [vmem:[%s17972_s28 + $0x28] sm:$0xff] %v8004_v15  ;;  %v7807_v15 = vand.u32 2147483648, %v7704_v12 }
 0xb7b   : > { %v7804_v14 = vsel %vm7803_vm10, %v9818_v18, %v7800_v61 }
 0xb7c   : > { %v7808_v31 = vor.u32 1.1754944e-38, %v7807_v15 }
 0xb7e   : > { %v7809_v22 = vsel %vm7806_vm1, %v7808_v31, %v7804_v14 }
 0xb7f   : > { %v7810_v34 = vmul.f32 %v7809_v22, %v17913_v16 }
 0xb81   : > { %v7832_v50 = vsel %vm7272_vm5, -1.0, %v7810_v34 }
 0xb88   : > { %v7963_v63 = vpop.permute.xlu0 %7962 }
 0xb89   : > { %v7992_v37 = vsel %vm5401_vm6, %v7828_v57, %v7963_v63 }
 0xb8a   : > { %v8001_v25 = vsel %vm7998_vm12, %v7992_v37, 0.0 }
 0xb8b   : > { %8009 = vst [vmem:[%s17972_s28 + $0x10] sm:$0xff] %v8001_v25 }
 0xb9f   : > { %v7988_v28 = vpop.permute.xlu2 %7987 }
 0xba0   : > { %v7997_v60 = vsel %vm5401_vm6, %v7833_v43, %v7988_v28 }
 0xba1   : > { %v8006_v49 = vsel %vm7998_vm12, %v7997_v60, 0.0 }
 0xba2   : > { %8014 = vst [vmem:[%s17972_s28 + $0x38] sm:$0xff] %v8006_v49 }
 0xba7   : > { %v7958_v19 = vpop.permute.xlu1 %7957 }
 0xba8   : > { %v7991_v30 = vsel %vm5401_vm6, %v7827_v46, %v7958_v19 }
 0xba9   : > { %v8000_v51 = vsel %vm7998_vm12, %v7991_v30, 0.0 }
 0xbaa   : > { %8008 = vst [vmem:[%s17972_s28 + $0x8] sm:$0xff] %v8000_v51 }
 0xbaf   : > { %v7973_v24 = vpop.permute.xlu1 %7972 }
 0xbb0   : > { %v7994_v11 = vsel %vm5401_vm6, %v7830_v32, %v7973_v24 }
 0xbb1   : > { %v8003_v27 = vsel %vm7998_vm12, %v7994_v11, 0.0 }
 0xbb2   : > { %8011 = vst [vmem:[%s17972_s28 + $0x20] sm:$0xff] %v8003_v27 }
 0xbb7   : > { %v7983_v63 = vpop.permute.xlu1 %7982 }
 0xbb8   : > { %v7996_v57 = vsel %vm5401_vm6, %v7832_v50, %v7983_v63 }
 0xbb9   : > { %v8005_v1 = vsel %vm7998_vm12, %v7996_v57, 0.0 }
 0xbba   : > { %8013 = vst [vmem:[%s17972_s28 + $0x30] sm:$0xff] %v8005_v1 }
 0xbbb PF: > { %s14_s15 = sadd.s32 1, %s9892_s15  }
 0xbbc   : > { %p11_p5 = scmp.ge.s32.totalorder %s14_s15, 6  }
 0xbbe   :  { %13 = sbr.rel (!%p11_p5) target bundleno = 1 (0x1), region = 69 }

</bundles_post_ra>
